<compile_context>
chip_gen: v5e
topology: v5e:2x2
jax: 0.10.0
libtpu: 0.0.40
codegen_flags: <defaults>
</compile_context>

<pallas_src>
import jax
import jax.numpy as jnp
import numpy as np
from jax.experimental import pallas as pl
from jax.experimental.pallas import tpu as pltpu


def senet_kernel(x_ref, w1_ref, w2_ref, out_ref):
    # x_ref: (B_TILE, F, E); w1_ref: (F, R); w2_ref: (R, F)
    x = x_ref[...].astype(jnp.float32)

    # Squeeze: mean over the embedding (lane) axis -> (B_TILE, F)
    z = jnp.mean(x, axis=-1)

    # Excitation: two bias-free FC layers with ReLU, batch folded into MXU M.
    h = jnp.dot(z, w1_ref[...], preferred_element_type=jnp.float32)
    h = jnp.maximum(h, 0.0)
    a = jnp.dot(h, w2_ref[...], preferred_element_type=jnp.float32)
    a = jnp.maximum(a, 0.0)                       # (B_TILE, F)

    # Re-weight each field's embedding.
    out_ref[...] = (x * a[:, :, None]).astype(out_ref.dtype)


def senet_forward(inputs, w1, w2, *, b_tile=128):
    """inputs: (B, F, E); w1: (F, R); w2: (R, F)  (already transposed for x@W)."""
    B, F, E = inputs.shape
    R = w1.shape[1]

    # Pad batch to a multiple of the batch tile (sliced off afterwards).
    pad = (-B) % b_tile
    x = jnp.pad(inputs, ((0, pad), (0, 0), (0, 0))) if pad else inputs
    Bp = B + pad

    out = pl.pallas_call(
        senet_kernel,
        out_shape=jax.ShapeDtypeStruct((Bp, F, E), inputs.dtype),
        grid_spec=pltpu.PrefetchScalarGridSpec(
            num_scalar_prefetch=0,
            grid=(Bp // b_tile,),
            in_specs=[
                pl.BlockSpec((b_tile, F, E), lambda i: (i, 0, 0)),
                pl.BlockSpec((F, R), lambda i: (0, 0)),
                pl.BlockSpec((R, F), lambda i: (0, 0)),
            ],
            out_specs=pl.BlockSpec((b_tile, F, E), lambda i: (i, 0, 0)),
        ),
        compiler_params=pltpu.CompilerParams(
            dimension_semantics=("parallel",),
        ),
    )(x, w1, w2)

    return out[:B]


def senet_ref(inputs, w1, w2):
    z = jnp.mean(inputs.astype(jnp.float32), axis=-1)
    a = jax.nn.relu(z @ w1)
    a = jax.nn.relu(a @ w2)
    return (inputs.astype(jnp.float32) * a[:, :, None]).astype(inputs.dtype)


if __name__ == "__main__":
    key = jax.random.PRNGKey(0)
    k_x, k_w1, k_w2 = jax.random.split(key, 3)

    batch = 256
    filed_size = 26
    embed = 32
    reduction_ratio = 3
    reduction_size = max(1, filed_size // reduction_ratio)   # = 8

    x = jax.random.normal(k_x, (batch, filed_size, embed), dtype=jnp.float32)
    # nn.Linear(filed_size, reduction_size, bias=False): y = x @ W1.T
    # We pass W1.T directly as (F, R); likewise W2.T as (R, F).
    w1 = jax.random.normal(k_w1, (filed_size, reduction_size), dtype=jnp.float32) * 0.1
    w2 = jax.random.normal(k_w2, (reduction_size, filed_size), dtype=jnp.float32) * 0.1

    out = senet_forward(x, w1, w2, b_tile=128)
    out = jax.block_until_ready(out)

    ref = jax.block_until_ready(senet_ref(x, w1, w2))
    np.testing.assert_allclose(np.asarray(out), np.asarray(ref), rtol=1e-5, atol=1e-5)

    print("KERNEL_OK")
</pallas_src>

<mosaic_0001>
module attributes {stable_mosaic.version = 11 : i64} {
  func.func @senet_kernel(%arg0: i32, %arg1: memref<128x26x32xf32, #tpu.memory_space<vmem>>, %arg2: memref<26x8xf32, #tpu.memory_space<vmem>>, %arg3: memref<8x26xf32, #tpu.memory_space<vmem>>, %arg4: memref<128x26x32xf32, #tpu.memory_space<vmem>>) attributes {dimension_semantics = [#tpu.dimension_semantics<parallel>], iteration_bounds = array<i64: 2>, scalar_prefetch = 0 : i64, scratch_operands = 0 : i64, tpu.core_type = #tpu.core_type<tc>, window_params = [{transform_indices = @transform_0, window_bounds = array<i64: 128, 26, 32>}, {pipeline_mode = #tpu.pipeline_mode<synchronous>, transform_indices = @transform_1, window_bounds = array<i64: 26, 8>}, {pipeline_mode = #tpu.pipeline_mode<synchronous>, transform_indices = @transform_2, window_bounds = array<i64: 8, 26>}, {transform_indices = @transform_3, window_bounds = array<i64: 128, 26, 32>}]} {
    %c0 = arith.constant 0 : index
    %c0_0 = arith.constant 0 : index
    %c0_1 = arith.constant 0 : index
    %0 = vector.load %arg1[%c0, %c0_0, %c0_1] : memref<128x26x32xf32, #tpu.memory_space<vmem>>, vector<128x26x32xf32>
    %cst = arith.constant dense<0.000000e+00> : vector<128x26xf32>
    %1 = vector.multi_reduction <add>, %0, %cst [2] : vector<128x26x32xf32> to vector<128x26xf32>
    %cst_2 = arith.constant 3.200000e+01 : f32
    %2 = vector.broadcast %cst_2 : f32 to vector<128x26xf32>
    %3 = arith.divf %1, %2 : vector<128x26xf32>
    %c0_3 = arith.constant 0 : index
    %c0_4 = arith.constant 0 : index
    %4 = vector.load %arg2[%c0_3, %c0_4] : memref<26x8xf32, #tpu.memory_space<vmem>>, vector<26x8xf32>
    %cst_5 = arith.constant dense<0.000000e+00> : vector<128x8xf32>
    %5 = tpu.matmul %3, %4, %cst_5 {dimension_numbers = #tpu.dot_dimension_numbers<[1], [0], [0], [1], [0, 0, 1, 1], [], []>} : vector<128x26xf32>, vector<26x8xf32>, vector<128x8xf32> -> vector<128x8xf32>
    %cst_6 = arith.constant 0.000000e+00 : f32
    %6 = vector.broadcast %cst_6 : f32 to vector<128x8xf32>
    %7 = arith.maximumf %5, %6 : vector<128x8xf32>
    %c0_7 = arith.constant 0 : index
    %c0_8 = arith.constant 0 : index
    %8 = vector.load %arg3[%c0_7, %c0_8] : memref<8x26xf32, #tpu.memory_space<vmem>>, vector<8x26xf32>
    %cst_9 = arith.constant dense<0.000000e+00> : vector<128x26xf32>
    %9 = tpu.matmul %7, %8, %cst_9 {dimension_numbers = #tpu.dot_dimension_numbers<[1], [0], [0], [1], [0, 0, 1, 1], [], []>} : vector<128x8xf32>, vector<8x26xf32>, vector<128x26xf32> -> vector<128x26xf32>
    %cst_10 = arith.constant 0.000000e+00 : f32
    %10 = vector.broadcast %cst_10 : f32 to vector<128x26xf32>
    %11 = arith.maximumf %9, %10 : vector<128x26xf32>
    %12 = vector.shape_cast %11 : vector<128x26xf32> to vector<128x26x1xf32>
    %13 = vector.broadcast %12 : vector<128x26x1xf32> to vector<128x26x32xf32>
    %14 = arith.mulf %0, %13 : vector<128x26x32xf32>
    %c0_11 = arith.constant 0 : index
    %c0_12 = arith.constant 0 : index
    %c0_13 = arith.constant 0 : index
    %15 = vector.load %arg4[%c0_11, %c0_12, %c0_13] : memref<128x26x32xf32, #tpu.memory_space<vmem>>, vector<128x26x32xf32>
    tpu.vector_store %arg4[%c0_11, %c0_12, %c0_13], %14 {strides = array<i32>} : memref<128x26x32xf32, #tpu.memory_space<vmem>>, vector<128x26x32xf32>,
    return
  }
  func.func @transform_0(%arg0: i32) -> (i32, i32, i32) {
    %c0_i32 = arith.constant 0 : i32
    %c0_i32_0 = arith.constant 0 : i32
    %c0_i32_1 = arith.constant 0 : i32
    return %arg0, %c0_i32, %c0_i32_0 : i32, i32, i32
  }
  func.func @transform_1(%arg0: i32) -> (i32, i32) {
    %c0_i32 = arith.constant 0 : i32
    %c0_i32_0 = arith.constant 0 : i32
    %c0_i32_1 = arith.constant 0 : i32
    return %c0_i32, %c0_i32_0 : i32, i32
  }
  func.func @transform_2(%arg0: i32) -> (i32, i32) {
    %c0_i32 = arith.constant 0 : i32
    %c0_i32_0 = arith.constant 0 : i32
    %c0_i32_1 = arith.constant 0 : i32
    return %c0_i32, %c0_i32_0 : i32, i32
  }
  func.func @transform_3(%arg0: i32) -> (i32, i32, i32) {
    %c0_i32 = arith.constant 0 : i32
    %c0_i32_0 = arith.constant 0 : i32
    %c0_i32_1 = arith.constant 0 : i32
    return %arg0, %c0_i32, %c0_i32_0 : i32, i32, i32
  }
}

</mosaic_0001>

<bundles_post_ra>
// kernel: tpu_custom_call.1
= control target key start
LH: loop header
LB: loop body
LE: loop exit
PB: predicated region body
PF: predicated region fallthrough
CT: control target
= control target key end

     0   :  { %s9838_s12 = smov 0   ;;  %s16313_s0 = inlined_call_operand.vmem [shape: f32[256,26,32], index: 0, kind: input, shape index: {}]   ;;  %s16314_s1 = inlined_call_operand.vmem [shape: f32[26,8], index: 1, kind: input, shape index: {}]   ;;  %s16315_s2 = inlined_call_operand.vmem [shape: f32[8,26], index: 2, kind: input, shape index: {}]   ;;  %s16316_s3 = inlined_call_operand.vmem [shape: f32[256,26,32], index: 3, kind: output, shape index: {}]  }
   0x1 LB: > { %s8818_s13 = sadd.s32 4294967295, %s9815_s12   ;;  %p8822_p0 = scmp.ge.s32.totalorder %s9815_s12, 1  ;;  %s9815_s12 = sphi %s9838_s12, %s13_s12  }
   0x2   : > { %p139_p1 = scmp.lt.s32.totalorder %s9815_s12, 3 }
   0x4   : > { %p140_p2 = pnand %p8822_p0, %p139_p1 }
   0x6   : > { %143 = sbr.rel (%p140_p2) target bundleno = 4770 (0x12a2), region = 32 }
   0xb   : > { %s8823_s14 = sshll.u32 %s8818_s13, 7  ;;  %vm691_vm0 = vcmask 261120   ;;  %vm701_vm1 = vcmask 254976   ;;  %vm4320_vm2 = vcmask 1041408   ;;  %vm3269_vm4 = vcmask 130112  }
   0xc   : > { %p166_p3 = scmp.lt.s32.totalorder %s8823_s14, 255  ;;  %vm3273_vm5 = vcmask 195712   ;;  %vm3277_vm6 = vcmask 261312   ;;  %vm4168_vm7 = vcmask 1041409   ;;  %vm4170_vm8 = vcmask 1042434  }
   0xd   : > { %vm4172_vm9 = vcmask 1043459   ;;  %vm4174_vm10 = vcmask 1044484   ;;  %vm4176_vm11 = vcmask 1045509   ;;  %vm4178_vm12 = vcmask 1046534  }
   0xe   : > { %s16446_s14 = smov (!%p166_p3, %s8823_s14), 255  ;;  %vm4180_vm13 = vcmask 1047559   ;;  %vm4287_vm14 = vcmask 211968   ;;  %vm4406_vm15 = vcmask 64512  }
   0xf   : > { %s8864_s15 = sshll.u32 %s16446_s14, 5 }
  0x10   : > { %s9854_s18 = scalar_lea.vmem %s16313_s0, %s8864_s15  ;;  %s13671_s4 = scalar_lea.vmem %s16316_s3, %s8864_s15 }
  0x11   : > { %v183_v0 = vld [vmem:[%s9854_s18 + $0x20] sm:$0xff]  ;;  %v181_v1 = vld [vmem:[%s9854_s18 + $0x10] sm:$0xff]  ;;  %v184_v6 = vld [vmem:[%s9854_s18 + $0x28] sm:$0xff] }
  0x12   : > { %v179_v2 = vld [vmem:[%s9854_s18] sm:$0xff]  ;;  %v705_v3 = vsel %vm691_vm0, %v183_v0, 0.0  ;;  %v698_v4 = vsel %vm691_vm0, %v181_v1, 0.0  ;;  %v182_v7 = vld [vmem:[%s9854_s18 + $0x18] sm:$0x3]  ;;  %v180_v8 = vld [vmem:[%s9854_s18 + $0x8] sm:$0xff] }
  0x13   : > { %v692_v5 = vsel %vm691_vm0, %v179_v2, 0.0  ;;  %706 = vadd.xlane.f32.xlu2 %v705_v3  ;;  %699 = vadd.xlane.f32.xlu1 %v698_v4  ;;  %v708_v9 = vsel %vm691_vm0, %v184_v6, 0.0  ;;  %v702_v10 = vsel %vm701_vm1, %v182_v7, 0.0  ;;  %v695_v11 = vsel %vm691_vm0, %v180_v8, 0.0  ;;  %v187_v12 = vld [vmem:[%s9854_s18 + $0x40] sm:$0xff]  ;;  %v185_v14 = vld [vmem:[%s9854_s18 + $0x30] sm:$0xff] }
  0x14   : > { %693 = vadd.xlane.f32.xlu0 %v692_v5  ;;  %v186_v13 = vld [vmem:[%s9854_s18 + $0x38] sm:$0x3]  ;;  %v717_v15 = vsel %vm691_vm0, %v187_v12, 0.0  ;;  %v711_v17 = vsel %vm691_vm0, %v185_v14, 0.0  ;;  %v189_v19 = vld [vmem:[%s9854_s18 + $0x50] sm:$0xff]  ;;  %v188_v20 = vld [vmem:[%s9854_s18 + $0x48] sm:$0xff] }
  0x15   : > { %v714_v16 = vsel %vm701_vm1, %v186_v13, 0.0  ;;  %v190_v18 = vld [vmem:[%s9854_s18 + $0x58] sm:$0x3]  ;;  %v723_v22 = vsel %vm691_vm0, %v189_v19, 0.0  ;;  %v720_v23 = vsel %vm691_vm0, %v188_v20, 0.0  ;;  %v193_v24 = vld [vmem:[%s9854_s18 + $0x70] sm:$0xff] }
  0x16   : > { %v726_v21 = vsel %vm701_vm1, %v190_v18, 0.0  ;;  %v192_v25 = vld [vmem:[%s9854_s18 + $0x68] sm:$0xff]  ;;  %v191_v26 = vld [vmem:[%s9854_s18 + $0x60] sm:$0xff]  ;;  %v735_v27 = vsel %vm691_vm0, %v193_v24, 0.0  ;;  %v194_v32 = vld [vmem:[%s9854_s18 + $0x78] sm:$0x3] }
  0x17   : > { %v732_v28 = vsel %vm691_vm0, %v192_v25, 0.0  ;;  %v729_v29 = vsel %vm691_vm0, %v191_v26, 0.0  ;;  %v196_v30 = vld [vmem:[%s9854_s18 + $0x88] sm:$0xff]  ;;  %v195_v31 = vld [vmem:[%s9854_s18 + $0x80] sm:$0xff]  ;;  %v738_v35 = vsel %vm701_vm1, %v194_v32, 0.0  ;;  %v197_v38 = vld [vmem:[%s9854_s18 + $0x90] sm:$0xff] }
  0x18   : > { %v744_v33 = vsel %vm691_vm0, %v196_v30, 0.0  ;;  %v741_v34 = vsel %vm691_vm0, %v195_v31, 0.0  ;;  %v199_v36 = vld [vmem:[%s9854_s18 + $0xa0] sm:$0xff]  ;;  %v198_v37 = vld [vmem:[%s9854_s18 + $0x98] sm:$0x3]  ;;  %v747_v41 = vsel %vm691_vm0, %v197_v38, 0.0 }
  0x19   : > { %v753_v39 = vsel %vm691_vm0, %v199_v36, 0.0  ;;  %v750_v40 = vsel %vm701_vm1, %v198_v37, 0.0  ;;  %v202_v42 = vld [vmem:[%s9854_s18 + $0xb8] sm:$0x3]  ;;  %v201_v43 = vld [vmem:[%s9854_s18 + $0xb0] sm:$0xff]  ;;  %v200_v44 = vld [vmem:[%s9854_s18 + $0xa8] sm:$0xff] }
  0x1a   : > { %v762_v45 = vsel %vm701_vm1, %v202_v42, 0.0  ;;  %v759_v46 = vsel %vm691_vm0, %v201_v43, 0.0  ;;  %v756_v47 = vsel %vm691_vm0, %v200_v44, 0.0  ;;  %v205_v48 = vld [vmem:[%s9854_s18 + $0xd0] sm:$0xff]  ;;  %v204_v49 = vld [vmem:[%s9854_s18 + $0xc8] sm:$0xff]  ;;  %v203_v50 = vld [vmem:[%s9854_s18 + $0xc0] sm:$0xff] }
  0x1b   : > { %709 = vadd.xlane.f32.xlu2 %v708_v9  ;;  %703 = vadd.xlane.f32.xlu1 %v702_v10  ;;  %v771_v51 = vsel %vm691_vm0, %v205_v48, 0.0  ;;  %v768_v52 = vsel %vm691_vm0, %v204_v49, 0.0  ;;  %v765_v53 = vsel %vm691_vm0, %v203_v50, 0.0  ;;  %v208_v54 = vld [vmem:[%s9854_s18 + $0xe8] sm:$0xff]  ;;  %v207_v55 = vld [vmem:[%s9854_s18 + $0xe0] sm:$0xff]  ;;  %v209_v62 = vld [vmem:[%s9854_s18 + $0xf0] sm:$0xff] }
  0x1c   : > { %696 = vadd.xlane.f32.xlu0 %v695_v11  ;;  %v206_v56 = vld [vmem:[%s9854_s18 + $0xd8] sm:$0x3]  ;;  %v780_v57 = vsel %vm691_vm0, %v208_v54, 0.0  ;;  %v777_v58 = vsel %vm691_vm0, %v207_v55, 0.0  ;;  %v211_v60 = vld [vmem:[%s9854_s18 + $0x100] sm:$0xff]  ;;  %v783_v1 = vsel %vm691_vm0, %v209_v62, 0.0 }
  0x1d   : > { %v774_v59 = vsel %vm701_vm1, %v206_v56, 0.0  ;;  %v210_v61 = vld [vmem:[%s9854_s18 + $0xf8] sm:$0x3]  ;;  %v789_v63 = vsel %vm691_vm0, %v211_v60, 0.0  ;;  %v213_v3 = vld [vmem:[%s9854_s18 + $0x110] sm:$0xff]  ;;  %v212_v4 = vld [vmem:[%s9854_s18 + $0x108] sm:$0xff] }
  0x1e   : > { %v786_v0 = vsel %vm701_vm1, %v210_v61, 0.0  ;;  %v214_v2 = vld [vmem:[%s9854_s18 + $0x118] sm:$0x3]  ;;  %v795_v6 = vsel %vm691_vm0, %v213_v3, 0.0  ;;  %v792_v7 = vsel %vm691_vm0, %v212_v4, 0.0  ;;  %v217_v8 = vld [vmem:[%s9854_s18 + $0x130] sm:$0xff] }
  0x1f   : > { %v798_v5 = vsel %vm701_vm1, %v214_v2, 0.0  ;;  %v216_v9 = vld [vmem:[%s9854_s18 + $0x128] sm:$0xff]  ;;  %v215_v10 = vld [vmem:[%s9854_s18 + $0x120] sm:$0xff]  ;;  %v807_v11 = vsel %vm691_vm0, %v217_v8, 0.0  ;;  %v226_v26 = vld [vmem:[%s9854_s18 + $0x178] sm:$0x3] }
  0x20   : > { %v804_v12 = vsel %vm691_vm0, %v216_v9, 0.0  ;;  %v801_v13 = vsel %vm691_vm0, %v215_v10, 0.0  ;;  %v220_v14 = vld [vmem:[%s9854_s18 + $0x148] sm:$0xff]  ;;  %v223_v20 = vld [vmem:[%s9854_s18 + $0x160] sm:$0xff]  ;;  %v834_v32 = vsel %vm701_vm1, %v226_v26, 0.0  ;;  %v9817_v62 = vmov 32.0  }
  0x21   : > { %v224_v30 = vld [vmem:[%s9854_s18 + $0x168] sm:$0xff]  ;;  %v230_v48 = vld [vmem:[%s9854_s18 + $0x198] sm:$0x3]  ;;  %9295 = vrcp.f32 %v9817_v62  ;;  %v241_v10 = vld [vmem:[%s9854_s18 + $0x1f0] sm:$0xff] }
  0x22   : > { %v228_v36 = vld [vmem:[%s9854_s18 + $0x188] sm:$0xff]  ;;  %v234_v54 = vld [vmem:[%s9854_s18 + $0x1b8] sm:$0x3] }
  0x23   : > { %718 = vadd.xlane.f32.xlu2 %v717_v15  ;;  %715 = vadd.xlane.f32.xlu1 %v714_v16  ;;  %v219_v15 = vld [vmem:[%s9854_s18 + $0x140] sm:$0xff]  ;;  %v218_v16 = vld [vmem:[%s9854_s18 + $0x138] sm:$0x3]  ;;  %v840_v42 = vsel %vm691_vm0, %v228_v36, 0.0  ;;  %v232_v44 = vld [vmem:[%s9854_s18 + $0x1a8] sm:$0xff]  ;;  %v858_v60 = vsel %vm701_vm1, %v234_v54, 0.0 }
  0x24   : > { %712 = vadd.xlane.f32.xlu0 %v711_v17  ;;  %v816_v17 = vsel %vm691_vm0, %v220_v14, 0.0  ;;  %v813_v18 = vsel %vm691_vm0, %v219_v15, 0.0  ;;  %v810_v19 = vsel %vm701_vm1, %v218_v16, 0.0  ;;  %v852_v50 = vsel %vm691_vm0, %v232_v44, 0.0  ;;  %v236_v3 = vld [vmem:[%s9854_s18 + $0x1c8] sm:$0xff]  ;;  %v239_v14 = vld [vmem:[%s9854_s18 + $0x1e0] sm:$0xff] }
  0x25   : > { %v864_v8 = vsel %vm691_vm0, %v236_v3, 0.0  ;;  %v2750_v36 = vld [vmem:[%s16314_s1 + $0x10] sm:$0xff]  ;;  %v2748_v44 = vld [vmem:[%s16314_s1] sm:$0xff] }
  0x2b   : > { %727 = vadd.xlane.f32.xlu2 %v726_v21  ;;  %724 = vadd.xlane.f32.xlu1 %v723_v22  ;;  %v222_v21 = vld [vmem:[%s9854_s18 + $0x158] sm:$0x3]  ;;  %v221_v22 = vld [vmem:[%s9854_s18 + $0x150] sm:$0xff] }
  0x2c   : > { %721 = vadd.xlane.f32.xlu0 %v720_v23  ;;  %v825_v23 = vsel %vm691_vm0, %v223_v20, 0.0  ;;  %v822_v24 = vsel %vm701_vm1, %v222_v21, 0.0  ;;  %v819_v25 = vsel %vm691_vm0, %v221_v22, 0.0  ;;  %v244_v21 = vld [vmem:[%s9854_s18 + $0x208] sm:$0xff]  ;;  %v243_v22 = vld [vmem:[%s9854_s18 + $0x200] sm:$0xff] }
  0x33   : > { %736 = vadd.xlane.f32.xlu2 %v735_v27  ;;  %733 = vadd.xlane.f32.xlu1 %v732_v28  ;;  %v225_v27 = vld [vmem:[%s9854_s18 + $0x170] sm:$0xff] }
  0x34   : > { %730 = vadd.xlane.f32.xlu0 %v729_v29 }
  0x3b   : > { %745 = vadd.xlane.f32.xlu2 %v744_v33  ;;  %742 = vadd.xlane.f32.xlu1 %v741_v34  ;;  %v831_v33 = vsel %vm691_vm0, %v225_v27, 0.0  ;;  %v828_v34 = vsel %vm691_vm0, %v224_v30, 0.0  ;;  %v3264_v27 = vlaneseq }
  0x3c   : > { %739 = vadd.xlane.f32.xlu0 %v738_v35  ;;  %v229_v35 = vld [vmem:[%s9854_s18 + $0x190] sm:$0xff] }
  0x43   : > { %754 = vadd.xlane.f32.xlu2 %v753_v39  ;;  %751 = vadd.xlane.f32.xlu1 %v750_v40  ;;  %v227_v39 = vld [vmem:[%s9854_s18 + $0x180] sm:$0xff] }
  0x44   : > { %748 = vadd.xlane.f32.xlu0 %v747_v41  ;;  %v843_v41 = vsel %vm691_vm0, %v229_v35, 0.0  ;;  %v837_v43 = vsel %vm691_vm0, %v227_v39, 0.0  ;;  %v2749_v39 = vld [vmem:[%s16314_s1 + $0x8] sm:$0xff] }
  0x4b   : > { %763 = vadd.xlane.f32.xlu2 %v762_v45  ;;  %760 = vadd.xlane.f32.xlu1 %v759_v46  ;;  %v231_v45 = vld [vmem:[%s9854_s18 + $0x1a0] sm:$0xff] }
  0x4c   : > { %757 = vadd.xlane.f32.xlu0 %v756_v47 }
  0x53   : > { %772 = vadd.xlane.f32.xlu2 %v771_v51  ;;  %769 = vadd.xlane.f32.xlu1 %v768_v52  ;;  %v849_v51 = vsel %vm691_vm0, %v231_v45, 0.0  ;;  %v846_v52 = vsel %vm701_vm1, %v230_v48, 0.0 }
  0x54   : > { %766 = vadd.xlane.f32.xlu0 %v765_v53  ;;  %v235_v53 = vld [vmem:[%s9854_s18 + $0x1c0] sm:$0xff] }
  0x5b   : > { %781 = vadd.xlane.f32.xlu2 %v780_v57  ;;  %778 = vadd.xlane.f32.xlu1 %v777_v58  ;;  %v233_v57 = vld [vmem:[%s9854_s18 + $0x1b0] sm:$0xff] }
  0x5c   : > { %775 = vadd.xlane.f32.xlu0 %v774_v59  ;;  %v861_v59 = vsel %vm691_vm0, %v235_v53, 0.0  ;;  %v855_v61 = vsel %vm691_vm0, %v233_v57, 0.0 }
  0x63   : > { %790 = vadd.xlane.f32.xlu2 %v789_v63  ;;  %787 = vadd.xlane.f32.xlu1 %v786_v0  ;;  %v238_v63 = vld [vmem:[%s9854_s18 + $0x1d8] sm:$0x3]  ;;  %v237_v0 = vld [vmem:[%s9854_s18 + $0x1d0] sm:$0xff] }
  0x64   : > { %784 = vadd.xlane.f32.xlu0 %v783_v1 }
  0x6b   : > { %799 = vadd.xlane.f32.xlu2 %v798_v5  ;;  %796 = vadd.xlane.f32.xlu1 %v795_v6  ;;  %v9296_v5 = vpop.eup %9295  ;;  %v870_v6 = vsel %vm701_vm1, %v238_v63, 0.0 }
  0x6c   : > { %793 = vadd.xlane.f32.xlu0 %v792_v7  ;;  %v867_v7 = vsel %vm691_vm0, %v237_v0, 0.0  ;;  %v2230_v9 = vmul.f32 32.0, %v9296_v5  ;;  %vm2234_vm3 = vweird.f32 %v9296_v5 }
  0x6e   : > { %v2231_v15 = vsub.f32 1.0, %v2230_v9 }
  0x70   : > { %v2232_v20 = vmul.f32 %v9296_v5, %v2231_v15 }
  0x72   : > { %v2233_v26 = vadd.f32 %v9296_v5, %v2232_v20 }
  0x73   : > { %808 = vadd.xlane.f32.xlu2 %v807_v11  ;;  %805 = vadd.xlane.f32.xlu1 %v804_v12  ;;  %v240_v11 = vld [vmem:[%s9854_s18 + $0x1e8] sm:$0xff] }
  0x74   : > { %802 = vadd.xlane.f32.xlu0 %v801_v13 }
  0x7b   : > { %817 = vadd.xlane.f32.xlu2 %v816_v17  ;;  %814 = vadd.xlane.f32.xlu1 %v813_v18  ;;  %v879_v17 = vsel %vm691_vm0, %v241_v10, 0.0  ;;  %v876_v18 = vsel %vm691_vm0, %v240_v11, 0.0  ;;  %v250_v11 = vld [vmem:[%s9854_s18 + $0x238] sm:$0x3] }
  0x7c   : > { %811 = vadd.xlane.f32.xlu0 %v810_v19  ;;  %v873_v19 = vsel %vm691_vm0, %v239_v14, 0.0  ;;  %v249_v14 = vld [vmem:[%s9854_s18 + $0x230] sm:$0xff] }
  0x83   : > { %826 = vadd.xlane.f32.xlu2 %v825_v23  ;;  %823 = vadd.xlane.f32.xlu1 %v822_v24 }
  0x84   : > { %820 = vadd.xlane.f32.xlu0 %v819_v25  ;;  %v242_v25 = vld [vmem:[%s9854_s18 + $0x1f8] sm:$0x3] }
  0x85   : > { %v882_v35 = vsel %vm701_vm1, %v242_v25, 0.0 }
  0x86   : > { %v9948_v28 = vpop.xlane.xlu2 %706  ;;  %v9950_v29 = vpop.xlane.xlu1 %699 }
  0x87   : > { %v9953_v31 = vpop.xlane.xlu0 %693 }
  0x8b   : > { %835 = vadd.xlane.f32.xlu2 %v834_v32  ;;  %832 = vadd.xlane.f32.xlu1 %v831_v33  ;;  %v2751_v32 = vld [vmem:[%s16314_s1 + $0x18] sm:$0x3]  ;;  %v888_v33 = vsel %vm691_vm0, %v244_v21, 0.0  ;;  %v248_v21 = vld [vmem:[%s9854_s18 + $0x228] sm:$0xff] }
  0x8c   : > { %829 = vadd.xlane.f32.xlu0 %v828_v34  ;;  %v885_v34 = vsel %vm691_vm0, %v243_v22, 0.0  ;;  %8829 = vmatpush.msk.msra.mxu0 %vm4320_vm2, %v2751_v32 }
  0x8d   : > { %8866 = vmatpush.msk.msra.mxu2 %vm4320_vm2, %v2751_v32 }
  0x8e   : > { %v9960_v37 = vpop.xlane.xlu2 %709  ;;  %v9962_v38 = vpop.xlane.xlu1 %703  ;;  %4337 = vmatpush.msra.mxu0 %v2750_v36 }
  0x8f   : > { %v9965_v40 = vpop.xlane.xlu0 %696  ;;  %8867 = vmatpush.msra.mxu2 %v2750_v36 }
  0x90   : > { %4338 = vmatpush.msra.mxu0 %v2749_v39 }
  0x91   : > { %8868 = vmatpush.msra.mxu2 %v2749_v39  ;;  %v900_v39 = vsel %vm691_vm0, %v248_v21, 0.0 }
  0x92   : > { %4339 = vmatpush.msra.mxu0 %v2748_v44 }
  0x93   : > { %844 = vadd.xlane.f32.xlu2 %v843_v41  ;;  %841 = vadd.xlane.f32.xlu1 %v840_v42  ;;  %v10039_v41 = vsel %vm2234_vm3, %v9296_v5, %v2233_v26  ;;  %v10042_v42 = vand.u32 127, %v3264_v27 }
  0x94   : > { %838 = vadd.xlane.f32.xlu0 %v837_v43  ;;  %v2236_v43 = vmul.f32 %v10039_v41, %v9953_v31  ;;  %v2237_v48 = vmul.f32 %v10039_v41, %v9965_v40  ;;  %v245_v31 = vld [vmem:[%s9854_s18 + $0x210] sm:$0xff]  ;;  %v2241_v54 = vmul.f32 %v10039_v41, %v9960_v37  ;;  %8869 = vmatpush.msra.mxu2 %v2748_v44 }
  0x95   : > { %v10050_v45 = vadd.s32 4294967288, %v10042_v42  ;;  %v2240_v40 = vmul.f32 %v10039_v41, %v9948_v28  ;;  %v10077_v3 = vadd.s32 4294967280, %v10042_v42  ;;  %v2238_v28 = vmul.f32 %v10039_v41, %v9950_v29 }
  0x96   : > { %v9972_v46 = vpop.xlane.xlu2 %718  ;;  %v9974_v47 = vpop.xlane.xlu1 %715 }
  0x97   : > { %v9977_v49 = vpop.xlane.xlu0 %712  ;;  %v3268_v63 = vperm.slane %v2237_v48, %v10050_v45  ;;  %v2244_v0 = vmul.f32 %v10039_v41, %v9972_v46  ;;  %v10085_v46 = vadd.s32 4294967272, %v10042_v42  ;;  %v3279_v29 = vperm.slane %v2240_v40, %v10042_v42  ;;  %v253_v40 = vld [vmem:[%s9854_s18 + $0x250] sm:$0xff] }
  0x98   : > { %v2242_v37 = vmul.f32 %v10039_v41, %v9977_v49  ;;  %v2239_v49 = vmul.f32 %v10039_v41, %v9962_v38  ;;  %v3272_v15 = vperm.slane %v2238_v28, %v10077_v3 }
  0x99   : > { %v3286_v9 = vperm.slane %v2244_v0, %v10042_v42 }
  0x9a   : > { %v3282_v10 = vperm.slane %v2242_v37, %v10077_v3  ;;  %v3276_v25 = vperm.slane %v2239_v49, %v10085_v46 }
  0x9b   : > { %853 = vadd.xlane.f32.xlu2 %v852_v50  ;;  %850 = vadd.xlane.f32.xlu1 %v849_v51  ;;  %v247_v50 = vld [vmem:[%s9854_s18 + $0x220] sm:$0xff]  ;;  %v246_v51 = vld [vmem:[%s9854_s18 + $0x218] sm:$0x3] }
  0x9c   : > { %847 = vadd.xlane.f32.xlu0 %v846_v52  ;;  %v894_v62 = vsel %vm701_vm1, %v246_v51, 0.0 }
  0x9e   : > { %v9984_v55 = vpop.xlane.xlu2 %727  ;;  %v9986_v56 = vpop.xlane.xlu1 %724 }
  0x9f   : > { %v9989_v58 = vpop.xlane.xlu0 %721  ;;  %v2246_v5 = vmul.f32 %v10039_v41, %v9986_v56  ;;  %v2243_v56 = vmul.f32 %v10039_v41, %v9974_v47  ;;  %v2247_v38 = vmul.f32 %v10039_v41, %v9984_v55 }
  0xa0   : > { %v2245_v57 = vmul.f32 %v10039_v41, %v9989_v58  ;;  %v891_v58 = vsel %vm691_vm0, %v245_v31, 0.0 }
  0xa3   : > { %862 = vadd.xlane.f32.xlu2 %v861_v59  ;;  %859 = vadd.xlane.f32.xlu1 %v858_v60  ;;  %v3266_v60 = vperm.slane %v2236_v43, %v10042_v42 }
  0xa4   : > { %856 = vadd.xlane.f32.xlu0 %v855_v61  ;;  %v897_v61 = vsel %vm691_vm0, %v247_v50, 0.0 }
  0xa6   : > { %v9996_v1 = vpop.xlane.xlu2 %736  ;;  %v9998_v2 = vpop.xlane.xlu1 %733 }
  0xa7   : > { %v10001_v4 = vpop.xlane.xlu0 %730  ;;  %v10118_v36 = vmul.f32 %v10039_v41, %v9996_v1 }
  0xa8   : > { %v2248_v47 = vmul.f32 %v10039_v41, %v10001_v4 }
  0xaa   : > { %v3293_v48 = vperm.slane %v2248_v47, %v10042_v42 }
  0xab   : > { %871 = vadd.xlane.f32.xlu2 %v870_v6  ;;  %868 = vadd.xlane.f32.xlu1 %v867_v7  ;;  %v3280_v6 = vperm.slane %v2241_v54, %v10050_v45  ;;  %v3287_v7 = vperm.slane %v2245_v57, %v10050_v45 }
  0xac   : > { %865 = vadd.xlane.f32.xlu0 %v864_v8  ;;  %v3270_v8 = vsel %vm3269_vm4, %v3268_v63, %v3266_v60  ;;  %v252_v60 = vld [vmem:[%s9854_s18 + $0x248] sm:$0xff] }
  0xad   : > { %v3281_v22 = vsel %vm3269_vm4, %v3280_v6, %v3279_v29  ;;  %v3288_v55 = vsel %vm3269_vm4, %v3287_v7, %v3286_v9  ;;  %v3274_v32 = vsel %vm3273_vm5, %v3272_v15, %v3270_v8  ;;  %v915_v7 = vsel %vm691_vm0, %v253_v40, 0.0 }
  0xae   : > { %v10008_v12 = vpop.xlane.xlu2 %745  ;;  %v10010_v13 = vpop.xlane.xlu1 %742  ;;  %v3283_v4 = vsel %vm3273_vm5, %v3282_v10, %v3281_v22  ;;  %v3278_v54 = vsel %vm3277_vm6, %v3276_v25, %v3274_v32  ;;  %v912_v29 = vsel %vm691_vm0, %v252_v60, 0.0  ;;  %v255_v32 = vld [vmem:[%s9854_s18 + $0x260] sm:$0xff] }
  0xaf   : > { %v10013_v16 = vpop.xlane.xlu0 %739  ;;  %v2253_v50 = vmul.f32 %v10039_v41, %v10008_v12  ;;  %v2252_v51 = vmul.f32 %v10039_v41, %v10010_v13  ;;  %v3296_v13 = vperm.slane %v10118_v36, %v10077_v3 }
  0xb0   : > { %v10130_v1 = vmul.f32 %v10039_v41, %v10013_v16 }
  0xb3   : > { %880 = vadd.xlane.f32.xlu2 %v879_v17  ;;  %877 = vadd.xlane.f32.xlu1 %v876_v18  ;;  %v3289_v17 = vperm.slane %v2246_v5, %v10077_v3  ;;  %v2249_v18 = vmul.f32 %v10039_v41, %v9998_v2  ;;  %v906_v2 = vsel %vm701_vm1, %v250_v11, 0.0  ;;  %v3301_v5 = vperm.slane %v2253_v50, %v10050_v45 }
  0xb4   : > { %874 = vadd.xlane.f32.xlu0 %v873_v19 }
  0xb5   : > { %v3290_v43 = vsel %vm3273_vm5, %v3289_v17, %v3288_v55  ;;  %v3294_v44 = vperm.slane %v2249_v18, %v10050_v45 }
  0xb6   : > { %v10020_v23 = vpop.xlane.xlu2 %754  ;;  %v10022_v24 = vpop.xlane.xlu1 %751 }
  0xb7   : > { %v10025_v30 = vpop.xlane.xlu0 %748  ;;  %v2256_v16 = vmul.f32 %v10039_v41, %v10020_v23  ;;  %v3300_v23 = vperm.slane %v2252_v51, %v10042_v42 }
  0xb9   : > { %v3307_v8 = vperm.slane %v2256_v16, %v10042_v42 }
  0xbb   : > { %889 = vadd.xlane.f32.xlu2 %v888_v33  ;;  %886 = vadd.xlane.f32.xlu1 %v885_v34  ;;  %v3284_v33 = vperm.slane %v2243_v56, %v10085_v46  ;;  %v903_v34 = vsel %vm691_vm0, %v249_v14, 0.0 }
  0xbc   : > { %883 = vadd.xlane.f32.xlu0 %v882_v35  ;;  %v3291_v35 = vperm.slane %v2247_v38, %v10085_v46 }
  0xbd   : > { %v3285_v57 = vsel %vm3277_vm6, %v3284_v33, %v3283_v4 }
  0xbe   : > { %v10056_v52 = vpop.xlane.xlu2 %763  ;;  %v10058_v53 = vpop.xlane.xlu1 %760  ;;  %v3292_v12 = vsel %vm3277_vm6, %v3291_v35, %v3290_v43 }
  0xbf   : > { %v758_v59 = vpop.xlane.xlu0 %757  ;;  %v2258_v63 = vmul.f32 %v10039_v41, %v10058_v53  ;;  %v2255_v53 = vmul.f32 %v10039_v41, %v10022_v24  ;;  %v2259_v10 = vmul.f32 %v10039_v41, %v10056_v52  ;;  %v4169_v52 = vsel %vm4168_vm7, %v3285_v57, %v3278_v54 }
  0xc0   : > { %v2257_v31 = vmul.f32 %v10039_v41, %v758_v59  ;;  %v2254_v59 = vmul.f32 %v10039_v41, %v10025_v30  ;;  %v3298_v30 = vperm.slane %v10130_v1, %v10085_v46  ;;  %v4171_v21 = vsel %vm4170_vm8, %v3292_v12, %v4169_v52  ;;  %v264_v52 = vld [vmem:[%s9854_s18 + $0x2a8] sm:$0xff] }
  0xc1   : > { %v3310_v11 = vperm.slane %v2258_v63, %v10077_v3  ;;  %v3312_v25 = vperm.slane %v2259_v10, %v10085_v46  ;;  %v921_v57 = vsel %vm691_vm0, %v255_v32, 0.0  ;;  %v261_v10 = vld [vmem:[%s9854_s18 + $0x290] sm:$0xff]  ;;  %v268_v32 = vld [vmem:[%s9854_s18 + $0x2c8] sm:$0xff] }
  0xc2   : > { %v3308_v6 = vperm.slane %v2257_v31, %v10050_v45  ;;  %v3303_v9 = vperm.slane %v2254_v59, %v10077_v3 }
  0xc3   : > { %898 = vadd.xlane.f32.xlu2 %v897_v61  ;;  %895 = vadd.xlane.f32.xlu1 %v894_v62  ;;  %v251_v61 = vld [vmem:[%s9854_s18 + $0x240] sm:$0xff]  ;;  %v3295_v62 = vsel %vm3269_vm4, %v3294_v44, %v3293_v48 }
  0xc4   : > { %892 = vadd.xlane.f32.xlu0 %v891_v58  ;;  %v909_v56 = vsel %vm691_vm0, %v251_v61, 0.0  ;;  %v3309_v17 = vsel %vm3269_vm4, %v3308_v6, %v3307_v8  ;;  %v3297_v33 = vsel %vm3273_vm5, %v3296_v13, %v3295_v62 }
  0xc5   : > { %v3299_v43 = vsel %vm3277_vm6, %v3298_v30, %v3297_v33  ;;  %v267_v33 = vld [vmem:[%s9854_s18 + $0x2c0] sm:$0xff] }
  0xc6   : > { %v773_v19 = vpop.xlane.xlu2 %772  ;;  %v770_v20 = vpop.xlane.xlu1 %769  ;;  %v4173_v40 = vsel %vm4172_vm9, %v3299_v43, %v4171_v21  ;;  %v263_v21 = vld [vmem:[%s9854_s18 + $0x2a0] sm:$0xff]  ;;  %v957_v43 = vsel %vm691_vm0, %v267_v33, 0.0 }
  0xc7   : > { %v767_v26 = vpop.xlane.xlu0 %766  ;;  %v2261_v0 = vmul.f32 %v10039_v41, %v770_v20  ;;  %v2262_v38 = vmul.f32 %v10039_v41, %v773_v19  ;;  %v3302_v19 = vsel %vm3269_vm4, %v3301_v5, %v3300_v23  ;;  %v3305_v20 = vperm.slane %v2255_v53, %v10085_v46  ;;  %v259_v5 = vld [vmem:[%s9854_s18 + $0x280] sm:$0xff]  ;;  %v258_v23 = vld [vmem:[%s9854_s18 + $0x278] sm:$0x3]  ;;  %v257_v53 = vld [vmem:[%s9854_s18 + $0x270] sm:$0xff] }
  0xc8   : > { %v2260_v37 = vmul.f32 %v10039_v41, %v767_v26  ;;  %v3304_v22 = vsel %vm3273_vm5, %v3303_v9, %v3302_v19  ;;  %v256_v26 = vld [vmem:[%s9854_s18 + $0x268] sm:$0xff]  ;;  %v927_v8 = vsel %vm691_vm0, %v257_v53, 0.0  ;;  %v262_v9 = vld [vmem:[%s9854_s18 + $0x298] sm:$0x3] }
  0xc9   : > { %v3315_v14 = vperm.slane %v2261_v0, %v10050_v45  ;;  %v3317_v55 = vperm.slane %v2262_v38, %v10077_v3  ;;  %v3306_v1 = vsel %vm3277_vm6, %v3305_v20, %v3304_v22  ;;  %v924_v54 = vsel %vm691_vm0, %v256_v26, 0.0 }
  0xca   : > { %v3314_v24 = vperm.slane %v2260_v37, %v10042_v42  ;;  %v4175_v63 = vsel %vm4174_vm10, %v3306_v1, %v4173_v40  ;;  %v945_v26 = vsel %vm691_vm0, %v263_v21, 0.0 }
  0xcb   : > { %907 = vadd.xlane.f32.xlu2 %v906_v2  ;;  %904 = vadd.xlane.f32.xlu1 %v903_v34  ;;  %v3311_v2 = vsel %vm3273_vm5, %v3310_v11, %v3309_v17  ;;  %v939_v17 = vsel %vm691_vm0, %v261_v10, 0.0  ;;  %v279_v10 = vld [vmem:[%s9854_s18 + $0x320] sm:$0xff] }
  0xcc   : > { %901 = vadd.xlane.f32.xlu0 %v900_v39  ;;  %v3316_v34 = vsel %vm3269_vm4, %v3315_v14, %v3314_v24  ;;  %v254_v39 = vld [vmem:[%s9854_s18 + $0x258] sm:$0x3]  ;;  %v3313_v16 = vsel %vm3277_vm6, %v3312_v25, %v3311_v2  ;;  %v260_v14 = vld [vmem:[%s9854_s18 + $0x288] sm:$0xff] }
  0xcd   : > { %v918_v13 = vsel %vm701_vm1, %v254_v39, 0.0  ;;  %v3318_v59 = vsel %vm3273_vm5, %v3317_v55, %v3316_v34  ;;  %v4177_v37 = vsel %vm4176_vm11, %v3313_v16, %v4175_v63  ;;  %v948_v55 = vsel %vm691_vm0, %v264_v52, 0.0  ;;  %v274_v16 = vld [vmem:[%s9854_s18 + $0x2f8] sm:$0x3] }
  0xce   : > { %v782_v58 = vpop.xlane.xlu2 %781  ;;  %v779_v28 = vpop.xlane.xlu1 %778  ;;  %v960_v39 = vsel %vm691_vm0, %v268_v32, 0.0  ;;  %v978_v63 = vsel %vm701_vm1, %v274_v16, 0.0  ;;  %v278_v52 = vld [vmem:[%s9854_s18 + $0x318] sm:$0x3] }
  0xcf   : > { %v776_v49 = vpop.xlane.xlu0 %775  ;;  %v2265_v18 = vmul.f32 %v10039_v41, %v782_v58  ;;  %v2264_v47 = vmul.f32 %v10039_v41, %v779_v28  ;;  %v990_v33 = vsel %vm701_vm1, %v278_v52, 0.0 }
  0xd0   : > { %v2263_v15 = vmul.f32 %v10039_v41, %v776_v49 }
  0xd1   : > { %v3322_v44 = vperm.slane %v2265_v18, %v10050_v45  ;;  %v3321_v48 = vperm.slane %v2264_v47, %v10042_v42  ;;  %v936_v18 = vsel %vm691_vm0, %v260_v14, 0.0  ;;  %v265_v47 = vld [vmem:[%s9854_s18 + $0x2b0] sm:$0xff] }
  0xd2   : > { %v3319_v4 = vperm.slane %v2263_v15, %v10085_v46  ;;  %v942_v15 = vsel %vm701_vm1, %v262_v9, 0.0  ;;  %v951_v25 = vsel %vm691_vm0, %v265_v47, 0.0  ;;  %v280_v9 = vld [vmem:[%s9854_s18 + $0x328] sm:$0xff] }
  0xd3   : > { %916 = vadd.xlane.f32.xlu2 %v915_v7  ;;  %913 = vadd.xlane.f32.xlu1 %v912_v29  ;;  %v3323_v62 = vsel %vm3269_vm4, %v3322_v44, %v3321_v48  ;;  %v933_v29 = vsel %vm691_vm0, %v259_v5, 0.0  ;;  %v271_v48 = vld [vmem:[%s9854_s18 + $0x2e0] sm:$0xff] }
  0xd4   : > { %910 = vadd.xlane.f32.xlu0 %v909_v56  ;;  %v3320_v61 = vsel %vm3277_vm6, %v3319_v4, %v3318_v59  ;;  %v930_v56 = vsel %vm701_vm1, %v258_v23, 0.0  ;;  %v266_v4 = vld [vmem:[%s9854_s18 + $0x2b8] sm:$0x3]  ;;  %v273_v59 = vld [vmem:[%s9854_s18 + $0x2f0] sm:$0xff] }
  0xd5   : > { %v4179_v28 = vsel %vm4178_vm12, %v3320_v61, %v4177_v37  ;;  %v954_v44 = vsel %vm701_vm1, %v266_v4, 0.0  ;;  %v272_v61 = vld [vmem:[%s9854_s18 + $0x2e8] sm:$0xff] }
  0xd6   : > { %v10185_v35 = vpop.xlane.xlu2 %790  ;;  %v788_v36 = vpop.xlane.xlu1 %787  ;;  %v972_v37 = vsel %vm691_vm0, %v272_v61, 0.0  ;;  %v281_v61 = vld [vmem:[%s9854_s18 + $0x330] sm:$0xff] }
  0xd7   : > { %v2267_v50 = vmul.f32 %v10039_v41, %v788_v36  ;;  %v785_v51 = vpop.xlane.xlu0 %784 }
  0xd8   : > { %v2266_v31 = vmul.f32 %v10039_v41, %v785_v51 }
  0xd9   : > { %v3326_v12 = vperm.slane %v2267_v50, %v10085_v46  ;;  %v270_v50 = vld [vmem:[%s9854_s18 + $0x2d8] sm:$0x3] }
  0xda   : > { %v3324_v60 = vperm.slane %v2266_v31, %v10077_v3  ;;  %v269_v31 = vld [vmem:[%s9854_s18 + $0x2d0] sm:$0xff] }
  0xdb   : > { %925 = vadd.xlane.f32.xlu2 %v924_v54  ;;  %922 = vadd.xlane.f32.xlu1 %v921_v57  ;;  %v969_v57 = vsel %vm691_vm0, %v271_v48, 0.0 }
  0xdc   : > { %919 = vadd.xlane.f32.xlu0 %v918_v13  ;;  %v3325_v0 = vsel %vm3273_vm5, %v3324_v60, %v3323_v62  ;;  %v963_v13 = vsel %vm691_vm0, %v269_v31, 0.0  ;;  %v282_v31 = vld [vmem:[%s9854_s18 + $0x338] sm:$0x3] }
  0xdd   : > { %v3327_v58 = vsel %vm3277_vm6, %v3326_v12, %v3325_v0  ;;  %v966_v12 = vsel %vm701_vm1, %v270_v50, 0.0  ;;  %v975_v0 = vsel %vm691_vm0, %v273_v59, 0.0  ;;  %v283_v50 = vld [vmem:[%s9854_s18 + $0x340] sm:$0xff] }
  0xde   : > { %v10211_v30 = vpop.xlane.xlu2 %799  ;;  %v10213_v6 = vpop.xlane.xlu1 %796  ;;  %v4181_v49 = vsel %vm4180_vm13, %v3327_v58, %v4179_v28  ;;  %v277_v58 = vld [vmem:[%s9854_s18 + $0x310] sm:$0xff]  ;;  %v276_v28 = vld [vmem:[%s9854_s18 + $0x308] sm:$0xff] }
  0xdf   : > { %8830 = vmatmul.msk.f32.vlgmr.msra.gmra.mxu0 %vm4287_vm14, %v4181_v49  ;;  %v10218_v7 = vpop.xlane.xlu0 %793  ;;  %v275_v49 = vld [vmem:[%s9854_s18 + $0x300] sm:$0xff]  ;;  %v2270_v32 = vmul.f32 %v10039_v41, %v10213_v6 }
  0xe0   : > { %v2269_v14 = vmul.f32 %v10039_v41, %v10218_v7  ;;  %v2268_v7 = vmul.f32 %v10039_v41, %v10185_v35 }
  0xe2   : > { %v3329_v35 = vperm.slane %v2269_v14, %v10050_v45 }
  0xe3   : > { %934 = vadd.xlane.f32.xlu2 %v933_v29  ;;  %931 = vadd.xlane.f32.xlu1 %v930_v56  ;;  %v987_v29 = vsel %vm691_vm0, %v277_v58, 0.0  ;;  %v984_v56 = vsel %vm691_vm0, %v276_v28, 0.0 }
  0xe4   : > { %928 = vadd.xlane.f32.xlu0 %v927_v8  ;;  %v981_v8 = vsel %vm691_vm0, %v275_v49, 0.0 }
  0xe6   : > { %v10225_v38 = vpop.xlane.xlu2 %808  ;;  %v10227_v11 = vpop.xlane.xlu1 %805 }
  0xe7   : > { %v10230_v24 = vpop.xlane.xlu0 %802 }
  0xeb   : > { %943 = vadd.xlane.f32.xlu2 %v942_v15  ;;  %940 = vadd.xlane.f32.xlu1 %v939_v17  ;;  %v2273_v15 = vmul.f32 %v10039_v41, %v10227_v11  ;;  %v2272_v17 = vmul.f32 %v10039_v41, %v10230_v24  ;;  %v10316_v11 = vmul.f32 %v10039_v41, %v10211_v30  ;;  %v996_v24 = vsel %vm691_vm0, %v280_v9, 0.0 }
  0xec   : > { %937 = vadd.xlane.f32.xlu0 %v936_v18 }
  0xed   : > { %v3336_v30 = vperm.slane %v2273_v15, %v10050_v45  ;;  %v3335_v4 = vperm.slane %v2272_v17, %v10042_v42 }
  0xee   : > { %v10237_v19 = vpop.xlane.xlu2 %817  ;;  %v10239_v20 = vpop.xlane.xlu1 %814 }
  0xef   : > { %v10242_v22 = vpop.xlane.xlu0 %811  ;;  %v2277_v21 = vmul.f32 %v10039_v41, %v10237_v19  ;;  %v2274_v19 = vmul.f32 %v10039_v41, %v10225_v38 }
  0xf1   : > { %v3343_v6 = vperm.slane %v2277_v21, %v10050_v45 }
  0xf3   : > { %952 = vadd.xlane.f32.xlu2 %v951_v25  ;;  %949 = vadd.xlane.f32.xlu1 %v948_v55  ;;  %v2276_v25 = vmul.f32 %v10039_v41, %v10239_v20 }
  0xf4   : > { %946 = vadd.xlane.f32.xlu0 %v945_v26  ;;  %v993_v26 = vsel %vm691_vm0, %v279_v10, 0.0  ;;  %v999_v10 = vsel %vm691_vm0, %v281_v61, 0.0 }
  0xf6   : > { %v10249_v2 = vpop.xlane.xlu2 %826  ;;  %v10251_v34 = vpop.xlane.xlu1 %823 }
  0xf7   : > { %v821_v36 = vpop.xlane.xlu0 %820  ;;  %v2279_v38 = vmul.f32 %v10039_v41, %v10251_v34  ;;  %v3331_v34 = vperm.slane %v2270_v32, %v10077_v3 }
  0xf8   : > { %v2278_v20 = vmul.f32 %v10039_v41, %v821_v36  ;;  %v3328_v36 = vperm.slane %v2268_v7, %v10042_v42 }
  0xfa   : > { %v3345_v48 = vperm.slane %v2278_v20, %v10077_v3 }
  0xfb   : > { %961 = vadd.xlane.f32.xlu2 %v960_v39  ;;  %958 = vadd.xlane.f32.xlu1 %v957_v43  ;;  %v2275_v39 = vmul.f32 %v10039_v41, %v10242_v22  ;;  %v3342_v43 = vperm.slane %v2276_v25, %v10042_v42  ;;  %v286_v25 = vld [vmem:[%s9854_s18 + $0x358] sm:$0x3] }
  0xfc   : > { %955 = vadd.xlane.f32.xlu0 %v954_v44  ;;  %v3338_v44 = vperm.slane %v2274_v19, %v10077_v3 }
  0xfe   : > { %v10259_v51 = vpop.xlane.xlu2 %835  ;;  %v10261_v1 = vpop.xlane.xlu1 %832 }
  0xff   : > { %v10264_v54 = vpop.xlane.xlu0 %829  ;;  %v10355_v28 = vmul.f32 %v10039_v41, %v10259_v51  ;;  %v2282_v49 = vmul.f32 %v10039_v41, %v10261_v1 }
 0x100   : > { %v2281_v22 = vmul.f32 %v10039_v41, %v10264_v54  ;;  %v2280_v54 = vmul.f32 %v10039_v41, %v10249_v2 }
 0x102   : > { %v3350_v2 = vperm.slane %v2281_v22, %v10050_v45  ;;  %v3349_v17 = vperm.slane %v2280_v54, %v10042_v42 }
 0x103   : > { %970 = vadd.xlane.f32.xlu2 %v969_v57  ;;  %967 = vadd.xlane.f32.xlu1 %v966_v12  ;;  %v3333_v57 = vperm.slane %v10316_v11, %v10085_v46  ;;  %v3337_v12 = vsel %vm3269_vm4, %v3336_v30, %v3335_v4 }
 0x104   : > { %964 = vadd.xlane.f32.xlu0 %v963_v13  ;;  %v3340_v13 = vperm.slane %v2275_v39, %v10085_v46  ;;  %v1014_v39 = vsel %vm701_vm1, %v286_v25, 0.0 }
 0x106   : > { %v10271_v40 = vpop.xlane.xlu2 %844  ;;  %v10273_v60 = vpop.xlane.xlu1 %841 }
 0x107   : > { %v10276_v62 = vpop.xlane.xlu0 %838  ;;  %v2285_v1 = vmul.f32 %v10039_v41, %v10273_v60  ;;  %v3352_v60 = vperm.slane %v2282_v49, %v10077_v3  ;;  %v2286_v32 = vmul.f32 %v10039_v41, %v10271_v40 }
 0x108   : > { %v2284_v15 = vmul.f32 %v10039_v41, %v10276_v62 }
 0x10b   : > { %979 = vadd.xlane.f32.xlu2 %v978_v63  ;;  %976 = vadd.xlane.f32.xlu1 %v975_v0  ;;  %v3330_v63 = vsel %vm3269_vm4, %v3329_v35, %v3328_v36  ;;  %v3344_v0 = vsel %vm3269_vm4, %v3343_v6, %v3342_v43  ;;  %v3356_v35 = vperm.slane %v2284_v15, %v10042_v42  ;;  %v284_v6 = vld [vmem:[%s9854_s18 + $0x348] sm:$0xff] }
 0x10c   : > { %973 = vadd.xlane.f32.xlu0 %v972_v37  ;;  %v3347_v37 = vperm.slane %v2279_v38, %v10085_v46  ;;  %v3346_v9 = vsel %vm3273_vm5, %v3345_v48, %v3344_v0  ;;  %v3332_v51 = vsel %vm3273_vm5, %v3331_v34, %v3330_v63  ;;  %v1008_v34 = vsel %vm691_vm0, %v284_v6, 0.0 }
 0x10d   : > { %v3334_v49 = vsel %vm3277_vm6, %v3333_v57, %v3332_v51 }
 0x10e   : > { %v10283_v5 = vpop.xlane.xlu2 %853  ;;  %v10285_v23 = vpop.xlane.xlu1 %850  ;;  %v3348_v7 = vsel %vm3277_vm6, %v3347_v37, %v3346_v9 }
 0x10f   : > { %v10288_v53 = vpop.xlane.xlu0 %847  ;;  %v2289_v52 = vmul.f32 %v10039_v41, %v10283_v5  ;;  %v2288_v62 = vmul.f32 %v10039_v41, %v10285_v23  ;;  %v3351_v5 = vsel %vm3269_vm4, %v3350_v2, %v3349_v17  ;;  %v287_v17 = vld [vmem:[%s9854_s18 + $0x360] sm:$0xff] }
 0x110   : > { %v2287_v40 = vmul.f32 %v10039_v41, %v10288_v53 }
 0x111   : > { %v3364_v43 = vperm.slane %v2289_v52, %v10050_v45  ;;  %v3363_v36 = vperm.slane %v2288_v62, %v10042_v42 }
 0x112   : > { %v3361_v61 = vperm.slane %v2287_v40, %v10085_v46  ;;  %v290_v40 = vld [vmem:[%s9854_s18 + $0x378] sm:$0x3] }
 0x113   : > { %988 = vadd.xlane.f32.xlu2 %v987_v29  ;;  %985 = vadd.xlane.f32.xlu1 %v984_v56  ;;  %v1005_v29 = vsel %vm691_vm0, %v283_v50, 0.0  ;;  %v1002_v56 = vsel %vm701_vm1, %v282_v31, 0.0 }
 0x114   : > { %982 = vadd.xlane.f32.xlu0 %v981_v8  ;;  %v3339_v8 = vsel %vm3273_vm5, %v3338_v44, %v3337_v12  ;;  %v3353_v12 = vsel %vm3273_vm5, %v3352_v60, %v3351_v5 }
 0x115   : > { %v3341_v14 = vsel %vm3277_vm6, %v3340_v13, %v3339_v8  ;;  %v3359_v13 = vperm.slane %v2286_v32, %v10077_v3  ;;  %v288_v8 = vld [vmem:[%s9854_s18 + $0x368] sm:$0xff] }
 0x116   : > { %v10301_v18 = vpop.xlane.xlu2 %862  ;;  %v10303_v47 = vpop.xlane.xlu1 %859  ;;  %v4182_v9 = vsel %vm4168_vm7, %v3341_v14, %v3334_v49  ;;  %v1020_v60 = vsel %vm691_vm0, %v288_v8, 0.0  ;;  %v301_v49 = vld [vmem:[%s9854_s18 + $0x3d0] sm:$0xff] }
 0x117   : > { %v10310_v55 = vpop.xlane.xlu0 %856  ;;  %v2292_v19 = vmul.f32 %v10039_v41, %v10301_v18  ;;  %v2291_v44 = vmul.f32 %v10039_v41, %v10303_v47  ;;  %v4183_v57 = vsel %vm4170_vm8, %v3348_v7, %v4182_v9  ;;  %v299_v9 = vld [vmem:[%s9854_s18 + $0x3c0] sm:$0xff] }
 0x118   : > { %v2290_v20 = vmul.f32 %v10039_v41, %v10310_v55 }
 0x119   : > { %v3370_v50 = vperm.slane %v2292_v19, %v10042_v42  ;;  %v3368_v54 = vperm.slane %v2291_v44, %v10085_v46  ;;  %v295_v44 = vld [vmem:[%s9854_s18 + $0x3a0] sm:$0xff] }
 0x11a   : > { %v3366_v31 = vperm.slane %v2290_v20, %v10077_v3 }
 0x11b   : > { %997 = vadd.xlane.f32.xlu2 %v996_v24  ;;  %994 = vadd.xlane.f32.xlu1 %v993_v26  ;;  %v3354_v24 = vperm.slane %v10355_v28, %v10085_v46  ;;  %v285_v26 = vld [vmem:[%s9854_s18 + $0x350] sm:$0xff] }
 0x11c   : > { %991 = vadd.xlane.f32.xlu0 %v990_v33  ;;  %v3357_v33 = vperm.slane %v2285_v1, %v10050_v45  ;;  %v1011_v55 = vsel %vm691_vm0, %v285_v26, 0.0  ;;  %v289_v28 = vld [vmem:[%s9854_s18 + $0x370] sm:$0xff]  ;;  %v1017_v26 = vsel %vm691_vm0, %v287_v17, 0.0 }
 0x11d   : > { %v3355_v2 = vsel %vm3277_vm6, %v3354_v24, %v3353_v12  ;;  %v1023_v14 = vsel %vm691_vm0, %v289_v28, 0.0  ;;  %v1041_v12 = vsel %vm691_vm0, %v295_v44, 0.0 }
 0x11e   : > { %v872_v16 = vpop.xlane.xlu2 %871  ;;  %v869_v59 = vpop.xlane.xlu1 %868  ;;  %v4184_v5 = vsel %vm4172_vm9, %v3355_v2, %v4183_v57  ;;  %v304_v57 = vld [vmem:[%s9854_s18 + $0x3e8] sm:$0xff] }
 0x11f   : > { %v866_v58 = vpop.xlane.xlu0 %865  ;;  %v2294_v30 = vmul.f32 %v10039_v41, %v869_v59  ;;  %v2295_v53 = vmul.f32 %v10039_v41, %v872_v16  ;;  %v3358_v59 = vsel %vm3269_vm4, %v3357_v33, %v3356_v35  ;;  %v3365_v16 = vsel %vm3269_vm4, %v3364_v43, %v3363_v36 }
 0x120   : > { %v2293_v21 = vmul.f32 %v10039_v41, %v866_v58  ;;  %v1026_v36 = vsel %vm701_vm1, %v290_v40, 0.0 }
 0x121   : > { %v3373_v47 = vperm.slane %v2294_v30, %v10077_v3 }
 0x122   : > { %v3371_v18 = vperm.slane %v2293_v21, %v10050_v45 }
 0x123   : > { %1006 = vadd.xlane.f32.xlu2 %v1005_v29  ;;  %1003 = vadd.xlane.f32.xlu1 %v1002_v56  ;;  %v3367_v29 = vsel %vm3273_vm5, %v3366_v31, %v3365_v16  ;;  %v3375_v56 = vperm.slane %v2295_v53, %v10085_v46  ;;  %v293_v53 = vld [vmem:[%s9854_s18 + $0x390] sm:$0xff]  ;;  %v296_v16 = vld [vmem:[%s9854_s18 + $0x3a8] sm:$0xff] }
 0x124   : > { %1000 = vadd.xlane.f32.xlu0 %v999_v10  ;;  %v3372_v63 = vsel %vm3269_vm4, %v3371_v18, %v3370_v50  ;;  %v3360_v10 = vsel %vm3273_vm5, %v3359_v13, %v3358_v59  ;;  %v3369_v62 = vsel %vm3277_vm6, %v3368_v54, %v3367_v29  ;;  %v1035_v59 = vsel %vm691_vm0, %v293_v53, 0.0  ;;  %v300_v29 = vld [vmem:[%s9854_s18 + $0x3c8] sm:$0xff] }
 0x125   : > { %v3374_v11 = vsel %vm3273_vm5, %v3373_v47, %v3372_v63  ;;  %v3362_v51 = vsel %vm3277_vm6, %v3361_v61, %v3360_v10  ;;  %v298_v47 = vld [vmem:[%s9854_s18 + $0x3b8] sm:$0x3]  ;;  %v297_v61 = vld [vmem:[%s9854_s18 + $0x3b0] sm:$0xff]  ;;  %v1044_v28 = vsel %vm691_vm0, %v296_v16, 0.0  ;;  %v1059_v10 = vsel %vm691_vm0, %v301_v49, 0.0 }
 0x126   : > { %v881_v23 = vpop.xlane.xlu2 %880  ;;  %v878_v4 = vpop.xlane.xlu1 %877  ;;  %v3376_v7 = vsel %vm3277_vm6, %v3375_v56, %v3374_v11  ;;  %v4185_v19 = vsel %vm4174_vm10, %v3362_v51, %v4184_v5  ;;  %v1056_v17 = vsel %vm691_vm0, %v300_v29, 0.0  ;;  %v1053_v11 = vsel %vm691_vm0, %v299_v9, 0.0  ;;  %v303_v51 = vld [vmem:[%s9854_s18 + $0x3e0] sm:$0xff]  ;;  %v313_v9 = vld [vmem:[%s9854_s18 + $0x430] sm:$0xff] }
 0x127   : > { %v875_v38 = vpop.xlane.xlu0 %874  ;;  %v2297_v48 = vmul.f32 %v10039_v41, %v878_v4  ;;  %v2298_v0 = vmul.f32 %v10039_v41, %v881_v23  ;;  %v4186_v33 = vsel %vm4176_vm11, %v3369_v62, %v4185_v19  ;;  %v292_v4 = vld [vmem:[%s9854_s18 + $0x388] sm:$0xff]  ;;  %v307_v5 = vld [vmem:[%s9854_s18 + $0x400] sm:$0xff] }
 0x128   : > { %v2296_v22 = vmul.f32 %v10039_v41, %v875_v38  ;;  %v4187_v30 = vsel %vm4178_vm12, %v3376_v7, %v4186_v33  ;;  %v1032_v38 = vsel %vm691_vm0, %v292_v4, 0.0  ;;  %v305_v33 = vld [vmem:[%s9854_s18 + $0x3f0] sm:$0xff] }
 0x129   : > { %v3378_v37 = vperm.slane %v2297_v48, %v10050_v45  ;;  %v3380_v52 = vperm.slane %v2298_v0, %v10077_v3  ;;  %v294_v48 = vld [vmem:[%s9854_s18 + $0x398] sm:$0x3]  ;;  %v1071_v4 = vsel %vm691_vm0, %v305_v33, 0.0 }
 0x12a   : > { %v3377_v58 = vperm.slane %v2296_v22, %v10042_v42  ;;  %v4405_v22 = vld [vmem:[%s16315_s2] sm:$0xff]  ;;  %v1038_v13 = vsel %vm701_vm1, %v294_v48, 0.0 }
 0x12b   : > { %1015 = vadd.xlane.f32.xlu2 %v1014_v39  ;;  %1012 = vadd.xlane.f32.xlu1 %v1011_v55  ;;  %v291_v39 = vld [vmem:[%s9854_s18 + $0x380] sm:$0xff] }
 0x12c   : > { %1009 = vadd.xlane.f32.xlu0 %v1008_v34  ;;  %v3379_v25 = vsel %vm3269_vm4, %v3378_v37, %v3377_v58  ;;  %v1029_v55 = vsel %vm691_vm0, %v291_v39, 0.0  ;;  %4470 = vmatpush.msra.mxu1 %v4405_v22  ;;  %v1050_v37 = vsel %vm701_vm1, %v298_v47, 0.0  ;;  %v1047_v58 = vsel %vm691_vm0, %v297_v61, 0.0 }
 0x12d   : > { %v3381_v20 = vsel %vm3273_vm5, %v3380_v52, %v3379_v25  ;;  %8870 = vmatpush.msra.mxu3 %v4405_v22  ;;  %v308_v22 = vld [vmem:[%s9854_s18 + $0x408] sm:$0xff] }
 0x12e   : > { %v10431_v1 = vpop.xlane.xlu2 %889  ;;  %v10433_v15 = vpop.xlane.xlu1 %886  ;;  %v1080_v61 = vsel %vm691_vm0, %v308_v22, 0.0 }
 0x12f   : > { %v884_v21 = vpop.xlane.xlu0 %883  ;;  %v2301_v39 = vmul.f32 %v10039_v41, %v10431_v1 }
 0x130   : > { %v2299_v24 = vmul.f32 %v10039_v41, %v884_v21 }
 0x132   : > { %v3382_v32 = vperm.slane %v2299_v24, %v10085_v46  ;;  %v1068_v24 = vsel %vm691_vm0, %v304_v57, 0.0 }
 0x133   : > { %1024 = vadd.xlane.f32.xlu2 %v1023_v14  ;;  %1021 = vadd.xlane.f32.xlu1 %v1020_v60  ;;  %v302_v14 = vld [vmem:[%s9854_s18 + $0x3d8] sm:$0x3]  ;;  %v1065_v60 = vsel %vm691_vm0, %v303_v51, 0.0 }
 0x134   : > { %1018 = vadd.xlane.f32.xlu0 %v1017_v26  ;;  %v3383_v35 = vsel %vm3277_vm6, %v3382_v32, %v3381_v20  ;;  %v1062_v62 = vsel %vm701_vm1, %v302_v14, 0.0  ;;  %v306_v32 = vld [vmem:[%s9854_s18 + $0x3f8] sm:$0x3]  ;;  %v311_v14 = vld [vmem:[%s9854_s18 + $0x420] sm:$0xff] }
 0x135   : > { %v4188_v23 = vsel %vm4180_vm13, %v3383_v35, %v4187_v30  ;;  %v1077_v30 = vsel %vm691_vm0, %v307_v5, 0.0 }
 0x136   : > { %8831 = vmatmul.msk.f32.gmra.mxu0 %vm4287_vm14, %v4188_v23  ;;  %v10458_v6 = vpop.xlane.xlu2 %898  ;;  %v10460_v43 = vpop.xlane.xlu1 %895  ;;  %v1074_v23 = vsel %vm701_vm1, %v306_v32, 0.0 }
 0x137   : > { %v10463_v18 = vpop.xlane.xlu0 %892  ;;  %v2304_v53 = vmul.f32 %v10039_v41, %v10458_v6 }
 0x13b   : > { %1033 = vadd.xlane.f32.xlu2 %v1032_v38  ;;  %1030 = vadd.xlane.f32.xlu1 %v1029_v55  ;;  %v310_v38 = vld [vmem:[%s9854_s18 + $0x418] sm:$0x3]  ;;  %v309_v55 = vld [vmem:[%s9854_s18 + $0x410] sm:$0xff] }
 0x13c   : > { %1027 = vadd.xlane.f32.xlu0 %v1026_v36  ;;  %v2300_v36 = vmul.f32 %v10039_v41, %v10433_v15  ;;  %v1083_v15 = vsel %vm691_vm0, %v309_v55, 0.0 }
 0x13e   : > { %v10473_v50 = vpop.xlane.xlu2 %907  ;;  %v10475_v31 = vpop.xlane.xlu1 %904  ;;  %v3384_v6 = vperm.slane %v2300_v36, %v10042_v42 }
 0x13f   : > { %v902_v34 = vpop.xlane.xlu0 %901  ;;  %v2306_v1 = vmul.f32 %v10039_v41, %v10475_v31 }
 0x140   : > { %v2305_v40 = vmul.f32 %v10039_v41, %v902_v34  ;;  %v1086_v34 = vsel %vm701_vm1, %v310_v38, 0.0 }
 0x141   : > { %v3394_v49 = vperm.slane %v2306_v1, %v10077_v3  ;;  %v314_v1 = vld [vmem:[%s9854_s18 + $0x438] sm:$0x3] }
 0x142   : > { %v3392_v47 = vperm.slane %v2305_v40, %v10050_v45 }
 0x143   : > { %1042 = vadd.xlane.f32.xlu2 %v1041_v12  ;;  %1039 = vadd.xlane.f32.xlu1 %v1038_v13  ;;  %v2302_v12 = vmul.f32 %v10039_v41, %v10463_v18  ;;  %v2303_v18 = vmul.f32 %v10039_v41, %v10460_v43 }
 0x144   : > { %1036 = vadd.xlane.f32.xlu0 %v1035_v59  ;;  %v3385_v59 = vperm.slane %v2301_v39, %v10050_v45 }
 0x146   : > { %v10483_v63 = vpop.xlane.xlu2 %916  ;;  %v10485_v0 = vpop.xlane.xlu1 %913 }
 0x147   : > { %v10488_v54 = vpop.xlane.xlu0 %910  ;;  %v2309_v31 = vmul.f32 %v10039_v41, %v10485_v0  ;;  %v2310_v43 = vmul.f32 %v10039_v41, %v10483_v63 }
 0x148   : > { %v2308_v16 = vmul.f32 %v10039_v41, %v10488_v54 }
 0x14b   : > { %1051 = vadd.xlane.f32.xlu2 %v1050_v37  ;;  %1048 = vadd.xlane.f32.xlu1 %v1047_v58  ;;  %v3391_v37 = vperm.slane %v2304_v53, %v10042_v42  ;;  %v3387_v58 = vperm.slane %v2302_v12, %v10077_v3  ;;  %v315_v12 = vld [vmem:[%s9854_s18 + $0x440] sm:$0xff] }
 0x14c   : > { %1045 = vadd.xlane.f32.xlu0 %v1044_v28  ;;  %v2307_v28 = vmul.f32 %v10039_v41, %v10473_v50  ;;  %v3386_v50 = vsel %vm3269_vm4, %v3385_v59, %v3384_v6 }
 0x14d   : > { %v3393_v0 = vsel %vm3269_vm4, %v3392_v47, %v3391_v37 }
 0x14e   : > { %v10495_v56 = vpop.xlane.xlu2 %925  ;;  %v10497_v8 = vpop.xlane.xlu1 %922 }
 0x14f   : > { %v10500_v2 = vpop.xlane.xlu0 %919  ;;  %v2313_v54 = vmul.f32 %v10039_v41, %v10495_v56  ;;  %v2312_v29 = vmul.f32 %v10039_v41, %v10497_v8  ;;  %v3388_v56 = vsel %vm3273_vm5, %v3387_v58, %v3386_v50  ;;  %v3396_v8 = vperm.slane %v2307_v28, %v10085_v46 }
 0x150   : > { %v2311_v63 = vmul.f32 %v10039_v41, %v10500_v2  ;;  %v1098_v28 = vsel %vm701_vm1, %v314_v1, 0.0 }
 0x151   : > { %v3406_v2 = vperm.slane %v2313_v54, %v10050_v45  ;;  %v3405_v32 = vperm.slane %v2312_v29, %v10042_v42 }
 0x153   : > { %1060 = vadd.xlane.f32.xlu2 %v1059_v10  ;;  %1057 = vadd.xlane.f32.xlu1 %v1056_v17  ;;  %v312_v10 = vld [vmem:[%s9854_s18 + $0x428] sm:$0xff]  ;;  %v3399_v17 = vperm.slane %v2309_v31, %v10050_v45  ;;  %v3407_v36 = vsel %vm3269_vm4, %v3406_v2, %v3405_v32  ;;  %v317_v2 = vld [vmem:[%s9854_s18 + $0x450] sm:$0xff] }
 0x154   : > { %1054 = vadd.xlane.f32.xlu0 %v1053_v11  ;;  %v3398_v11 = vperm.slane %v2308_v16, %v10042_v42  ;;  %v1092_v5 = vsel %vm691_vm0, %v312_v10, 0.0 }
 0x156   : > { %v10507_v52 = vpop.xlane.xlu2 %934  ;;  %v10509_v21 = vpop.xlane.xlu1 %931 }
 0x157   : > { %v10512_v25 = vpop.xlane.xlu0 %928  ;;  %v2316_v40 = vmul.f32 %v10039_v41, %v10507_v52  ;;  %v2315_v38 = vmul.f32 %v10039_v41, %v10509_v21  ;;  %v316_v52 = vld [vmem:[%s9854_s18 + $0x448] sm:$0xff] }
 0x158   : > { %v2314_v33 = vmul.f32 %v10039_v41, %v10512_v25  ;;  %v1104_v58 = vsel %vm691_vm0, %v316_v52, 0.0 }
 0x159   : > { %v3412_v6 = vperm.slane %v2316_v40, %v10042_v42 }
 0x15a   : > { %v3408_v53 = vperm.slane %v2314_v33, %v10077_v3 }
 0x15b   : > { %1069 = vadd.xlane.f32.xlu2 %v1068_v24  ;;  %1066 = vadd.xlane.f32.xlu1 %v1065_v60  ;;  %v3389_v24 = vperm.slane %v2303_v18, %v10085_v46  ;;  %v3410_v18 = vperm.slane %v2315_v38, %v10085_v46 }
 0x15c   : > { %1063 = vadd.xlane.f32.xlu0 %v1062_v62  ;;  %v4341_v26 = vpop.f32.mrf.mxu0  ;;  %v3395_v62 = vsel %vm3273_vm5, %v3394_v49, %v3393_v0 }
 0x15d   : > { %v4389_v7 = vmax.f32 %v4341_v26, 0.0  ;;  %v3401_v26 = vperm.slane %v2310_v43, %v10077_v3  ;;  %v3390_v25 = vsel %vm3277_vm6, %v3389_v24, %v3388_v56  ;;  %v3397_v55 = vsel %vm3277_vm6, %v3396_v8, %v3395_v62  ;;  %v319_v24 = vld [vmem:[%s9854_s18 + $0x460] sm:$0xff]  ;;  %v318_v56 = vld [vmem:[%s9854_s18 + $0x458] sm:$0x3] }
 0x15e   : > { %v10519_v19 = vpop.xlane.xlu2 %943  ;;  %v10521_v20 = vpop.xlane.xlu1 %940  ;;  %v1113_v38 = vsel %vm691_vm0, %v319_v24, 0.0 }
 0x15f   : > { %8846 = vmatmul.msk.f32.vlgmr.msra.gmra.mxu1 %vm4406_vm15, %v4389_v7  ;;  %v938_v35 = vpop.xlane.xlu0 %937  ;;  %v1095_v7 = vsel %vm691_vm0, %v313_v9, 0.0  ;;  %v2319_v49 = vmul.f32 %v10039_v41, %v10519_v19 }
 0x160   : > { %v2317_v39 = vmul.f32 %v10039_v41, %v938_v35  ;;  %v2318_v35 = vmul.f32 %v10039_v41, %v10521_v20 }
 0x162   : > { %v3415_v43 = vperm.slane %v2318_v35, %v10077_v3 }
 0x163   : > { %1078 = vadd.xlane.f32.xlu2 %v1077_v30  ;;  %1075 = vadd.xlane.f32.xlu1 %v1074_v23  ;;  %v1089_v30 = vsel %vm691_vm0, %v311_v14, 0.0  ;;  %v3400_v23 = vsel %vm3269_vm4, %v3399_v17, %v3398_v11 }
 0x164   : > { %1072 = vadd.xlane.f32.xlu0 %v1071_v4  ;;  %v3403_v4 = vperm.slane %v2311_v63, %v10085_v46  ;;  %v3402_v22 = vsel %vm3273_vm5, %v3401_v26, %v3400_v23 }
 0x166   : > { %v10535_v44 = vpop.xlane.xlu2 %952  ;;  %v10537_v48 = vpop.xlane.xlu1 %949  ;;  %v3404_v21 = vsel %vm3277_vm6, %v3403_v4, %v3402_v22  ;;  %v1107_v22 = vsel %vm691_vm0, %v317_v2, 0.0  ;;  %v329_v2 = vld [vmem:[%s9854_s18 + $0x4b0] sm:$0xff] }
 0x167   : > { %v10544_v13 = vpop.xlane.xlu0 %946  ;;  %v2322_v0 = vmul.f32 %v10039_v41, %v10535_v44  ;;  %v4189_v44 = vsel %vm4168_vm7, %v3397_v55, %v3390_v25  ;;  %v1110_v25 = vsel %vm701_vm1, %v318_v56, 0.0 }
 0x168   : > { %v2320_v59 = vmul.f32 %v10039_v41, %v10544_v13  ;;  %v3409_v13 = vsel %vm3273_vm5, %v3408_v53, %v3407_v36  ;;  %v4190_v63 = vsel %vm4170_vm8, %v3404_v21, %v4189_v44 }
 0x169   : > { %v3422_v14 = vperm.slane %v2322_v0, %v10077_v3  ;;  %v325_v0 = vld [vmem:[%s9854_s18 + $0x490] sm:$0xff] }
 0x16a   : > { %v3419_v9 = vperm.slane %v2320_v59, %v10042_v42 }
 0x16b   : > { %1087 = vadd.xlane.f32.xlu2 %v1086_v34  ;;  %1084 = vadd.xlane.f32.xlu1 %v1083_v15  ;;  %v3413_v34 = vperm.slane %v2317_v39, %v10050_v45  ;;  %v2321_v15 = vmul.f32 %v10039_v41, %v10537_v48  ;;  %v1101_v48 = vsel %vm691_vm0, %v315_v12, 0.0 }
 0x16c   : > { %1081 = vadd.xlane.f32.xlu0 %v1080_v61 }
 0x16d   : > { %v3414_v54 = vsel %vm3269_vm4, %v3413_v34, %v3412_v6  ;;  %v3420_v29 = vperm.slane %v2321_v15, %v10050_v45  ;;  %v322_v6 = vld [vmem:[%s9854_s18 + $0x478] sm:$0x3] }
 0x16e   : > { %v962_v57 = vpop.xlane.xlu2 %961  ;;  %v959_v51 = vpop.xlane.xlu1 %958  ;;  %v3416_v8 = vsel %vm3273_vm5, %v3415_v43, %v3414_v54  ;;  %v324_v54 = vld [vmem:[%s9854_s18 + $0x488] sm:$0xff] }
 0x16f   : > { %v956_v60 = vpop.xlane.xlu0 %955  ;;  %v2325_v20 = vmul.f32 %v10039_v41, %v962_v57  ;;  %v2324_v31 = vmul.f32 %v10039_v41, %v959_v51  ;;  %v3411_v57 = vsel %vm3277_vm6, %v3410_v18, %v3409_v13  ;;  %v3417_v51 = vperm.slane %v2319_v49, %v10085_v46  ;;  %v321_v18 = vld [vmem:[%s9854_s18 + $0x470] sm:$0xff] }
 0x170   : > { %v2323_v10 = vmul.f32 %v10039_v41, %v956_v60  ;;  %v3421_v60 = vsel %vm3269_vm4, %v3420_v29, %v3419_v9  ;;  %v4191_v34 = vsel %vm4172_vm9, %v3411_v57, %v4190_v63  ;;  %v1122_v13 = vsel %vm701_vm1, %v322_v6, 0.0  ;;  %v327_v63 = vld [vmem:[%s9854_s18 + $0x4a0] sm:$0xff] }
 0x171   : > { %v3427_v50 = vperm.slane %v2325_v20, %v10050_v45  ;;  %v3426_v17 = vperm.slane %v2324_v31, %v10042_v42  ;;  %v3423_v55 = vsel %vm3273_vm5, %v3422_v14, %v3421_v60  ;;  %v3418_v53 = vsel %vm3277_vm6, %v3417_v51, %v3416_v8  ;;  %v326_v14 = vld [vmem:[%s9854_s18 + $0x498] sm:$0x3] }
 0x172   : > { %v3424_v62 = vperm.slane %v2323_v10, %v10085_v46  ;;  %v4192_v59 = vsel %vm4174_vm10, %v3418_v53, %v4191_v34  ;;  %v1119_v49 = vsel %vm691_vm0, %v321_v18, 0.0  ;;  %v323_v10 = vld [vmem:[%s9854_s18 + $0x480] sm:$0xff]  ;;  %v1137_v8 = vsel %vm691_vm0, %v327_v63, 0.0  ;;  %v340_v18 = vld [vmem:[%s9854_s18 + $0x508] sm:$0xff]  ;;  %v341_v63 = vld [vmem:[%s9854_s18 + $0x510] sm:$0xff] }
 0x173   : > { %1096 = vadd.xlane.f32.xlu2 %v1095_v7  ;;  %1093 = vadd.xlane.f32.xlu1 %v1092_v5  ;;  %v3428_v32 = vsel %vm3269_vm4, %v3427_v50, %v3426_v17  ;;  %v1131_v17 = vsel %vm691_vm0, %v325_v0, 0.0  ;;  %v1125_v44 = vsel %vm691_vm0, %v323_v10, 0.0  ;;  %v1134_v60 = vsel %vm701_vm1, %v326_v14, 0.0 }
 0x174   : > { %1090 = vadd.xlane.f32.xlu0 %v1089_v30  ;;  %v3425_v35 = vsel %vm3277_vm6, %v3424_v62, %v3423_v55  ;;  %v331_v62 = vld [vmem:[%s9854_s18 + $0x4c0] sm:$0xff] }
 0x176   : > { %v971_v47 = vpop.xlane.xlu2 %970  ;;  %v968_v61 = vpop.xlane.xlu1 %967 }
 0x177   : > { %v965_v16 = vpop.xlane.xlu0 %964  ;;  %v2327_v19 = vmul.f32 %v10039_v41, %v968_v61  ;;  %v2328_v26 = vmul.f32 %v10039_v41, %v971_v47  ;;  %v4193_v61 = vsel %vm4176_vm11, %v3425_v35, %v4192_v59  ;;  %v337_v35 = vld [vmem:[%s9854_s18 + $0x4f0] sm:$0xff] }
 0x178   : > { %v2326_v37 = vmul.f32 %v10039_v41, %v965_v16 }
 0x179   : > { %v3431_v33 = vperm.slane %v2327_v19, %v10085_v46  ;;  %v3433_v52 = vperm.slane %v2328_v26, %v10042_v42  ;;  %v1128_v19 = vsel %vm691_vm0, %v324_v54, 0.0  ;;  %v330_v26 = vld [vmem:[%s9854_s18 + $0x4b8] sm:$0x3] }
 0x17a   : > { %v3429_v11 = vperm.slane %v2326_v37, %v10077_v3 }
 0x17b   : > { %1105 = vadd.xlane.f32.xlu2 %v1104_v58  ;;  %1102 = vadd.xlane.f32.xlu1 %v1101_v48  ;;  %v320_v58 = vld [vmem:[%s9854_s18 + $0x468] sm:$0xff] }
 0x17c   : > { %1099 = vadd.xlane.f32.xlu0 %v1098_v28  ;;  %v3430_v39 = vsel %vm3273_vm5, %v3429_v11, %v3428_v32  ;;  %v1116_v43 = vsel %vm691_vm0, %v320_v58, 0.0  ;;  %v328_v11 = vld [vmem:[%s9854_s18 + $0x4a8] sm:$0xff] }
 0x17d   : > { %v3432_v21 = vsel %vm3277_vm6, %v3431_v33, %v3430_v39  ;;  %v1140_v56 = vsel %vm691_vm0, %v328_v11, 0.0  ;;  %v1149_v33 = vsel %vm691_vm0, %v331_v62, 0.0  ;;  %v333_v39 = vld [vmem:[%s9854_s18 + $0x4d0] sm:$0xff] }
 0x17e   : > { %v980_v7 = vpop.xlane.xlu2 %979  ;;  %v977_v5 = vpop.xlane.xlu1 %976  ;;  %v4194_v37 = vsel %vm4178_vm12, %v3432_v21, %v4193_v61  ;;  %v335_v21 = vld [vmem:[%s9854_s18 + $0x4e0] sm:$0xff] }
 0x17f   : > { %v2331_v30 = vmul.f32 %v10039_v41, %v980_v7  ;;  %v2330_v23 = vmul.f32 %v10039_v41, %v977_v5  ;;  %v974_v4 = vpop.xlane.xlu0 %973 }
 0x180   : > { %v2329_v40 = vmul.f32 %v10039_v41, %v974_v4  ;;  %v334_v4 = vld [vmem:[%s9854_s18 + $0x4d8] sm:$0x3] }
 0x181   : > { %v3436_v36 = vperm.slane %v2330_v23, %v10077_v3  ;;  %v3438_v12 = vperm.slane %v2331_v30, %v10085_v46  ;;  %v1146_v30 = vsel %vm701_vm1, %v330_v26, 0.0  ;;  %v1143_v23 = vsel %vm691_vm0, %v329_v2, 0.0 }
 0x182   : > { %v3434_v1 = vperm.slane %v2329_v40, %v10050_v45 }
 0x183   : > { %1114 = vadd.xlane.f32.xlu2 %v1113_v38  ;;  %1111 = vadd.xlane.f32.xlu1 %v1110_v25  ;;  %v332_v25 = vld [vmem:[%s9854_s18 + $0x4c8] sm:$0xff] }
 0x184   : > { %v3435_v15 = vsel %vm3269_vm4, %v3434_v1, %v3433_v52  ;;  %1108 = vadd.xlane.f32.xlu0 %v1107_v22  ;;  %v1155_v22 = vsel %vm691_vm0, %v333_v39, 0.0  ;;  %v1152_v53 = vsel %vm691_vm0, %v332_v25, 0.0  ;;  %v336_v52 = vld [vmem:[%s9854_s18 + $0x4e8] sm:$0xff] }
 0x185   : > { %v3437_v47 = vsel %vm3273_vm5, %v3436_v36, %v3435_v15  ;;  %v1158_v36 = vsel %vm701_vm1, %v334_v4, 0.0  ;;  %v1167_v15 = vsel %vm691_vm0, %v337_v35, 0.0  ;;  %v1164_v59 = vsel %vm691_vm0, %v336_v52, 0.0 }
 0x186   : > { %v10673_v20 = vpop.xlane.xlu2 %988  ;;  %v10675_v31 = vpop.xlane.xlu1 %985  ;;  %v3439_v16 = vsel %vm3277_vm6, %v3438_v12, %v3437_v47  ;;  %v1161_v47 = vsel %vm691_vm0, %v335_v21, 0.0 }
 0x187   : > { %v10680_v48 = vpop.xlane.xlu0 %982  ;;  %v4195_v28 = vsel %vm4180_vm13, %v3439_v16, %v4194_v37  ;;  %v339_v16 = vld [vmem:[%s9854_s18 + $0x500] sm:$0xff]  ;;  %v2333_v54 = vmul.f32 %v10039_v41, %v10675_v31  ;;  %v2334_v14 = vmul.f32 %v10039_v41, %v10673_v20 }
 0x188   : > { %8832 = vmatmul.msk.f32.gmra.mxu0 %vm4287_vm14, %v4195_v28  ;;  %v338_v28 = vld [vmem:[%s9854_s18 + $0x4f8] sm:$0x3]  ;;  %v2332_v10 = vmul.f32 %v10039_v41, %v10680_v48 }
 0x189   : > { %v1170_v0 = vsel %vm701_vm1, %v338_v28, 0.0 }
 0x18a   : > { %v3440_v31 = vperm.slane %v2332_v10, %v10042_v42 }
 0x18b   : > { %1123 = vadd.xlane.f32.xlu2 %v1122_v13  ;;  %1120 = vadd.xlane.f32.xlu1 %v1119_v49  ;;  %v1176_v49 = vsel %vm691_vm0, %v340_v18, 0.0 }
 0x18c   : > { %1117 = vadd.xlane.f32.xlu0 %v1116_v43  ;;  %v1173_v43 = vsel %vm691_vm0, %v339_v16, 0.0 }
 0x18e   : > { %v10689_v29 = vpop.xlane.xlu2 %997  ;;  %v10691_v9 = vpop.xlane.xlu1 %994 }
 0x18f   : > { %v10694_v50 = vpop.xlane.xlu0 %991  ;;  %v2336_v62 = vmul.f32 %v10039_v41, %v10691_v9 }
 0x190   : > { %v2335_v9 = vmul.f32 %v10039_v41, %v10694_v50 }
 0x191   : > { %v3447_v4 = vperm.slane %v2336_v62, %v10042_v42 }
 0x193   : > { %1132 = vadd.xlane.f32.xlu2 %v1131_v17  ;;  %1129 = vadd.xlane.f32.xlu1 %v1128_v19  ;;  %v343_v17 = vld [vmem:[%s9854_s18 + $0x520] sm:$0xff]  ;;  %v342_v19 = vld [vmem:[%s9854_s18 + $0x518] sm:$0x3] }
 0x194   : > { %1126 = vadd.xlane.f32.xlu0 %v1125_v44  ;;  %v1185_v26 = vsel %vm691_vm0, %v343_v17, 0.0  ;;  %v1182_v2 = vsel %vm701_vm1, %v342_v19, 0.0 }
 0x196   : > { %v10701_v57 = vpop.xlane.xlu2 %1006  ;;  %v10703_v51 = vpop.xlane.xlu1 %1003 }
 0x197   : > { %v10706_v24 = vpop.xlane.xlu0 %1000  ;;  %v2340_v20 = vmul.f32 %v10039_v41, %v10701_v57  ;;  %v2339_v39 = vmul.f32 %v10039_v41, %v10703_v51 }
 0x199   : > { %v3452_v18 = vperm.slane %v2339_v39, %v10085_v46 }
 0x19b   : > { %1141 = vadd.xlane.f32.xlu2 %v1140_v56  ;;  %1138 = vadd.xlane.f32.xlu1 %v1137_v8  ;;  %v3441_v56 = vperm.slane %v2333_v54, %v10050_v45 }
 0x19c   : > { %1135 = vadd.xlane.f32.xlu0 %v1134_v60  ;;  %v2337_v60 = vmul.f32 %v10039_v41, %v10689_v29 }
 0x19d   : > { %v3442_v57 = vsel %vm3269_vm4, %v3441_v56, %v3440_v31 }
 0x19e   : > { %v10713_v7 = vpop.xlane.xlu2 %1015  ;;  %v10715_v5 = vpop.xlane.xlu1 %1012 }
 0x19f   : > { %v1010_v32 = vpop.xlane.xlu0 %1009  ;;  %v2342_v29 = vmul.f32 %v10039_v41, %v10715_v5  ;;  %v3454_v5 = vperm.slane %v2340_v20, %v10042_v42  ;;  %v2343_v50 = vmul.f32 %v10039_v41, %v10713_v7 }
 0x1a0   : > { %v2341_v8 = vmul.f32 %v10039_v41, %v1010_v32  ;;  %v1179_v32 = vsel %vm691_vm0, %v341_v63, 0.0 }
 0x1a1   : > { %v3459_v28 = vperm.slane %v2343_v50, %v10085_v46 }
 0x1a3   : > { %1150 = vadd.xlane.f32.xlu2 %v1149_v33  ;;  %1147 = vadd.xlane.f32.xlu1 %v1146_v30  ;;  %v2338_v33 = vmul.f32 %v10039_v41, %v10706_v24  ;;  %v3443_v30 = vperm.slane %v2334_v14, %v10077_v3  ;;  %v3448_v24 = vperm.slane %v2337_v60, %v10050_v45  ;;  %v348_v60 = vld [vmem:[%s9854_s18 + $0x548] sm:$0xff] }
 0x1a4   : > { %1144 = vadd.xlane.f32.xlu0 %v1143_v23  ;;  %v3455_v23 = vperm.slane %v2341_v8, %v10050_v45 }
 0x1a5   : > { %v3450_v25 = vperm.slane %v2338_v33, %v10077_v3 }
 0x1a6   : > { %v10723_v40 = vpop.xlane.xlu2 %1024  ;;  %v10725_v38 = vpop.xlane.xlu1 %1021 }
 0x1a7   : > { %v10728_v55 = vpop.xlane.xlu0 %1018  ;;  %v2345_v35 = vmul.f32 %v10039_v41, %v10725_v38 }
 0x1a8   : > { %v2344_v52 = vmul.f32 %v10039_v41, %v10728_v55 }
 0x1a9   : > { %v3462_v54 = vperm.slane %v2345_v35, %v10050_v45 }
 0x1aa   : > { %v3461_v10 = vperm.slane %v2344_v52, %v10042_v42 }
 0x1ab   : > { %1159 = vadd.xlane.f32.xlu2 %v1158_v36  ;;  %1156 = vadd.xlane.f32.xlu1 %v1155_v22  ;;  %v346_v36 = vld [vmem:[%s9854_s18 + $0x538] sm:$0x3]  ;;  %v345_v22 = vld [vmem:[%s9854_s18 + $0x530] sm:$0xff] }
 0x1ac   : > { %1153 = vadd.xlane.f32.xlu0 %v1152_v53  ;;  %v3457_v53 = vperm.slane %v2342_v29, %v10077_v3  ;;  %v1194_v16 = vsel %vm701_vm1, %v346_v36, 0.0  ;;  %v1191_v38 = vsel %vm691_vm0, %v345_v22, 0.0  ;;  %v3463_v62 = vsel %vm3269_vm4, %v3462_v54, %v3461_v10 }
 0x1ae   : > { %v10735_v12 = vpop.xlane.xlu2 %1033  ;;  %v10737_v1 = vpop.xlane.xlu1 %1030 }
 0x1af   : > { %v10740_v34 = vpop.xlane.xlu0 %1027  ;;  %v2349_v17 = vmul.f32 %v10039_v41, %v10735_v12  ;;  %v2348_v19 = vmul.f32 %v10039_v41, %v10737_v1 }
 0x1b1   : > { %v3469_v29 = vperm.slane %v2349_v17, %v10050_v45 }
 0x1b3   : > { %v4344_v61 = vpop.f32.mrf.mxu0  ;;  %1168 = vadd.xlane.f32.xlu2 %v1167_v15  ;;  %1165 = vadd.xlane.f32.xlu1 %v1164_v59  ;;  %v344_v15 = vld [vmem:[%s9854_s18 + $0x528] sm:$0xff]  ;;  %v3444_v59 = vsel %vm3273_vm5, %v3443_v30, %v3442_v57  ;;  %v1200_v57 = vsel %vm691_vm0, %v348_v60, 0.0 }
 0x1b4   : > { %v4390_v6 = vmax.f32 %v4344_v61, 0.0  ;;  %1162 = vadd.xlane.f32.xlu0 %v1161_v47  ;;  %v3445_v47 = vperm.slane %v2335_v9, %v10085_v46  ;;  %v3456_v61 = vsel %vm3269_vm4, %v3455_v23, %v3454_v5 }
 0x1b6   : > { %8847 = vmatmul.msk.f32.gmra.mxu1 %vm4406_vm15, %v4390_v6  ;;  %v10748_v37 = vpop.xlane.xlu2 %1042  ;;  %v10750_v58 = vpop.xlane.xlu1 %1039  ;;  %v3449_v6 = vsel %vm3269_vm4, %v3448_v24, %v3447_v4  ;;  %v3446_v14 = vsel %vm3277_vm6, %v3445_v47, %v3444_v59 }
 0x1b7   : > { %v10753_v13 = vpop.xlane.xlu0 %1036  ;;  %v3451_v55 = vsel %vm3273_vm5, %v3450_v25, %v3449_v6  ;;  %v2352_v12 = vmul.f32 %v10039_v41, %v10748_v37  ;;  %v3468_v37 = vperm.slane %v2348_v19, %v10042_v42  ;;  %v2351_v23 = vmul.f32 %v10039_v41, %v10750_v58  ;;  %v351_v6 = vld [vmem:[%s9854_s18 + $0x560] sm:$0xff] }
 0x1b8   : > { %v3453_v56 = vsel %vm3277_vm6, %v3452_v18, %v3451_v55  ;;  %v2350_v1 = vmul.f32 %v10039_v41, %v10753_v13 }
 0x1b9   : > { %v3475_v4 = vperm.slane %v2352_v12, %v10042_v42 }
 0x1ba   : > { %v3471_v39 = vperm.slane %v2350_v1, %v10077_v3 }
 0x1bb   : > { %1177 = vadd.xlane.f32.xlu2 %v1176_v49  ;;  %1174 = vadd.xlane.f32.xlu1 %v1173_v43  ;;  %v2346_v49 = vmul.f32 %v10039_v41, %v10723_v40  ;;  %v1188_v43 = vsel %vm691_vm0, %v344_v15, 0.0  ;;  %v2347_v40 = vmul.f32 %v10039_v41, %v10740_v34  ;;  %v349_v34 = vld [vmem:[%s9854_s18 + $0x550] sm:$0xff] }
 0x1bc   : > { %1171 = vadd.xlane.f32.xlu0 %v1170_v0  ;;  %v3458_v0 = vsel %vm3273_vm5, %v3457_v53, %v3456_v61 }
 0x1bd   : > { %v3460_v31 = vsel %vm3277_vm6, %v3459_v28, %v3458_v0  ;;  %v3464_v8 = vperm.slane %v2346_v49, %v10077_v3  ;;  %v3466_v13 = vperm.slane %v2347_v40, %v10085_v46 }
 0x1be   : > { %v10764_v44 = vpop.xlane.xlu2 %1051  ;;  %v10766_v11 = vpop.xlane.xlu1 %1048 }
 0x1bf   : > { %v1046_v48 = vpop.xlane.xlu0 %1045  ;;  %v2355_v5 = vmul.f32 %v10039_v41, %v10764_v44  ;;  %v4196_v44 = vsel %vm4168_vm7, %v3453_v56, %v3446_v14  ;;  %v3465_v18 = vsel %vm3273_vm5, %v3464_v8, %v3463_v62  ;;  %v1209_v56 = vsel %vm691_vm0, %v351_v6, 0.0  ;;  %v364_v6 = vld [vmem:[%s9854_s18 + $0x5c8] sm:$0xff] }
 0x1c0   : > { %v2353_v63 = vmul.f32 %v10039_v41, %v1046_v48  ;;  %v347_v48 = vld [vmem:[%s9854_s18 + $0x540] sm:$0xff]  ;;  %v4197_v15 = vsel %vm4170_vm8, %v3460_v31, %v4196_v44  ;;  %v3467_v0 = vsel %vm3277_vm6, %v3466_v13, %v3465_v18  ;;  %v360_v44 = vld [vmem:[%s9854_s18 + $0x5a8] sm:$0xff] }
 0x1c1   : > { %v1197_v24 = vsel %vm691_vm0, %v347_v48, 0.0  ;;  %v3480_v47 = vperm.slane %v2355_v5, %v10085_v46  ;;  %v357_v5 = vld [vmem:[%s9854_s18 + $0x590] sm:$0xff]  ;;  %v363_v18 = vld [vmem:[%s9854_s18 + $0x5c0] sm:$0xff] }
 0x1c2   : > { %v3476_v30 = vperm.slane %v2353_v63, %v10050_v45 }
 0x1c3   : > { %1186 = vadd.xlane.f32.xlu2 %v1185_v26  ;;  %1183 = vadd.xlane.f32.xlu1 %v1182_v2  ;;  %v2354_v26 = vmul.f32 %v10039_v41, %v10766_v11  ;;  %v1203_v11 = vsel %vm691_vm0, %v349_v34, 0.0  ;;  %v4198_v34 = vsel %vm4172_vm9, %v3467_v0, %v4197_v15  ;;  %v359_v15 = vld [vmem:[%s9854_s18 + $0x5a0] sm:$0xff]  ;;  %v1245_v0 = vsel %vm691_vm0, %v363_v18, 0.0 }
 0x1c4   : > { %1180 = vadd.xlane.f32.xlu0 %v1179_v32  ;;  %v3477_v53 = vsel %vm3269_vm4, %v3476_v30, %v3475_v4 }
 0x1c5   : > { %v3478_v50 = vperm.slane %v2354_v26, %v10077_v3 }
 0x1c6   : > { %v1061_v21 = vpop.xlane.xlu2 %1060  ;;  %v1058_v51 = vpop.xlane.xlu1 %1057 }
 0x1c7   : > { %v1055_v7 = vpop.xlane.xlu0 %1054  ;;  %v2357_v2 = vmul.f32 %v10039_v41, %v1058_v51  ;;  %v2358_v25 = vmul.f32 %v10039_v41, %v1061_v21  ;;  %v3470_v21 = vsel %vm3269_vm4, %v3469_v29, %v3468_v37  ;;  %v3473_v51 = vperm.slane %v2351_v23, %v10085_v46  ;;  %v355_v29 = vld [vmem:[%s9854_s18 + $0x580] sm:$0xff]  ;;  %v354_v37 = vld [vmem:[%s9854_s18 + $0x578] sm:$0x3]  ;;  %v353_v23 = vld [vmem:[%s9854_s18 + $0x570] sm:$0xff] }
 0x1c8   : > { %v2356_v20 = vmul.f32 %v10039_v41, %v1055_v7  ;;  %v3472_v59 = vsel %vm3273_vm5, %v3471_v39, %v3470_v21  ;;  %v352_v7 = vld [vmem:[%s9854_s18 + $0x568] sm:$0xff]  ;;  %v1215_v4 = vsel %vm691_vm0, %v353_v23, 0.0  ;;  %v358_v39 = vld [vmem:[%s9854_s18 + $0x598] sm:$0x3] }
 0x1c9   : > { %v3483_v36 = vperm.slane %v2357_v2, %v10050_v45  ;;  %v3485_v61 = vperm.slane %v2358_v25, %v10077_v3  ;;  %v3474_v40 = vsel %vm3277_vm6, %v3473_v51, %v3472_v59  ;;  %v1212_v14 = vsel %vm691_vm0, %v352_v7, 0.0 }
 0x1ca   : > { %v3482_v58 = vperm.slane %v2356_v20, %v10042_v42  ;;  %v4199_v26 = vsel %vm4174_vm10, %v3474_v40, %v4198_v34  ;;  %v1233_v7 = vsel %vm691_vm0, %v359_v15, 0.0  ;;  %v369_v34 = vld [vmem:[%s9854_s18 + $0x5f0] sm:$0xff] }
 0x1cb   : > { %1195 = vadd.xlane.f32.xlu2 %v1194_v16  ;;  %1192 = vadd.xlane.f32.xlu1 %v1191_v38  ;;  %v3479_v16 = vsel %vm3273_vm5, %v3478_v50, %v3477_v53  ;;  %v1227_v53 = vsel %vm691_vm0, %v357_v5, 0.0 }
 0x1cc   : > { %1189 = vadd.xlane.f32.xlu0 %v1188_v43  ;;  %v3484_v38 = vsel %vm3269_vm4, %v3483_v36, %v3482_v58  ;;  %v350_v43 = vld [vmem:[%s9854_s18 + $0x558] sm:$0x3]  ;;  %v3481_v12 = vsel %vm3277_vm6, %v3480_v47, %v3479_v16  ;;  %v356_v36 = vld [vmem:[%s9854_s18 + $0x588] sm:$0xff] }
 0x1cd   : > { %v1206_v8 = vsel %vm701_vm1, %v350_v43, 0.0  ;;  %v3486_v1 = vsel %vm3273_vm5, %v3485_v61, %v3484_v38  ;;  %v4200_v20 = vsel %vm4176_vm11, %v3481_v12, %v4199_v26  ;;  %v1236_v61 = vsel %vm691_vm0, %v360_v44, 0.0  ;;  %v368_v26 = vld [vmem:[%s9854_s18 + $0x5e8] sm:$0xff] }
 0x1ce   : > { %v1070_v33 = vpop.xlane.xlu2 %1069  ;;  %v1067_v32 = vpop.xlane.xlu1 %1066  ;;  %v1248_v43 = vsel %vm691_vm0, %v364_v6, 0.0 }
 0x1cf   : > { %v1064_v9 = vpop.xlane.xlu0 %1063  ;;  %v2361_v35 = vmul.f32 %v10039_v41, %v1070_v33  ;;  %v2360_v52 = vmul.f32 %v10039_v41, %v1067_v32 }
 0x1d0   : > { %v2359_v22 = vmul.f32 %v10039_v41, %v1064_v9 }
 0x1d1   : > { %v3490_v54 = vperm.slane %v2361_v35, %v10050_v45  ;;  %v3489_v10 = vperm.slane %v2360_v52, %v10042_v42  ;;  %v1224_v35 = vsel %vm691_vm0, %v356_v36, 0.0  ;;  %v361_v52 = vld [vmem:[%s9854_s18 + $0x5b0] sm:$0xff]  ;;  %v376_v36 = vld [vmem:[%s9854_s18 + $0x628] sm:$0xff] }
 0x1d2   : > { %v3487_v55 = vperm.slane %v2359_v22, %v10085_v46  ;;  %v1230_v22 = vsel %vm701_vm1, %v358_v39, 0.0  ;;  %v1239_v47 = vsel %vm691_vm0, %v361_v52, 0.0 }
 0x1d3   : > { %1204 = vadd.xlane.f32.xlu2 %v1203_v11  ;;  %1201 = vadd.xlane.f32.xlu1 %v1200_v57  ;;  %v3491_v62 = vsel %vm3269_vm4, %v3490_v54, %v3489_v10  ;;  %v1221_v57 = vsel %vm691_vm0, %v355_v29, 0.0  ;;  %v367_v10 = vld [vmem:[%s9854_s18 + $0x5e0] sm:$0xff]  ;;  %v373_v29 = vld [vmem:[%s9854_s18 + $0x610] sm:$0xff] }
 0x1d4   : > { %1198 = vadd.xlane.f32.xlu0 %v1197_v24  ;;  %v3488_v48 = vsel %vm3277_vm6, %v3487_v55, %v3486_v1  ;;  %v1218_v24 = vsel %vm701_vm1, %v354_v37, 0.0  ;;  %v362_v55 = vld [vmem:[%s9854_s18 + $0x5b8] sm:$0x3]  ;;  %v372_v37 = vld [vmem:[%s9854_s18 + $0x608] sm:$0xff] }
 0x1d5   : > { %v4201_v32 = vsel %vm4178_vm12, %v3488_v48, %v4200_v20  ;;  %v1242_v54 = vsel %vm701_vm1, %v362_v55, 0.0  ;;  %v370_v1 = vld [vmem:[%s9854_s18 + $0x5f8] sm:$0x3]  ;;  %v1272_v39 = vsel %vm691_vm0, %v372_v37, 0.0 }
 0x1d6   : > { %v10880_v28 = vpop.xlane.xlu2 %1078  ;;  %v1076_v49 = vpop.xlane.xlu1 %1075  ;;  %v1266_v20 = vsel %vm701_vm1, %v370_v1, 0.0 }
 0x1d7   : > { %v2363_v17 = vmul.f32 %v10039_v41, %v1076_v49  ;;  %v1073_v19 = vpop.xlane.xlu0 %1072 }
 0x1d8   : > { %v2362_v63 = vmul.f32 %v10039_v41, %v1073_v19 }
 0x1d9   : > { %v3494_v31 = vperm.slane %v2363_v17, %v10085_v46  ;;  %v366_v17 = vld [vmem:[%s9854_s18 + $0x5d8] sm:$0x3] }
 0x1da   : > { %v3492_v60 = vperm.slane %v2362_v63, %v10077_v3  ;;  %v365_v63 = vld [vmem:[%s9854_s18 + $0x5d0] sm:$0xff] }
 0x1db   : > { %1213 = vadd.xlane.f32.xlu2 %v1212_v14  ;;  %1210 = vadd.xlane.f32.xlu1 %v1209_v56  ;;  %v1257_v56 = vsel %vm691_vm0, %v367_v10, 0.0 }
 0x1dc   : > { %1207 = vadd.xlane.f32.xlu0 %v1206_v8  ;;  %v3493_v2 = vsel %vm3273_vm5, %v3492_v60, %v3491_v62  ;;  %v1251_v8 = vsel %vm691_vm0, %v365_v63, 0.0 }
 0x1dd   : > { %v3495_v33 = vsel %vm3277_vm6, %v3494_v31, %v3493_v2  ;;  %v1254_v31 = vsel %vm701_vm1, %v366_v17, 0.0 }
 0x1de   : > { %v10906_v13 = vpop.xlane.xlu2 %1087  ;;  %v10908_v30 = vpop.xlane.xlu1 %1084  ;;  %v4202_v9 = vsel %vm4180_vm13, %v3495_v33, %v4201_v32  ;;  %v1263_v33 = vsel %vm691_vm0, %v369_v34, 0.0  ;;  %v1260_v32 = vsel %vm691_vm0, %v368_v26, 0.0  ;;  %v377_v26 = vld [vmem:[%s9854_s18 + $0x630] sm:$0xff] }
 0x1df   : > { %8833 = vmatmul.msk.f32.gmra.mxu0 %vm4287_vm14, %v4202_v9  ;;  %v10913_v11 = vpop.xlane.xlu0 %1081  ;;  %v2366_v55 = vmul.f32 %v10039_v41, %v10908_v30 }
 0x1e3   : > { %1222 = vadd.xlane.f32.xlu2 %v1221_v57  ;;  %1219 = vadd.xlane.f32.xlu1 %v1218_v24  ;;  %v371_v57 = vld [vmem:[%s9854_s18 + $0x600] sm:$0xff] }
 0x1e4   : > { %1216 = vadd.xlane.f32.xlu0 %v1215_v4  ;;  %v1275_v4 = vsel %vm691_vm0, %v373_v29, 0.0  ;;  %v1269_v5 = vsel %vm691_vm0, %v371_v57, 0.0 }
 0x1e6   : > { %v10920_v25 = vpop.xlane.xlu2 %1096  ;;  %v10922_v50 = vpop.xlane.xlu1 %1093 }
 0x1e7   : > { %v10925_v58 = vpop.xlane.xlu0 %1090 }
 0x1e8   : > { %v2368_v52 = vmul.f32 %v10039_v41, %v10925_v58  ;;  %v1284_v58 = vsel %vm691_vm0, %v376_v36, 0.0 }
 0x1eb   : > { %1231 = vadd.xlane.f32.xlu2 %v1230_v22  ;;  %1228 = vadd.xlane.f32.xlu1 %v1227_v53  ;;  %v375_v22 = vld [vmem:[%s9854_s18 + $0x620] sm:$0xff]  ;;  %v2365_v53 = vmul.f32 %v10039_v41, %v10913_v11  ;;  %v2364_v11 = vmul.f32 %v10039_v41, %v10880_v28 }
 0x1ec   : > { %1225 = vadd.xlane.f32.xlu0 %v1224_v35  ;;  %v2369_v35 = vmul.f32 %v10039_v41, %v10922_v50  ;;  %v11014_v50 = vmul.f32 %v10039_v41, %v10906_v13  ;;  %v1281_v18 = vsel %vm691_vm0, %v375_v22, 0.0  ;;  %v1287_v22 = vsel %vm691_vm0, %v377_v26, 0.0 }
 0x1ed   : > { %v3497_v13 = vperm.slane %v2365_v53, %v10050_v45  ;;  %v3496_v10 = vperm.slane %v2364_v11, %v10042_v42 }
 0x1ee   : > { %v10932_v21 = vpop.xlane.xlu2 %1105  ;;  %v10934_v51 = vpop.xlane.xlu1 %1102 }
 0x1ef   : > { %v10937_v59 = vpop.xlane.xlu0 %1099 }
 0x1f3   : > { %1240 = vadd.xlane.f32.xlu2 %v1239_v47  ;;  %1237 = vadd.xlane.f32.xlu1 %v1236_v61  ;;  %v374_v47 = vld [vmem:[%s9854_s18 + $0x618] sm:$0x3]  ;;  %v2373_v61 = vmul.f32 %v10039_v41, %v10932_v21  ;;  %v2370_v21 = vmul.f32 %v10039_v41, %v10920_v25 }
 0x1f4   : > { %1234 = vadd.xlane.f32.xlu0 %v1233_v7  ;;  %v2372_v7 = vmul.f32 %v10039_v41, %v10934_v51  ;;  %v1278_v28 = vsel %vm701_vm1, %v374_v47, 0.0 }
 0x1f5   : > { %v3511_v30 = vperm.slane %v2373_v61, %v10050_v45  ;;  %v3506_v17 = vperm.slane %v2370_v21, %v10077_v3 }
 0x1f6   : > { %v10944_v16 = vpop.xlane.xlu2 %1114  ;;  %v10946_v38 = vpop.xlane.xlu1 %1111  ;;  %v3510_v25 = vperm.slane %v2372_v7, %v10042_v42  ;;  %v382_v7 = vld [vmem:[%s9854_s18 + $0x658] sm:$0x3] }
 0x1f7   : > { %v10949_v49 = vpop.xlane.xlu0 %1108 }
 0x1f8   : > { %v2374_v51 = vmul.f32 %v10039_v41, %v10949_v49  ;;  %v2375_v49 = vmul.f32 %v10039_v41, %v10946_v38  ;;  %v3499_v38 = vperm.slane %v2366_v55, %v10077_v3 }
 0x1fa   : > { %v3513_v63 = vperm.slane %v2374_v51, %v10077_v3 }
 0x1fb   : > { %1249 = vadd.xlane.f32.xlu2 %v1248_v43  ;;  %1246 = vadd.xlane.f32.xlu1 %v1245_v0  ;;  %v3504_v43 = vperm.slane %v2369_v35, %v10050_v45  ;;  %v3503_v0 = vperm.slane %v2368_v52, %v10042_v42 }
 0x1fc   : > { %1243 = vadd.xlane.f32.xlu0 %v1242_v54  ;;  %v2371_v54 = vmul.f32 %v10039_v41, %v10937_v59 }
 0x1fe   : > { %v10956_v19 = vpop.xlane.xlu2 %1123  ;;  %v10958_v40 = vpop.xlane.xlu1 %1120  ;;  %v3508_v1 = vperm.slane %v2371_v54, %v10085_v46  ;;  %v1302_v54 = vsel %vm701_vm1, %v382_v7, 0.0 }
 0x1ff   : > { %v10961_v14 = vpop.xlane.xlu0 %1117  ;;  %v11054_v37 = vmul.f32 %v10039_v41, %v10956_v19  ;;  %v2378_v57 = vmul.f32 %v10039_v41, %v10958_v40 }
 0x200   : > { %v2377_v59 = vmul.f32 %v10039_v41, %v10961_v14  ;;  %v2376_v14 = vmul.f32 %v10039_v41, %v10944_v16 }
 0x202   : > { %v3518_v16 = vperm.slane %v2377_v59, %v10050_v45  ;;  %v3517_v52 = vperm.slane %v2376_v14, %v10042_v42 }
 0x203   : > { %1258 = vadd.xlane.f32.xlu2 %v1257_v56  ;;  %1255 = vadd.xlane.f32.xlu1 %v1254_v31  ;;  %v379_v56 = vld [vmem:[%s9854_s18 + $0x640] sm:$0xff]  ;;  %v378_v31 = vld [vmem:[%s9854_s18 + $0x638] sm:$0x3] }
 0x204   : > { %1252 = vadd.xlane.f32.xlu0 %v1251_v8  ;;  %v3501_v8 = vperm.slane %v11014_v50, %v10085_v46 }
 0x205   : > { %v4347_v12 = vpop.f32.mrf.mxu0 }
 0x206   : > { %v4391_v60 = vmax.f32 %v4347_v12, 0.0  ;;  %v10968_v48 = vpop.xlane.xlu2 %1132  ;;  %v10970_v62 = vpop.xlane.xlu1 %1129  ;;  %v3505_v12 = vsel %vm3269_vm4, %v3504_v43, %v3503_v0 }
 0x207   : > { %v10973_v2 = vpop.xlane.xlu0 %1126  ;;  %v2381_v40 = vmul.f32 %v10039_v41, %v10970_v62  ;;  %v3520_v62 = vperm.slane %v2378_v57, %v10077_v3  ;;  %v2382_v55 = vmul.f32 %v10039_v41, %v10968_v48 }
 0x208   : > { %8848 = vmatmul.msk.f32.gmra.mxu1 %vm4406_vm15, %v4391_v60  ;;  %v2380_v35 = vmul.f32 %v10039_v41, %v10973_v2 }
 0x20b   : > { %1267 = vadd.xlane.f32.xlu2 %v1266_v20  ;;  %1264 = vadd.xlane.f32.xlu1 %v1263_v33  ;;  %v3498_v20 = vsel %vm3269_vm4, %v3497_v13, %v3496_v10  ;;  %v3512_v33 = vsel %vm3269_vm4, %v3511_v30, %v3510_v25  ;;  %v3524_v13 = vperm.slane %v2380_v35, %v10042_v42  ;;  %v380_v30 = vld [vmem:[%s9854_s18 + $0x648] sm:$0xff] }
 0x20c   : > { %1261 = vadd.xlane.f32.xlu0 %v1260_v32  ;;  %v3515_v32 = vperm.slane %v2375_v49, %v10085_v46  ;;  %v3514_v36 = vsel %vm3273_vm5, %v3513_v63, %v3512_v33  ;;  %v3500_v19 = vsel %vm3273_vm5, %v3499_v38, %v3498_v20  ;;  %v1296_v38 = vsel %vm691_vm0, %v380_v30, 0.0 }
 0x20d   : > { %v3502_v57 = vsel %vm3277_vm6, %v3501_v8, %v3500_v19 }
 0x20e   : > { %v10981_v9 = vpop.xlane.xlu2 %1141  ;;  %v10983_v23 = vpop.xlane.xlu1 %1138  ;;  %v3516_v11 = vsel %vm3277_vm6, %v3515_v32, %v3514_v36 }
 0x20f   : > { %v10986_v24 = vpop.xlane.xlu0 %1135  ;;  %v2385_v47 = vmul.f32 %v10039_v41, %v10981_v9  ;;  %v2384_v2 = vmul.f32 %v10039_v41, %v10983_v23  ;;  %v3519_v9 = vsel %vm3269_vm4, %v3518_v16, %v3517_v52  ;;  %v383_v52 = vld [vmem:[%s9854_s18 + $0x660] sm:$0xff] }
 0x210   : > { %v2383_v48 = vmul.f32 %v10039_v41, %v10986_v24 }
 0x211   : > { %v3532_v25 = vperm.slane %v2385_v47, %v10050_v45  ;;  %v3531_v10 = vperm.slane %v2384_v2, %v10042_v42 }
 0x212   : > { %v3529_v26 = vperm.slane %v2383_v48, %v10085_v46  ;;  %v386_v48 = vld [vmem:[%s9854_s18 + $0x678] sm:$0x3] }
 0x213   : > { %1276 = vadd.xlane.f32.xlu2 %v1275_v4  ;;  %1273 = vadd.xlane.f32.xlu1 %v1272_v39  ;;  %v1293_v4 = vsel %vm691_vm0, %v379_v56, 0.0  ;;  %v1290_v39 = vsel %vm701_vm1, %v378_v31, 0.0 }
 0x214   : > { %1270 = vadd.xlane.f32.xlu0 %v1269_v5  ;;  %v3507_v5 = vsel %vm3273_vm5, %v3506_v17, %v3505_v12  ;;  %v3521_v12 = vsel %vm3273_vm5, %v3520_v62, %v3519_v9 }
 0x215   : > { %v3509_v53 = vsel %vm3277_vm6, %v3508_v1, %v3507_v5  ;;  %v3527_v1 = vperm.slane %v2382_v55, %v10077_v3  ;;  %v384_v5 = vld [vmem:[%s9854_s18 + $0x668] sm:$0xff] }
 0x216   : > { %v10999_v44 = vpop.xlane.xlu2 %1150  ;;  %v11001_v15 = vpop.xlane.xlu1 %1147  ;;  %v4203_v36 = vsel %vm4168_vm7, %v3509_v53, %v3502_v57  ;;  %v1308_v62 = vsel %vm691_vm0, %v384_v5, 0.0  ;;  %v396_v57 = vld [vmem:[%s9854_s18 + $0x6c8] sm:$0xff]  ;;  %v395_v5 = vld [vmem:[%s9854_s18 + $0x6c0] sm:$0xff] }
 0x217   : > { %v11008_v6 = vpop.xlane.xlu0 %1144  ;;  %v2388_v21 = vmul.f32 %v10039_v41, %v10999_v44  ;;  %v2387_v17 = vmul.f32 %v10039_v41, %v11001_v15  ;;  %v4204_v8 = vsel %vm4170_vm8, %v3516_v11, %v4203_v36 }
 0x218   : > { %v2386_v51 = vmul.f32 %v10039_v41, %v11008_v6 }
 0x219   : > { %v3538_v56 = vperm.slane %v2388_v21, %v10042_v42  ;;  %v3536_v14 = vperm.slane %v2387_v17, %v10085_v46  ;;  %v391_v17 = vld [vmem:[%s9854_s18 + $0x6a0] sm:$0xff] }
 0x21a   : > { %v3534_v31 = vperm.slane %v2386_v51, %v10077_v3 }
 0x21b   : > { %1285 = vadd.xlane.f32.xlu2 %v1284_v58  ;;  %1282 = vadd.xlane.f32.xlu1 %v1281_v18  ;;  %v3522_v58 = vperm.slane %v11054_v37, %v10085_v46  ;;  %v381_v18 = vld [vmem:[%s9854_s18 + $0x650] sm:$0xff] }
 0x21c   : > { %1279 = vadd.xlane.f32.xlu0 %v1278_v28  ;;  %v3525_v28 = vperm.slane %v2381_v40, %v10050_v45  ;;  %v1299_v6 = vsel %vm691_vm0, %v381_v18, 0.0  ;;  %v385_v37 = vld [vmem:[%s9854_s18 + $0x670] sm:$0xff]  ;;  %v1305_v18 = vsel %vm691_vm0, %v383_v52, 0.0  ;;  %v1341_v52 = vsel %vm691_vm0, %v395_v5, 0.0 }
 0x21d   : > { %v3523_v16 = vsel %vm3277_vm6, %v3522_v58, %v3521_v12  ;;  %v1311_v53 = vsel %vm691_vm0, %v385_v37, 0.0  ;;  %v397_v37 = vld [vmem:[%s9854_s18 + $0x6d0] sm:$0xff] }
 0x21e   : > { %v1160_v34 = vpop.xlane.xlu2 %1159  ;;  %v1157_v60 = vpop.xlane.xlu1 %1156  ;;  %v4205_v9 = vsel %vm4172_vm9, %v3523_v16, %v4204_v8  ;;  %v1347_v16 = vsel %vm691_vm0, %v397_v37, 0.0  ;;  %v399_v8 = vld [vmem:[%s9854_s18 + $0x6e0] sm:$0xff]  ;;  %v409_v5 = vld [vmem:[%s9854_s18 + $0x730] sm:$0xff] }
 0x21f   : > { %v1154_v29 = vpop.xlane.xlu0 %1153  ;;  %v2390_v43 = vmul.f32 %v10039_v41, %v1157_v60  ;;  %v2391_v24 = vmul.f32 %v10039_v41, %v1160_v34  ;;  %v3526_v60 = vsel %vm3269_vm4, %v3525_v28, %v3524_v13  ;;  %v3533_v34 = vsel %vm3269_vm4, %v3532_v25, %v3531_v10 }
 0x220   : > { %v2389_v61 = vmul.f32 %v10039_v41, %v1154_v29  ;;  %v1314_v10 = vsel %vm701_vm1, %v386_v48, 0.0  ;;  %v406_v48 = vld [vmem:[%s9854_s18 + $0x718] sm:$0x3] }
 0x221   : > { %v3541_v15 = vperm.slane %v2390_v43, %v10077_v3 }
 0x222   : > { %v3539_v44 = vperm.slane %v2389_v61, %v10050_v45 }
 0x223   : > { %1294 = vadd.xlane.f32.xlu2 %v1293_v4  ;;  %1291 = vadd.xlane.f32.xlu1 %v1290_v39  ;;  %v3535_v4 = vsel %vm3273_vm5, %v3534_v31, %v3533_v34  ;;  %v3543_v39 = vperm.slane %v2391_v24, %v10085_v46  ;;  %v389_v31 = vld [vmem:[%s9854_s18 + $0x690] sm:$0xff] }
 0x224   : > { %1288 = vadd.xlane.f32.xlu0 %v1287_v22  ;;  %v3540_v20 = vsel %vm3269_vm4, %v3539_v44, %v3538_v56  ;;  %v3528_v22 = vsel %vm3273_vm5, %v3527_v1, %v3526_v60  ;;  %v3537_v2 = vsel %vm3277_vm6, %v3536_v14, %v3535_v4  ;;  %v1323_v1 = vsel %vm691_vm0, %v389_v31, 0.0  ;;  %v394_v60 = vld [vmem:[%s9854_s18 + $0x6b8] sm:$0x3] }
 0x225   : > { %v3542_v50 = vsel %vm3273_vm5, %v3541_v15, %v3540_v20  ;;  %v3530_v19 = vsel %vm3277_vm6, %v3529_v26, %v3528_v22  ;;  %v393_v15 = vld [vmem:[%s9854_s18 + $0x6b0] sm:$0xff]  ;;  %v1338_v14 = vsel %vm701_vm1, %v394_v60, 0.0  ;;  %v1344_v22 = vsel %vm691_vm0, %v396_v57, 0.0 }
 0x226   : > { %v1169_v23 = vpop.xlane.xlu2 %1168  ;;  %v1166_v0 = vpop.xlane.xlu1 %1165  ;;  %v3544_v11 = vsel %vm3277_vm6, %v3543_v39, %v3542_v50  ;;  %v4206_v21 = vsel %vm4174_vm10, %v3530_v19, %v4205_v9  ;;  %v400_v50 = vld [vmem:[%s9854_s18 + $0x6e8] sm:$0xff]  ;;  %v402_v9 = vld [vmem:[%s9854_s18 + $0x6f8] sm:$0x3] }
 0x227   : > { %v1163_v49 = vpop.xlane.xlu0 %1162  ;;  %v2393_v63 = vmul.f32 %v10039_v41, %v1166_v0  ;;  %v2394_v33 = vmul.f32 %v10039_v41, %v1169_v23  ;;  %v4207_v28 = vsel %vm4176_vm11, %v3537_v2, %v4206_v21  ;;  %v388_v0 = vld [vmem:[%s9854_s18 + $0x688] sm:$0xff] }
 0x228   : > { %v2392_v59 = vmul.f32 %v10039_v41, %v1163_v49  ;;  %v4208_v43 = vsel %vm4178_vm12, %v3544_v11, %v4207_v28  ;;  %v1320_v49 = vsel %vm691_vm0, %v388_v0, 0.0  ;;  %v403_v11 = vld [vmem:[%s9854_s18 + $0x700] sm:$0xff] }
 0x229   : > { %v3546_v32 = vperm.slane %v2393_v63, %v10050_v45  ;;  %v3548_v47 = vperm.slane %v2394_v33, %v10077_v3  ;;  %v390_v63 = vld [vmem:[%s9854_s18 + $0x698] sm:$0x3]  ;;  %v392_v33 = vld [vmem:[%s9854_s18 + $0x6a8] sm:$0xff] }
 0x22a   : > { %v3545_v29 = vperm.slane %v2392_v59, %v10042_v42  ;;  %v1326_v12 = vsel %vm701_vm1, %v390_v63, 0.0  ;;  %v404_v63 = vld [vmem:[%s9854_s18 + $0x708] sm:$0xff] }
 0x22b   : > { %1303 = vadd.xlane.f32.xlu2 %v1302_v54  ;;  %1300 = vadd.xlane.f32.xlu1 %v1299_v6  ;;  %v387_v54 = vld [vmem:[%s9854_s18 + $0x680] sm:$0xff] }
 0x22c   : > { %1297 = vadd.xlane.f32.xlu0 %v1296_v38  ;;  %v3547_v7 = vsel %vm3269_vm4, %v3546_v32, %v3545_v29  ;;  %v1317_v6 = vsel %vm691_vm0, %v387_v54, 0.0  ;;  %v1329_v38 = vsel %vm691_vm0, %v391_v17, 0.0  ;;  %v1335_v32 = vsel %vm691_vm0, %v393_v15, 0.0 }
 0x22d   : > { %v3549_v51 = vsel %vm3273_vm5, %v3548_v47, %v3547_v7  ;;  %v1332_v29 = vsel %vm691_vm0, %v392_v33, 0.0  ;;  %v1356_v7 = vsel %vm691_vm0, %v400_v50, 0.0  ;;  %v1368_v15 = vsel %vm691_vm0, %v404_v63, 0.0 }
 0x22e   : > { %v11130_v40 = vpop.xlane.xlu2 %1177  ;;  %v11132_v35 = vpop.xlane.xlu1 %1174 }
 0x22f   : > { %v1172_v61 = vpop.xlane.xlu0 %1171  ;;  %v2397_v0 = vmul.f32 %v10039_v41, %v11130_v40 }
 0x230   : > { %v2395_v58 = vmul.f32 %v10039_v41, %v1172_v61  ;;  %v398_v61 = vld [vmem:[%s9854_s18 + $0x6d8] sm:$0x3] }
 0x232   : > { %v3550_v55 = vperm.slane %v2395_v58, %v10085_v46  ;;  %v1353_v58 = vsel %vm691_vm0, %v399_v8, 0.0 }
 0x233   : > { %1312 = vadd.xlane.f32.xlu2 %v1311_v53  ;;  %1309 = vadd.xlane.f32.xlu1 %v1308_v62  ;;  %v1350_v62 = vsel %vm701_vm1, %v398_v61, 0.0  ;;  %v407_v61 = vld [vmem:[%s9854_s18 + $0x720] sm:$0xff] }
 0x234   : > { %1306 = vadd.xlane.f32.xlu0 %v1305_v18  ;;  %v3551_v13 = vsel %vm3277_vm6, %v3550_v55, %v3549_v51  ;;  %v401_v51 = vld [vmem:[%s9854_s18 + $0x6f0] sm:$0xff] }
 0x235   : > { %v4209_v23 = vsel %vm4180_vm13, %v3551_v13, %v4208_v43  ;;  %v1365_v13 = vsel %vm691_vm0, %v403_v11, 0.0  ;;  %v1362_v43 = vsel %vm701_vm1, %v402_v9, 0.0 }
 0x236   : > { %8834 = vmatmul.msk.f32.gmra.mxu0 %vm4287_vm14, %v4209_v23  ;;  %v11157_v30 = vpop.xlane.xlu2 %1186  ;;  %v11159_v25 = vpop.xlane.xlu1 %1183  ;;  %v1359_v23 = vsel %vm691_vm0, %v401_v51, 0.0 }
 0x237   : > { %v11162_v44 = vpop.xlane.xlu0 %1180  ;;  %v2400_v31 = vmul.f32 %v10039_v41, %v11157_v30 }
 0x23b   : > { %1321 = vadd.xlane.f32.xlu2 %v1320_v49  ;;  %1318 = vadd.xlane.f32.xlu1 %v1317_v6  ;;  %v405_v49 = vld [vmem:[%s9854_s18 + $0x710] sm:$0xff]  ;;  %v2396_v6 = vmul.f32 %v10039_v41, %v11132_v35 }
 0x23c   : > { %1315 = vadd.xlane.f32.xlu0 %v1314_v10  ;;  %v1371_v35 = vsel %vm691_vm0, %v405_v49, 0.0 }
 0x23d   : > { %v3552_v30 = vperm.slane %v2396_v6, %v10042_v42 }
 0x23e   : > { %v11169_v59 = vpop.xlane.xlu2 %1195  ;;  %v11171_v56 = vpop.xlane.xlu1 %1192 }
 0x23f   : > { %v1190_v24 = vpop.xlane.xlu0 %1189  ;;  %v2402_v40 = vmul.f32 %v10039_v41, %v11171_v56 }
 0x240   : > { %v2401_v54 = vmul.f32 %v10039_v41, %v1190_v24  ;;  %v1374_v24 = vsel %vm701_vm1, %v406_v48, 0.0 }
 0x241   : > { %v3562_v37 = vperm.slane %v2402_v40, %v10077_v3  ;;  %v410_v40 = vld [vmem:[%s9854_s18 + $0x738] sm:$0x3] }
 0x242   : > { %v3560_v60 = vperm.slane %v2401_v54, %v10050_v45 }
 0x243   : > { %1330 = vadd.xlane.f32.xlu2 %v1329_v38  ;;  %1327 = vadd.xlane.f32.xlu1 %v1326_v12  ;;  %v2398_v38 = vmul.f32 %v10039_v41, %v11162_v44  ;;  %v2399_v44 = vmul.f32 %v10039_v41, %v11159_v25 }
 0x244   : > { %1324 = vadd.xlane.f32.xlu0 %v1323_v1  ;;  %v3553_v1 = vperm.slane %v2397_v0, %v10050_v45 }
 0x246   : > { %v11179_v26 = vpop.xlane.xlu2 %1204  ;;  %v11181_v20 = vpop.xlane.xlu1 %1201 }
 0x247   : > { %v11184_v34 = vpop.xlane.xlu0 %1198  ;;  %v2405_v56 = vmul.f32 %v10039_v41, %v11181_v20  ;;  %v2406_v25 = vmul.f32 %v10039_v41, %v11179_v26 }
 0x248   : > { %v2404_v33 = vmul.f32 %v10039_v41, %v11184_v34 }
 0x24b   : > { %1339 = vadd.xlane.f32.xlu2 %v1338_v14  ;;  %1336 = vadd.xlane.f32.xlu1 %v1335_v32  ;;  %v3559_v14 = vperm.slane %v2400_v31, %v10042_v42  ;;  %v3555_v32 = vperm.slane %v2398_v38, %v10077_v3  ;;  %v411_v38 = vld [vmem:[%s9854_s18 + $0x740] sm:$0xff] }
 0x24c   : > { %1333 = vadd.xlane.f32.xlu0 %v1332_v29  ;;  %v2403_v29 = vmul.f32 %v10039_v41, %v11169_v59  ;;  %v3554_v59 = vsel %vm3269_vm4, %v3553_v1, %v3552_v30 }
 0x24d   : > { %v3561_v20 = vsel %vm3269_vm4, %v3560_v60, %v3559_v14 }
 0x24e   : > { %v11191_v4 = vpop.xlane.xlu2 %1213  ;;  %v11193_v39 = vpop.xlane.xlu1 %1210 }
 0x24f   : > { %v11196_v36 = vpop.xlane.xlu0 %1207  ;;  %v2409_v34 = vmul.f32 %v10039_v41, %v11191_v4  ;;  %v2408_v57 = vmul.f32 %v10039_v41, %v11193_v39  ;;  %v3556_v4 = vsel %vm3273_vm5, %v3555_v32, %v3554_v59  ;;  %v3564_v39 = vperm.slane %v2403_v29, %v10085_v46 }
 0x250   : > { %v2407_v26 = vmul.f32 %v10039_v41, %v11196_v36  ;;  %v1386_v29 = vsel %vm701_vm1, %v410_v40, 0.0 }
 0x251   : > { %v3574_v36 = vperm.slane %v2409_v34, %v10050_v45  ;;  %v3573_v9 = vperm.slane %v2408_v57, %v10042_v42 }
 0x253   : > { %1348 = vadd.xlane.f32.xlu2 %v1347_v16  ;;  %1345 = vadd.xlane.f32.xlu1 %v1344_v22  ;;  %v408_v16 = vld [vmem:[%s9854_s18 + $0x728] sm:$0xff]  ;;  %v3567_v22 = vperm.slane %v2405_v56, %v10050_v45  ;;  %v3575_v6 = vsel %vm3269_vm4, %v3574_v36, %v3573_v9  ;;  %v413_v36 = vld [vmem:[%s9854_s18 + $0x750] sm:$0xff] }
 0x254   : > { %1342 = vadd.xlane.f32.xlu0 %v1341_v52  ;;  %v3566_v52 = vperm.slane %v2404_v33, %v10042_v42  ;;  %v1380_v11 = vsel %vm691_vm0, %v408_v16, 0.0 }
 0x256   : > { %v11203_v19 = vpop.xlane.xlu2 %1222  ;;  %v11205_v47 = vpop.xlane.xlu1 %1219 }
 0x257   : > { %v11208_v53 = vpop.xlane.xlu0 %1216  ;;  %v2412_v54 = vmul.f32 %v10039_v41, %v11203_v19  ;;  %v2411_v48 = vmul.f32 %v10039_v41, %v11205_v47  ;;  %v412_v19 = vld [vmem:[%s9854_s18 + $0x748] sm:$0xff] }
 0x258   : > { %v2410_v51 = vmul.f32 %v10039_v41, %v11208_v53  ;;  %v1392_v32 = vsel %vm691_vm0, %v412_v19, 0.0 }
 0x259   : > { %v3580_v30 = vperm.slane %v2412_v54, %v10042_v42 }
 0x25a   : > { %v3576_v31 = vperm.slane %v2410_v51, %v10077_v3 }
 0x25b   : > { %1357 = vadd.xlane.f32.xlu2 %v1356_v7  ;;  %1354 = vadd.xlane.f32.xlu1 %v1353_v58  ;;  %v3557_v7 = vperm.slane %v2399_v44, %v10085_v46  ;;  %v3578_v44 = vperm.slane %v2411_v48, %v10085_v46 }
 0x25c   : > { %1351 = vadd.xlane.f32.xlu0 %v1350_v62  ;;  %v4350_v2 = vpop.f32.mrf.mxu0  ;;  %v3563_v62 = vsel %vm3273_vm5, %v3562_v37, %v3561_v20 }
 0x25d   : > { %v4392_v18 = vmax.f32 %v4350_v2, 0.0  ;;  %v3569_v2 = vperm.slane %v2406_v25, %v10077_v3  ;;  %v3558_v53 = vsel %vm3277_vm6, %v3557_v7, %v3556_v4  ;;  %v3565_v49 = vsel %vm3277_vm6, %v3564_v39, %v3563_v62  ;;  %v415_v7 = vld [vmem:[%s9854_s18 + $0x760] sm:$0xff]  ;;  %v414_v4 = vld [vmem:[%s9854_s18 + $0x758] sm:$0x3] }
 0x25e   : > { %v11215_v55 = vpop.xlane.xlu2 %1231  ;;  %v11217_v21 = vpop.xlane.xlu1 %1228  ;;  %v1401_v48 = vsel %vm691_vm0, %v415_v7, 0.0 }
 0x25f   : > { %8849 = vmatmul.msk.f32.gmra.mxu1 %vm4406_vm15, %v4392_v18  ;;  %v1226_v28 = vpop.xlane.xlu0 %1225  ;;  %v1383_v18 = vsel %vm691_vm0, %v409_v5, 0.0  ;;  %v2415_v37 = vmul.f32 %v10039_v41, %v11215_v55 }
 0x260   : > { %v2413_v0 = vmul.f32 %v10039_v41, %v1226_v28  ;;  %v2414_v28 = vmul.f32 %v10039_v41, %v11217_v21 }
 0x262   : > { %v3583_v25 = vperm.slane %v2414_v28, %v10077_v3 }
 0x263   : > { %1366 = vadd.xlane.f32.xlu2 %v1365_v13  ;;  %1363 = vadd.xlane.f32.xlu1 %v1362_v43  ;;  %v1377_v13 = vsel %vm691_vm0, %v407_v61, 0.0  ;;  %v3568_v43 = vsel %vm3269_vm4, %v3567_v22, %v3566_v52 }
 0x264   : > { %1360 = vadd.xlane.f32.xlu0 %v1359_v23  ;;  %v3571_v23 = vperm.slane %v2407_v26, %v10085_v46  ;;  %v3570_v63 = vsel %vm3273_vm5, %v3569_v2, %v3568_v43 }
 0x266   : > { %v11231_v10 = vpop.xlane.xlu2 %1240  ;;  %v11233_v17 = vpop.xlane.xlu1 %1237  ;;  %v3572_v47 = vsel %vm3277_vm6, %v3571_v23, %v3570_v63  ;;  %v1395_v63 = vsel %vm691_vm0, %v413_v36, 0.0  ;;  %v425_v36 = vld [vmem:[%s9854_s18 + $0x7b0] sm:$0xff] }
 0x267   : > { %v11240_v12 = vpop.xlane.xlu0 %1234  ;;  %v2418_v20 = vmul.f32 %v10039_v41, %v11231_v10  ;;  %v4210_v10 = vsel %vm4168_vm7, %v3565_v49, %v3558_v53  ;;  %v1398_v53 = vsel %vm701_vm1, %v414_v4, 0.0 }
 0x268   : > { %v2416_v1 = vmul.f32 %v10039_v41, %v11240_v12  ;;  %v3577_v12 = vsel %vm3273_vm5, %v3576_v31, %v3575_v6  ;;  %v4211_v26 = vsel %vm4170_vm8, %v3572_v47, %v4210_v10 }
 0x269   : > { %v3590_v61 = vperm.slane %v2418_v20, %v10077_v3  ;;  %v421_v20 = vld [vmem:[%s9854_s18 + $0x790] sm:$0xff] }
 0x26a   : > { %v3587_v5 = vperm.slane %v2416_v1, %v10042_v42 }
 0x26b   : > { %1375 = vadd.xlane.f32.xlu2 %v1374_v24  ;;  %1372 = vadd.xlane.f32.xlu1 %v1371_v35  ;;  %v3581_v24 = vperm.slane %v2413_v0, %v10050_v45  ;;  %v2417_v35 = vmul.f32 %v10039_v41, %v11233_v17  ;;  %v1389_v17 = vsel %vm691_vm0, %v411_v38, 0.0 }
 0x26c   : > { %1369 = vadd.xlane.f32.xlu0 %v1368_v15 }
 0x26d   : > { %v3582_v34 = vsel %vm3269_vm4, %v3581_v24, %v3580_v30  ;;  %v3588_v57 = vperm.slane %v2417_v35, %v10050_v45  ;;  %v418_v30 = vld [vmem:[%s9854_s18 + $0x778] sm:$0x3] }
 0x26e   : > { %v1250_v50 = vpop.xlane.xlu2 %1249  ;;  %v1247_v8 = vpop.xlane.xlu1 %1246  ;;  %v3584_v39 = vsel %vm3273_vm5, %v3583_v25, %v3582_v34  ;;  %v420_v34 = vld [vmem:[%s9854_s18 + $0x788] sm:$0xff] }
 0x26f   : > { %v1244_v58 = vpop.xlane.xlu0 %1243  ;;  %v2421_v21 = vmul.f32 %v10039_v41, %v1250_v50  ;;  %v2420_v56 = vmul.f32 %v10039_v41, %v1247_v8  ;;  %v3579_v50 = vsel %vm3277_vm6, %v3578_v44, %v3577_v12  ;;  %v3585_v8 = vperm.slane %v2415_v37, %v10085_v46  ;;  %v417_v44 = vld [vmem:[%s9854_s18 + $0x770] sm:$0xff] }
 0x270   : > { %v2419_v16 = vmul.f32 %v10039_v41, %v1244_v58  ;;  %v3589_v58 = vsel %vm3269_vm4, %v3588_v57, %v3587_v5  ;;  %v4212_v24 = vsel %vm4172_vm9, %v3579_v50, %v4211_v26  ;;  %v1410_v12 = vsel %vm701_vm1, %v418_v30, 0.0  ;;  %v423_v26 = vld [vmem:[%s9854_s18 + $0x7a0] sm:$0xff] }
 0x271   : > { %v3595_v59 = vperm.slane %v2421_v21, %v10050_v45  ;;  %v3594_v22 = vperm.slane %v2420_v56, %v10042_v42  ;;  %v3591_v49 = vsel %vm3273_vm5, %v3590_v61, %v3589_v58  ;;  %v3586_v31 = vsel %vm3277_vm6, %v3585_v8, %v3584_v39  ;;  %v422_v61 = vld [vmem:[%s9854_s18 + $0x798] sm:$0x3] }
 0x272   : > { %v3592_v62 = vperm.slane %v2419_v16, %v10085_v46  ;;  %v4213_v1 = vsel %vm4174_vm10, %v3586_v31, %v4212_v24  ;;  %v1407_v37 = vsel %vm691_vm0, %v417_v44, 0.0  ;;  %v419_v16 = vld [vmem:[%s9854_s18 + $0x780] sm:$0xff]  ;;  %v1425_v39 = vsel %vm691_vm0, %v423_v26, 0.0  ;;  %v436_v44 = vld [vmem:[%s9854_s18 + $0x808] sm:$0xff]  ;;  %v437_v26 = vld [vmem:[%s9854_s18 + $0x810] sm:$0xff] }
 0x273   : > { %1384 = vadd.xlane.f32.xlu2 %v1383_v18  ;;  %1381 = vadd.xlane.f32.xlu1 %v1380_v11  ;;  %v3596_v9 = vsel %vm3269_vm4, %v3595_v59, %v3594_v22  ;;  %v1419_v22 = vsel %vm691_vm0, %v421_v20, 0.0  ;;  %v1413_v10 = vsel %vm691_vm0, %v419_v16, 0.0  ;;  %v1422_v58 = vsel %vm701_vm1, %v422_v61, 0.0 }
 0x274   : > { %1378 = vadd.xlane.f32.xlu0 %v1377_v13  ;;  %v3593_v28 = vsel %vm3277_vm6, %v3592_v62, %v3591_v49  ;;  %v427_v62 = vld [vmem:[%s9854_s18 + $0x7c0] sm:$0xff] }
 0x276   : > { %v1259_v60 = vpop.xlane.xlu2 %1258  ;;  %v1256_v15 = vpop.xlane.xlu1 %1255 }
 0x277   : > { %v1253_v33 = vpop.xlane.xlu0 %1252  ;;  %v2423_v55 = vmul.f32 %v10039_v41, %v1256_v15  ;;  %v2424_v2 = vmul.f32 %v10039_v41, %v1259_v60  ;;  %v4214_v15 = vsel %vm4176_vm11, %v3593_v28, %v4213_v1  ;;  %v433_v28 = vld [vmem:[%s9854_s18 + $0x7f0] sm:$0xff] }
 0x278   : > { %v2422_v14 = vmul.f32 %v10039_v41, %v1253_v33 }
 0x279   : > { %v3599_v51 = vperm.slane %v2423_v55, %v10085_v46  ;;  %v3601_v19 = vperm.slane %v2424_v2, %v10042_v42  ;;  %v1416_v55 = vsel %vm691_vm0, %v420_v34, 0.0  ;;  %v426_v2 = vld [vmem:[%s9854_s18 + $0x7b8] sm:$0x3] }
 0x27a   : > { %v3597_v52 = vperm.slane %v2422_v14, %v10077_v3 }
 0x27b   : > { %1393 = vadd.xlane.f32.xlu2 %v1392_v32  ;;  %1390 = vadd.xlane.f32.xlu1 %v1389_v17  ;;  %v416_v32 = vld [vmem:[%s9854_s18 + $0x768] sm:$0xff] }
 0x27c   : > { %1387 = vadd.xlane.f32.xlu0 %v1386_v29  ;;  %v3598_v0 = vsel %vm3273_vm5, %v3597_v52, %v3596_v9  ;;  %v1404_v25 = vsel %vm691_vm0, %v416_v32, 0.0  ;;  %v424_v52 = vld [vmem:[%s9854_s18 + $0x7a8] sm:$0xff] }
 0x27d   : > { %v3600_v47 = vsel %vm3277_vm6, %v3599_v51, %v3598_v0  ;;  %v1428_v4 = vsel %vm691_vm0, %v424_v52, 0.0  ;;  %v1437_v51 = vsel %vm691_vm0, %v427_v62, 0.0  ;;  %v429_v0 = vld [vmem:[%s9854_s18 + $0x7d0] sm:$0xff] }
 0x27e   : > { %v1268_v18 = vpop.xlane.xlu2 %1267  ;;  %v1265_v11 = vpop.xlane.xlu1 %1264  ;;  %v4215_v14 = vsel %vm4178_vm12, %v3600_v47, %v4214_v15  ;;  %v431_v47 = vld [vmem:[%s9854_s18 + $0x7e0] sm:$0xff] }
 0x27f   : > { %v2427_v13 = vmul.f32 %v10039_v41, %v1268_v18  ;;  %v2426_v43 = vmul.f32 %v10039_v41, %v1265_v11  ;;  %v1262_v23 = vpop.xlane.xlu0 %1261 }
 0x280   : > { %v2425_v54 = vmul.f32 %v10039_v41, %v1262_v23  ;;  %v430_v23 = vld [vmem:[%s9854_s18 + $0x7d8] sm:$0x3] }
 0x281   : > { %v3604_v6 = vperm.slane %v2426_v43, %v10077_v3  ;;  %v3606_v38 = vperm.slane %v2427_v13, %v10085_v46  ;;  %v1434_v13 = vsel %vm701_vm1, %v426_v2, 0.0  ;;  %v1431_v43 = vsel %vm691_vm0, %v425_v36, 0.0 }
 0x282   : > { %v3602_v40 = vperm.slane %v2425_v54, %v10050_v45 }
 0x283   : > { %1402 = vadd.xlane.f32.xlu2 %v1401_v48  ;;  %1399 = vadd.xlane.f32.xlu1 %v1398_v53  ;;  %v428_v53 = vld [vmem:[%s9854_s18 + $0x7c8] sm:$0xff] }
 0x284   : > { %v3603_v35 = vsel %vm3269_vm4, %v3602_v40, %v3601_v19  ;;  %1396 = vadd.xlane.f32.xlu0 %v1395_v63  ;;  %v1443_v63 = vsel %vm691_vm0, %v429_v0, 0.0  ;;  %v1440_v31 = vsel %vm691_vm0, %v428_v53, 0.0  ;;  %v432_v19 = vld [vmem:[%s9854_s18 + $0x7e8] sm:$0xff] }
 0x285   : > { %v3605_v60 = vsel %vm3273_vm5, %v3604_v6, %v3603_v35  ;;  %v1446_v6 = vsel %vm701_vm1, %v430_v23, 0.0  ;;  %v1455_v35 = vsel %vm691_vm0, %v433_v28, 0.0  ;;  %v1452_v1 = vsel %vm691_vm0, %v432_v19, 0.0 }
 0x286   : > { %v11369_v21 = vpop.xlane.xlu2 %1276  ;;  %v11371_v56 = vpop.xlane.xlu1 %1273  ;;  %v3607_v33 = vsel %vm3277_vm6, %v3606_v38, %v3605_v60  ;;  %v1449_v60 = vsel %vm691_vm0, %v431_v47, 0.0 }
 0x287   : > { %v11376_v17 = vpop.xlane.xlu0 %1270  ;;  %v4216_v29 = vsel %vm4180_vm13, %v3607_v33, %v4215_v14  ;;  %v435_v33 = vld [vmem:[%s9854_s18 + $0x800] sm:$0xff]  ;;  %v2429_v34 = vmul.f32 %v10039_v41, %v11371_v56  ;;  %v2430_v61 = vmul.f32 %v10039_v41, %v11369_v21 }
 0x288   : > { %8835 = vmatmul.msk.f32.gmra.mxu0 %vm4287_vm14, %v4216_v29  ;;  %v434_v29 = vld [vmem:[%s9854_s18 + $0x7f8] sm:$0x3]  ;;  %v2428_v16 = vmul.f32 %v10039_v41, %v11376_v17 }
 0x289   : > { %v1458_v20 = vsel %vm701_vm1, %v434_v29, 0.0 }
 0x28a   : > { %v3608_v56 = vperm.slane %v2428_v16, %v10042_v42 }
 0x28b   : > { %1411 = vadd.xlane.f32.xlu2 %v1410_v12  ;;  %1408 = vadd.xlane.f32.xlu1 %v1407_v37  ;;  %v1464_v37 = vsel %vm691_vm0, %v436_v44, 0.0 }
 0x28c   : > { %1405 = vadd.xlane.f32.xlu0 %v1404_v25  ;;  %v1461_v25 = vsel %vm691_vm0, %v435_v33, 0.0 }
 0x28e   : > { %v11385_v57 = vpop.xlane.xlu2 %1285  ;;  %v11387_v5 = vpop.xlane.xlu1 %1282 }
 0x28f   : > { %v11390_v59 = vpop.xlane.xlu0 %1279  ;;  %v2432_v62 = vmul.f32 %v10039_v41, %v11387_v5 }
 0x290   : > { %v2431_v5 = vmul.f32 %v10039_v41, %v11390_v59 }
 0x291   : > { %v3615_v23 = vperm.slane %v2432_v62, %v10042_v42 }
 0x293   : > { %1420 = vadd.xlane.f32.xlu2 %v1419_v22  ;;  %1417 = vadd.xlane.f32.xlu1 %v1416_v55  ;;  %v439_v22 = vld [vmem:[%s9854_s18 + $0x820] sm:$0xff]  ;;  %v438_v55 = vld [vmem:[%s9854_s18 + $0x818] sm:$0x3] }
 0x294   : > { %1414 = vadd.xlane.f32.xlu0 %v1413_v10  ;;  %v1473_v2 = vsel %vm691_vm0, %v439_v22, 0.0  ;;  %v1470_v36 = vsel %vm701_vm1, %v438_v55, 0.0 }
 0x296   : > { %v11397_v50 = vpop.xlane.xlu2 %1294  ;;  %v11399_v8 = vpop.xlane.xlu1 %1291 }
 0x297   : > { %v11402_v7 = vpop.xlane.xlu0 %1288  ;;  %v2436_v21 = vmul.f32 %v10039_v41, %v11397_v50  ;;  %v2435_v0 = vmul.f32 %v10039_v41, %v11399_v8 }
 0x299   : > { %v3620_v44 = vperm.slane %v2435_v0, %v10085_v46 }
 0x29b   : > { %1429 = vadd.xlane.f32.xlu2 %v1428_v4  ;;  %1426 = vadd.xlane.f32.xlu1 %v1425_v39  ;;  %v3609_v4 = vperm.slane %v2429_v34, %v10050_v45 }
 0x29c   : > { %1423 = vadd.xlane.f32.xlu0 %v1422_v58  ;;  %v2433_v58 = vmul.f32 %v10039_v41, %v11385_v57 }
 0x29d   : > { %v3610_v50 = vsel %vm3269_vm4, %v3609_v4, %v3608_v56 }
 0x29e   : > { %v11409_v18 = vpop.xlane.xlu2 %1303  ;;  %v11411_v11 = vpop.xlane.xlu1 %1300 }
 0x29f   : > { %v1298_v9 = vpop.xlane.xlu0 %1297  ;;  %v2438_v57 = vmul.f32 %v10039_v41, %v11411_v11  ;;  %v3622_v11 = vperm.slane %v2436_v21, %v10042_v42  ;;  %v2439_v59 = vmul.f32 %v10039_v41, %v11409_v18 }
 0x2a0   : > { %v2437_v39 = vmul.f32 %v10039_v41, %v1298_v9  ;;  %v1467_v9 = vsel %vm691_vm0, %v437_v26, 0.0 }
 0x2a1   : > { %v3627_v29 = vperm.slane %v2439_v59, %v10085_v46 }
 0x2a3   : > { %1438 = vadd.xlane.f32.xlu2 %v1437_v51  ;;  %1435 = vadd.xlane.f32.xlu1 %v1434_v13  ;;  %v2434_v51 = vmul.f32 %v10039_v41, %v11402_v7  ;;  %v3611_v13 = vperm.slane %v2430_v61, %v10077_v3  ;;  %v3616_v7 = vperm.slane %v2433_v58, %v10050_v45  ;;  %v444_v58 = vld [vmem:[%s9854_s18 + $0x848] sm:$0xff] }
 0x2a4   : > { %1432 = vadd.xlane.f32.xlu0 %v1431_v43  ;;  %v3623_v43 = vperm.slane %v2437_v39, %v10050_v45 }
 0x2a5   : > { %v3618_v53 = vperm.slane %v2434_v51, %v10077_v3 }
 0x2a6   : > { %v11419_v54 = vpop.xlane.xlu2 %1312  ;;  %v11421_v48 = vpop.xlane.xlu1 %1309 }
 0x2a7   : > { %v11424_v49 = vpop.xlane.xlu0 %1306  ;;  %v2441_v28 = vmul.f32 %v10039_v41, %v11421_v48 }
 0x2a8   : > { %v2440_v19 = vmul.f32 %v10039_v41, %v11424_v49 }
 0x2a9   : > { %v3630_v34 = vperm.slane %v2441_v28, %v10050_v45 }
 0x2aa   : > { %v3629_v16 = vperm.slane %v2440_v19, %v10042_v42 }
 0x2ab   : > { %1447 = vadd.xlane.f32.xlu2 %v1446_v6  ;;  %1444 = vadd.xlane.f32.xlu1 %v1443_v63  ;;  %v442_v6 = vld [vmem:[%s9854_s18 + $0x838] sm:$0x3]  ;;  %v441_v63 = vld [vmem:[%s9854_s18 + $0x830] sm:$0xff] }
 0x2ac   : > { %1441 = vadd.xlane.f32.xlu0 %v1440_v31  ;;  %v3625_v31 = vperm.slane %v2438_v57, %v10077_v3  ;;  %v1482_v33 = vsel %vm701_vm1, %v442_v6, 0.0  ;;  %v1479_v48 = vsel %vm691_vm0, %v441_v63, 0.0  ;;  %v3631_v62 = vsel %vm3269_vm4, %v3630_v34, %v3629_v16 }
 0x2ae   : > { %v11431_v38 = vpop.xlane.xlu2 %1321  ;;  %v11433_v40 = vpop.xlane.xlu1 %1318 }
 0x2af   : > { %v11436_v24 = vpop.xlane.xlu0 %1315  ;;  %v2445_v22 = vmul.f32 %v10039_v41, %v11431_v38  ;;  %v2444_v55 = vmul.f32 %v10039_v41, %v11433_v40 }
 0x2b1   : > { %v3637_v57 = vperm.slane %v2445_v22, %v10050_v45 }
 0x2b3   : > { %v4353_v15 = vpop.f32.mrf.mxu0  ;;  %1456 = vadd.xlane.f32.xlu2 %v1455_v35  ;;  %1453 = vadd.xlane.f32.xlu1 %v1452_v1  ;;  %v440_v35 = vld [vmem:[%s9854_s18 + $0x828] sm:$0xff]  ;;  %v3612_v1 = vsel %vm3273_vm5, %v3611_v13, %v3610_v50  ;;  %v1488_v50 = vsel %vm691_vm0, %v444_v58, 0.0 }
 0x2b4   : > { %v4393_v30 = vmax.f32 %v4353_v15, 0.0  ;;  %1450 = vadd.xlane.f32.xlu0 %v1449_v60  ;;  %v3613_v60 = vperm.slane %v2431_v5, %v10085_v46  ;;  %v3624_v15 = vsel %vm3269_vm4, %v3623_v43, %v3622_v11 }
 0x2b6   : > { %8850 = vmatmul.msk.f32.gmra.mxu1 %vm4406_vm15, %v4393_v30  ;;  %v11444_v14 = vpop.xlane.xlu2 %1330  ;;  %v11446_v32 = vpop.xlane.xlu1 %1327  ;;  %v3617_v30 = vsel %vm3269_vm4, %v3616_v7, %v3615_v23  ;;  %v3614_v61 = vsel %vm3277_vm6, %v3613_v60, %v3612_v1 }
 0x2b7   : > { %v11449_v12 = vpop.xlane.xlu0 %1324  ;;  %v3619_v49 = vsel %vm3273_vm5, %v3618_v53, %v3617_v30  ;;  %v2448_v38 = vmul.f32 %v10039_v41, %v11444_v14  ;;  %v3636_v14 = vperm.slane %v2444_v55, %v10042_v42  ;;  %v2447_v43 = vmul.f32 %v10039_v41, %v11446_v32  ;;  %v447_v30 = vld [vmem:[%s9854_s18 + $0x860] sm:$0xff] }
 0x2b8   : > { %v3621_v4 = vsel %vm3277_vm6, %v3620_v44, %v3619_v49  ;;  %v2446_v40 = vmul.f32 %v10039_v41, %v11449_v12 }
 0x2b9   : > { %v3643_v23 = vperm.slane %v2448_v38, %v10042_v42 }
 0x2ba   : > { %v3639_v0 = vperm.slane %v2446_v40, %v10077_v3 }
 0x2bb   : > { %1465 = vadd.xlane.f32.xlu2 %v1464_v37  ;;  %1462 = vadd.xlane.f32.xlu1 %v1461_v25  ;;  %v2442_v37 = vmul.f32 %v10039_v41, %v11419_v54  ;;  %v1476_v25 = vsel %vm691_vm0, %v440_v35, 0.0  ;;  %v2443_v54 = vmul.f32 %v10039_v41, %v11436_v24  ;;  %v445_v24 = vld [vmem:[%s9854_s18 + $0x850] sm:$0xff] }
 0x2bc   : > { %1459 = vadd.xlane.f32.xlu0 %v1458_v20  ;;  %v3626_v20 = vsel %vm3273_vm5, %v3625_v31, %v3624_v15 }
 0x2bd   : > { %v3628_v56 = vsel %vm3277_vm6, %v3627_v29, %v3626_v20  ;;  %v3632_v39 = vperm.slane %v2442_v37, %v10077_v3  ;;  %v3634_v12 = vperm.slane %v2443_v54, %v10085_v46 }
 0x2be   : > { %v11460_v10 = vpop.xlane.xlu2 %1339  ;;  %v11462_v52 = vpop.xlane.xlu1 %1336 }
 0x2bf   : > { %v1334_v17 = vpop.xlane.xlu0 %1333  ;;  %v2451_v11 = vmul.f32 %v10039_v41, %v11460_v10  ;;  %v4217_v10 = vsel %vm4168_vm7, %v3621_v4, %v3614_v61  ;;  %v3633_v44 = vsel %vm3273_vm5, %v3632_v39, %v3631_v62  ;;  %v1497_v4 = vsel %vm691_vm0, %v447_v30, 0.0  ;;  %v460_v30 = vld [vmem:[%s9854_s18 + $0x8c8] sm:$0xff] }
 0x2c0   : > { %v2449_v26 = vmul.f32 %v10039_v41, %v1334_v17  ;;  %v443_v17 = vld [vmem:[%s9854_s18 + $0x840] sm:$0xff]  ;;  %v4218_v35 = vsel %vm4170_vm8, %v3628_v56, %v4217_v10  ;;  %v3635_v20 = vsel %vm3277_vm6, %v3634_v12, %v3633_v44  ;;  %v456_v10 = vld [vmem:[%s9854_s18 + $0x8a8] sm:$0xff] }
 0x2c1   : > { %v1485_v7 = vsel %vm691_vm0, %v443_v17, 0.0  ;;  %v3648_v60 = vperm.slane %v2451_v11, %v10085_v46  ;;  %v453_v11 = vld [vmem:[%s9854_s18 + $0x890] sm:$0xff]  ;;  %v459_v44 = vld [vmem:[%s9854_s18 + $0x8c0] sm:$0xff] }
 0x2c2   : > { %v3644_v13 = vperm.slane %v2449_v26, %v10050_v45 }
 0x2c3   : > { %1474 = vadd.xlane.f32.xlu2 %v1473_v2  ;;  %1471 = vadd.xlane.f32.xlu1 %v1470_v36  ;;  %v2450_v2 = vmul.f32 %v10039_v41, %v11462_v52  ;;  %v1491_v52 = vsel %vm691_vm0, %v445_v24, 0.0  ;;  %v4219_v24 = vsel %vm4172_vm9, %v3635_v20, %v4218_v35  ;;  %v455_v35 = vld [vmem:[%s9854_s18 + $0x8a0] sm:$0xff]  ;;  %v1533_v20 = vsel %vm691_vm0, %v459_v44, 0.0 }
 0x2c4   : > { %1468 = vadd.xlane.f32.xlu0 %v1467_v9  ;;  %v3645_v31 = vsel %vm3269_vm4, %v3644_v13, %v3643_v23 }
 0x2c5   : > { %v3646_v59 = vperm.slane %v2450_v2, %v10077_v3 }
 0x2c6   : > { %v1349_v47 = vpop.xlane.xlu2 %1348  ;;  %v1346_v8 = vpop.xlane.xlu1 %1345 }
 0x2c7   : > { %v1343_v18 = vpop.xlane.xlu0 %1342  ;;  %v2453_v36 = vmul.f32 %v10039_v41, %v1346_v8  ;;  %v2454_v53 = vmul.f32 %v10039_v41, %v1349_v47  ;;  %v3638_v47 = vsel %vm3269_vm4, %v3637_v57, %v3636_v14  ;;  %v3641_v8 = vperm.slane %v2447_v43, %v10085_v46  ;;  %v451_v57 = vld [vmem:[%s9854_s18 + $0x880] sm:$0xff]  ;;  %v450_v14 = vld [vmem:[%s9854_s18 + $0x878] sm:$0x3]  ;;  %v449_v43 = vld [vmem:[%s9854_s18 + $0x870] sm:$0xff] }
 0x2c8   : > { %v2452_v21 = vmul.f32 %v10039_v41, %v1343_v18  ;;  %v3640_v1 = vsel %vm3273_vm5, %v3639_v0, %v3638_v47  ;;  %v448_v18 = vld [vmem:[%s9854_s18 + $0x868] sm:$0xff]  ;;  %v1503_v23 = vsel %vm691_vm0, %v449_v43, 0.0  ;;  %v454_v0 = vld [vmem:[%s9854_s18 + $0x898] sm:$0x3] }
 0x2c9   : > { %v3651_v6 = vperm.slane %v2453_v36, %v10050_v45  ;;  %v3653_v15 = vperm.slane %v2454_v53, %v10077_v3  ;;  %v3642_v54 = vsel %vm3277_vm6, %v3641_v8, %v3640_v1  ;;  %v1500_v61 = vsel %vm691_vm0, %v448_v18, 0.0 }
 0x2ca   : > { %v3650_v32 = vperm.slane %v2452_v21, %v10042_v42  ;;  %v4220_v2 = vsel %vm4174_vm10, %v3642_v54, %v4219_v24  ;;  %v1521_v18 = vsel %vm691_vm0, %v455_v35, 0.0  ;;  %v465_v24 = vld [vmem:[%s9854_s18 + $0x8f0] sm:$0xff] }
 0x2cb   : > { %1483 = vadd.xlane.f32.xlu2 %v1482_v33  ;;  %1480 = vadd.xlane.f32.xlu1 %v1479_v48  ;;  %v3647_v33 = vsel %vm3273_vm5, %v3646_v59, %v3645_v31  ;;  %v1515_v31 = vsel %vm691_vm0, %v453_v11, 0.0 }
 0x2cc   : > { %1477 = vadd.xlane.f32.xlu0 %v1476_v25  ;;  %v3652_v48 = vsel %vm3269_vm4, %v3651_v6, %v3650_v32  ;;  %v446_v25 = vld [vmem:[%s9854_s18 + $0x858] sm:$0x3]  ;;  %v3649_v38 = vsel %vm3277_vm6, %v3648_v60, %v3647_v33  ;;  %v452_v6 = vld [vmem:[%s9854_s18 + $0x888] sm:$0xff] }
 0x2cd   : > { %v1494_v39 = vsel %vm701_vm1, %v446_v25, 0.0  ;;  %v3654_v40 = vsel %vm3273_vm5, %v3653_v15, %v3652_v48  ;;  %v4221_v21 = vsel %vm4176_vm11, %v3649_v38, %v4220_v2  ;;  %v1524_v15 = vsel %vm691_vm0, %v456_v10, 0.0  ;;  %v464_v2 = vld [vmem:[%s9854_s18 + $0x8e8] sm:$0xff] }
 0x2ce   : > { %v1358_v51 = vpop.xlane.xlu2 %1357  ;;  %v1355_v9 = vpop.xlane.xlu1 %1354  ;;  %v1536_v25 = vsel %vm691_vm0, %v460_v30, 0.0 }
 0x2cf   : > { %v1352_v5 = vpop.xlane.xlu0 %1351  ;;  %v2457_v28 = vmul.f32 %v10039_v41, %v1358_v51  ;;  %v2456_v19 = vmul.f32 %v10039_v41, %v1355_v9 }
 0x2d0   : > { %v2455_v63 = vmul.f32 %v10039_v41, %v1352_v5 }
 0x2d1   : > { %v3658_v34 = vperm.slane %v2457_v28, %v10050_v45  ;;  %v3657_v16 = vperm.slane %v2456_v19, %v10042_v42  ;;  %v1512_v28 = vsel %vm691_vm0, %v452_v6, 0.0  ;;  %v457_v19 = vld [vmem:[%s9854_s18 + $0x8b0] sm:$0xff]  ;;  %v472_v6 = vld [vmem:[%s9854_s18 + $0x928] sm:$0xff] }
 0x2d2   : > { %v3655_v49 = vperm.slane %v2455_v63, %v10085_v46  ;;  %v1518_v63 = vsel %vm701_vm1, %v454_v0, 0.0  ;;  %v1527_v60 = vsel %vm691_vm0, %v457_v19, 0.0 }
 0x2d3   : > { %1492 = vadd.xlane.f32.xlu2 %v1491_v52  ;;  %1489 = vadd.xlane.f32.xlu1 %v1488_v50  ;;  %v3659_v62 = vsel %vm3269_vm4, %v3658_v34, %v3657_v16  ;;  %v1509_v50 = vsel %vm691_vm0, %v451_v57, 0.0  ;;  %v463_v16 = vld [vmem:[%s9854_s18 + $0x8e0] sm:$0xff]  ;;  %v469_v57 = vld [vmem:[%s9854_s18 + $0x910] sm:$0xff] }
 0x2d4   : > { %1486 = vadd.xlane.f32.xlu0 %v1485_v7  ;;  %v3656_v17 = vsel %vm3277_vm6, %v3655_v49, %v3654_v40  ;;  %v1506_v7 = vsel %vm701_vm1, %v450_v14, 0.0  ;;  %v458_v49 = vld [vmem:[%s9854_s18 + $0x8b8] sm:$0x3]  ;;  %v468_v14 = vld [vmem:[%s9854_s18 + $0x908] sm:$0xff] }
 0x2d5   : > { %v4222_v9 = vsel %vm4178_vm12, %v3656_v17, %v4221_v21  ;;  %v1530_v34 = vsel %vm701_vm1, %v458_v49, 0.0  ;;  %v466_v40 = vld [vmem:[%s9854_s18 + $0x8f8] sm:$0x3]  ;;  %v1560_v0 = vsel %vm691_vm0, %v468_v14, 0.0 }
 0x2d6   : > { %v11576_v29 = vpop.xlane.xlu2 %1366  ;;  %v1364_v37 = vpop.xlane.xlu1 %1363  ;;  %v1554_v21 = vsel %vm701_vm1, %v466_v40, 0.0 }
 0x2d7   : > { %v2459_v22 = vmul.f32 %v10039_v41, %v1364_v37  ;;  %v1361_v55 = vpop.xlane.xlu0 %1360 }
 0x2d8   : > { %v2458_v26 = vmul.f32 %v10039_v41, %v1361_v55 }
 0x2d9   : > { %v3662_v56 = vperm.slane %v2459_v22, %v10085_v46  ;;  %v462_v22 = vld [vmem:[%s9854_s18 + $0x8d8] sm:$0x3] }
 0x2da   : > { %v3660_v58 = vperm.slane %v2458_v26, %v10077_v3  ;;  %v461_v26 = vld [vmem:[%s9854_s18 + $0x8d0] sm:$0xff] }
 0x2db   : > { %1501 = vadd.xlane.f32.xlu2 %v1500_v61  ;;  %1498 = vadd.xlane.f32.xlu1 %v1497_v4  ;;  %v1545_v4 = vsel %vm691_vm0, %v463_v16, 0.0 }
 0x2dc   : > { %1495 = vadd.xlane.f32.xlu0 %v1494_v39  ;;  %v3661_v36 = vsel %vm3273_vm5, %v3660_v58, %v3659_v62  ;;  %v1539_v39 = vsel %vm691_vm0, %v461_v26, 0.0 }
 0x2dd   : > { %v3663_v51 = vsel %vm3277_vm6, %v3662_v56, %v3661_v36  ;;  %v1542_v56 = vsel %vm701_vm1, %v462_v22, 0.0 }
 0x2de   : > { %v11602_v12 = vpop.xlane.xlu2 %1375  ;;  %v11604_v13 = vpop.xlane.xlu1 %1372  ;;  %v4223_v5 = vsel %vm4180_vm13, %v3663_v51, %v4222_v9  ;;  %v1551_v51 = vsel %vm691_vm0, %v465_v24, 0.0  ;;  %v1548_v9 = vsel %vm691_vm0, %v464_v2, 0.0  ;;  %v473_v2 = vld [vmem:[%s9854_s18 + $0x930] sm:$0xff] }
 0x2df   : > { %8836 = vmatmul.msk.f32.gmra.mxu0 %vm4287_vm14, %v4223_v5  ;;  %v11609_v52 = vpop.xlane.xlu0 %1369  ;;  %v2462_v49 = vmul.f32 %v10039_v41, %v11604_v13 }
 0x2e3   : > { %1510 = vadd.xlane.f32.xlu2 %v1509_v50  ;;  %1507 = vadd.xlane.f32.xlu1 %v1506_v7  ;;  %v467_v50 = vld [vmem:[%s9854_s18 + $0x900] sm:$0xff] }
 0x2e4   : > { %1504 = vadd.xlane.f32.xlu0 %v1503_v23  ;;  %v1563_v23 = vsel %vm691_vm0, %v469_v57, 0.0  ;;  %v1557_v11 = vsel %vm691_vm0, %v467_v50, 0.0 }
 0x2e6   : > { %v11616_v53 = vpop.xlane.xlu2 %1384  ;;  %v11618_v59 = vpop.xlane.xlu1 %1381 }
 0x2e7   : > { %v11621_v32 = vpop.xlane.xlu0 %1378 }
 0x2e8   : > { %v2464_v19 = vmul.f32 %v10039_v41, %v11621_v32  ;;  %v1572_v32 = vsel %vm691_vm0, %v472_v6, 0.0 }
 0x2eb   : > { %1519 = vadd.xlane.f32.xlu2 %v1518_v63  ;;  %1516 = vadd.xlane.f32.xlu1 %v1515_v31  ;;  %v471_v63 = vld [vmem:[%s9854_s18 + $0x920] sm:$0xff]  ;;  %v2461_v31 = vmul.f32 %v10039_v41, %v11609_v52  ;;  %v2460_v52 = vmul.f32 %v10039_v41, %v11576_v29 }
 0x2ec   : > { %1513 = vadd.xlane.f32.xlu0 %v1512_v28  ;;  %v2465_v28 = vmul.f32 %v10039_v41, %v11618_v59  ;;  %v11710_v59 = vmul.f32 %v10039_v41, %v11602_v12  ;;  %v1569_v44 = vsel %vm691_vm0, %v471_v63, 0.0  ;;  %v1575_v63 = vsel %vm691_vm0, %v473_v2, 0.0 }
 0x2ed   : > { %v3665_v12 = vperm.slane %v2461_v31, %v10050_v45  ;;  %v3664_v16 = vperm.slane %v2460_v52, %v10042_v42 }
 0x2ee   : > { %v11628_v47 = vpop.xlane.xlu2 %1393  ;;  %v11630_v8 = vpop.xlane.xlu1 %1390 }
 0x2ef   : > { %v11633_v1 = vpop.xlane.xlu0 %1387 }
 0x2f3   : > { %1528 = vadd.xlane.f32.xlu2 %v1527_v60  ;;  %1525 = vadd.xlane.f32.xlu1 %v1524_v15  ;;  %v470_v60 = vld [vmem:[%s9854_s18 + $0x918] sm:$0x3]  ;;  %v2469_v15 = vmul.f32 %v10039_v41, %v11628_v47  ;;  %v2466_v47 = vmul.f32 %v10039_v41, %v11616_v53 }
 0x2f4   : > { %1522 = vadd.xlane.f32.xlu0 %v1521_v18  ;;  %v2468_v18 = vmul.f32 %v10039_v41, %v11630_v8  ;;  %v1566_v29 = vsel %vm701_vm1, %v470_v60, 0.0 }
 0x2f5   : > { %v3679_v13 = vperm.slane %v2469_v15, %v10050_v45  ;;  %v3674_v22 = vperm.slane %v2466_v47, %v10077_v3 }
 0x2f6   : > { %v11640_v33 = vpop.xlane.xlu2 %1402  ;;  %v11642_v48 = vpop.xlane.xlu1 %1399  ;;  %v3678_v53 = vperm.slane %v2468_v18, %v10042_v42  ;;  %v478_v18 = vld [vmem:[%s9854_s18 + $0x958] sm:$0x3] }
 0x2f7   : > { %v11645_v37 = vpop.xlane.xlu0 %1396 }
 0x2f8   : > { %v2470_v8 = vmul.f32 %v10039_v41, %v11645_v37  ;;  %v2471_v37 = vmul.f32 %v10039_v41, %v11642_v48  ;;  %v3667_v48 = vperm.slane %v2462_v49, %v10077_v3 }
 0x2fa   : > { %v3681_v26 = vperm.slane %v2470_v8, %v10077_v3 }
 0x2fb   : > { %1537 = vadd.xlane.f32.xlu2 %v1536_v25  ;;  %1534 = vadd.xlane.f32.xlu1 %v1533_v20  ;;  %v3672_v25 = vperm.slane %v2465_v28, %v10050_v45  ;;  %v3671_v20 = vperm.slane %v2464_v19, %v10042_v42 }
 0x2fc   : > { %1531 = vadd.xlane.f32.xlu0 %v1530_v34  ;;  %v2467_v34 = vmul.f32 %v10039_v41, %v11633_v1 }
 0x2fe   : > { %v11652_v55 = vpop.xlane.xlu2 %1411  ;;  %v11654_v54 = vpop.xlane.xlu1 %1408  ;;  %v3676_v40 = vperm.slane %v2467_v34, %v10085_v46  ;;  %v1590_v34 = vsel %vm701_vm1, %v478_v18, 0.0 }
 0x2ff   : > { %v11657_v61 = vpop.xlane.xlu0 %1405  ;;  %v11750_v14 = vmul.f32 %v10039_v41, %v11652_v55  ;;  %v2474_v50 = vmul.f32 %v10039_v41, %v11654_v54 }
 0x300   : > { %v2473_v1 = vmul.f32 %v10039_v41, %v11657_v61  ;;  %v2472_v61 = vmul.f32 %v10039_v41, %v11640_v33 }
 0x302   : > { %v3686_v33 = vperm.slane %v2473_v1, %v10050_v45  ;;  %v3685_v19 = vperm.slane %v2472_v61, %v10042_v42 }
 0x303   : > { %1546 = vadd.xlane.f32.xlu2 %v1545_v4  ;;  %1543 = vadd.xlane.f32.xlu1 %v1542_v56  ;;  %v475_v4 = vld [vmem:[%s9854_s18 + $0x940] sm:$0xff]  ;;  %v474_v56 = vld [vmem:[%s9854_s18 + $0x938] sm:$0x3] }
 0x304   : > { %1540 = vadd.xlane.f32.xlu0 %v1539_v39  ;;  %v3669_v39 = vperm.slane %v11710_v59, %v10085_v46 }
 0x305   : > { %v4356_v38 = vpop.f32.mrf.mxu0 }
 0x306   : > { %v4394_v58 = vmax.f32 %v4356_v38, 0.0  ;;  %v11664_v17 = vpop.xlane.xlu2 %1420  ;;  %v11666_v62 = vpop.xlane.xlu1 %1417  ;;  %v3673_v38 = vsel %vm3269_vm4, %v3672_v25, %v3671_v20 }
 0x307   : > { %v11669_v36 = vpop.xlane.xlu0 %1414  ;;  %v2477_v54 = vmul.f32 %v10039_v41, %v11666_v62  ;;  %v3688_v62 = vperm.slane %v2474_v50, %v10077_v3  ;;  %v2478_v49 = vmul.f32 %v10039_v41, %v11664_v17 }
 0x308   : > { %8851 = vmatmul.msk.f32.gmra.mxu1 %vm4406_vm15, %v4394_v58  ;;  %v2476_v28 = vmul.f32 %v10039_v41, %v11669_v36 }
 0x30b   : > { %1555 = vadd.xlane.f32.xlu2 %v1554_v21  ;;  %1552 = vadd.xlane.f32.xlu1 %v1551_v51  ;;  %v3666_v21 = vsel %vm3269_vm4, %v3665_v12, %v3664_v16  ;;  %v3680_v51 = vsel %vm3269_vm4, %v3679_v13, %v3678_v53  ;;  %v3692_v12 = vperm.slane %v2476_v28, %v10042_v42  ;;  %v476_v13 = vld [vmem:[%s9854_s18 + $0x948] sm:$0xff] }
 0x30c   : > { %1549 = vadd.xlane.f32.xlu0 %v1548_v9  ;;  %v3683_v9 = vperm.slane %v2471_v37, %v10085_v46  ;;  %v3682_v6 = vsel %vm3273_vm5, %v3681_v26, %v3680_v51  ;;  %v3668_v55 = vsel %vm3273_vm5, %v3667_v48, %v3666_v21  ;;  %v1584_v48 = vsel %vm691_vm0, %v476_v13, 0.0 }
 0x30d   : > { %v3670_v50 = vsel %vm3277_vm6, %v3669_v39, %v3668_v55 }
 0x30e   : > { %v11677_v5 = vpop.xlane.xlu2 %1429  ;;  %v11679_v43 = vpop.xlane.xlu1 %1426  ;;  %v3684_v52 = vsel %vm3277_vm6, %v3683_v9, %v3682_v6 }
 0x30f   : > { %v11682_v7 = vpop.xlane.xlu0 %1423  ;;  %v2481_v60 = vmul.f32 %v10039_v41, %v11677_v5  ;;  %v2480_v36 = vmul.f32 %v10039_v41, %v11679_v43  ;;  %v3687_v5 = vsel %vm3269_vm4, %v3686_v33, %v3685_v19  ;;  %v479_v19 = vld [vmem:[%s9854_s18 + $0x960] sm:$0xff] }
 0x310   : > { %v2479_v17 = vmul.f32 %v10039_v41, %v11682_v7 }
 0x311   : > { %v3700_v53 = vperm.slane %v2481_v60, %v10050_v45  ;;  %v3699_v16 = vperm.slane %v2480_v36, %v10042_v42 }
 0x312   : > { %v3697_v2 = vperm.slane %v2479_v17, %v10085_v46  ;;  %v482_v17 = vld [vmem:[%s9854_s18 + $0x978] sm:$0x3] }
 0x313   : > { %1564 = vadd.xlane.f32.xlu2 %v1563_v23  ;;  %1561 = vadd.xlane.f32.xlu1 %v1560_v0  ;;  %v1581_v23 = vsel %vm691_vm0, %v475_v4, 0.0  ;;  %v1578_v0 = vsel %vm701_vm1, %v474_v56, 0.0 }
 0x314   : > { %1558 = vadd.xlane.f32.xlu0 %v1557_v11  ;;  %v3675_v11 = vsel %vm3273_vm5, %v3674_v22, %v3673_v38  ;;  %v3689_v38 = vsel %vm3273_vm5, %v3688_v62, %v3687_v5 }
 0x315   : > { %v3677_v31 = vsel %vm3277_vm6, %v3676_v40, %v3675_v11  ;;  %v3695_v40 = vperm.slane %v2478_v49, %v10077_v3  ;;  %v480_v11 = vld [vmem:[%s9854_s18 + $0x968] sm:$0xff] }
 0x316   : > { %v11695_v10 = vpop.xlane.xlu2 %1438  ;;  %v11697_v35 = vpop.xlane.xlu1 %1435  ;;  %v4224_v6 = vsel %vm4168_vm7, %v3677_v31, %v3670_v50  ;;  %v1596_v62 = vsel %vm691_vm0, %v480_v11, 0.0  ;;  %v492_v50 = vld [vmem:[%s9854_s18 + $0x9c8] sm:$0xff]  ;;  %v491_v11 = vld [vmem:[%s9854_s18 + $0x9c0] sm:$0xff] }
 0x317   : > { %v11704_v30 = vpop.xlane.xlu0 %1432  ;;  %v2484_v47 = vmul.f32 %v10039_v41, %v11695_v10  ;;  %v2483_v22 = vmul.f32 %v10039_v41, %v11697_v35  ;;  %v4225_v39 = vsel %vm4170_vm8, %v3684_v52, %v4224_v6 }
 0x318   : > { %v2482_v8 = vmul.f32 %v10039_v41, %v11704_v30 }
 0x319   : > { %v3706_v4 = vperm.slane %v2484_v47, %v10042_v42  ;;  %v3704_v61 = vperm.slane %v2483_v22, %v10085_v46  ;;  %v487_v22 = vld [vmem:[%s9854_s18 + $0x9a0] sm:$0xff] }
 0x31a   : > { %v3702_v56 = vperm.slane %v2482_v8, %v10077_v3 }
 0x31b   : > { %1573 = vadd.xlane.f32.xlu2 %v1572_v32  ;;  %1570 = vadd.xlane.f32.xlu1 %v1569_v44  ;;  %v3690_v32 = vperm.slane %v11750_v14, %v10085_v46  ;;  %v477_v44 = vld [vmem:[%s9854_s18 + $0x950] sm:$0xff] }
 0x31c   : > { %1567 = vadd.xlane.f32.xlu0 %v1566_v29  ;;  %v3693_v29 = vperm.slane %v2477_v54, %v10050_v45  ;;  %v1587_v30 = vsel %vm691_vm0, %v477_v44, 0.0  ;;  %v481_v14 = vld [vmem:[%s9854_s18 + $0x970] sm:$0xff]  ;;  %v1593_v44 = vsel %vm691_vm0, %v479_v19, 0.0  ;;  %v1629_v19 = vsel %vm691_vm0, %v491_v11, 0.0 }
 0x31d   : > { %v3691_v33 = vsel %vm3277_vm6, %v3690_v32, %v3689_v38  ;;  %v1599_v31 = vsel %vm691_vm0, %v481_v14, 0.0  ;;  %v493_v14 = vld [vmem:[%s9854_s18 + $0x9d0] sm:$0xff] }
 0x31e   : > { %v1448_v24 = vpop.xlane.xlu2 %1447  ;;  %v1445_v58 = vpop.xlane.xlu1 %1444  ;;  %v4226_v5 = vsel %vm4172_vm9, %v3691_v33, %v4225_v39  ;;  %v1635_v33 = vsel %vm691_vm0, %v493_v14, 0.0  ;;  %v495_v39 = vld [vmem:[%s9854_s18 + $0x9e0] sm:$0xff]  ;;  %v505_v11 = vld [vmem:[%s9854_s18 + $0xa30] sm:$0xff] }
 0x31f   : > { %v1442_v57 = vpop.xlane.xlu0 %1441  ;;  %v2486_v25 = vmul.f32 %v10039_v41, %v1445_v58  ;;  %v2487_v7 = vmul.f32 %v10039_v41, %v1448_v24  ;;  %v3694_v58 = vsel %vm3269_vm4, %v3693_v29, %v3692_v12  ;;  %v3701_v24 = vsel %vm3269_vm4, %v3700_v53, %v3699_v16 }
 0x320   : > { %v2485_v15 = vmul.f32 %v10039_v41, %v1442_v57  ;;  %v1602_v16 = vsel %vm701_vm1, %v482_v17, 0.0  ;;  %v502_v17 = vld [vmem:[%s9854_s18 + $0xa18] sm:$0x3] }
 0x321   : > { %v3709_v35 = vperm.slane %v2486_v25, %v10077_v3 }
 0x322   : > { %v3707_v10 = vperm.slane %v2485_v15, %v10050_v45 }
 0x323   : > { %1582 = vadd.xlane.f32.xlu2 %v1581_v23  ;;  %1579 = vadd.xlane.f32.xlu1 %v1578_v0  ;;  %v3703_v23 = vsel %vm3273_vm5, %v3702_v56, %v3701_v24  ;;  %v3711_v0 = vperm.slane %v2487_v7, %v10085_v46  ;;  %v485_v56 = vld [vmem:[%s9854_s18 + $0x990] sm:$0xff] }
 0x324   : > { %1576 = vadd.xlane.f32.xlu0 %v1575_v63  ;;  %v3708_v21 = vsel %vm3269_vm4, %v3707_v10, %v3706_v4  ;;  %v3696_v63 = vsel %vm3273_vm5, %v3695_v40, %v3694_v58  ;;  %v3705_v36 = vsel %vm3277_vm6, %v3704_v61, %v3703_v23  ;;  %v1611_v40 = vsel %vm691_vm0, %v485_v56, 0.0  ;;  %v490_v58 = vld [vmem:[%s9854_s18 + $0x9b8] sm:$0x3] }
 0x325   : > { %v3710_v59 = vsel %vm3273_vm5, %v3709_v35, %v3708_v21  ;;  %v3698_v55 = vsel %vm3277_vm6, %v3697_v2, %v3696_v63  ;;  %v489_v35 = vld [vmem:[%s9854_s18 + $0x9b0] sm:$0xff]  ;;  %v1626_v61 = vsel %vm701_vm1, %v490_v58, 0.0  ;;  %v1632_v63 = vsel %vm691_vm0, %v492_v50, 0.0 }
 0x326   : > { %v1457_v43 = vpop.xlane.xlu2 %1456  ;;  %v1454_v20 = vpop.xlane.xlu1 %1453  ;;  %v3712_v52 = vsel %vm3277_vm6, %v3711_v0, %v3710_v59  ;;  %v4227_v47 = vsel %vm4174_vm10, %v3698_v55, %v4226_v5  ;;  %v496_v59 = vld [vmem:[%s9854_s18 + $0x9e8] sm:$0xff]  ;;  %v498_v5 = vld [vmem:[%s9854_s18 + $0x9f8] sm:$0x3] }
 0x327   : > { %v1451_v37 = vpop.xlane.xlu0 %1450  ;;  %v2489_v26 = vmul.f32 %v10039_v41, %v1454_v20  ;;  %v2490_v51 = vmul.f32 %v10039_v41, %v1457_v43  ;;  %v4228_v29 = vsel %vm4176_vm11, %v3705_v36, %v4227_v47  ;;  %v484_v20 = vld [vmem:[%s9854_s18 + $0x988] sm:$0xff] }
 0x328   : > { %v2488_v1 = vmul.f32 %v10039_v41, %v1451_v37  ;;  %v4229_v25 = vsel %vm4178_vm12, %v3712_v52, %v4228_v29  ;;  %v1608_v37 = vsel %vm691_vm0, %v484_v20, 0.0  ;;  %v499_v52 = vld [vmem:[%s9854_s18 + $0xa00] sm:$0xff] }
 0x329   : > { %v3714_v9 = vperm.slane %v2489_v26, %v10050_v45  ;;  %v3716_v60 = vperm.slane %v2490_v51, %v10077_v3  ;;  %v486_v26 = vld [vmem:[%s9854_s18 + $0x998] sm:$0x3]  ;;  %v488_v51 = vld [vmem:[%s9854_s18 + $0x9a8] sm:$0xff] }
 0x32a   : > { %v3713_v57 = vperm.slane %v2488_v1, %v10042_v42  ;;  %v1614_v38 = vsel %vm701_vm1, %v486_v26, 0.0  ;;  %v500_v26 = vld [vmem:[%s9854_s18 + $0xa08] sm:$0xff] }
 0x32b   : > { %1591 = vadd.xlane.f32.xlu2 %v1590_v34  ;;  %1588 = vadd.xlane.f32.xlu1 %v1587_v30  ;;  %v483_v34 = vld [vmem:[%s9854_s18 + $0x980] sm:$0xff] }
 0x32c   : > { %1585 = vadd.xlane.f32.xlu0 %v1584_v48  ;;  %v3715_v18 = vsel %vm3269_vm4, %v3714_v9, %v3713_v57  ;;  %v1605_v30 = vsel %vm691_vm0, %v483_v34, 0.0  ;;  %v1617_v48 = vsel %vm691_vm0, %v487_v22, 0.0  ;;  %v1623_v9 = vsel %vm691_vm0, %v489_v35, 0.0 }
 0x32d   : > { %v3717_v8 = vsel %vm3273_vm5, %v3716_v60, %v3715_v18  ;;  %v1620_v57 = vsel %vm691_vm0, %v488_v51, 0.0  ;;  %v1644_v18 = vsel %vm691_vm0, %v496_v59, 0.0  ;;  %v1656_v35 = vsel %vm691_vm0, %v500_v26, 0.0 }
 0x32e   : > { %v11826_v54 = vpop.xlane.xlu2 %1465  ;;  %v11828_v28 = vpop.xlane.xlu1 %1462 }
 0x32f   : > { %v1460_v15 = vpop.xlane.xlu0 %1459  ;;  %v2493_v20 = vmul.f32 %v10039_v41, %v11826_v54 }
 0x330   : > { %v2491_v32 = vmul.f32 %v10039_v41, %v1460_v15  ;;  %v494_v15 = vld [vmem:[%s9854_s18 + $0x9d8] sm:$0x3] }
 0x332   : > { %v3718_v49 = vperm.slane %v2491_v32, %v10085_v46  ;;  %v1641_v32 = vsel %vm691_vm0, %v495_v39, 0.0 }
 0x333   : > { %1600 = vadd.xlane.f32.xlu2 %v1599_v31  ;;  %1597 = vadd.xlane.f32.xlu1 %v1596_v62  ;;  %v1638_v62 = vsel %vm701_vm1, %v494_v15, 0.0  ;;  %v503_v15 = vld [vmem:[%s9854_s18 + $0xa20] sm:$0xff] }
 0x334   : > { %1594 = vadd.xlane.f32.xlu0 %v1593_v44  ;;  %v3719_v12 = vsel %vm3277_vm6, %v3718_v49, %v3717_v8  ;;  %v497_v8 = vld [vmem:[%s9854_s18 + $0x9f0] sm:$0xff] }
 0x335   : > { %v4230_v43 = vsel %vm4180_vm13, %v3719_v12, %v4229_v25  ;;  %v1653_v12 = vsel %vm691_vm0, %v499_v52, 0.0  ;;  %v1650_v25 = vsel %vm701_vm1, %v498_v5, 0.0 }
 0x336   : > { %8837 = vmatmul.msk.f32.gmra.mxu0 %vm4287_vm14, %v4230_v43  ;;  %v11853_v13 = vpop.xlane.xlu2 %1474  ;;  %v11855_v53 = vpop.xlane.xlu1 %1471  ;;  %v1647_v43 = vsel %vm691_vm0, %v497_v8, 0.0 }
 0x337   : > { %v11858_v10 = vpop.xlane.xlu0 %1468  ;;  %v2496_v56 = vmul.f32 %v10039_v41, %v11853_v13 }
 0x33b   : > { %1609 = vadd.xlane.f32.xlu2 %v1608_v37  ;;  %1606 = vadd.xlane.f32.xlu1 %v1605_v30  ;;  %v501_v37 = vld [vmem:[%s9854_s18 + $0xa10] sm:$0xff]  ;;  %v2492_v30 = vmul.f32 %v10039_v41, %v11828_v28 }
 0x33c   : > { %1603 = vadd.xlane.f32.xlu0 %v1602_v16  ;;  %v1659_v28 = vsel %vm691_vm0, %v501_v37, 0.0 }
 0x33d   : > { %v3720_v13 = vperm.slane %v2492_v30, %v10042_v42 }
 0x33e   : > { %v11865_v1 = vpop.xlane.xlu2 %1483  ;;  %v11867_v4 = vpop.xlane.xlu1 %1480 }
 0x33f   : > { %v1478_v7 = vpop.xlane.xlu0 %1477  ;;  %v2498_v54 = vmul.f32 %v10039_v41, %v11867_v4 }
 0x340   : > { %v2497_v34 = vmul.f32 %v10039_v41, %v1478_v7  ;;  %v1662_v7 = vsel %vm701_vm1, %v502_v17, 0.0 }
 0x341   : > { %v3730_v14 = vperm.slane %v2498_v54, %v10077_v3  ;;  %v506_v54 = vld [vmem:[%s9854_s18 + $0xa38] sm:$0x3] }
 0x342   : > { %v3728_v58 = vperm.slane %v2497_v34, %v10050_v45 }
 0x343   : > { %1618 = vadd.xlane.f32.xlu2 %v1617_v48  ;;  %1615 = vadd.xlane.f32.xlu1 %v1614_v38  ;;  %v2494_v48 = vmul.f32 %v10039_v41, %v11858_v10  ;;  %v2495_v10 = vmul.f32 %v10039_v41, %v11855_v53 }
 0x344   : > { %1612 = vadd.xlane.f32.xlu0 %v1611_v40  ;;  %v3721_v40 = vperm.slane %v2493_v20, %v10050_v45 }
 0x346   : > { %v11875_v2 = vpop.xlane.xlu2 %1492  ;;  %v11877_v21 = vpop.xlane.xlu1 %1489 }
 0x347   : > { %v11880_v24 = vpop.xlane.xlu0 %1486  ;;  %v2501_v4 = vmul.f32 %v10039_v41, %v11877_v21  ;;  %v2502_v53 = vmul.f32 %v10039_v41, %v11875_v2 }
 0x348   : > { %v2500_v51 = vmul.f32 %v10039_v41, %v11880_v24 }
 0x34b   : > { %1627 = vadd.xlane.f32.xlu2 %v1626_v61  ;;  %1624 = vadd.xlane.f32.xlu1 %v1623_v9  ;;  %v3727_v61 = vperm.slane %v2496_v56, %v10042_v42  ;;  %v3723_v9 = vperm.slane %v2494_v48, %v10077_v3  ;;  %v507_v48 = vld [vmem:[%s9854_s18 + $0xa40] sm:$0xff] }
 0x34c   : > { %1621 = vadd.xlane.f32.xlu0 %v1620_v57  ;;  %v2499_v57 = vmul.f32 %v10039_v41, %v11865_v1  ;;  %v3722_v1 = vsel %vm3269_vm4, %v3721_v40, %v3720_v13 }
 0x34d   : > { %v3729_v21 = vsel %vm3269_vm4, %v3728_v58, %v3727_v61 }
 0x34e   : > { %v11887_v23 = vpop.xlane.xlu2 %1501  ;;  %v11889_v0 = vpop.xlane.xlu1 %1498 }
 0x34f   : > { %v11892_v6 = vpop.xlane.xlu0 %1495  ;;  %v2505_v24 = vmul.f32 %v10039_v41, %v11887_v23  ;;  %v2504_v50 = vmul.f32 %v10039_v41, %v11889_v0  ;;  %v3724_v23 = vsel %vm3273_vm5, %v3723_v9, %v3722_v1  ;;  %v3732_v0 = vperm.slane %v2499_v57, %v10085_v46 }
 0x350   : > { %v2503_v2 = vmul.f32 %v10039_v41, %v11892_v6  ;;  %v1674_v57 = vsel %vm701_vm1, %v506_v54, 0.0 }
 0x351   : > { %v3742_v6 = vperm.slane %v2505_v24, %v10050_v45  ;;  %v3741_v5 = vperm.slane %v2504_v50, %v10042_v42 }
 0x353   : > { %1636 = vadd.xlane.f32.xlu2 %v1635_v33  ;;  %1633 = vadd.xlane.f32.xlu1 %v1632_v63  ;;  %v504_v33 = vld [vmem:[%s9854_s18 + $0xa28] sm:$0xff]  ;;  %v3735_v63 = vperm.slane %v2501_v4, %v10050_v45  ;;  %v3743_v30 = vsel %vm3269_vm4, %v3742_v6, %v3741_v5  ;;  %v509_v6 = vld [vmem:[%s9854_s18 + $0xa50] sm:$0xff] }
 0x354   : > { %1630 = vadd.xlane.f32.xlu0 %v1629_v19  ;;  %v3734_v19 = vperm.slane %v2500_v51, %v10042_v42  ;;  %v1668_v52 = vsel %vm691_vm0, %v504_v33, 0.0 }
 0x356   : > { %v11899_v55 = vpop.xlane.xlu2 %1510  ;;  %v11901_v60 = vpop.xlane.xlu1 %1507 }
 0x357   : > { %v11904_v31 = vpop.xlane.xlu0 %1504  ;;  %v2508_v34 = vmul.f32 %v10039_v41, %v11899_v55  ;;  %v2507_v17 = vmul.f32 %v10039_v41, %v11901_v60  ;;  %v508_v55 = vld [vmem:[%s9854_s18 + $0xa48] sm:$0xff] }
 0x358   : > { %v2506_v8 = vmul.f32 %v10039_v41, %v11904_v31  ;;  %v1680_v9 = vsel %vm691_vm0, %v508_v55, 0.0 }
 0x359   : > { %v3748_v13 = vperm.slane %v2508_v34, %v10042_v42 }
 0x35a   : > { %v3744_v56 = vperm.slane %v2506_v8, %v10077_v3 }
 0x35b   : > { %1645 = vadd.xlane.f32.xlu2 %v1644_v18  ;;  %1642 = vadd.xlane.f32.xlu1 %v1641_v32  ;;  %v3725_v18 = vperm.slane %v2495_v10, %v10085_v46  ;;  %v3746_v10 = vperm.slane %v2507_v17, %v10085_v46 }
 0x35c   : > { %1639 = vadd.xlane.f32.xlu0 %v1638_v62  ;;  %v4359_v36 = vpop.f32.mrf.mxu0  ;;  %v3731_v62 = vsel %vm3273_vm5, %v3730_v14, %v3729_v21 }
 0x35d   : > { %v4395_v44 = vmax.f32 %v4359_v36, 0.0  ;;  %v3737_v36 = vperm.slane %v2502_v53, %v10077_v3  ;;  %v3726_v31 = vsel %vm3277_vm6, %v3725_v18, %v3724_v23  ;;  %v3733_v37 = vsel %vm3277_vm6, %v3732_v0, %v3731_v62  ;;  %v511_v18 = vld [vmem:[%s9854_s18 + $0xa60] sm:$0xff]  ;;  %v510_v23 = vld [vmem:[%s9854_s18 + $0xa58] sm:$0x3] }
 0x35e   : > { %v11911_v49 = vpop.xlane.xlu2 %1519  ;;  %v11913_v47 = vpop.xlane.xlu1 %1516  ;;  %v1689_v17 = vsel %vm691_vm0, %v511_v18, 0.0 }
 0x35f   : > { %8852 = vmatmul.msk.f32.gmra.mxu1 %vm4406_vm15, %v4395_v44  ;;  %v1514_v29 = vpop.xlane.xlu0 %1513  ;;  %v1671_v44 = vsel %vm691_vm0, %v505_v11, 0.0  ;;  %v2511_v14 = vmul.f32 %v10039_v41, %v11911_v49 }
 0x360   : > { %v2509_v20 = vmul.f32 %v10039_v41, %v1514_v29  ;;  %v2510_v29 = vmul.f32 %v10039_v41, %v11913_v47 }
 0x362   : > { %v3751_v53 = vperm.slane %v2510_v29, %v10077_v3 }
 0x363   : > { %1654 = vadd.xlane.f32.xlu2 %v1653_v12  ;;  %1651 = vadd.xlane.f32.xlu1 %v1650_v25  ;;  %v1665_v12 = vsel %vm691_vm0, %v503_v15, 0.0  ;;  %v3736_v25 = vsel %vm3269_vm4, %v3735_v63, %v3734_v19 }
 0x364   : > { %1648 = vadd.xlane.f32.xlu0 %v1647_v43  ;;  %v3739_v43 = vperm.slane %v2503_v2, %v10085_v46  ;;  %v3738_v26 = vsel %vm3273_vm5, %v3737_v36, %v3736_v25 }
 0x366   : > { %v11927_v16 = vpop.xlane.xlu2 %1528  ;;  %v11929_v22 = vpop.xlane.xlu1 %1525  ;;  %v3740_v60 = vsel %vm3277_vm6, %v3739_v43, %v3738_v26  ;;  %v1683_v26 = vsel %vm691_vm0, %v509_v6, 0.0  ;;  %v521_v6 = vld [vmem:[%s9854_s18 + $0xab0] sm:$0xff] }
 0x367   : > { %v11936_v38 = vpop.xlane.xlu0 %1522  ;;  %v2514_v21 = vmul.f32 %v10039_v41, %v11927_v16  ;;  %v4231_v16 = vsel %vm4168_vm7, %v3733_v37, %v3726_v31  ;;  %v1686_v31 = vsel %vm701_vm1, %v510_v23, 0.0 }
 0x368   : > { %v2512_v40 = vmul.f32 %v10039_v41, %v11936_v38  ;;  %v3745_v38 = vsel %vm3273_vm5, %v3744_v56, %v3743_v30  ;;  %v4232_v2 = vsel %vm4170_vm8, %v3740_v60, %v4231_v16 }
 0x369   : > { %v3758_v15 = vperm.slane %v2514_v21, %v10077_v3  ;;  %v517_v21 = vld [vmem:[%s9854_s18 + $0xa90] sm:$0xff] }
 0x36a   : > { %v3755_v11 = vperm.slane %v2512_v40, %v10042_v42 }
 0x36b   : > { %1663 = vadd.xlane.f32.xlu2 %v1662_v7  ;;  %1660 = vadd.xlane.f32.xlu1 %v1659_v28  ;;  %v3749_v7 = vperm.slane %v2509_v20, %v10050_v45  ;;  %v2513_v28 = vmul.f32 %v10039_v41, %v11929_v22  ;;  %v1677_v22 = vsel %vm691_vm0, %v507_v48, 0.0 }
 0x36c   : > { %1657 = vadd.xlane.f32.xlu0 %v1656_v35 }
 0x36d   : > { %v3750_v24 = vsel %vm3269_vm4, %v3749_v7, %v3748_v13  ;;  %v3756_v50 = vperm.slane %v2513_v28, %v10050_v45  ;;  %v514_v13 = vld [vmem:[%s9854_s18 + $0xa78] sm:$0x3] }
 0x36e   : > { %v1538_v59 = vpop.xlane.xlu2 %1537  ;;  %v1535_v39 = vpop.xlane.xlu1 %1534  ;;  %v3752_v0 = vsel %vm3273_vm5, %v3751_v53, %v3750_v24  ;;  %v516_v24 = vld [vmem:[%s9854_s18 + $0xa88] sm:$0xff] }
 0x36f   : > { %v1532_v32 = vpop.xlane.xlu0 %1531  ;;  %v2517_v47 = vmul.f32 %v10039_v41, %v1538_v59  ;;  %v2516_v4 = vmul.f32 %v10039_v41, %v1535_v39  ;;  %v3747_v59 = vsel %vm3277_vm6, %v3746_v10, %v3745_v38  ;;  %v3753_v39 = vperm.slane %v2511_v14, %v10085_v46  ;;  %v513_v10 = vld [vmem:[%s9854_s18 + $0xa70] sm:$0xff] }
 0x370   : > { %v2515_v33 = vmul.f32 %v10039_v41, %v1532_v32  ;;  %v3757_v32 = vsel %vm3269_vm4, %v3756_v50, %v3755_v11  ;;  %v4233_v7 = vsel %vm4172_vm9, %v3747_v59, %v4232_v2  ;;  %v1698_v38 = vsel %vm701_vm1, %v514_v13, 0.0  ;;  %v519_v2 = vld [vmem:[%s9854_s18 + $0xaa0] sm:$0xff] }
 0x371   : > { %v3763_v1 = vperm.slane %v2517_v47, %v10050_v45  ;;  %v3762_v63 = vperm.slane %v2516_v4, %v10042_v42  ;;  %v3759_v37 = vsel %vm3273_vm5, %v3758_v15, %v3757_v32  ;;  %v3754_v56 = vsel %vm3277_vm6, %v3753_v39, %v3752_v0  ;;  %v518_v15 = vld [vmem:[%s9854_s18 + $0xa98] sm:$0x3] }
 0x372   : > { %v3760_v62 = vperm.slane %v2515_v33, %v10085_v46  ;;  %v4234_v40 = vsel %vm4174_vm10, %v3754_v56, %v4233_v7  ;;  %v1695_v14 = vsel %vm691_vm0, %v513_v10, 0.0  ;;  %v515_v33 = vld [vmem:[%s9854_s18 + $0xa80] sm:$0xff]  ;;  %v1713_v0 = vsel %vm691_vm0, %v519_v2, 0.0  ;;  %v532_v10 = vld [vmem:[%s9854_s18 + $0xb08] sm:$0xff]  ;;  %v533_v2 = vld [vmem:[%s9854_s18 + $0xb10] sm:$0xff] }
 0x373   : > { %1672 = vadd.xlane.f32.xlu2 %v1671_v44  ;;  %1669 = vadd.xlane.f32.xlu1 %v1668_v52  ;;  %v3764_v5 = vsel %vm3269_vm4, %v3763_v1, %v3762_v63  ;;  %v1707_v63 = vsel %vm691_vm0, %v517_v21, 0.0  ;;  %v1701_v16 = vsel %vm691_vm0, %v515_v33, 0.0  ;;  %v1710_v32 = vsel %vm701_vm1, %v518_v15, 0.0 }
 0x374   : > { %1666 = vadd.xlane.f32.xlu0 %v1665_v12  ;;  %v3761_v29 = vsel %vm3277_vm6, %v3760_v62, %v3759_v37  ;;  %v523_v62 = vld [vmem:[%s9854_s18 + $0xac0] sm:$0xff] }
 0x376   : > { %v1547_v58 = vpop.xlane.xlu2 %1546  ;;  %v1544_v35 = vpop.xlane.xlu1 %1543 }
 0x377   : > { %v1541_v51 = vpop.xlane.xlu0 %1540  ;;  %v2519_v49 = vmul.f32 %v10039_v41, %v1544_v35  ;;  %v2520_v36 = vmul.f32 %v10039_v41, %v1547_v58  ;;  %v4235_v35 = vsel %vm4176_vm11, %v3761_v29, %v4234_v40  ;;  %v529_v29 = vld [vmem:[%s9854_s18 + $0xaf0] sm:$0xff] }
 0x378   : > { %v2518_v61 = vmul.f32 %v10039_v41, %v1541_v51 }
 0x379   : > { %v3767_v8 = vperm.slane %v2519_v49, %v10085_v46  ;;  %v3769_v55 = vperm.slane %v2520_v36, %v10042_v42  ;;  %v1704_v49 = vsel %vm691_vm0, %v516_v24, 0.0  ;;  %v522_v36 = vld [vmem:[%s9854_s18 + $0xab8] sm:$0x3] }
 0x37a   : > { %v3765_v19 = vperm.slane %v2518_v61, %v10077_v3 }
 0x37b   : > { %1681 = vadd.xlane.f32.xlu2 %v1680_v9  ;;  %1678 = vadd.xlane.f32.xlu1 %v1677_v22  ;;  %v512_v9 = vld [vmem:[%s9854_s18 + $0xa68] sm:$0xff] }
 0x37c   : > { %1675 = vadd.xlane.f32.xlu0 %v1674_v57  ;;  %v3766_v20 = vsel %vm3273_vm5, %v3765_v19, %v3764_v5  ;;  %v1692_v53 = vsel %vm691_vm0, %v512_v9, 0.0  ;;  %v520_v19 = vld [vmem:[%s9854_s18 + $0xaa8] sm:$0xff] }
 0x37d   : > { %v3768_v60 = vsel %vm3277_vm6, %v3767_v8, %v3766_v20  ;;  %v1716_v23 = vsel %vm691_vm0, %v520_v19, 0.0  ;;  %v1725_v8 = vsel %vm691_vm0, %v523_v62, 0.0  ;;  %v525_v20 = vld [vmem:[%s9854_s18 + $0xad0] sm:$0xff] }
 0x37e   : > { %v1556_v44 = vpop.xlane.xlu2 %1555  ;;  %v1553_v52 = vpop.xlane.xlu1 %1552  ;;  %v4236_v61 = vsel %vm4178_vm12, %v3768_v60, %v4235_v35  ;;  %v527_v60 = vld [vmem:[%s9854_s18 + $0xae0] sm:$0xff] }
 0x37f   : > { %v2523_v12 = vmul.f32 %v10039_v41, %v1556_v44  ;;  %v2522_v25 = vmul.f32 %v10039_v41, %v1553_v52  ;;  %v1550_v43 = vpop.xlane.xlu0 %1549 }
 0x380   : > { %v2521_v34 = vmul.f32 %v10039_v41, %v1550_v43  ;;  %v526_v43 = vld [vmem:[%s9854_s18 + $0xad8] sm:$0x3] }
 0x381   : > { %v3772_v30 = vperm.slane %v2522_v25, %v10077_v3  ;;  %v3774_v48 = vperm.slane %v2523_v12, %v10085_v46  ;;  %v1722_v12 = vsel %vm701_vm1, %v522_v36, 0.0  ;;  %v1719_v25 = vsel %vm691_vm0, %v521_v6, 0.0 }
 0x382   : > { %v3770_v54 = vperm.slane %v2521_v34, %v10050_v45 }
 0x383   : > { %1690 = vadd.xlane.f32.xlu2 %v1689_v17  ;;  %1687 = vadd.xlane.f32.xlu1 %v1686_v31  ;;  %v524_v31 = vld [vmem:[%s9854_s18 + $0xac8] sm:$0xff] }
 0x384   : > { %v3771_v28 = vsel %vm3269_vm4, %v3770_v54, %v3769_v55  ;;  %1684 = vadd.xlane.f32.xlu0 %v1683_v26  ;;  %v1731_v26 = vsel %vm691_vm0, %v525_v20, 0.0  ;;  %v1728_v56 = vsel %vm691_vm0, %v524_v31, 0.0  ;;  %v528_v55 = vld [vmem:[%s9854_s18 + $0xae8] sm:$0xff] }
 0x385   : > { %v3773_v58 = vsel %vm3273_vm5, %v3772_v30, %v3771_v28  ;;  %v1734_v30 = vsel %vm701_vm1, %v526_v43, 0.0  ;;  %v1743_v28 = vsel %vm691_vm0, %v529_v29, 0.0  ;;  %v1740_v40 = vsel %vm691_vm0, %v528_v55, 0.0 }
 0x386   : > { %v12065_v47 = vpop.xlane.xlu2 %1564  ;;  %v12067_v4 = vpop.xlane.xlu1 %1561  ;;  %v3775_v51 = vsel %vm3277_vm6, %v3774_v48, %v3773_v58  ;;  %v1737_v58 = vsel %vm691_vm0, %v527_v60, 0.0 }
 0x387   : > { %v12072_v22 = vpop.xlane.xlu0 %1558  ;;  %v4237_v57 = vsel %vm4180_vm13, %v3775_v51, %v4236_v61  ;;  %v531_v51 = vld [vmem:[%s9854_s18 + $0xb00] sm:$0xff]  ;;  %v2525_v24 = vmul.f32 %v10039_v41, %v12067_v4  ;;  %v2526_v15 = vmul.f32 %v10039_v41, %v12065_v47 }
 0x388   : > { %8838 = vmatmul.msk.f32.vlgmr.msra.gmra.mxu2 %vm4287_vm14, %v4237_v57  ;;  %v530_v57 = vld [vmem:[%s9854_s18 + $0xaf8] sm:$0x3]  ;;  %v2524_v33 = vmul.f32 %v10039_v41, %v12072_v22 }
 0x389   : > { %v1746_v21 = vsel %vm701_vm1, %v530_v57, 0.0 }
 0x38a   : > { %v3776_v4 = vperm.slane %v2524_v33, %v10042_v42 }
 0x38b   : > { %1699 = vadd.xlane.f32.xlu2 %v1698_v38  ;;  %1696 = vadd.xlane.f32.xlu1 %v1695_v14  ;;  %v1752_v14 = vsel %vm691_vm0, %v532_v10, 0.0 }
 0x38c   : > { %1693 = vadd.xlane.f32.xlu0 %v1692_v53  ;;  %v1749_v53 = vsel %vm691_vm0, %v531_v51, 0.0 }
 0x38e   : > { %v12081_v50 = vpop.xlane.xlu2 %1573  ;;  %v12083_v11 = vpop.xlane.xlu1 %1570 }
 0x38f   : > { %v12086_v1 = vpop.xlane.xlu0 %1567  ;;  %v2528_v62 = vmul.f32 %v10039_v41, %v12083_v11 }
 0x390   : > { %v2527_v11 = vmul.f32 %v10039_v41, %v12086_v1 }
 0x391   : > { %v3783_v43 = vperm.slane %v2528_v62, %v10042_v42 }
 0x393   : > { %1708 = vadd.xlane.f32.xlu2 %v1707_v63  ;;  %1705 = vadd.xlane.f32.xlu1 %v1704_v49  ;;  %v535_v63 = vld [vmem:[%s9854_s18 + $0xb20] sm:$0xff]  ;;  %v534_v49 = vld [vmem:[%s9854_s18 + $0xb18] sm:$0x3] }
 0x394   : > { %1702 = vadd.xlane.f32.xlu0 %v1701_v16  ;;  %v1761_v36 = vsel %vm691_vm0, %v535_v63, 0.0  ;;  %v1758_v6 = vsel %vm701_vm1, %v534_v49, 0.0 }
 0x396   : > { %v12093_v59 = vpop.xlane.xlu2 %1582  ;;  %v12095_v39 = vpop.xlane.xlu1 %1579 }
 0x397   : > { %v12098_v18 = vpop.xlane.xlu0 %1576  ;;  %v2532_v47 = vmul.f32 %v10039_v41, %v12093_v59  ;;  %v2531_v20 = vmul.f32 %v10039_v41, %v12095_v39 }
 0x399   : > { %v3788_v10 = vperm.slane %v2531_v20, %v10085_v46 }
 0x39b   : > { %1717 = vadd.xlane.f32.xlu2 %v1716_v23  ;;  %1714 = vadd.xlane.f32.xlu1 %v1713_v0  ;;  %v3777_v23 = vperm.slane %v2525_v24, %v10050_v45 }
 0x39c   : > { %1711 = vadd.xlane.f32.xlu0 %v1710_v32  ;;  %v2529_v32 = vmul.f32 %v10039_v41, %v12081_v50 }
 0x39d   : > { %v3778_v59 = vsel %vm3269_vm4, %v3777_v23, %v3776_v4 }
 0x39e   : > { %v12105_v44 = vpop.xlane.xlu2 %1591  ;;  %v12107_v52 = vpop.xlane.xlu1 %1588 }
 0x39f   : > { %v1586_v5 = vpop.xlane.xlu0 %1585  ;;  %v2534_v50 = vmul.f32 %v10039_v41, %v12107_v52  ;;  %v3790_v52 = vperm.slane %v2532_v47, %v10042_v42  ;;  %v2535_v1 = vmul.f32 %v10039_v41, %v12105_v44 }
 0x3a0   : > { %v2533_v0 = vmul.f32 %v10039_v41, %v1586_v5  ;;  %v1755_v5 = vsel %vm691_vm0, %v533_v2, 0.0 }
 0x3a1   : > { %v3795_v57 = vperm.slane %v2535_v1, %v10085_v46 }
 0x3a3   : > { %1726 = vadd.xlane.f32.xlu2 %v1725_v8  ;;  %1723 = vadd.xlane.f32.xlu1 %v1722_v12  ;;  %v2530_v8 = vmul.f32 %v10039_v41, %v12098_v18  ;;  %v3779_v12 = vperm.slane %v2526_v15, %v10077_v3  ;;  %v3784_v18 = vperm.slane %v2529_v32, %v10050_v45  ;;  %v540_v32 = vld [vmem:[%s9854_s18 + $0xb48] sm:$0xff] }
 0x3a4   : > { %1720 = vadd.xlane.f32.xlu0 %v1719_v25  ;;  %v3791_v25 = vperm.slane %v2533_v0, %v10050_v45 }
 0x3a5   : > { %v3786_v31 = vperm.slane %v2530_v8, %v10077_v3 }
 0x3a6   : > { %v12115_v34 = vpop.xlane.xlu2 %1600  ;;  %v12117_v17 = vpop.xlane.xlu1 %1597 }
 0x3a7   : > { %v12120_v37 = vpop.xlane.xlu0 %1594  ;;  %v2537_v29 = vmul.f32 %v10039_v41, %v12117_v17 }
 0x3a8   : > { %v2536_v55 = vmul.f32 %v10039_v41, %v12120_v37 }
 0x3a9   : > { %v3798_v24 = vperm.slane %v2537_v29, %v10050_v45 }
 0x3aa   : > { %v3797_v33 = vperm.slane %v2536_v55, %v10042_v42 }
 0x3ab   : > { %1735 = vadd.xlane.f32.xlu2 %v1734_v30  ;;  %1732 = vadd.xlane.f32.xlu1 %v1731_v26  ;;  %v538_v30 = vld [vmem:[%s9854_s18 + $0xb38] sm:$0x3]  ;;  %v537_v26 = vld [vmem:[%s9854_s18 + $0xb30] sm:$0xff] }
 0x3ac   : > { %1729 = vadd.xlane.f32.xlu0 %v1728_v56  ;;  %v3793_v56 = vperm.slane %v2534_v50, %v10077_v3  ;;  %v1770_v51 = vsel %vm701_vm1, %v538_v30, 0.0  ;;  %v1767_v17 = vsel %vm691_vm0, %v537_v26, 0.0  ;;  %v3799_v62 = vsel %vm3269_vm4, %v3798_v24, %v3797_v33 }
 0x3ae   : > { %v12127_v48 = vpop.xlane.xlu2 %1609  ;;  %v12129_v54 = vpop.xlane.xlu1 %1606 }
 0x3af   : > { %v12132_v7 = vpop.xlane.xlu0 %1603  ;;  %v2541_v63 = vmul.f32 %v10039_v41, %v12127_v48  ;;  %v2540_v49 = vmul.f32 %v10039_v41, %v12129_v54 }
 0x3b1   : > { %v3805_v50 = vperm.slane %v2541_v63, %v10050_v45 }
 0x3b3   : > { %v4362_v35 = vpop.f32.mrf.mxu0  ;;  %1744 = vadd.xlane.f32.xlu2 %v1743_v28  ;;  %1741 = vadd.xlane.f32.xlu1 %v1740_v40  ;;  %v536_v28 = vld [vmem:[%s9854_s18 + $0xb28] sm:$0xff]  ;;  %v3780_v40 = vsel %vm3273_vm5, %v3779_v12, %v3778_v59  ;;  %v1776_v59 = vsel %vm691_vm0, %v540_v32, 0.0 }
 0x3b4   : > { %v4396_v13 = vmax.f32 %v4362_v35, 0.0  ;;  %1738 = vadd.xlane.f32.xlu0 %v1737_v58  ;;  %v3781_v58 = vperm.slane %v2527_v11, %v10085_v46  ;;  %v3792_v35 = vsel %vm3269_vm4, %v3791_v25, %v3790_v52 }
 0x3b6   : > { %8853 = vmatmul.msk.f32.gmra.mxu1 %vm4406_vm15, %v4396_v13  ;;  %v12140_v61 = vpop.xlane.xlu2 %1618  ;;  %v12142_v9 = vpop.xlane.xlu1 %1615  ;;  %v3785_v13 = vsel %vm3269_vm4, %v3784_v18, %v3783_v43  ;;  %v3782_v15 = vsel %vm3277_vm6, %v3781_v58, %v3780_v40 }
 0x3b7   : > { %v12145_v38 = vpop.xlane.xlu0 %1612  ;;  %v3787_v37 = vsel %vm3273_vm5, %v3786_v31, %v3785_v13  ;;  %v2544_v48 = vmul.f32 %v10039_v41, %v12140_v61  ;;  %v3804_v61 = vperm.slane %v2540_v49, %v10042_v42  ;;  %v2543_v25 = vmul.f32 %v10039_v41, %v12142_v9  ;;  %v543_v13 = vld [vmem:[%s9854_s18 + $0xb60] sm:$0xff] }
 0x3b8   : > { %v3789_v23 = vsel %vm3277_vm6, %v3788_v10, %v3787_v37  ;;  %v2542_v54 = vmul.f32 %v10039_v41, %v12145_v38 }
 0x3b9   : > { %v3811_v43 = vperm.slane %v2544_v48, %v10042_v42 }
 0x3ba   : > { %v3807_v20 = vperm.slane %v2542_v54, %v10077_v3 }
 0x3bb   : > { %1753 = vadd.xlane.f32.xlu2 %v1752_v14  ;;  %1750 = vadd.xlane.f32.xlu1 %v1749_v53  ;;  %v2538_v14 = vmul.f32 %v10039_v41, %v12115_v34  ;;  %v1764_v53 = vsel %vm691_vm0, %v536_v28, 0.0  ;;  %v2539_v34 = vmul.f32 %v10039_v41, %v12132_v7  ;;  %v541_v7 = vld [vmem:[%s9854_s18 + $0xb50] sm:$0xff] }
 0x3bc   : > { %1747 = vadd.xlane.f32.xlu0 %v1746_v21  ;;  %v3794_v21 = vsel %vm3273_vm5, %v3793_v56, %v3792_v35 }
 0x3bd   : > { %v3796_v4 = vsel %vm3277_vm6, %v3795_v57, %v3794_v21  ;;  %v3800_v0 = vperm.slane %v2538_v14, %v10077_v3  ;;  %v3802_v38 = vperm.slane %v2539_v34, %v10085_v46 }
 0x3be   : > { %v12156_v16 = vpop.xlane.xlu2 %1627  ;;  %v12158_v19 = vpop.xlane.xlu1 %1624 }
 0x3bf   : > { %v1622_v22 = vpop.xlane.xlu0 %1621  ;;  %v2547_v52 = vmul.f32 %v10039_v41, %v12156_v16  ;;  %v4238_v16 = vsel %vm4168_vm7, %v3789_v23, %v3782_v15  ;;  %v3801_v10 = vsel %vm3273_vm5, %v3800_v0, %v3799_v62  ;;  %v1785_v23 = vsel %vm691_vm0, %v543_v13, 0.0  ;;  %v556_v13 = vld [vmem:[%s9854_s18 + $0xbc8] sm:$0xff] }
 0x3c0   : > { %v2545_v2 = vmul.f32 %v10039_v41, %v1622_v22  ;;  %v539_v22 = vld [vmem:[%s9854_s18 + $0xb40] sm:$0xff]  ;;  %v4239_v28 = vsel %vm4170_vm8, %v3796_v4, %v4238_v16  ;;  %v3803_v21 = vsel %vm3277_vm6, %v3802_v38, %v3801_v10  ;;  %v552_v16 = vld [vmem:[%s9854_s18 + $0xba8] sm:$0xff] }
 0x3c1   : > { %v1773_v18 = vsel %vm691_vm0, %v539_v22, 0.0  ;;  %v3816_v58 = vperm.slane %v2547_v52, %v10085_v46  ;;  %v549_v52 = vld [vmem:[%s9854_s18 + $0xb90] sm:$0xff]  ;;  %v555_v10 = vld [vmem:[%s9854_s18 + $0xbc0] sm:$0xff] }
 0x3c2   : > { %v3812_v12 = vperm.slane %v2545_v2, %v10050_v45 }
 0x3c3   : > { %1762 = vadd.xlane.f32.xlu2 %v1761_v36  ;;  %1759 = vadd.xlane.f32.xlu1 %v1758_v6  ;;  %v2546_v36 = vmul.f32 %v10039_v41, %v12158_v19  ;;  %v1779_v19 = vsel %vm691_vm0, %v541_v7, 0.0  ;;  %v4240_v7 = vsel %vm4172_vm9, %v3803_v21, %v4239_v28  ;;  %v551_v28 = vld [vmem:[%s9854_s18 + $0xba0] sm:$0xff]  ;;  %v1821_v21 = vsel %vm691_vm0, %v555_v10, 0.0 }
 0x3c4   : > { %1756 = vadd.xlane.f32.xlu0 %v1755_v5  ;;  %v3813_v56 = vsel %vm3269_vm4, %v3812_v12, %v3811_v43 }
 0x3c5   : > { %v3814_v1 = vperm.slane %v2546_v36, %v10077_v3 }
 0x3c6   : > { %v1637_v60 = vpop.xlane.xlu2 %1636  ;;  %v1634_v39 = vpop.xlane.xlu1 %1633 }
 0x3c7   : > { %v1631_v44 = vpop.xlane.xlu0 %1630  ;;  %v2549_v6 = vmul.f32 %v10039_v41, %v1634_v39  ;;  %v2550_v31 = vmul.f32 %v10039_v41, %v1637_v60  ;;  %v3806_v60 = vsel %vm3269_vm4, %v3805_v50, %v3804_v61  ;;  %v3809_v39 = vperm.slane %v2543_v25, %v10085_v46  ;;  %v547_v50 = vld [vmem:[%s9854_s18 + $0xb80] sm:$0xff]  ;;  %v546_v61 = vld [vmem:[%s9854_s18 + $0xb78] sm:$0x3]  ;;  %v545_v25 = vld [vmem:[%s9854_s18 + $0xb70] sm:$0xff] }
 0x3c8   : > { %v2548_v47 = vmul.f32 %v10039_v41, %v1631_v44  ;;  %v3808_v40 = vsel %vm3273_vm5, %v3807_v20, %v3806_v60  ;;  %v544_v44 = vld [vmem:[%s9854_s18 + $0xb68] sm:$0xff]  ;;  %v1791_v43 = vsel %vm691_vm0, %v545_v25, 0.0  ;;  %v550_v20 = vld [vmem:[%s9854_s18 + $0xb98] sm:$0x3] }
 0x3c9   : > { %v3819_v30 = vperm.slane %v2549_v6, %v10050_v45  ;;  %v3821_v35 = vperm.slane %v2550_v31, %v10077_v3  ;;  %v3810_v34 = vsel %vm3277_vm6, %v3809_v39, %v3808_v40  ;;  %v1788_v15 = vsel %vm691_vm0, %v544_v44, 0.0 }
 0x3ca   : > { %v3818_v9 = vperm.slane %v2548_v47, %v10042_v42  ;;  %v4241_v36 = vsel %vm4174_vm10, %v3810_v34, %v4240_v7  ;;  %v1809_v44 = vsel %vm691_vm0, %v551_v28, 0.0 }
 0x3cb   : > { %1771 = vadd.xlane.f32.xlu2 %v1770_v51  ;;  %1768 = vadd.xlane.f32.xlu1 %v1767_v17  ;;  %v3815_v51 = vsel %vm3273_vm5, %v3814_v1, %v3813_v56  ;;  %v1803_v56 = vsel %vm691_vm0, %v549_v52, 0.0 }
 0x3cc   : > { %1765 = vadd.xlane.f32.xlu0 %v1764_v53  ;;  %v3820_v17 = vsel %vm3269_vm4, %v3819_v30, %v3818_v9  ;;  %v542_v53 = vld [vmem:[%s9854_s18 + $0xb58] sm:$0x3]  ;;  %v3817_v48 = vsel %vm3277_vm6, %v3816_v58, %v3815_v51  ;;  %v548_v30 = vld [vmem:[%s9854_s18 + $0xb88] sm:$0xff] }
 0x3cd   : > { %v1782_v0 = vsel %vm701_vm1, %v542_v53, 0.0  ;;  %v3822_v54 = vsel %vm3273_vm5, %v3821_v35, %v3820_v17  ;;  %v4242_v47 = vsel %vm4176_vm11, %v3817_v48, %v4241_v36  ;;  %v1812_v35 = vsel %vm691_vm0, %v552_v16, 0.0  ;;  %v562_v48 = vld [vmem:[%s9854_s18 + $0xbf8] sm:$0x3] }
 0x3ce   : > { %v1646_v8 = vpop.xlane.xlu2 %1645  ;;  %v1643_v5 = vpop.xlane.xlu1 %1642  ;;  %v1824_v53 = vsel %vm691_vm0, %v556_v13, 0.0  ;;  %v1842_v36 = vsel %vm701_vm1, %v562_v48, 0.0 }
 0x3cf   : > { %v1640_v11 = vpop.xlane.xlu0 %1639  ;;  %v2553_v29 = vmul.f32 %v10039_v41, %v1646_v8  ;;  %v2552_v55 = vmul.f32 %v10039_v41, %v1643_v5 }
 0x3d0   : > { %v2551_v26 = vmul.f32 %v10039_v41, %v1640_v11 }
 0x3d1   : > { %v3826_v24 = vperm.slane %v2553_v29, %v10050_v45  ;;  %v3825_v33 = vperm.slane %v2552_v55, %v10042_v42  ;;  %v1800_v29 = vsel %vm691_vm0, %v548_v30, 0.0  ;;  %v553_v55 = vld [vmem:[%s9854_s18 + $0xbb0] sm:$0xff]  ;;  %v568_v30 = vld [vmem:[%s9854_s18 + $0xc28] sm:$0xff] }
 0x3d2   : > { %v3823_v37 = vperm.slane %v2551_v26, %v10085_v46  ;;  %v1806_v26 = vsel %vm701_vm1, %v550_v20, 0.0  ;;  %v1815_v58 = vsel %vm691_vm0, %v553_v55, 0.0 }
 0x3d3   : > { %1780 = vadd.xlane.f32.xlu2 %v1779_v19  ;;  %1777 = vadd.xlane.f32.xlu1 %v1776_v59  ;;  %v3827_v62 = vsel %vm3269_vm4, %v3826_v24, %v3825_v33  ;;  %v1797_v59 = vsel %vm691_vm0, %v547_v50, 0.0  ;;  %v559_v33 = vld [vmem:[%s9854_s18 + $0xbe0] sm:$0xff]  ;;  %v565_v50 = vld [vmem:[%s9854_s18 + $0xc10] sm:$0xff] }
 0x3d4   : > { %1774 = vadd.xlane.f32.xlu0 %v1773_v18  ;;  %v3824_v22 = vsel %vm3277_vm6, %v3823_v37, %v3822_v54  ;;  %v1794_v18 = vsel %vm701_vm1, %v546_v61, 0.0  ;;  %v554_v37 = vld [vmem:[%s9854_s18 + $0xbb8] sm:$0x3]  ;;  %v561_v54 = vld [vmem:[%s9854_s18 + $0xbf0] sm:$0xff]  ;;  %v564_v61 = vld [vmem:[%s9854_s18 + $0xc08] sm:$0xff] }
 0x3d5   : > { %v4243_v5 = vsel %vm4178_vm12, %v3824_v22, %v4242_v47  ;;  %v1818_v24 = vsel %vm701_vm1, %v554_v37, 0.0  ;;  %v560_v22 = vld [vmem:[%s9854_s18 + $0xbe8] sm:$0xff]  ;;  %v1848_v20 = vsel %vm691_vm0, %v564_v61, 0.0 }
 0x3d6   : > { %v12272_v57 = vpop.xlane.xlu2 %1654  ;;  %v1652_v14 = vpop.xlane.xlu1 %1651  ;;  %v1836_v47 = vsel %vm691_vm0, %v560_v22, 0.0 }
 0x3d7   : > { %v2555_v63 = vmul.f32 %v10039_v41, %v1652_v14  ;;  %v1649_v49 = vpop.xlane.xlu0 %1648 }
 0x3d8   : > { %v2554_v2 = vmul.f32 %v10039_v41, %v1649_v49 }
 0x3d9   : > { %v3830_v4 = vperm.slane %v2555_v63, %v10085_v46  ;;  %v558_v63 = vld [vmem:[%s9854_s18 + $0xbd8] sm:$0x3] }
 0x3da   : > { %v3828_v32 = vperm.slane %v2554_v2, %v10077_v3  ;;  %v557_v2 = vld [vmem:[%s9854_s18 + $0xbd0] sm:$0xff] }
 0x3db   : > { %1789 = vadd.xlane.f32.xlu2 %v1788_v15  ;;  %1786 = vadd.xlane.f32.xlu1 %v1785_v23  ;;  %v1833_v23 = vsel %vm691_vm0, %v559_v33, 0.0 }
 0x3dc   : > { %1783 = vadd.xlane.f32.xlu0 %v1782_v0  ;;  %v3829_v6 = vsel %vm3273_vm5, %v3828_v32, %v3827_v62  ;;  %v1827_v0 = vsel %vm691_vm0, %v557_v2, 0.0 }
 0x3dd   : > { %v3831_v8 = vsel %vm3277_vm6, %v3830_v4, %v3829_v6  ;;  %v1830_v4 = vsel %vm701_vm1, %v558_v63, 0.0  ;;  %v1839_v6 = vsel %vm691_vm0, %v561_v54, 0.0 }
 0x3de   : > { %v12298_v38 = vpop.xlane.xlu2 %1663  ;;  %v12300_v12 = vpop.xlane.xlu1 %1660  ;;  %v4244_v11 = vsel %vm4180_vm13, %v3831_v8, %v4243_v5 }
 0x3df   : > { %8839 = vmatmul.msk.f32.gmra.mxu2 %vm4287_vm14, %v4244_v11  ;;  %v12305_v19 = vpop.xlane.xlu0 %1657  ;;  %v2558_v37 = vmul.f32 %v10039_v41, %v12300_v12 }
 0x3e3   : > { %1798 = vadd.xlane.f32.xlu2 %v1797_v59  ;;  %1795 = vadd.xlane.f32.xlu1 %v1794_v18  ;;  %v563_v59 = vld [vmem:[%s9854_s18 + $0xc00] sm:$0xff] }
 0x3e4   : > { %1792 = vadd.xlane.f32.xlu0 %v1791_v43  ;;  %v1851_v43 = vsel %vm691_vm0, %v565_v50, 0.0  ;;  %v1845_v52 = vsel %vm691_vm0, %v563_v59, 0.0 }
 0x3e6   : > { %v12312_v31 = vpop.xlane.xlu2 %1672  ;;  %v12314_v1 = vpop.xlane.xlu1 %1669 }
 0x3e7   : > { %v12317_v9 = vpop.xlane.xlu0 %1666 }
 0x3e8   : > { %v2560_v55 = vmul.f32 %v10039_v41, %v12317_v9  ;;  %v1860_v9 = vsel %vm691_vm0, %v568_v30, 0.0 }
 0x3eb   : > { %1807 = vadd.xlane.f32.xlu2 %v1806_v26  ;;  %1804 = vadd.xlane.f32.xlu1 %v1803_v56  ;;  %v567_v26 = vld [vmem:[%s9854_s18 + $0xc20] sm:$0xff]  ;;  %v2557_v56 = vmul.f32 %v10039_v41, %v12305_v19  ;;  %v2556_v19 = vmul.f32 %v10039_v41, %v12272_v57 }
 0x3ec   : > { %1801 = vadd.xlane.f32.xlu0 %v1800_v29  ;;  %v2561_v29 = vmul.f32 %v10039_v41, %v12314_v1  ;;  %v12406_v1 = vmul.f32 %v10039_v41, %v12298_v38  ;;  %v1857_v10 = vsel %vm691_vm0, %v567_v26, 0.0 }
 0x3ed   : > { %v3833_v38 = vperm.slane %v2557_v56, %v10050_v45  ;;  %v3832_v33 = vperm.slane %v2556_v19, %v10042_v42 }
 0x3ee   : > { %v12324_v60 = vpop.xlane.xlu2 %1681  ;;  %v12326_v39 = vpop.xlane.xlu1 %1678 }
 0x3ef   : > { %v12329_v40 = vpop.xlane.xlu0 %1675 }
 0x3f3   : > { %1816 = vadd.xlane.f32.xlu2 %v1815_v58  ;;  %1813 = vadd.xlane.f32.xlu1 %v1812_v35  ;;  %v566_v58 = vld [vmem:[%s9854_s18 + $0xc18] sm:$0x3]  ;;  %v2565_v35 = vmul.f32 %v10039_v41, %v12324_v60  ;;  %v2562_v60 = vmul.f32 %v10039_v41, %v12312_v31 }
 0x3f4   : > { %1810 = vadd.xlane.f32.xlu0 %v1809_v44  ;;  %v2564_v44 = vmul.f32 %v10039_v41, %v12326_v39  ;;  %v1854_v57 = vsel %vm701_vm1, %v566_v58, 0.0 }
 0x3f5   : > { %v3847_v12 = vperm.slane %v2565_v35, %v10050_v45  ;;  %v3842_v63 = vperm.slane %v2562_v60, %v10077_v3 }
 0x3f6   : > { %v12336_v51 = vpop.xlane.xlu2 %1690  ;;  %v12338_v17 = vpop.xlane.xlu1 %1687  ;;  %v3846_v31 = vperm.slane %v2564_v44, %v10042_v42  ;;  %v574_v44 = vld [vmem:[%s9854_s18 + $0xc58] sm:$0x3] }
 0x3f7   : > { %v12341_v14 = vpop.xlane.xlu0 %1684 }
 0x3f8   : > { %v2566_v39 = vmul.f32 %v10039_v41, %v12341_v14  ;;  %v2567_v14 = vmul.f32 %v10039_v41, %v12338_v17  ;;  %v3835_v17 = vperm.slane %v2558_v37, %v10077_v3 }
 0x3fa   : > { %v3849_v2 = vperm.slane %v2566_v39, %v10077_v3 }
 0x3fb   : > { %1825 = vadd.xlane.f32.xlu2 %v1824_v53  ;;  %1822 = vadd.xlane.f32.xlu1 %v1821_v21  ;;  %v3840_v53 = vperm.slane %v2561_v29, %v10050_v45  ;;  %v3839_v21 = vperm.slane %v2560_v55, %v10042_v42 }
 0x3fc   : > { %1819 = vadd.xlane.f32.xlu0 %v1818_v24  ;;  %v2563_v24 = vmul.f32 %v10039_v41, %v12329_v40 }
 0x3fd   : > { %v3841_v48 = vsel %vm3269_vm4, %v3840_v53, %v3839_v21 }
 0x3fe   : > { %v12348_v49 = vpop.xlane.xlu2 %1699  ;;  %v12350_v34 = vpop.xlane.xlu1 %1696  ;;  %v3844_v54 = vperm.slane %v2563_v24, %v10085_v46  ;;  %v1878_v24 = vsel %vm701_vm1, %v574_v44, 0.0 }
 0x3ff   : > { %v12353_v15 = vpop.xlane.xlu0 %1693  ;;  %v12446_v61 = vmul.f32 %v10039_v41, %v12348_v49  ;;  %v2570_v59 = vmul.f32 %v10039_v41, %v12350_v34 }
 0x400   : > { %v2569_v40 = vmul.f32 %v10039_v41, %v12353_v15  ;;  %v2568_v15 = vmul.f32 %v10039_v41, %v12336_v51 }
 0x402   : > { %v3854_v51 = vperm.slane %v2569_v40, %v10050_v45  ;;  %v3853_v55 = vperm.slane %v2568_v15, %v10042_v42 }
 0x403   : > { %1834 = vadd.xlane.f32.xlu2 %v1833_v23  ;;  %1831 = vadd.xlane.f32.xlu1 %v1830_v4  ;;  %v571_v23 = vld [vmem:[%s9854_s18 + $0xc40] sm:$0xff]  ;;  %v570_v4 = vld [vmem:[%s9854_s18 + $0xc38] sm:$0x3] }
 0x404   : > { %1828 = vadd.xlane.f32.xlu0 %v1827_v0  ;;  %v3837_v0 = vperm.slane %v12406_v1, %v10085_v46 }
 0x406   : > { %v12360_v7 = vpop.xlane.xlu2 %1708  ;;  %v12362_v32 = vpop.xlane.xlu1 %1705 }
 0x407   : > { %v12365_v62 = vpop.xlane.xlu0 %1702  ;;  %v2573_v34 = vmul.f32 %v10039_v41, %v12362_v32  ;;  %v3856_v32 = vperm.slane %v2570_v59, %v10077_v3  ;;  %v2574_v37 = vmul.f32 %v10039_v41, %v12360_v7 }
 0x408   : > { %v2572_v29 = vmul.f32 %v10039_v41, %v12365_v62 }
 0x40b   : > { %v4365_v8 = vpop.f32.mrf.mxu2  ;;  %1843 = vadd.xlane.f32.xlu2 %v1842_v36  ;;  %1840 = vadd.xlane.f32.xlu1 %v1839_v6  ;;  %v569_v6 = vld [vmem:[%s9854_s18 + $0xc30] sm:$0xff] }
 0x40c   : > { %v4397_v5 = vmax.f32 %v4365_v8, 0.0  ;;  %1837 = vadd.xlane.f32.xlu0 %v1836_v47  ;;  %v3834_v47 = vsel %vm3269_vm4, %v3833_v38, %v3832_v33  ;;  %v3848_v8 = vsel %vm3269_vm4, %v3847_v12, %v3846_v31  ;;  %v1863_v26 = vsel %vm691_vm0, %v569_v6, 0.0  ;;  %v572_v12 = vld [vmem:[%s9854_s18 + $0xc48] sm:$0xff] }
 0x40d   : > { %v3850_v30 = vsel %vm3273_vm5, %v3849_v2, %v3848_v8  ;;  %v3836_v49 = vsel %vm3273_vm5, %v3835_v17, %v3834_v47  ;;  %v3860_v38 = vperm.slane %v2572_v29, %v10042_v42  ;;  %v1872_v17 = vsel %vm691_vm0, %v572_v12, 0.0 }
 0x40e   : > { %8854 = vmatmul.msk.f32.gmra.mxu1 %vm4406_vm15, %v4397_v5  ;;  %v12373_v11 = vpop.xlane.xlu2 %1717  ;;  %v12375_v25 = vpop.xlane.xlu1 %1714  ;;  %v3851_v5 = vperm.slane %v2567_v14, %v10085_v46  ;;  %v3838_v59 = vsel %vm3277_vm6, %v3837_v0, %v3836_v49 }
 0x40f   : > { %v12378_v18 = vpop.xlane.xlu0 %1711  ;;  %v2577_v58 = vmul.f32 %v10039_v41, %v12373_v11  ;;  %v2576_v62 = vmul.f32 %v10039_v41, %v12375_v25  ;;  %v3855_v11 = vsel %vm3269_vm4, %v3854_v51, %v3853_v55  ;;  %v575_v55 = vld [vmem:[%s9854_s18 + $0xc60] sm:$0xff] }
 0x410   : > { %v3852_v19 = vsel %vm3277_vm6, %v3851_v5, %v3850_v30  ;;  %v2575_v7 = vmul.f32 %v10039_v41, %v12378_v18 }
 0x411   : > { %v3868_v31 = vperm.slane %v2577_v58, %v10050_v45  ;;  %v3867_v33 = vperm.slane %v2576_v62, %v10042_v42 }
 0x412   : > { %v3865_v6 = vperm.slane %v2575_v7, %v10085_v46  ;;  %v578_v7 = vld [vmem:[%s9854_s18 + $0xc78] sm:$0x3] }
 0x413   : > { %1852 = vadd.xlane.f32.xlu2 %v1851_v43  ;;  %1849 = vadd.xlane.f32.xlu1 %v1848_v20  ;;  %v1869_v43 = vsel %vm691_vm0, %v571_v23, 0.0  ;;  %v1866_v20 = vsel %vm701_vm1, %v570_v4, 0.0 }
 0x414   : > { %1846 = vadd.xlane.f32.xlu0 %v1845_v52  ;;  %v3843_v52 = vsel %vm3273_vm5, %v3842_v63, %v3841_v48  ;;  %v3857_v48 = vsel %vm3273_vm5, %v3856_v32, %v3855_v11 }
 0x415   : > { %v3845_v56 = vsel %vm3277_vm6, %v3844_v54, %v3843_v52  ;;  %v3863_v54 = vperm.slane %v2574_v37, %v10077_v3  ;;  %v576_v52 = vld [vmem:[%s9854_s18 + $0xc68] sm:$0xff] }
 0x416   : > { %v12391_v16 = vpop.xlane.xlu2 %1726  ;;  %v12393_v28 = vpop.xlane.xlu1 %1723  ;;  %v4245_v30 = vsel %vm4168_vm7, %v3845_v56, %v3838_v59  ;;  %v1884_v32 = vsel %vm691_vm0, %v576_v52, 0.0  ;;  %v588_v59 = vld [vmem:[%s9854_s18 + $0xcc8] sm:$0xff]  ;;  %v587_v52 = vld [vmem:[%s9854_s18 + $0xcc0] sm:$0xff] }
 0x417   : > { %v12400_v13 = vpop.xlane.xlu0 %1720  ;;  %v2580_v60 = vmul.f32 %v10039_v41, %v12391_v16  ;;  %v2579_v63 = vmul.f32 %v10039_v41, %v12393_v28  ;;  %v4246_v0 = vsel %vm4170_vm8, %v3852_v19, %v4245_v30 }
 0x418   : > { %v2578_v39 = vmul.f32 %v10039_v41, %v12400_v13 }
 0x419   : > { %v3874_v23 = vperm.slane %v2580_v60, %v10042_v42  ;;  %v3872_v15 = vperm.slane %v2579_v63, %v10085_v46  ;;  %v583_v63 = vld [vmem:[%s9854_s18 + $0xca0] sm:$0xff] }
 0x41a   : > { %v3870_v4 = vperm.slane %v2578_v39, %v10077_v3 }
 0x41b   : > { %1861 = vadd.xlane.f32.xlu2 %v1860_v9  ;;  %1858 = vadd.xlane.f32.xlu1 %v1857_v10  ;;  %v3858_v9 = vperm.slane %v12446_v61, %v10085_v46  ;;  %v573_v10 = vld [vmem:[%s9854_s18 + $0xc50] sm:$0xff] }
 0x41c   : > { %1855 = vadd.xlane.f32.xlu0 %v1854_v57  ;;  %v3861_v57 = vperm.slane %v2573_v34, %v10050_v45  ;;  %v1875_v13 = vsel %vm691_vm0, %v573_v10, 0.0  ;;  %v577_v61 = vld [vmem:[%s9854_s18 + $0xc70] sm:$0xff]  ;;  %v1881_v10 = vsel %vm691_vm0, %v575_v55, 0.0  ;;  %v1917_v55 = vsel %vm691_vm0, %v587_v52, 0.0 }
 0x41d   : > { %v3859_v51 = vsel %vm3277_vm6, %v3858_v9, %v3857_v48  ;;  %v1887_v56 = vsel %vm691_vm0, %v577_v61, 0.0  ;;  %v589_v61 = vld [vmem:[%s9854_s18 + $0xcd0] sm:$0xff] }
 0x41e   : > { %v1736_v22 = vpop.xlane.xlu2 %1735  ;;  %v1733_v36 = vpop.xlane.xlu1 %1732  ;;  %v4247_v11 = vsel %vm4172_vm9, %v3859_v51, %v4246_v0  ;;  %v1923_v51 = vsel %vm691_vm0, %v589_v61, 0.0  ;;  %v591_v0 = vld [vmem:[%s9854_s18 + $0xce0] sm:$0xff]  ;;  %v601_v52 = vld [vmem:[%s9854_s18 + $0xd30] sm:$0xff] }
 0x41f   : > { %v1730_v50 = vpop.xlane.xlu0 %1729  ;;  %v2582_v53 = vmul.f32 %v10039_v41, %v1733_v36  ;;  %v2583_v18 = vmul.f32 %v10039_v41, %v1736_v22  ;;  %v3862_v36 = vsel %vm3269_vm4, %v3861_v57, %v3860_v38  ;;  %v3869_v22 = vsel %vm3269_vm4, %v3868_v31, %v3867_v33 }
 0x420   : > { %v2581_v35 = vmul.f32 %v10039_v41, %v1730_v50  ;;  %v1890_v33 = vsel %vm701_vm1, %v578_v7, 0.0  ;;  %v598_v7 = vld [vmem:[%s9854_s18 + $0xd18] sm:$0x3] }
 0x421   : > { %v3877_v28 = vperm.slane %v2582_v53, %v10077_v3 }
 0x422   : > { %v3875_v16 = vperm.slane %v2581_v35, %v10050_v45 }
 0x423   : > { %1870 = vadd.xlane.f32.xlu2 %v1869_v43  ;;  %1867 = vadd.xlane.f32.xlu1 %v1866_v20  ;;  %v3871_v43 = vsel %vm3273_vm5, %v3870_v4, %v3869_v22  ;;  %v3879_v20 = vperm.slane %v2583_v18, %v10085_v46  ;;  %v581_v4 = vld [vmem:[%s9854_s18 + $0xc90] sm:$0xff] }
 0x424   : > { %1864 = vadd.xlane.f32.xlu0 %v1863_v26  ;;  %v3876_v47 = vsel %vm3269_vm4, %v3875_v16, %v3874_v23  ;;  %v3864_v26 = vsel %vm3273_vm5, %v3863_v54, %v3862_v36  ;;  %v3873_v62 = vsel %vm3277_vm6, %v3872_v15, %v3871_v43  ;;  %v1899_v54 = vsel %vm691_vm0, %v581_v4, 0.0  ;;  %v586_v36 = vld [vmem:[%s9854_s18 + $0xcb8] sm:$0x3] }
 0x425   : > { %v3878_v1 = vsel %vm3273_vm5, %v3877_v28, %v3876_v47  ;;  %v3866_v49 = vsel %vm3277_vm6, %v3865_v6, %v3864_v26  ;;  %v585_v28 = vld [vmem:[%s9854_s18 + $0xcb0] sm:$0xff]  ;;  %v1914_v15 = vsel %vm701_vm1, %v586_v36, 0.0  ;;  %v1920_v26 = vsel %vm691_vm0, %v588_v59, 0.0 }
 0x426   : > { %v1745_v25 = vpop.xlane.xlu2 %1744  ;;  %v1742_v21 = vpop.xlane.xlu1 %1741  ;;  %v3880_v19 = vsel %vm3277_vm6, %v3879_v20, %v3878_v1  ;;  %v4248_v60 = vsel %vm4174_vm10, %v3866_v49, %v4247_v11  ;;  %v592_v1 = vld [vmem:[%s9854_s18 + $0xce8] sm:$0xff] }
 0x427   : > { %v1739_v14 = vpop.xlane.xlu0 %1738  ;;  %v2585_v2 = vmul.f32 %v10039_v41, %v1742_v21  ;;  %v2586_v8 = vmul.f32 %v10039_v41, %v1745_v25  ;;  %v4249_v57 = vsel %vm4176_vm11, %v3873_v62, %v4248_v60  ;;  %v580_v21 = vld [vmem:[%s9854_s18 + $0xc88] sm:$0xff]  ;;  %v595_v62 = vld [vmem:[%s9854_s18 + $0xd00] sm:$0xff] }
 0x428   : > { %v2584_v40 = vmul.f32 %v10039_v41, %v1739_v14  ;;  %v4250_v53 = vsel %vm4178_vm12, %v3880_v19, %v4249_v57  ;;  %v1896_v14 = vsel %vm691_vm0, %v580_v21, 0.0 }
 0x429   : > { %v3882_v5 = vperm.slane %v2585_v2, %v10050_v45  ;;  %v3884_v58 = vperm.slane %v2586_v8, %v10077_v3  ;;  %v582_v2 = vld [vmem:[%s9854_s18 + $0xc98] sm:$0x3]  ;;  %v584_v8 = vld [vmem:[%s9854_s18 + $0xca8] sm:$0xff] }
 0x42a   : > { %v3881_v50 = vperm.slane %v2584_v40, %v10042_v42  ;;  %v1902_v48 = vsel %vm701_vm1, %v582_v2, 0.0  ;;  %v596_v2 = vld [vmem:[%s9854_s18 + $0xd08] sm:$0xff] }
 0x42b   : > { %1879 = vadd.xlane.f32.xlu2 %v1878_v24  ;;  %1876 = vadd.xlane.f32.xlu1 %v1875_v13  ;;  %v579_v24 = vld [vmem:[%s9854_s18 + $0xc80] sm:$0xff] }
 0x42c   : > { %1873 = vadd.xlane.f32.xlu0 %v1872_v17  ;;  %v3883_v44 = vsel %vm3269_vm4, %v3882_v5, %v3881_v50  ;;  %v1893_v13 = vsel %vm691_vm0, %v579_v24, 0.0  ;;  %v1905_v17 = vsel %vm691_vm0, %v583_v63, 0.0  ;;  %v1911_v5 = vsel %vm691_vm0, %v585_v28, 0.0 }
 0x42d   : > { %v3885_v39 = vsel %vm3273_vm5, %v3884_v58, %v3883_v44  ;;  %v1908_v50 = vsel %vm691_vm0, %v584_v8, 0.0  ;;  %v1932_v44 = vsel %vm691_vm0, %v592_v1, 0.0  ;;  %v1944_v28 = vsel %vm691_vm0, %v596_v2, 0.0 }
 0x42e   : > { %v12522_v34 = vpop.xlane.xlu2 %1753  ;;  %v12524_v29 = vpop.xlane.xlu1 %1750 }
 0x42f   : > { %v1748_v35 = vpop.xlane.xlu0 %1747  ;;  %v2589_v21 = vmul.f32 %v10039_v41, %v12522_v34 }
 0x430   : > { %v2587_v9 = vmul.f32 %v10039_v41, %v1748_v35  ;;  %v590_v35 = vld [vmem:[%s9854_s18 + $0xcd8] sm:$0x3] }
 0x432   : > { %v3886_v37 = vperm.slane %v2587_v9, %v10085_v46  ;;  %v1929_v9 = vsel %vm691_vm0, %v591_v0, 0.0 }
 0x433   : > { %1888 = vadd.xlane.f32.xlu2 %v1887_v56  ;;  %1885 = vadd.xlane.f32.xlu1 %v1884_v32  ;;  %v1926_v32 = vsel %vm701_vm1, %v590_v35, 0.0  ;;  %v599_v35 = vld [vmem:[%s9854_s18 + $0xd20] sm:$0xff] }
 0x434   : > { %1882 = vadd.xlane.f32.xlu0 %v1881_v10  ;;  %v3887_v38 = vsel %vm3277_vm6, %v3886_v37, %v3885_v39  ;;  %v594_v10 = vld [vmem:[%s9854_s18 + $0xcf8] sm:$0x3]  ;;  %v593_v37 = vld [vmem:[%s9854_s18 + $0xcf0] sm:$0xff]  ;;  %v1941_v39 = vsel %vm691_vm0, %v595_v62, 0.0 }
 0x435   : > { %v4251_v25 = vsel %vm4180_vm13, %v3887_v38, %v4250_v53  ;;  %v1938_v57 = vsel %vm701_vm1, %v594_v10, 0.0  ;;  %v1935_v38 = vsel %vm691_vm0, %v593_v37, 0.0  ;;  %v1959_v10 = vsel %vm691_vm0, %v601_v52, 0.0 }
 0x436   : > { %8840 = vmatmul.msk.f32.gmra.mxu2 %vm4287_vm14, %v4251_v25  ;;  %v12549_v12 = vpop.xlane.xlu2 %1762  ;;  %v12551_v31 = vpop.xlane.xlu1 %1759 }
 0x437   : > { %v12554_v16 = vpop.xlane.xlu0 %1756  ;;  %v2592_v4 = vmul.f32 %v10039_v41, %v12549_v12 }
 0x438   : > { %v2590_v34 = vmul.f32 %v10039_v41, %v12554_v16  ;;  %v2591_v16 = vmul.f32 %v10039_v41, %v12551_v31 }
 0x43b   : > { %1897 = vadd.xlane.f32.xlu2 %v1896_v14  ;;  %1894 = vadd.xlane.f32.xlu1 %v1893_v13  ;;  %v597_v14 = vld [vmem:[%s9854_s18 + $0xd10] sm:$0xff]  ;;  %v2588_v13 = vmul.f32 %v10039_v41, %v12524_v29 }
 0x43c   : > { %1891 = vadd.xlane.f32.xlu0 %v1890_v33  ;;  %v1947_v29 = vsel %vm691_vm0, %v597_v14, 0.0 }
 0x43d   : > { %v3888_v12 = vperm.slane %v2588_v13, %v10042_v42 }
 0x43e   : > { %v12561_v40 = vpop.xlane.xlu2 %1771  ;;  %v12563_v23 = vpop.xlane.xlu1 %1768 }
 0x43f   : > { %v1766_v18 = vpop.xlane.xlu0 %1765 }
 0x440   : > { %v2593_v24 = vmul.f32 %v10039_v41, %v1766_v18  ;;  %v2594_v18 = vmul.f32 %v10039_v41, %v12563_v23 }
 0x442   : > { %v3896_v36 = vperm.slane %v2593_v24, %v10050_v45  ;;  %v3898_v61 = vperm.slane %v2594_v18, %v10077_v3  ;;  %v602_v18 = vld [vmem:[%s9854_s18 + $0xd38] sm:$0x3] }
 0x443   : > { %1906 = vadd.xlane.f32.xlu2 %v1905_v17  ;;  %1903 = vadd.xlane.f32.xlu1 %v1902_v48  ;;  %v1950_v48 = vsel %vm701_vm1, %v598_v7, 0.0 }
 0x444   : > { %1900 = vadd.xlane.f32.xlu0 %v1899_v54  ;;  %v3889_v54 = vperm.slane %v2589_v21, %v10050_v45 }
 0x446   : > { %v12571_v6 = vpop.xlane.xlu2 %1780  ;;  %v12573_v47 = vpop.xlane.xlu1 %1777 }
 0x447   : > { %v12576_v22 = vpop.xlane.xlu0 %1774  ;;  %v2597_v23 = vmul.f32 %v10039_v41, %v12573_v47  ;;  %v2598_v31 = vmul.f32 %v10039_v41, %v12571_v6 }
 0x448   : > { %v2596_v8 = vmul.f32 %v10039_v41, %v12576_v22 }
 0x449   : > { %v3905_v62 = vperm.slane %v2598_v31, %v10077_v3 }
 0x44b   : > { %1915 = vadd.xlane.f32.xlu2 %v1914_v15  ;;  %1912 = vadd.xlane.f32.xlu1 %v1911_v5  ;;  %v3895_v15 = vperm.slane %v2592_v4, %v10042_v42  ;;  %v3891_v5 = vperm.slane %v2590_v34, %v10077_v3  ;;  %v603_v34 = vld [vmem:[%s9854_s18 + $0xd40] sm:$0xff] }
 0x44c   : > { %1909 = vadd.xlane.f32.xlu0 %v1908_v50  ;;  %v2595_v50 = vmul.f32 %v10039_v41, %v12561_v40  ;;  %v3890_v40 = vsel %vm3269_vm4, %v3889_v54, %v3888_v12 }
 0x44d   : > { %v3897_v47 = vsel %vm3269_vm4, %v3896_v36, %v3895_v15 }
 0x44e   : > { %v12583_v43 = vpop.xlane.xlu2 %1789  ;;  %v12585_v20 = vpop.xlane.xlu1 %1786 }
 0x44f   : > { %v12588_v30 = vpop.xlane.xlu0 %1783  ;;  %v2601_v22 = vmul.f32 %v10039_v41, %v12583_v43  ;;  %v2600_v59 = vmul.f32 %v10039_v41, %v12585_v20  ;;  %v3892_v43 = vsel %vm3273_vm5, %v3891_v5, %v3890_v40  ;;  %v3900_v20 = vperm.slane %v2595_v50, %v10085_v46 }
 0x450   : > { %v2599_v6 = vmul.f32 %v10039_v41, %v12588_v30  ;;  %v1962_v50 = vsel %vm701_vm1, %v602_v18, 0.0 }
 0x451   : > { %v3910_v30 = vperm.slane %v2601_v22, %v10050_v45 }
 0x453   : > { %1924 = vadd.xlane.f32.xlu2 %v1923_v51  ;;  %1921 = vadd.xlane.f32.xlu1 %v1920_v26  ;;  %v600_v51 = vld [vmem:[%s9854_s18 + $0xd28] sm:$0xff]  ;;  %v3903_v26 = vperm.slane %v2597_v23, %v10050_v45 }
 0x454   : > { %1918 = vadd.xlane.f32.xlu0 %v1917_v55  ;;  %v3902_v55 = vperm.slane %v2596_v8, %v10042_v42  ;;  %v1956_v37 = vsel %vm691_vm0, %v600_v51, 0.0 }
 0x456   : > { %v12595_v49 = vpop.xlane.xlu2 %1798  ;;  %v12597_v58 = vpop.xlane.xlu1 %1795 }
 0x457   : > { %v12600_v56 = vpop.xlane.xlu0 %1792  ;;  %v2604_v24 = vmul.f32 %v10039_v41, %v12595_v49  ;;  %v2603_v7 = vmul.f32 %v10039_v41, %v12597_v58  ;;  %v604_v49 = vld [vmem:[%s9854_s18 + $0xd48] sm:$0xff] }
 0x458   : > { %v1968_v5 = vsel %vm691_vm0, %v604_v49, 0.0 }
 0x459   : > { %v3916_v12 = vperm.slane %v2604_v24, %v10042_v42 }
 0x45b   : > { %1933 = vadd.xlane.f32.xlu2 %v1932_v44  ;;  %1930 = vadd.xlane.f32.xlu1 %v1929_v9  ;;  %v3893_v44 = vperm.slane %v2591_v16, %v10085_v46  ;;  %v3914_v16 = vperm.slane %v2603_v7, %v10085_v46 }
 0x45c   : > { %1927 = vadd.xlane.f32.xlu0 %v1926_v32  ;;  %v3899_v32 = vsel %vm3273_vm5, %v3898_v61, %v3897_v47 }
 0x45d   : > { %v3901_v14 = vsel %vm3277_vm6, %v3900_v20, %v3899_v32 }
 0x45e   : > { %v12607_v19 = vpop.xlane.xlu2 %1807  ;;  %v12609_v11 = vpop.xlane.xlu1 %1804 }
 0x45f   : > { %v12612_v60 = vpop.xlane.xlu0 %1801  ;;  %v2607_v61 = vmul.f32 %v10039_v41, %v12607_v19 }
 0x460   : > { %v2605_v21 = vmul.f32 %v10039_v41, %v12612_v60  ;;  %v2606_v60 = vmul.f32 %v10039_v41, %v12609_v11 }
 0x462   : > { %v4368_v53 = vpop.f32.mrf.mxu2  ;;  %v3919_v31 = vperm.slane %v2606_v60, %v10077_v3 }
 0x463   : > { %v4398_v25 = vmax.f32 %v4368_v53, 0.0  ;;  %1942 = vadd.xlane.f32.xlu2 %v1941_v39  ;;  %1939 = vadd.xlane.f32.xlu1 %v1938_v57  ;;  %v3909_v39 = vperm.slane %v2600_v59, %v10042_v42  ;;  %v2602_v57 = vmul.f32 %v10039_v41, %v12600_v56  ;;  %v3904_v53 = vsel %vm3269_vm4, %v3903_v26, %v3902_v55 }
 0x464   : > { %1936 = vadd.xlane.f32.xlu0 %v1935_v38  ;;  %v1953_v38 = vsel %vm691_vm0, %v599_v35, 0.0  ;;  %v3894_v56 = vsel %vm3277_vm6, %v3893_v44, %v3892_v43  ;;  %v3906_v2 = vsel %vm3273_vm5, %v3905_v62, %v3904_v53  ;;  %v607_v44 = vld [vmem:[%s9854_s18 + $0xd60] sm:$0xff]  ;;  %v606_v43 = vld [vmem:[%s9854_s18 + $0xd58] sm:$0x3] }
 0x465   : > { %8855 = vmatmul.msk.f32.vlgmr.msra.gmra.mxu3 %vm4406_vm15, %v4398_v25  ;;  %v3907_v25 = vperm.slane %v2599_v6, %v10085_v46  ;;  %v3911_v13 = vsel %vm3269_vm4, %v3910_v30, %v3909_v39  ;;  %v3912_v4 = vperm.slane %v2602_v57, %v10077_v3  ;;  %v605_v30 = vld [vmem:[%s9854_s18 + $0xd50] sm:$0xff]  ;;  %v1977_v7 = vsel %vm691_vm0, %v607_v44, 0.0 }
 0x466   : > { %v12625_v33 = vpop.xlane.xlu2 %1816  ;;  %v12627_v63 = vpop.xlane.xlu1 %1813 }
 0x467   : > { %v12634_v17 = vpop.xlane.xlu0 %1810  ;;  %v3908_v58 = vsel %vm3277_vm6, %v3907_v25, %v3906_v2  ;;  %v2610_v47 = vmul.f32 %v10039_v41, %v12625_v33  ;;  %v4252_v33 = vsel %vm4168_vm7, %v3901_v14, %v3894_v56  ;;  %v1974_v56 = vsel %vm701_vm1, %v606_v43, 0.0 }
 0x468   : > { %v2608_v54 = vmul.f32 %v10039_v41, %v12634_v17  ;;  %v3913_v17 = vsel %vm3273_vm5, %v3912_v4, %v3911_v13  ;;  %v4253_v6 = vsel %vm4170_vm8, %v3908_v58, %v4252_v33  ;;  %v1971_v2 = vsel %vm691_vm0, %v605_v30, 0.0  ;;  %v617_v30 = vld [vmem:[%s9854_s18 + $0xdb0] sm:$0xff] }
 0x469   : > { %v3926_v35 = vperm.slane %v2610_v47, %v10077_v3  ;;  %v613_v47 = vld [vmem:[%s9854_s18 + $0xd90] sm:$0xff] }
 0x46a   : > { %v3923_v52 = vperm.slane %v2608_v54, %v10042_v42 }
 0x46b   : > { %1951 = vadd.xlane.f32.xlu2 %v1950_v48  ;;  %1948 = vadd.xlane.f32.xlu1 %v1947_v29  ;;  %v3917_v48 = vperm.slane %v2605_v21, %v10050_v45  ;;  %v2609_v29 = vmul.f32 %v10039_v41, %v12627_v63  ;;  %v1965_v63 = vsel %vm691_vm0, %v603_v34, 0.0 }
 0x46c   : > { %1945 = vadd.xlane.f32.xlu0 %v1944_v28 }
 0x46d   : > { %v3918_v22 = vsel %vm3269_vm4, %v3917_v48, %v3916_v12  ;;  %v3924_v59 = vperm.slane %v2609_v29, %v10050_v45  ;;  %v610_v12 = vld [vmem:[%s9854_s18 + $0xd78] sm:$0x3] }
 0x46e   : > { %v1826_v1 = vpop.xlane.xlu2 %1825  ;;  %v1823_v0 = vpop.xlane.xlu1 %1822  ;;  %v3920_v20 = vsel %vm3273_vm5, %v3919_v31, %v3918_v22  ;;  %v612_v22 = vld [vmem:[%s9854_s18 + $0xd88] sm:$0xff] }
 0x46f   : > { %v1820_v9 = vpop.xlane.xlu0 %1819  ;;  %v2613_v11 = vmul.f32 %v10039_v41, %v1826_v1  ;;  %v2612_v23 = vmul.f32 %v10039_v41, %v1823_v0  ;;  %v3915_v1 = vsel %vm3277_vm6, %v3914_v16, %v3913_v17  ;;  %v3921_v0 = vperm.slane %v2607_v61, %v10085_v46  ;;  %v609_v16 = vld [vmem:[%s9854_s18 + $0xd70] sm:$0xff] }
 0x470   : > { %v2611_v51 = vmul.f32 %v10039_v41, %v1820_v9  ;;  %v3925_v9 = vsel %vm3269_vm4, %v3924_v59, %v3923_v52  ;;  %v4254_v48 = vsel %vm4172_vm9, %v3915_v1, %v4253_v6  ;;  %v1986_v17 = vsel %vm701_vm1, %v610_v12, 0.0  ;;  %v615_v6 = vld [vmem:[%s9854_s18 + $0xda0] sm:$0xff] }
 0x471   : > { %v3931_v40 = vperm.slane %v2613_v11, %v10050_v45  ;;  %v3930_v26 = vperm.slane %v2612_v23, %v10042_v42  ;;  %v3927_v14 = vsel %vm3273_vm5, %v3926_v35, %v3925_v9  ;;  %v3922_v4 = vsel %vm3277_vm6, %v3921_v0, %v3920_v20  ;;  %v614_v35 = vld [vmem:[%s9854_s18 + $0xd98] sm:$0x3]  ;;  %v627_v12 = vld [vmem:[%s9854_s18 + $0xe00] sm:$0xff] }
 0x472   : > { %v3928_v32 = vperm.slane %v2611_v51, %v10085_v46  ;;  %v4255_v54 = vsel %vm4174_vm10, %v3922_v4, %v4254_v48  ;;  %v1983_v61 = vsel %vm691_vm0, %v609_v16, 0.0  ;;  %v611_v51 = vld [vmem:[%s9854_s18 + $0xd80] sm:$0xff]  ;;  %v2001_v20 = vsel %vm691_vm0, %v615_v6, 0.0  ;;  %v629_v6 = vld [vmem:[%s9854_s18 + $0xe10] sm:$0xff] }
 0x473   : > { %1960 = vadd.xlane.f32.xlu2 %v1959_v10  ;;  %1957 = vadd.xlane.f32.xlu1 %v1956_v37  ;;  %v3932_v39 = vsel %vm3269_vm4, %v3931_v40, %v3930_v26  ;;  %v1995_v26 = vsel %vm691_vm0, %v613_v47, 0.0  ;;  %v1989_v33 = vsel %vm691_vm0, %v611_v51, 0.0  ;;  %v1998_v9 = vsel %vm701_vm1, %v614_v35, 0.0 }
 0x474   : > { %1954 = vadd.xlane.f32.xlu0 %v1953_v38  ;;  %v3929_v60 = vsel %vm3277_vm6, %v3928_v32, %v3927_v14  ;;  %v619_v32 = vld [vmem:[%s9854_s18 + $0xdc0] sm:$0xff] }
 0x476   : > { %v1835_v36 = vpop.xlane.xlu2 %1834  ;;  %v1832_v28 = vpop.xlane.xlu1 %1831 }
 0x477   : > { %v1829_v8 = vpop.xlane.xlu0 %1828  ;;  %v2615_v19 = vmul.f32 %v10039_v41, %v1832_v28  ;;  %v2616_v62 = vmul.f32 %v10039_v41, %v1835_v36  ;;  %v4256_v28 = vsel %vm4176_vm11, %v3929_v60, %v4255_v54  ;;  %v625_v60 = vld [vmem:[%s9854_s18 + $0xdf0] sm:$0xff] }
 0x478   : > { %v2614_v15 = vmul.f32 %v10039_v41, %v1829_v8 }
 0x479   : > { %v3935_v57 = vperm.slane %v2615_v19, %v10085_v46  ;;  %v3937_v49 = vperm.slane %v2616_v62, %v10042_v42  ;;  %v1992_v19 = vsel %vm691_vm0, %v612_v22, 0.0  ;;  %v618_v62 = vld [vmem:[%s9854_s18 + $0xdb8] sm:$0x3] }
 0x47a   : > { %v3933_v55 = vperm.slane %v2614_v15, %v10077_v3 }
 0x47b   : > { %1969 = vadd.xlane.f32.xlu2 %v1968_v5  ;;  %1966 = vadd.xlane.f32.xlu1 %v1965_v63  ;;  %v608_v5 = vld [vmem:[%s9854_s18 + $0xd68] sm:$0xff] }
 0x47c   : > { %1963 = vadd.xlane.f32.xlu0 %v1962_v50  ;;  %v3934_v21 = vsel %vm3273_vm5, %v3933_v55, %v3932_v39  ;;  %v1980_v31 = vsel %vm691_vm0, %v608_v5, 0.0  ;;  %v616_v55 = vld [vmem:[%s9854_s18 + $0xda8] sm:$0xff] }
 0x47d   : > { %v3936_v58 = vsel %vm3277_vm6, %v3935_v57, %v3934_v21  ;;  %v2004_v43 = vsel %vm691_vm0, %v616_v55, 0.0  ;;  %v2013_v57 = vsel %vm691_vm0, %v619_v32, 0.0  ;;  %v621_v21 = vld [vmem:[%s9854_s18 + $0xdd0] sm:$0xff] }
 0x47e   : > { %v1844_v10 = vpop.xlane.xlu2 %1843  ;;  %v1841_v37 = vpop.xlane.xlu1 %1840  ;;  %v4257_v15 = vsel %vm4178_vm12, %v3936_v58, %v4256_v28  ;;  %v623_v58 = vld [vmem:[%s9854_s18 + $0xde0] sm:$0xff]  ;;  %v628_v28 = vld [vmem:[%s9854_s18 + $0xe08] sm:$0xff] }
 0x47f   : > { %v2619_v38 = vmul.f32 %v10039_v41, %v1844_v10  ;;  %v2618_v53 = vmul.f32 %v10039_v41, %v1841_v37  ;;  %v1838_v25 = vpop.xlane.xlu0 %1837 }
 0x480   : > { %v2617_v24 = vmul.f32 %v10039_v41, %v1838_v25  ;;  %v622_v25 = vld [vmem:[%s9854_s18 + $0xdd8] sm:$0x3] }
 0x481   : > { %v3940_v13 = vperm.slane %v2618_v53, %v10077_v3  ;;  %v3942_v34 = vperm.slane %v2619_v38, %v10085_v46  ;;  %v2010_v38 = vsel %vm701_vm1, %v618_v62, 0.0  ;;  %v2007_v53 = vsel %vm691_vm0, %v617_v30, 0.0 }
 0x482   : > { %v3938_v18 = vperm.slane %v2617_v24, %v10050_v45 }
 0x483   : > { %1978 = vadd.xlane.f32.xlu2 %v1977_v7  ;;  %1975 = vadd.xlane.f32.xlu1 %v1974_v56  ;;  %v620_v56 = vld [vmem:[%s9854_s18 + $0xdc8] sm:$0xff] }
 0x484   : > { %v3939_v29 = vsel %vm3269_vm4, %v3938_v18, %v3937_v49  ;;  %1972 = vadd.xlane.f32.xlu0 %v1971_v2  ;;  %v2019_v2 = vsel %vm691_vm0, %v621_v21, 0.0  ;;  %v2016_v4 = vsel %vm691_vm0, %v620_v56, 0.0  ;;  %v624_v49 = vld [vmem:[%s9854_s18 + $0xde8] sm:$0xff] }
 0x485   : > { %v3941_v36 = vsel %vm3273_vm5, %v3940_v13, %v3939_v29  ;;  %v2022_v13 = vsel %vm701_vm1, %v622_v25, 0.0  ;;  %v2031_v29 = vsel %vm691_vm0, %v625_v60, 0.0  ;;  %v2028_v54 = vsel %vm691_vm0, %v624_v49, 0.0 }
 0x486   : > { %v12764_v11 = vpop.xlane.xlu2 %1852  ;;  %v12766_v23 = vpop.xlane.xlu1 %1849  ;;  %v3943_v8 = vsel %vm3277_vm6, %v3942_v34, %v3941_v36  ;;  %v2025_v36 = vsel %vm691_vm0, %v623_v58, 0.0 }
 0x487   : > { %v12771_v63 = vpop.xlane.xlu0 %1846  ;;  %v4258_v50 = vsel %vm4180_vm13, %v3943_v8, %v4257_v15  ;;  %v626_v15 = vld [vmem:[%s9854_s18 + $0xdf8] sm:$0x3]  ;;  %v2621_v22 = vmul.f32 %v10039_v41, %v12766_v23  ;;  %v2622_v35 = vmul.f32 %v10039_v41, %v12764_v11 }
 0x488   : > { %8841 = vmatmul.msk.f32.gmra.mxu2 %vm4287_vm14, %v4258_v50  ;;  %v2040_v50 = vsel %vm691_vm0, %v628_v28, 0.0  ;;  %v2620_v51 = vmul.f32 %v10039_v41, %v12771_v63 }
 0x489   : > { %v3945_v23 = vperm.slane %v2621_v22, %v10050_v45 }
 0x48b   : > { %1987 = vadd.xlane.f32.xlu2 %v1986_v17  ;;  %1984 = vadd.xlane.f32.xlu1 %v1983_v61  ;;  %v2037_v17 = vsel %vm691_vm0, %v627_v12, 0.0 }
 0x48c   : > { %1981 = vadd.xlane.f32.xlu0 %v1980_v31  ;;  %v2034_v31 = vsel %vm701_vm1, %v626_v15, 0.0 }
 0x48e   : > { %v12780_v59 = vpop.xlane.xlu2 %1861  ;;  %v12782_v52 = vpop.xlane.xlu1 %1858 }
 0x48f   : > { %v12785_v40 = vpop.xlane.xlu0 %1855  ;;  %v2624_v32 = vmul.f32 %v10039_v41, %v12782_v52 }
 0x490   : > { %v2623_v52 = vmul.f32 %v10039_v41, %v12785_v40 }
 0x491   : > { %v3951_v25 = vperm.slane %v2624_v32, %v10042_v42 }
 0x493   : > { %1996 = vadd.xlane.f32.xlu2 %v1995_v26  ;;  %1993 = vadd.xlane.f32.xlu1 %v1992_v19  ;;  %v631_v26 = vld [vmem:[%s9854_s18 + $0xe20] sm:$0xff]  ;;  %v630_v19 = vld [vmem:[%s9854_s18 + $0xe18] sm:$0x3] }
 0x494   : > { %1990 = vadd.xlane.f32.xlu0 %v1989_v33  ;;  %v2049_v62 = vsel %vm691_vm0, %v631_v26, 0.0  ;;  %v2046_v30 = vsel %vm701_vm1, %v630_v19, 0.0 }
 0x496   : > { %v12792_v1 = vpop.xlane.xlu2 %1870  ;;  %v12794_v0 = vpop.xlane.xlu1 %1867 }
 0x497   : > { %v12797_v44 = vpop.xlane.xlu0 %1864  ;;  %v2628_v11 = vmul.f32 %v10039_v41, %v12792_v1  ;;  %v2627_v21 = vmul.f32 %v10039_v41, %v12794_v0 }
 0x499   : > { %v3956_v15 = vperm.slane %v2627_v21, %v10085_v46 }
 0x49b   : > { %2005 = vadd.xlane.f32.xlu2 %v2004_v43  ;;  %2002 = vadd.xlane.f32.xlu1 %v2001_v20  ;;  %v3944_v43 = vperm.slane %v2620_v51, %v10042_v42 }
 0x49c   : > { %1999 = vadd.xlane.f32.xlu0 %v1998_v9  ;;  %v2625_v9 = vmul.f32 %v10039_v41, %v12780_v59 }
 0x49d   : > { %v3946_v1 = vsel %vm3269_vm4, %v3945_v23, %v3944_v43 }
 0x49e   : > { %v12804_v10 = vpop.xlane.xlu2 %1879  ;;  %v12806_v37 = vpop.xlane.xlu1 %1876 }
 0x49f   : > { %v1874_v39 = vpop.xlane.xlu0 %1873  ;;  %v2630_v59 = vmul.f32 %v10039_v41, %v12806_v37  ;;  %v3958_v37 = vperm.slane %v2628_v11, %v10042_v42  ;;  %v2631_v40 = vmul.f32 %v10039_v41, %v12804_v10 }
 0x4a0   : > { %v2629_v63 = vmul.f32 %v10039_v41, %v1874_v39  ;;  %v2043_v39 = vsel %vm691_vm0, %v629_v6, 0.0 }
 0x4a3   : > { %2014 = vadd.xlane.f32.xlu2 %v2013_v57  ;;  %2011 = vadd.xlane.f32.xlu1 %v2010_v38  ;;  %v2626_v57 = vmul.f32 %v10039_v41, %v12797_v44  ;;  %v3947_v38 = vperm.slane %v2622_v35, %v10077_v3  ;;  %v3952_v44 = vperm.slane %v2625_v9, %v10050_v45  ;;  %v636_v9 = vld [vmem:[%s9854_s18 + $0xe48] sm:$0xff] }
 0x4a4   : > { %2008 = vadd.xlane.f32.xlu0 %v2007_v53  ;;  %v3959_v53 = vperm.slane %v2629_v63, %v10050_v45 }
 0x4a5   : > { %v3954_v56 = vperm.slane %v2626_v57, %v10077_v3  ;;  %v3953_v12 = vsel %vm3269_vm4, %v3952_v44, %v3951_v25 }
 0x4a6   : > { %v12814_v24 = vpop.xlane.xlu2 %1888  ;;  %v12816_v7 = vpop.xlane.xlu1 %1885  ;;  %v3960_v28 = vsel %vm3269_vm4, %v3959_v53, %v3958_v37 }
 0x4a7   : > { %v12819_v14 = vpop.xlane.xlu0 %1882  ;;  %v2633_v60 = vmul.f32 %v10039_v41, %v12816_v7 }
 0x4a8   : > { %v2632_v49 = vmul.f32 %v10039_v41, %v12819_v14  ;;  %v3955_v14 = vsel %vm3273_vm5, %v3954_v56, %v3953_v12  ;;  %v639_v12 = vld [vmem:[%s9854_s18 + $0xe60] sm:$0xff] }
 0x4a9   : > { %v3966_v22 = vperm.slane %v2633_v60, %v10050_v45  ;;  %v3957_v23 = vsel %vm3277_vm6, %v3956_v15, %v3955_v14 }
 0x4aa   : > { %v3965_v51 = vperm.slane %v2632_v49, %v10042_v42 }
 0x4ab   : > { %2023 = vadd.xlane.f32.xlu2 %v2022_v13  ;;  %2020 = vadd.xlane.f32.xlu1 %v2019_v2  ;;  %v634_v13 = vld [vmem:[%s9854_s18 + $0xe38] sm:$0x3]  ;;  %v633_v2 = vld [vmem:[%s9854_s18 + $0xe30] sm:$0xff] }
 0x4ac   : > { %2017 = vadd.xlane.f32.xlu0 %v2016_v4  ;;  %v3961_v4 = vperm.slane %v2630_v59, %v10077_v3  ;;  %v2055_v7 = vsel %vm691_vm0, %v633_v2, 0.0  ;;  %v3967_v32 = vsel %vm3269_vm4, %v3966_v22, %v3965_v51 }
 0x4ae   : > { %v12826_v34 = vpop.xlane.xlu2 %1897  ;;  %v12828_v18 = vpop.xlane.xlu1 %1894 }
 0x4af   : > { %v12831_v48 = vpop.xlane.xlu0 %1891  ;;  %v2637_v26 = vmul.f32 %v10039_v41, %v12826_v34  ;;  %v2636_v19 = vmul.f32 %v10039_v41, %v12828_v18 }
 0x4b1   : > { %v3973_v59 = vperm.slane %v2637_v26, %v10050_v45 }
 0x4b3   : > { %2032 = vadd.xlane.f32.xlu2 %v2031_v29  ;;  %2029 = vadd.xlane.f32.xlu1 %v2028_v54  ;;  %v632_v29 = vld [vmem:[%s9854_s18 + $0xe28] sm:$0xff]  ;;  %v3948_v54 = vsel %vm3273_vm5, %v3947_v38, %v3946_v1  ;;  %v2064_v1 = vsel %vm691_vm0, %v636_v9, 0.0 }
 0x4b4   : > { %2026 = vadd.xlane.f32.xlu0 %v2025_v36  ;;  %v3949_v36 = vperm.slane %v2623_v52, %v10085_v46 }
 0x4b6   : > { %v12838_v16 = vpop.xlane.xlu2 %1906  ;;  %v12840_v8 = vpop.xlane.xlu1 %1903  ;;  %v3950_v35 = vsel %vm3277_vm6, %v3949_v36, %v3948_v54 }
 0x4b7   : > { %v12843_v5 = vpop.xlane.xlu0 %1900  ;;  %v2640_v34 = vmul.f32 %v10039_v41, %v12838_v16  ;;  %v3972_v16 = vperm.slane %v2636_v19, %v10042_v42  ;;  %v2639_v53 = vmul.f32 %v10039_v41, %v12840_v8 }
 0x4b8   : > { %v2638_v18 = vmul.f32 %v10039_v41, %v12843_v5 }
 0x4b9   : > { %v4371_v61 = vpop.f32.mrf.mxu2  ;;  %v3979_v25 = vperm.slane %v2640_v34, %v10042_v42 }
 0x4ba   : > { %v4399_v47 = vmax.f32 %v4371_v61, 0.0  ;;  %v2634_v61 = vmul.f32 %v10039_v41, %v12814_v24  ;;  %v2635_v24 = vmul.f32 %v10039_v41, %v12831_v48  ;;  %v637_v48 = vld [vmem:[%s9854_s18 + $0xe50] sm:$0xff]  ;;  %v3975_v21 = vperm.slane %v2638_v18, %v10077_v3 }
 0x4bb   : > { %2041 = vadd.xlane.f32.xlu2 %v2040_v50  ;;  %2038 = vadd.xlane.f32.xlu1 %v2037_v17  ;;  %v2058_v50 = vsel %vm701_vm1, %v634_v13, 0.0  ;;  %v3963_v17 = vperm.slane %v2631_v40, %v10085_v46 }
 0x4bc   : > { %2035 = vadd.xlane.f32.xlu0 %v2034_v31  ;;  %8856 = vmatmul.msk.f32.gmra.mxu3 %vm4406_vm15, %v4399_v47  ;;  %v2052_v31 = vsel %vm691_vm0, %v632_v29, 0.0  ;;  %v3962_v47 = vsel %vm3273_vm5, %v3961_v4, %v3960_v28  ;;  %v3968_v63 = vperm.slane %v2634_v61, %v10077_v3  ;;  %v3970_v5 = vperm.slane %v2635_v24, %v10085_v46 }
 0x4bd   : > { %v3964_v43 = vsel %vm3277_vm6, %v3963_v17, %v3962_v47 }
 0x4be   : > { %v12855_v33 = vpop.xlane.xlu2 %1915  ;;  %v12857_v55 = vpop.xlane.xlu1 %1912  ;;  %v3969_v15 = vsel %vm3273_vm5, %v3968_v63, %v3967_v32 }
 0x4bf   : > { %v1910_v20 = vpop.xlane.xlu0 %1909  ;;  %v2643_v37 = vmul.f32 %v10039_v41, %v12855_v33  ;;  %v4259_v33 = vsel %vm4168_vm7, %v3957_v23, %v3950_v35  ;;  %v3971_v47 = vsel %vm3277_vm6, %v3970_v5, %v3969_v15  ;;  %v2073_v23 = vsel %vm691_vm0, %v639_v12, 0.0  ;;  %v652_v12 = vld [vmem:[%s9854_s18 + $0xec8] sm:$0xff]  ;;  %v651_v15 = vld [vmem:[%s9854_s18 + $0xec0] sm:$0xff] }
 0x4c0   : > { %v2641_v6 = vmul.f32 %v10039_v41, %v1910_v20  ;;  %v635_v20 = vld [vmem:[%s9854_s18 + $0xe40] sm:$0xff]  ;;  %v4260_v29 = vsel %vm4170_vm8, %v3964_v43, %v4259_v33  ;;  %v648_v33 = vld [vmem:[%s9854_s18 + $0xea8] sm:$0xff] }
 0x4c1   : > { %v2061_v44 = vsel %vm691_vm0, %v635_v20, 0.0  ;;  %v3984_v36 = vperm.slane %v2643_v37, %v10085_v46  ;;  %v645_v37 = vld [vmem:[%s9854_s18 + $0xe90] sm:$0xff] }
 0x4c2   : > { %v3980_v38 = vperm.slane %v2641_v6, %v10050_v45 }
 0x4c3   : > { %2050 = vadd.xlane.f32.xlu2 %v2049_v62  ;;  %2047 = vadd.xlane.f32.xlu1 %v2046_v30  ;;  %v2642_v62 = vmul.f32 %v10039_v41, %v12857_v55  ;;  %v2067_v55 = vsel %vm691_vm0, %v637_v48, 0.0  ;;  %v4261_v48 = vsel %vm4172_vm9, %v3971_v47, %v4260_v29  ;;  %v647_v29 = vld [vmem:[%s9854_s18 + $0xea0] sm:$0xff]  ;;  %v2109_v47 = vsel %vm691_vm0, %v651_v15, 0.0 }
 0x4c4   : > { %2044 = vadd.xlane.f32.xlu0 %v2043_v39  ;;  %v3981_v4 = vsel %vm3269_vm4, %v3980_v38, %v3979_v25 }
 0x4c5   : > { %v3982_v40 = vperm.slane %v2642_v62, %v10077_v3 }
 0x4c6   : > { %v1925_v58 = vpop.xlane.xlu2 %1924  ;;  %v1922_v0 = vpop.xlane.xlu1 %1921 }
 0x4c7   : > { %v1919_v10 = vpop.xlane.xlu0 %1918  ;;  %v2645_v30 = vmul.f32 %v10039_v41, %v1922_v0  ;;  %v2646_v56 = vmul.f32 %v10039_v41, %v1925_v58  ;;  %v3974_v58 = vsel %vm3269_vm4, %v3973_v59, %v3972_v16  ;;  %v3977_v0 = vperm.slane %v2639_v53, %v10085_v46  ;;  %v643_v59 = vld [vmem:[%s9854_s18 + $0xe80] sm:$0xff]  ;;  %v642_v16 = vld [vmem:[%s9854_s18 + $0xe78] sm:$0x3]  ;;  %v641_v53 = vld [vmem:[%s9854_s18 + $0xe70] sm:$0xff] }
 0x4c8   : > { %v2644_v11 = vmul.f32 %v10039_v41, %v1919_v10  ;;  %v3976_v54 = vsel %vm3273_vm5, %v3975_v21, %v3974_v58  ;;  %v640_v10 = vld [vmem:[%s9854_s18 + $0xe68] sm:$0xff]  ;;  %v2079_v25 = vsel %vm691_vm0, %v641_v53, 0.0  ;;  %v646_v21 = vld [vmem:[%s9854_s18 + $0xe98] sm:$0x3] }
 0x4c9   : > { %v3987_v13 = vperm.slane %v2645_v30, %v10050_v45  ;;  %v3989_v28 = vperm.slane %v2646_v56, %v10077_v3  ;;  %v3978_v24 = vsel %vm3277_vm6, %v3977_v0, %v3976_v54  ;;  %v2076_v35 = vsel %vm691_vm0, %v640_v10, 0.0 }
 0x4ca   : > { %v3986_v8 = vperm.slane %v2644_v11, %v10042_v42  ;;  %v4262_v62 = vsel %vm4174_vm10, %v3978_v24, %v4261_v48  ;;  %v2097_v10 = vsel %vm691_vm0, %v647_v29, 0.0 }
 0x4cb   : > { %2059 = vadd.xlane.f32.xlu2 %v2058_v50  ;;  %2056 = vadd.xlane.f32.xlu1 %v2055_v7  ;;  %v3983_v50 = vsel %vm3273_vm5, %v3982_v40, %v3981_v4  ;;  %v2091_v4 = vsel %vm691_vm0, %v645_v37, 0.0 }
 0x4cc   : > { %2053 = vadd.xlane.f32.xlu0 %v2052_v31  ;;  %v3988_v7 = vsel %vm3269_vm4, %v3987_v13, %v3986_v8  ;;  %v638_v31 = vld [vmem:[%s9854_s18 + $0xe58] sm:$0x3]  ;;  %v3985_v34 = vsel %vm3277_vm6, %v3984_v36, %v3983_v50  ;;  %v644_v13 = vld [vmem:[%s9854_s18 + $0xe88] sm:$0xff] }
 0x4cd   : > { %v2070_v63 = vsel %vm701_vm1, %v638_v31, 0.0  ;;  %v3990_v18 = vsel %vm3273_vm5, %v3989_v28, %v3988_v7  ;;  %v4263_v11 = vsel %vm4176_vm11, %v3985_v34, %v4262_v62  ;;  %v2100_v28 = vsel %vm691_vm0, %v648_v33, 0.0  ;;  %v658_v34 = vld [vmem:[%s9854_s18 + $0xef8] sm:$0x3] }
 0x4ce   : > { %v1934_v57 = vpop.xlane.xlu2 %1933  ;;  %v1931_v39 = vpop.xlane.xlu1 %1930  ;;  %v2112_v31 = vsel %vm691_vm0, %v652_v12, 0.0  ;;  %v2130_v62 = vsel %vm701_vm1, %v658_v34, 0.0 }
 0x4cf   : > { %v1928_v52 = vpop.xlane.xlu0 %1927  ;;  %v2649_v60 = vmul.f32 %v10039_v41, %v1934_v57  ;;  %v2648_v49 = vmul.f32 %v10039_v41, %v1931_v39 }
 0x4d0   : > { %v2647_v2 = vmul.f32 %v10039_v41, %v1928_v52 }
 0x4d1   : > { %v3994_v22 = vperm.slane %v2649_v60, %v10050_v45  ;;  %v3993_v51 = vperm.slane %v2648_v49, %v10042_v42  ;;  %v2088_v60 = vsel %vm691_vm0, %v644_v13, 0.0  ;;  %v649_v49 = vld [vmem:[%s9854_s18 + $0xeb0] sm:$0xff]  ;;  %v664_v13 = vld [vmem:[%s9854_s18 + $0xf28] sm:$0xff] }
 0x4d2   : > { %v3991_v14 = vperm.slane %v2647_v2, %v10085_v46  ;;  %v2094_v2 = vsel %vm701_vm1, %v646_v21, 0.0  ;;  %v2103_v36 = vsel %vm691_vm0, %v649_v49, 0.0 }
 0x4d3   : > { %2068 = vadd.xlane.f32.xlu2 %v2067_v55  ;;  %2065 = vadd.xlane.f32.xlu1 %v2064_v1  ;;  %v3995_v32 = vsel %vm3269_vm4, %v3994_v22, %v3993_v51  ;;  %v2085_v1 = vsel %vm691_vm0, %v643_v59, 0.0  ;;  %v655_v51 = vld [vmem:[%s9854_s18 + $0xee0] sm:$0xff]  ;;  %v661_v59 = vld [vmem:[%s9854_s18 + $0xf10] sm:$0xff] }
 0x4d4   : > { %2062 = vadd.xlane.f32.xlu0 %v2061_v44  ;;  %v3992_v20 = vsel %vm3277_vm6, %v3991_v14, %v3990_v18  ;;  %v2082_v44 = vsel %vm701_vm1, %v642_v16, 0.0  ;;  %v650_v14 = vld [vmem:[%s9854_s18 + $0xeb8] sm:$0x3]  ;;  %v657_v18 = vld [vmem:[%s9854_s18 + $0xef0] sm:$0xff]  ;;  %v660_v16 = vld [vmem:[%s9854_s18 + $0xf08] sm:$0xff] }
 0x4d5   : > { %v4264_v39 = vsel %vm4178_vm12, %v3992_v20, %v4263_v11  ;;  %v2106_v22 = vsel %vm701_vm1, %v650_v14, 0.0  ;;  %v656_v20 = vld [vmem:[%s9854_s18 + $0xee8] sm:$0xff]  ;;  %v2136_v21 = vsel %vm691_vm0, %v660_v16, 0.0 }
 0x4d6   : > { %v12971_v17 = vpop.xlane.xlu2 %1942  ;;  %v1940_v61 = vpop.xlane.xlu1 %1939  ;;  %v2124_v11 = vsel %vm691_vm0, %v656_v20, 0.0 }
 0x4d7   : > { %v2651_v26 = vmul.f32 %v10039_v41, %v1940_v61  ;;  %v1937_v19 = vpop.xlane.xlu0 %1936 }
 0x4d8   : > { %v2650_v6 = vmul.f32 %v10039_v41, %v1937_v19 }
 0x4d9   : > { %v3998_v43 = vperm.slane %v2651_v26, %v10085_v46  ;;  %v654_v26 = vld [vmem:[%s9854_s18 + $0xed8] sm:$0x3] }
 0x4da   : > { %v3996_v9 = vperm.slane %v2650_v6, %v10077_v3  ;;  %v653_v6 = vld [vmem:[%s9854_s18 + $0xed0] sm:$0xff] }
 0x4db   : > { %2077 = vadd.xlane.f32.xlu2 %v2076_v35  ;;  %2074 = vadd.xlane.f32.xlu1 %v2073_v23  ;;  %v2121_v23 = vsel %vm691_vm0, %v655_v51, 0.0 }
 0x4dc   : > { %2071 = vadd.xlane.f32.xlu0 %v2070_v63  ;;  %v3997_v30 = vsel %vm3273_vm5, %v3996_v9, %v3995_v32  ;;  %v2115_v63 = vsel %vm691_vm0, %v653_v6, 0.0 }
 0x4dd   : > { %v3999_v57 = vsel %vm3277_vm6, %v3998_v43, %v3997_v30  ;;  %v2118_v43 = vsel %vm701_vm1, %v654_v26, 0.0  ;;  %v2127_v30 = vsel %vm691_vm0, %v657_v18, 0.0 }
 0x4de   : > { %v12997_v5 = vpop.xlane.xlu2 %1951  ;;  %v12999_v38 = vpop.xlane.xlu1 %1948  ;;  %v4265_v52 = vsel %vm4180_vm13, %v3999_v57, %v4264_v39 }
 0x4df   : > { %8842 = vmatmul.msk.f32.gmra.mxu2 %vm4287_vm14, %v4265_v52  ;;  %v13004_v55 = vpop.xlane.xlu0 %1945  ;;  %v2654_v14 = vmul.f32 %v10039_v41, %v12999_v38 }
 0x4e3   : > { %2086 = vadd.xlane.f32.xlu2 %v2085_v1  ;;  %2083 = vadd.xlane.f32.xlu1 %v2082_v44  ;;  %v659_v1 = vld [vmem:[%s9854_s18 + $0xf00] sm:$0xff] }
 0x4e4   : > { %2080 = vadd.xlane.f32.xlu0 %v2079_v25  ;;  %v2139_v25 = vsel %vm691_vm0, %v661_v59, 0.0  ;;  %v2133_v37 = vsel %vm691_vm0, %v659_v1, 0.0 }
 0x4e6   : > { %v13011_v56 = vpop.xlane.xlu2 %1960  ;;  %v13013_v40 = vpop.xlane.xlu1 %1957 }
 0x4e7   : > { %v13016_v8 = vpop.xlane.xlu0 %1954 }
 0x4e8   : > { %v2656_v49 = vmul.f32 %v10039_v41, %v13016_v8  ;;  %v2148_v8 = vsel %vm691_vm0, %v664_v13, 0.0 }
 0x4eb   : > { %2095 = vadd.xlane.f32.xlu2 %v2094_v2  ;;  %2092 = vadd.xlane.f32.xlu1 %v2091_v4  ;;  %v663_v2 = vld [vmem:[%s9854_s18 + $0xf20] sm:$0xff]  ;;  %v2653_v4 = vmul.f32 %v10039_v41, %v13004_v55  ;;  %v2652_v55 = vmul.f32 %v10039_v41, %v12971_v17 }
 0x4ec   : > { %2089 = vadd.xlane.f32.xlu0 %v2088_v60  ;;  %v2657_v60 = vmul.f32 %v10039_v41, %v13013_v40  ;;  %v13105_v40 = vmul.f32 %v10039_v41, %v12997_v5  ;;  %v2145_v15 = vsel %vm691_vm0, %v663_v2, 0.0 }
 0x4ed   : > { %v4001_v5 = vperm.slane %v2653_v4, %v10050_v45  ;;  %v4000_v51 = vperm.slane %v2652_v55, %v10042_v42 }
 0x4ee   : > { %v13023_v58 = vpop.xlane.xlu2 %1969  ;;  %v13025_v0 = vpop.xlane.xlu1 %1966 }
 0x4ef   : > { %v13028_v54 = vpop.xlane.xlu0 %1963 }
 0x4f3   : > { %2104 = vadd.xlane.f32.xlu2 %v2103_v36  ;;  %2101 = vadd.xlane.f32.xlu1 %v2100_v28  ;;  %v662_v36 = vld [vmem:[%s9854_s18 + $0xf18] sm:$0x3]  ;;  %v2661_v28 = vmul.f32 %v10039_v41, %v13023_v58  ;;  %v2658_v58 = vmul.f32 %v10039_v41, %v13011_v56 }
 0x4f4   : > { %2098 = vadd.xlane.f32.xlu0 %v2097_v10  ;;  %v2660_v10 = vmul.f32 %v10039_v41, %v13025_v0  ;;  %v2142_v17 = vsel %vm701_vm1, %v662_v36, 0.0 }
 0x4f5   : > { %v4015_v38 = vperm.slane %v2661_v28, %v10050_v45  ;;  %v4010_v26 = vperm.slane %v2658_v58, %v10077_v3 }
 0x4f6   : > { %v13035_v50 = vpop.xlane.xlu2 %1978  ;;  %v13037_v7 = vpop.xlane.xlu1 %1975  ;;  %v4014_v56 = vperm.slane %v2660_v10, %v10042_v42  ;;  %v670_v10 = vld [vmem:[%s9854_s18 + $0xf58] sm:$0x3] }
 0x4f7   : > { %v13040_v61 = vpop.xlane.xlu0 %1972 }
 0x4f8   : > { %v2662_v0 = vmul.f32 %v10039_v41, %v13040_v61  ;;  %v2663_v61 = vmul.f32 %v10039_v41, %v13037_v7  ;;  %v4003_v7 = vperm.slane %v2654_v14, %v10077_v3 }
 0x4fa   : > { %v4017_v6 = vperm.slane %v2662_v0, %v10077_v3 }
 0x4fb   : > { %2113 = vadd.xlane.f32.xlu2 %v2112_v31  ;;  %2110 = vadd.xlane.f32.xlu1 %v2109_v47  ;;  %v4008_v31 = vperm.slane %v2657_v60, %v10050_v45  ;;  %v4007_v47 = vperm.slane %v2656_v49, %v10042_v42 }
 0x4fc   : > { %2107 = vadd.xlane.f32.xlu0 %v2106_v22  ;;  %v2659_v22 = vmul.f32 %v10039_v41, %v13028_v54 }
 0x4fd   : > { %v4009_v34 = vsel %vm3269_vm4, %v4008_v31, %v4007_v47 }
 0x4fe   : > { %v13047_v19 = vpop.xlane.xlu2 %1987  ;;  %v13049_v24 = vpop.xlane.xlu1 %1984  ;;  %v4012_v18 = vperm.slane %v2659_v22, %v10085_v46  ;;  %v2166_v22 = vsel %vm701_vm1, %v670_v10, 0.0 }
 0x4ff   : > { %v13052_v35 = vpop.xlane.xlu0 %1981  ;;  %v13145_v16 = vmul.f32 %v10039_v41, %v13047_v19  ;;  %v2666_v1 = vmul.f32 %v10039_v41, %v13049_v24 }
 0x500   : > { %v2665_v54 = vmul.f32 %v10039_v41, %v13052_v35  ;;  %v2664_v35 = vmul.f32 %v10039_v41, %v13035_v50 }
 0x502   : > { %v4022_v50 = vperm.slane %v2665_v54, %v10050_v45  ;;  %v4021_v49 = vperm.slane %v2664_v35, %v10042_v42 }
 0x503   : > { %2122 = vadd.xlane.f32.xlu2 %v2121_v23  ;;  %2119 = vadd.xlane.f32.xlu1 %v2118_v43  ;;  %v667_v23 = vld [vmem:[%s9854_s18 + $0xf40] sm:$0xff]  ;;  %v666_v43 = vld [vmem:[%s9854_s18 + $0xf38] sm:$0x3] }
 0x504   : > { %2116 = vadd.xlane.f32.xlu0 %v2115_v63  ;;  %v4005_v63 = vperm.slane %v13105_v40, %v10085_v46 }
 0x506   : > { %v13059_v48 = vpop.xlane.xlu2 %1996  ;;  %v13061_v9 = vpop.xlane.xlu1 %1993 }
 0x507   : > { %v13064_v32 = vpop.xlane.xlu0 %1990  ;;  %v2669_v24 = vmul.f32 %v10039_v41, %v13061_v9  ;;  %v4024_v9 = vperm.slane %v2666_v1, %v10077_v3  ;;  %v2670_v14 = vmul.f32 %v10039_v41, %v13059_v48 }
 0x508   : > { %v2668_v60 = vmul.f32 %v10039_v41, %v13064_v32 }
 0x50b   : > { %v4374_v57 = vpop.f32.mrf.mxu2  ;;  %2131 = vadd.xlane.f32.xlu2 %v2130_v62  ;;  %2128 = vadd.xlane.f32.xlu1 %v2127_v30  ;;  %v665_v30 = vld [vmem:[%s9854_s18 + $0xf30] sm:$0xff] }
 0x50c   : > { %v4400_v39 = vmax.f32 %v4374_v57, 0.0  ;;  %2125 = vadd.xlane.f32.xlu0 %v2124_v11  ;;  %v4002_v11 = vsel %vm3269_vm4, %v4001_v5, %v4000_v51  ;;  %v4016_v57 = vsel %vm3269_vm4, %v4015_v38, %v4014_v56  ;;  %v2151_v2 = vsel %vm691_vm0, %v665_v30, 0.0  ;;  %v668_v38 = vld [vmem:[%s9854_s18 + $0xf48] sm:$0xff] }
 0x50d   : > { %v4018_v13 = vsel %vm3273_vm5, %v4017_v6, %v4016_v57  ;;  %v4004_v19 = vsel %vm3273_vm5, %v4003_v7, %v4002_v11  ;;  %v4028_v5 = vperm.slane %v2668_v60, %v10042_v42  ;;  %v2160_v7 = vsel %vm691_vm0, %v668_v38, 0.0 }
 0x50e   : > { %8857 = vmatmul.msk.f32.gmra.mxu3 %vm4406_vm15, %v4400_v39  ;;  %v13072_v52 = vpop.xlane.xlu2 %2005  ;;  %v13074_v53 = vpop.xlane.xlu1 %2002  ;;  %v4019_v39 = vperm.slane %v2663_v61, %v10085_v46  ;;  %v4006_v1 = vsel %vm3277_vm6, %v4005_v63, %v4004_v19 }
 0x50f   : > { %v13077_v44 = vpop.xlane.xlu0 %1999  ;;  %v2673_v36 = vmul.f32 %v10039_v41, %v13072_v52  ;;  %v2672_v32 = vmul.f32 %v10039_v41, %v13074_v53  ;;  %v4023_v52 = vsel %vm3269_vm4, %v4022_v50, %v4021_v49  ;;  %v671_v49 = vld [vmem:[%s9854_s18 + $0xf60] sm:$0xff] }
 0x510   : > { %v4020_v55 = vsel %vm3277_vm6, %v4019_v39, %v4018_v13  ;;  %v2671_v48 = vmul.f32 %v10039_v41, %v13077_v44 }
 0x511   : > { %v4036_v56 = vperm.slane %v2673_v36, %v10050_v45  ;;  %v4035_v51 = vperm.slane %v2672_v32, %v10042_v42 }
 0x512   : > { %v4033_v30 = vperm.slane %v2671_v48, %v10085_v46  ;;  %v674_v48 = vld [vmem:[%s9854_s18 + $0xf78] sm:$0x3] }
 0x513   : > { %2140 = vadd.xlane.f32.xlu2 %v2139_v25  ;;  %2137 = vadd.xlane.f32.xlu1 %v2136_v21  ;;  %v2157_v25 = vsel %vm691_vm0, %v667_v23, 0.0  ;;  %v2154_v21 = vsel %vm701_vm1, %v666_v43, 0.0 }
 0x514   : > { %2134 = vadd.xlane.f32.xlu0 %v2133_v37  ;;  %v4011_v37 = vsel %vm3273_vm5, %v4010_v26, %v4009_v34  ;;  %v4025_v34 = vsel %vm3273_vm5, %v4024_v9, %v4023_v52 }
 0x515   : > { %v4013_v4 = vsel %vm3277_vm6, %v4012_v18, %v4011_v37  ;;  %v4031_v18 = vperm.slane %v2670_v14, %v10077_v3  ;;  %v672_v37 = vld [vmem:[%s9854_s18 + $0xf68] sm:$0xff] }
 0x516   : > { %v13090_v33 = vpop.xlane.xlu2 %2014  ;;  %v13092_v29 = vpop.xlane.xlu1 %2011  ;;  %v4266_v13 = vsel %vm4168_vm7, %v4013_v4, %v4006_v1  ;;  %v2172_v9 = vsel %vm691_vm0, %v672_v37, 0.0  ;;  %v685_v1 = vld [vmem:[%s9854_s18 + $0xfd0] sm:$0xff] }
 0x517   : > { %v13099_v12 = vpop.xlane.xlu0 %2008  ;;  %v2676_v58 = vmul.f32 %v10039_v41, %v13090_v33  ;;  %v2675_v26 = vmul.f32 %v10039_v41, %v13092_v29  ;;  %v4267_v63 = vsel %vm4170_vm8, %v4020_v55, %v4266_v13  ;;  %v683_v13 = vld [vmem:[%s9854_s18 + $0xfc0] sm:$0xff] }
 0x518   : > { %v2674_v0 = vmul.f32 %v10039_v41, %v13099_v12 }
 0x519   : > { %v4042_v23 = vperm.slane %v2676_v58, %v10042_v42  ;;  %v4040_v35 = vperm.slane %v2675_v26, %v10085_v46  ;;  %v679_v26 = vld [vmem:[%s9854_s18 + $0xfa0] sm:$0xff] }
 0x51a   : > { %v4038_v43 = vperm.slane %v2674_v0, %v10077_v3 }
 0x51b   : > { %2149 = vadd.xlane.f32.xlu2 %v2148_v8  ;;  %2146 = vadd.xlane.f32.xlu1 %v2145_v15  ;;  %v4026_v8 = vperm.slane %v13145_v16, %v10085_v46  ;;  %v669_v15 = vld [vmem:[%s9854_s18 + $0xf50] sm:$0xff] }
 0x51c   : > { %2143 = vadd.xlane.f32.xlu0 %v2142_v17  ;;  %v4029_v17 = vperm.slane %v2669_v24, %v10050_v45  ;;  %v2163_v12 = vsel %vm691_vm0, %v669_v15, 0.0  ;;  %v673_v16 = vld [vmem:[%s9854_s18 + $0xf70] sm:$0xff]  ;;  %v2169_v15 = vsel %vm691_vm0, %v671_v49, 0.0 }
 0x51d   : > { %v4027_v50 = vsel %vm3277_vm6, %v4026_v8, %v4025_v34  ;;  %v2175_v4 = vsel %vm691_vm0, %v673_v16, 0.0  ;;  %v13281_v16 = vshrl.u32 %v3264_v27, 7 }
 0x51e   : > { %v2024_v20 = vpop.xlane.xlu2 %2023  ;;  %v2021_v62 = vpop.xlane.xlu1 %2020  ;;  %v4268_v52 = vsel %vm4172_vm9, %v4027_v50, %v4267_v63 }
 0x51f   : > { %v2018_v59 = vpop.xlane.xlu0 %2017  ;;  %v2678_v31 = vmul.f32 %v10039_v41, %v2021_v62  ;;  %v2679_v44 = vmul.f32 %v10039_v41, %v2024_v20  ;;  %v4030_v62 = vsel %vm3269_vm4, %v4029_v17, %v4028_v5  ;;  %v4037_v20 = vsel %vm3269_vm4, %v4036_v56, %v4035_v51  ;;  %8880 = vset.pattern.permute.xlu2 %v13281_v16 }
 0x520   : > { %v2677_v28 = vmul.f32 %v10039_v41, %v2018_v59  ;;  %v2178_v51 = vsel %vm701_vm1, %v674_v48, 0.0  ;;  %v13292_v50 = vadd.s32 8, %v13281_v16  ;;  %v13301_v63 = vadd.s32 16, %v13281_v16 }
 0x521   : > { %v4045_v29 = vperm.slane %v2678_v31, %v10077_v3 }
 0x522   : > { %v4043_v33 = vperm.slane %v2677_v28, %v10050_v45  ;;  %8881 = vset.pattern.permute.xlu0 %v13292_v50  ;;  %8882 = vset.pattern.permute.xlu1 %v13301_v63 }
 0x523   : > { %2158 = vadd.xlane.f32.xlu2 %v2157_v25  ;;  %2155 = vadd.xlane.f32.xlu1 %v2154_v21  ;;  %v4039_v25 = vsel %vm3273_vm5, %v4038_v43, %v4037_v20  ;;  %v4047_v21 = vperm.slane %v2679_v44, %v10085_v46  ;;  %v677_v43 = vld [vmem:[%s9854_s18 + $0xf90] sm:$0xff] }
 0x524   : > { %2152 = vadd.xlane.f32.xlu0 %v2151_v2  ;;  %v4044_v11 = vsel %vm3269_vm4, %v4043_v33, %v4042_v23  ;;  %v4032_v2 = vsel %vm3273_vm5, %v4031_v18, %v4030_v62  ;;  %v4041_v32 = vsel %vm3277_vm6, %v4040_v35, %v4039_v25  ;;  %v2187_v18 = vsel %vm691_vm0, %v677_v43, 0.0  ;;  %v682_v62 = vld [vmem:[%s9854_s18 + $0xfb8] sm:$0x3]  ;;  %v684_v25 = vld [vmem:[%s9854_s18 + $0xfc8] sm:$0xff] }
 0x525   : > { %v4046_v40 = vsel %vm3273_vm5, %v4045_v29, %v4044_v11  ;;  %v4034_v19 = vsel %vm3277_vm6, %v4033_v30, %v4032_v2  ;;  %v681_v29 = vld [vmem:[%s9854_s18 + $0xfb0] sm:$0xff]  ;;  %v2202_v35 = vsel %vm701_vm1, %v682_v62, 0.0  ;;  %v2211_v2 = vsel %vm691_vm0, %v685_v1, 0.0 }
 0x526   : > { %v2033_v53 = vpop.xlane.xlu2 %2032  ;;  %v2030_v47 = vpop.xlane.xlu1 %2029  ;;  %v4048_v55 = vsel %vm3277_vm6, %v4047_v21, %v4046_v40  ;;  %v4269_v58 = vsel %vm4174_vm10, %v4034_v19, %v4268_v52  ;;  %v2208_v49 = vsel %vm691_vm0, %v684_v25, 0.0  ;;  %v2205_v40 = vsel %vm691_vm0, %v683_v13, 0.0  ;;  %v688_v19 = vld [vmem:[%s9854_s18 + $0xfe8] sm:$0xff] }
 0x527   : > { %v2027_v61 = vpop.xlane.xlu0 %2026  ;;  %v2681_v6 = vmul.f32 %v10039_v41, %v2030_v47  ;;  %v2682_v57 = vmul.f32 %v10039_v41, %v2033_v53  ;;  %v4270_v17 = vsel %vm4176_vm11, %v4041_v32, %v4269_v58  ;;  %v676_v47 = vld [vmem:[%s9854_s18 + $0xf88] sm:$0xff]  ;;  %v689_v58 = vld [vmem:[%s9854_s18 + $0xff0] sm:$0xff] }
 0x528   : > { %v2680_v54 = vmul.f32 %v10039_v41, %v2027_v61  ;;  %v4271_v31 = vsel %vm4178_vm12, %v4048_v55, %v4270_v17  ;;  %v2184_v61 = vsel %vm691_vm0, %v676_v47, 0.0  ;;  %v690_v55 = vld [vmem:[%s9854_s18 + $0xff8] sm:$0x3] }
 0x529   : > { %v4050_v39 = vperm.slane %v2681_v6, %v10050_v45  ;;  %v4052_v36 = vperm.slane %v2682_v57, %v10077_v3  ;;  %v678_v6 = vld [vmem:[%s9854_s18 + $0xf98] sm:$0x3]  ;;  %v680_v57 = vld [vmem:[%s9854_s18 + $0xfa8] sm:$0xff]  ;;  %v2226_v17 = vsel %vm701_vm1, %v690_v55, 0.0 }
 0x52a   : > { %v4049_v59 = vperm.slane %v2680_v54, %v10042_v42  ;;  %v2190_v34 = vsel %vm701_vm1, %v678_v6, 0.0 }
 0x52b   : > { %2167 = vadd.xlane.f32.xlu2 %v2166_v22  ;;  %2164 = vadd.xlane.f32.xlu1 %v2163_v12  ;;  %v675_v22 = vld [vmem:[%s9854_s18 + $0xf80] sm:$0xff] }
 0x52c   : > { %2161 = vadd.xlane.f32.xlu0 %v2160_v7  ;;  %v4051_v10 = vsel %vm3269_vm4, %v4050_v39, %v4049_v59  ;;  %v2181_v12 = vsel %vm691_vm0, %v675_v22, 0.0  ;;  %v2193_v7 = vsel %vm691_vm0, %v679_v26, 0.0  ;;  %v2199_v39 = vsel %vm691_vm0, %v681_v29, 0.0  ;;  %v4472_v26 = vpop.f32.mrf.mxu1 }
 0x52d   : > { %v4053_v0 = vsel %vm3273_vm5, %v4052_v36, %v4051_v10  ;;  %v2196_v59 = vsel %vm691_vm0, %v680_v57, 0.0  ;;  %v687_v36 = vld [vmem:[%s9854_s18 + $0xfe0] sm:$0xff]  ;;  %v686_v10 = vld [vmem:[%s9854_s18 + $0xfd8] sm:$0x3] }
 0x52e   : > { %v13221_v24 = vpop.xlane.xlu2 %2041  ;;  %v13223_v60 = vpop.xlane.xlu1 %2038  ;;  %v2217_v32 = vsel %vm691_vm0, %v687_v36, 0.0 }
 0x52f   : > { %v2036_v28 = vpop.xlane.xlu0 %2035 }
 0x530   : > { %v2683_v8 = vmul.f32 %v10039_v41, %v2036_v28 }
 0x532   : > { %v4054_v14 = vperm.slane %v2683_v8, %v10085_v46 }
 0x533   : > { %2176 = vadd.xlane.f32.xlu2 %v2175_v4  ;;  %2173 = vadd.xlane.f32.xlu1 %v2172_v9  ;;  %v2220_v9 = vsel %vm691_vm0, %v688_v19, 0.0 }
 0x534   : > { %2170 = vadd.xlane.f32.xlu0 %v2169_v15  ;;  %v4055_v5 = vsel %vm3277_vm6, %v4054_v14, %v4053_v0  ;;  %v2214_v15 = vsel %vm701_vm1, %v686_v10, 0.0  ;;  %v4475_v25 = vpop.f32.mrf.mxu1 }
 0x535   : > { %v4272_v53 = vsel %vm4180_vm13, %v4055_v5, %v4271_v31  ;;  %v2223_v5 = vsel %vm691_vm0, %v689_v58, 0.0  ;;  %v13367_v10 = vmax.f32 %v4475_v25, 0.0 }
 0x536   : > { %8843 = vmatmul.msk.f32.gmra.mxu2 %vm4287_vm14, %v4272_v53  ;;  %v13248_v38 = vpop.xlane.xlu2 %2050  ;;  %v13250_v56 = vpop.xlane.xlu1 %2047 }
 0x537   : > { %v13253_v33 = vpop.xlane.xlu0 %2044  ;;  %v2688_v6 = vmul.f32 %v10039_v41, %v13248_v38  ;;  %v2687_v62 = vmul.f32 %v10039_v41, %v13250_v56 }
 0x538   : > { %v2686_v43 = vmul.f32 %v10039_v41, %v13253_v33 }
 0x539   : > { %v4061_v13 = vperm.slane %v2687_v62, %v10085_v46 }
 0x53a   : > { %v4059_v38 = vperm.slane %v2686_v43, %v10077_v3  ;;  %v13394_v43 = vadd.s32 24, %v13281_v16 }
 0x53b   : > { %2185 = vadd.xlane.f32.xlu2 %v2184_v61  ;;  %2182 = vadd.xlane.f32.xlu1 %v2181_v12  ;;  %v2685_v61 = vmul.f32 %v10039_v41, %v13221_v24  ;;  %v2684_v12 = vmul.f32 %v10039_v41, %v13223_v60  ;;  %v4063_v60 = vperm.slane %v2688_v6, %v10042_v42 }
 0x53c   : > { %2179 = vadd.xlane.f32.xlu0 %v2178_v51 }
 0x53d   : > { %v4057_v24 = vperm.slane %v2685_v61, %v10050_v45 }
 0x53e   : > { %v13260_v54 = vpop.xlane.xlu2 %2059  ;;  %v13262_v23 = vpop.xlane.xlu1 %2056 }
 0x53f   : > { %v2054_v44 = vpop.xlane.xlu0 %2053  ;;  %v2691_v33 = vmul.f32 %v10039_v41, %v13260_v54 }
 0x540   : > { %v2689_v47 = vmul.f32 %v10039_v41, %v2054_v44  ;;  %v2690_v44 = vmul.f32 %v10039_v41, %v13262_v23 }
 0x542   : > { %v4066_v23 = vperm.slane %v2690_v44, %v10077_v3 }
 0x543   : > { %2194 = vadd.xlane.f32.xlu2 %v2193_v7  ;;  %2191 = vadd.xlane.f32.xlu1 %v2190_v34  ;;  %v4064_v7 = vperm.slane %v2689_v47, %v10050_v45  ;;  %v13337_v34 = vmax.f32 %v4472_v26, 0.0 }
 0x544   : > { %2188 = vadd.xlane.f32.xlu0 %v2187_v18  ;;  %v4056_v18 = vperm.slane %v2684_v12, %v10042_v42 }
 0x546   : > { %v13270_v30 = vpop.xlane.xlu2 %2068  ;;  %v13272_v11 = vpop.xlane.xlu1 %2065  ;;  %v4058_v1 = vsel %vm3269_vm4, %v4057_v24, %v4056_v18 }
 0x547   : > { %v13275_v20 = vpop.xlane.xlu0 %2062  ;;  %v2693_v29 = vmul.f32 %v10039_v41, %v13272_v11  ;;  %v4060_v54 = vsel %vm3273_vm5, %v4059_v38, %v4058_v1 }
 0x548   : > { %v2692_v57 = vmul.f32 %v10039_v41, %v13275_v20  ;;  %v2694_v20 = vmul.f32 %v10039_v41, %v13270_v30 }
 0x54a   : > { %v4070_v19 = vperm.slane %v2692_v57, %v10042_v42 }
 0x54b   : > { %2203 = vadd.xlane.f32.xlu2 %v2202_v35  ;;  %2200 = vadd.xlane.f32.xlu1 %v2199_v39  ;;  %v4065_v35 = vsel %vm3269_vm4, %v4064_v7, %v4063_v60 }
 0x54c   : > { %2197 = vadd.xlane.f32.xlu0 %v2196_v59  ;;  %v4067_v11 = vsel %vm3273_vm5, %v4066_v23, %v4065_v35 }
 0x54e   : > { %v13286_v21 = vpop.xlane.xlu2 %2077  ;;  %v13288_v37 = vpop.xlane.xlu1 %2074 }
 0x54f   : > { %v13294_v27 = vpop.xlane.xlu0 %2071  ;;  %v2697_v36 = vmul.f32 %v10039_v41, %v13286_v21  ;;  %v2696_v55 = vmul.f32 %v10039_v41, %v13288_v37  ;;  %v4073_v21 = vperm.slane %v2694_v20, %v10077_v3 }
 0x550   : > { %v2695_v58 = vmul.f32 %v10039_v41, %v13294_v27 }
 0x553   : > { %2212 = vadd.xlane.f32.xlu2 %v2211_v2  ;;  %2209 = vadd.xlane.f32.xlu1 %v2208_v49  ;;  %v4068_v2 = vperm.slane %v2691_v33, %v10085_v46  ;;  %v13358_v49 = vperm.slane %v13337_v34, 0 }
 0x554   : > { %2206 = vadd.xlane.f32.xlu0 %v2205_v40  ;;  %v4071_v40 = vperm.slane %v2693_v29, %v10050_v45 }
 0x555   : > { %v4069_v30 = vsel %vm3277_vm6, %v4068_v2, %v4067_v11 }
 0x556   : > { %v13306_v28 = vpop.xlane.xlu2 %2086  ;;  %v13308_v4 = vpop.xlane.xlu1 %2083 }
 0x557   : > { %v13311_v8 = vpop.xlane.xlu0 %2080 }
 0x55b   : > { %2221 = vadd.xlane.f32.xlu2 %v2220_v9  ;;  %2218 = vadd.xlane.f32.xlu1 %v2217_v32  ;;  %v13372_v32 = vperm.slane %v13337_v34, 3 }
 0x55c   : > { %2215 = vadd.xlane.f32.xlu0 %v2214_v15  ;;  %v4062_v15 = vsel %vm3277_vm6, %v4061_v13, %v4060_v54 }
 0x55e   : > { %v13317_v52 = vpop.xlane.xlu2 %2095  ;;  %v2093_v14 = vpop.xlane.xlu1 %2092 }
 0x55f   : > { %v2090_v0 = vpop.xlane.xlu0 %2089  ;;  %v2703_v24 = vmul.f32 %v10039_v41, %v13317_v52 }
 0x560   : > { %v2701_v9 = vmul.f32 %v10039_v41, %v2090_v0  ;;  %v2700_v0 = vmul.f32 %v10039_v41, %v13306_v28 }
 0x562   : > { %v4377_v31 = vpop.f32.mrf.mxu2  ;;  %v4085_v12 = vperm.slane %v2701_v9, %v10050_v45  ;;  %v4084_v44 = vperm.slane %v2700_v0, %v10042_v42 }
 0x563   : > { %v4401_v53 = vmax.f32 %v4377_v31, 0.0  ;;  %2227 = vadd.xlane.f32.xlu1 %v2226_v17  ;;  %v4072_v17 = vsel %vm3269_vm4, %v4071_v40, %v4070_v19  ;;  %v4078_v31 = vperm.slane %v2697_v36, %v10050_v45 }
 0x564   : > { %2224 = vadd.xlane.f32.xlu0 %v2223_v5  ;;  %v2698_v5 = vmul.f32 %v10039_v41, %v13311_v8  ;;  %v4077_v8 = vperm.slane %v2696_v55, %v10042_v42  ;;  %v4086_v33 = vsel %vm3269_vm4, %v4085_v12, %v4084_v44 }
 0x565   : > { %8858 = vmatmul.msk.f32.gmra.mxu3 %vm4406_vm15, %v4401_v53  ;;  %v2702_v53 = vmul.f32 %v10039_v41, %v2093_v14  ;;  %v4075_v14 = vperm.slane %v2695_v58, %v10085_v46 }
 0x566   : > { %v13324_v22 = vpop.xlane.xlu2 %2104  ;;  %v2102_v48 = vpop.xlane.xlu1 %2101  ;;  %v4080_v7 = vperm.slane %v2698_v5, %v10077_v3  ;;  %v4079_v52 = vsel %vm3269_vm4, %v4078_v31, %v4077_v8 }
 0x567   : > { %v2099_v51 = vpop.xlane.xlu0 %2098  ;;  %v2705_v47 = vmul.f32 %v10039_v41, %v2102_v48  ;;  %v2699_v48 = vmul.f32 %v10039_v41, %v13308_v4  ;;  %v2706_v18 = vmul.f32 %v10039_v41, %v13324_v22  ;;  %v4087_v60 = vperm.slane %v2702_v53, %v10077_v3 }
 0x568   : > { %v2704_v37 = vmul.f32 %v10039_v41, %v2099_v51  ;;  %v4074_v22 = vsel %vm3273_vm5, %v4073_v21, %v4072_v17  ;;  %v4081_v1 = vsel %vm3273_vm5, %v4080_v7, %v4079_v52  ;;  %v4273_v21 = vsel %vm4168_vm7, %v4069_v30, %v4062_v15 }
 0x569   : > { %v4092_v62 = vperm.slane %v2705_v47, %v10050_v45  ;;  %v4082_v35 = vperm.slane %v2699_v48, %v10085_v46  ;;  %v4094_v25 = vperm.slane %v2706_v18, %v10077_v3  ;;  %v4088_v13 = vsel %vm3273_vm5, %v4087_v60, %v4086_v33  ;;  %v4478_v33 = vpop.f32.mrf.mxu1 }
 0x56a   : > { %v4091_v4 = vperm.slane %v2704_v37, %v10042_v42  ;;  %v4561_v60 = vperm.slane %v13337_v34, 1 }
 0x56b   : > { %v4083_v17 = vsel %vm3277_vm6, %v4082_v35, %v4081_v1 }
 0x56c   : > { %v4093_v54 = vsel %vm3269_vm4, %v4092_v62, %v4091_v4 }
 0x56d   : > { %v4095_v53 = vsel %vm3273_vm5, %v4094_v25, %v4093_v54 }
 0x56e   : > { %v2114_v39 = vpop.xlane.xlu2 %2113  ;;  %v2111_v59 = vpop.xlane.xlu1 %2110 }
 0x56f   : > { %v2108_v56 = vpop.xlane.xlu0 %2107  ;;  %v2709_v26 = vmul.f32 %v10039_v41, %v2114_v39  ;;  %v2708_v6 = vmul.f32 %v10039_v41, %v2111_v59  ;;  %v4076_v59 = vsel %vm3277_vm6, %v4075_v14, %v4074_v22 }
 0x570   : > { %v2707_v38 = vmul.f32 %v10039_v41, %v2108_v56  ;;  %v4089_v56 = vperm.slane %v2703_v24, %v10085_v46  ;;  %v4274_v31 = vsel %vm4170_vm8, %v4076_v59, %v4273_v21 }
 0x571   : > { %v4099_v23 = vperm.slane %v2709_v26, %v10050_v45  ;;  %v4098_v29 = vperm.slane %v2708_v6, %v10042_v42  ;;  %v4275_v26 = vsel %vm4172_vm9, %v4083_v17, %v4274_v31 }
 0x572   : > { %v4096_v2 = vperm.slane %v2707_v38, %v10085_v46  ;;  %v4090_v37 = vsel %vm3277_vm6, %v4089_v56, %v4088_v13  ;;  %v13476_v38 = vperm.slane %v13367_v10, 5  ;;  %v4481_v56 = vpop.f32.mrf.mxu1 }
 0x573   : > { %4541 = vperm.xlu2 %8880, %v13358_v49   ;;  %v4100_v19 = vsel %vm3269_vm4, %v4099_v23, %v4098_v29  ;;  %v13481_v29 = vmax.f32 %v4478_v33, 0.0  ;;  %v13503_v13 = vmax.f32 %v4481_v56, 0.0 }
 0x575   : > { %v13489_v22 = vperm.slane %v13481_v29, 2  ;;  %v13500_v1 = vperm.slane %v13481_v29, 7 }
 0x576   : > { %v2123_v61 = vpop.xlane.xlu2 %2122  ;;  %v2120_v27 = vpop.xlane.xlu1 %2119 }
 0x577   : > { %v2117_v28 = vpop.xlane.xlu0 %2116  ;;  %v2711_v57 = vmul.f32 %v10039_v41, %v2120_v27  ;;  %v2712_v11 = vmul.f32 %v10039_v41, %v2123_v61  ;;  %v4097_v61 = vsel %vm3277_vm6, %v4096_v2, %v4095_v53 }
 0x578   : > { %v2710_v51 = vmul.f32 %v10039_v41, %v2117_v28  ;;  %4547 = vperm.xlu0 %8881, %v13358_v49   ;;  %v4276_v28 = vsel %vm4174_vm10, %v4090_v37, %v4275_v26 }
 0x579   : > { %v4103_v36 = vperm.slane %v2711_v57, %v10085_v46  ;;  %v4105_v15 = vperm.slane %v2712_v11, %v10042_v42  ;;  %v4277_v14 = vsel %vm4176_vm11, %v4097_v61, %v4276_v28  ;;  %v13509_v11 = vperm.slane %v13503_v13, 4 }
 0x57a   : > { %v4101_v39 = vperm.slane %v2710_v51, %v10077_v3 }
 0x57b   : > { %8883 = vset.pattern.permute.xlu2 %v13394_v43 }
 0x57c   : > { %4553 = vperm.xlu1 %8882, %v13358_v49   ;;  %v4102_v0 = vsel %vm3273_vm5, %v4101_v39, %v4100_v19 }
 0x57d   : > { %v4104_v12 = vsel %vm3277_vm6, %v4103_v36, %v4102_v0  ;;  %v13515_v36 = vperm.slane %v13337_v34, 2 }
 0x57e   : > { %v2132_v20 = vpop.xlane.xlu2 %2131  ;;  %v2129_v40 = vpop.xlane.xlu1 %2128  ;;  %v4278_v7 = vsel %vm4178_vm12, %v4104_v12, %v4277_v14 }
 0x57f   : > { %v2715_v9 = vmul.f32 %v10039_v41, %v2132_v20  ;;  %v2714_v55 = vmul.f32 %v10039_v41, %v2129_v40  ;;  %v2126_v58 = vpop.xlane.xlu0 %2125  ;;  %v4484_v20 = vpop.f32.mrf.mxu1 }
 0x580   : > { %v2713_v5 = vmul.f32 %v10039_v41, %v2126_v58  ;;  %4622 = vperm.xlu0 %8881, %v13372_v32   ;;  %v13512_v19 = vmax.f32 %v4484_v20, 0.0 }
 0x581   : > { %v4108_v47 = vperm.slane %v2714_v55, %v10077_v3  ;;  %v4110_v30 = vperm.slane %v2715_v9, %v10085_v46 }
 0x582   : > { %v4106_v27 = vperm.slane %v2713_v5, %v10050_v45  ;;  %v13524_v58 = vperm.slane %v13512_v19, 1  ;;  %v13536_v31 = vperm.slane %v13512_v19, 6 }
 0x583   : > { %4559 = vperm.xlu2 %8883, %v13358_v49   ;;  %v13460_v49 = vperm.slane %v13367_v10, 0 }
 0x584   : > { %v4107_v6 = vsel %vm3269_vm4, %v4106_v27, %v4105_v15  ;;  %8885 = vset.pattern.permute.xlu1 %v13292_v50 }
 0x585   : > { %v4109_v8 = vsel %vm3273_vm5, %v4108_v47, %v4107_v6 }
 0x586   : > { %v13455_v48 = vpop.xlane.xlu2 %2140  ;;  %v13457_v51 = vpop.xlane.xlu1 %2137  ;;  %v4111_v44 = vsel %vm3277_vm6, %v4110_v30, %v4109_v8 }
 0x587   : > { %v13464_v24 = vpop.xlane.xlu0 %2134  ;;  %v4279_v18 = vsel %vm4180_vm13, %v4111_v44, %v4278_v7  ;;  %v4487_v17 = vpop.f32.mrf.mxu1  ;;  %v2717_v30 = vmul.f32 %v10039_v41, %v13457_v51  ;;  %v2718_v44 = vmul.f32 %v10039_v41, %v13455_v48 }
 0x588   : > { %4747 = vperm.xlu0 %8881, %v13460_v49   ;;  %8844 = vmatmul.msk.f32.gmra.mxu2 %vm4287_vm14, %v4279_v18  ;;  %v13541_v61 = vmax.f32 %v4487_v17, 0.0  ;;  %v2716_v27 = vmul.f32 %v10039_v41, %v13464_v24 }
 0x589   : > { %v4113_v51 = vperm.slane %v2717_v30, %v10050_v45  ;;  %v4115_v56 = vperm.slane %v2718_v44, %v10077_v3 }
 0x58a   : > { %v13553_v6 = vperm.slane %v13541_v61, 3  ;;  %v4112_v7 = vperm.slane %v2716_v27, %v10042_v42 }
 0x58b   : > { %8884 = vset.pattern.permute.xlu2 %v13281_v16 }
 0x58c   : > { %4572 = vperm.xlu1 %8885, %v4561_v60   ;;  %v4114_v20 = vsel %vm3269_vm4, %v4113_v51, %v4112_v7 }
 0x58e   : > { %v13471_v62 = vpop.xlane.xlu2 %2149  ;;  %v13473_v4 = vpop.xlane.xlu1 %2146 }
 0x58f   : > { %v13478_v23 = vpop.xlane.xlu0 %2143  ;;  %v4490_v47 = vpop.f32.mrf.mxu1  ;;  %v2721_v24 = vmul.f32 %v10039_v41, %v13471_v62  ;;  %v2720_v18 = vmul.f32 %v10039_v41, %v13473_v4 }
 0x590   : > { %4872 = vperm.xlu0 %8881, %v13476_v38   ;;  %v13555_v8 = vmax.f32 %v4490_v47, 0.0  ;;  %v13578_v62 = vmul.f32 %v10039_v41, %v13478_v23 }
 0x591   : > { %v4120_v17 = vperm.slane %v2721_v24, %v10050_v45 }
 0x592   : > { %v13572_v48 = vperm.slane %v13555_v8, 0 }
 0x593   : > { %4566 = vperm.xlu2 %8884, %v4561_v60  }
 0x594   : > { %8887 = vset.pattern.permute.xlu1 %v13394_v43 }
 0x596   : > { %v13484_v57 = vpop.xlane.xlu2 %2158  ;;  %v13486_v52 = vpop.xlane.xlu1 %2155 }
 0x597   : > { %v13491_v35 = vpop.xlane.xlu0 %2152  ;;  %v4493_v14 = vpop.f32.mrf.mxu1  ;;  %v2724_v47 = vmul.f32 %v10039_v41, %v13484_v57  ;;  %v4116_v57 = vsel %vm3273_vm5, %v4115_v56, %v4114_v20 }
 0x598   : > { %4997 = vperm.xlu0 %8881, %v13489_v22   ;;  %v2722_v4 = vmul.f32 %v10039_v41, %v13491_v35  ;;  %v13593_v35 = vperm.slane %v13555_v8, 5 }
 0x599   : > { %v4126_v24 = vperm.slane %v2724_v47, %v10042_v42 }
 0x59b   : > { %8886 = vset.pattern.permute.xlu2 %v13301_v63 }
 0x59c   : > { %4584 = vperm.xlu1 %8887, %v4561_v60  }
 0x59e   : > { %v13495_v39 = vpop.xlane.xlu2 %2167  ;;  %v13497_v59 = vpop.xlane.xlu1 %2164 }
 0x59f   : > { %v2162_v25 = vpop.xlane.xlu0 %2161 }
 0x5a0   : > { %5122 = vperm.xlu0 %8881, %v13500_v1   ;;  %v2725_v33 = vmul.f32 %v10039_v41, %v2162_v25  ;;  %v4119_v25 = vperm.slane %v2720_v18, %v10042_v42  ;;  %v2727_v18 = vmul.f32 %v10039_v41, %v13495_v39 }
 0x5a2   : > { %v4127_v44 = vperm.slane %v2725_v33, %v10050_v45  ;;  %v4121_v7 = vsel %vm3269_vm4, %v4120_v17, %v4119_v25 }
 0x5a3   : > { %4578 = vperm.xlu2 %8886, %v4561_v60   ;;  %v13567_v60 = vmax.f32 %v4493_v14, 0.0 }
 0x5a4   : > { %8889 = vset.pattern.permute.xlu1 %v13301_v63 }
 0x5a5   : > { %v13596_v51 = vperm.slane %v13567_v60, 2 }
 0x5a6   : > { %v13506_v54 = vpop.xlane.xlu2 %2176  ;;  %v2174_v2 = vpop.xlane.xlu1 %2173 }
 0x5a7   : > { %v2171_v40 = vpop.xlane.xlu0 %2170  ;;  %v2729_v27 = vmul.f32 %v10039_v41, %v2174_v2  ;;  %v2723_v2 = vmul.f32 %v10039_v41, %v13486_v52  ;;  %v2730_v56 = vmul.f32 %v10039_v41, %v13506_v54 }
 0x5a8   : > { %5247 = vperm.xlu0 %8881, %v13509_v11   ;;  %v2728_v23 = vmul.f32 %v10039_v41, %v2171_v40  ;;  %v4122_v40 = vperm.slane %v2722_v4, %v10077_v3  ;;  %v4128_v4 = vsel %vm3269_vm4, %v4127_v44, %v4126_v24 }
 0x5a9   : > { %v4134_v20 = vperm.slane %v2729_v27, %v10050_v45  ;;  %v4124_v54 = vperm.slane %v2723_v2, %v10085_v46 }
 0x5aa   : > { %v4123_v47 = vsel %vm3273_vm5, %v4122_v40, %v4121_v7  ;;  %v4136_v40 = vperm.slane %v2730_v56, %v10077_v3 }
 0x5ab   : > { %8888 = vset.pattern.permute.xlu2 %v13292_v50 }
 0x5ac   : > { %4603 = vperm.xlu1 %8889, %v13515_v36  }
 0x5ae   : > { %v13519_v9 = vpop.xlane.xlu2 %2185  ;;  %v13521_v55 = vpop.xlane.xlu1 %2182 }
 0x5af   : > { %v13526_v21 = vpop.xlane.xlu0 %2179  ;;  %v2733_v17 = vmul.f32 %v10039_v41, %v13519_v9  ;;  %v2732_v39 = vmul.f32 %v10039_v41, %v13521_v55  ;;  %v4131_v9 = vperm.slane %v2727_v18, %v10085_v46 }
 0x5b0   : > { %5372 = vperm.xlu0 %8881, %v13524_v58   ;;  %v2731_v25 = vmul.f32 %v10039_v41, %v13526_v21 }
 0x5b1   : > { %v4140_v18 = vperm.slane %v2732_v39, %v10042_v42 }
 0x5b3   : > { %4597 = vperm.xlu2 %8888, %v13515_v36  }
 0x5b4   : > { %8891 = vset.pattern.permute.xlu1 %v13281_v16 }
 0x5b6   : > { %v13531_v0 = vpop.xlane.xlu2 %2194  ;;  %v13533_v5 = vpop.xlane.xlu1 %2191 }
 0x5b7   : > { %v13538_v53 = vpop.xlane.xlu0 %2188 }
 0x5b8   : > { %5497 = vperm.xlu0 %8881, %v13536_v31  }
 0x5b9   : > { %v4380_v37 = vpop.f32.mrf.mxu2 }
 0x5ba   : > { %v4402_v15 = vmax.f32 %v4380_v37, 0.0  ;;  %v2726_v37 = vmul.f32 %v10039_v41, %v13497_v59  ;;  %v4117_v59 = vperm.slane %v13578_v62, %v10085_v46  ;;  %v4133_v62 = vperm.slane %v2728_v23, %v10042_v42 }
 0x5bb   : > { %8890 = vset.pattern.permute.xlu2 %v13394_v43 }
 0x5bc   : > { %8859 = vmatmul.msk.f32.gmra.mxu3 %vm4406_vm15, %v4402_v15  ;;  %4616 = vperm.xlu1 %8891, %v13372_v32   ;;  %v4129_v33 = vperm.slane %v2726_v37, %v10077_v3  ;;  %v2734_v37 = vmul.f32 %v10039_v41, %v13538_v53  ;;  %v4135_v7 = vsel %vm3269_vm4, %v4134_v20, %v4133_v62 }
 0x5bd   : > { %v4141_v53 = vperm.slane %v2733_v17, %v10050_v45  ;;  %v4118_v17 = vsel %vm3277_vm6, %v4117_v59, %v4116_v57  ;;  %v4137_v57 = vsel %vm3273_vm5, %v4136_v40, %v4135_v7 }
 0x5be   : > { %v13550_v12 = vpop.xlane.xlu2 %2203  ;;  %v2201_v26 = vpop.xlane.xlu1 %2200  ;;  %v4130_v2 = vsel %vm3273_vm5, %v4129_v33, %v4128_v4  ;;  %v4143_v33 = vperm.slane %v2734_v37, %v10077_v3 }
 0x5bf   : > { %v2198_v28 = vpop.xlane.xlu0 %2197  ;;  %v2738_v27 = vmul.f32 %v10039_v41, %v2201_v26  ;;  %v4138_v26 = vperm.slane %v2731_v25, %v10085_v46  ;;  %v2739_v56 = vmul.f32 %v10039_v41, %v13550_v12  ;;  %v4125_v12 = vsel %vm3277_vm6, %v4124_v54, %v4123_v47 }
 0x5c0   : > { %5622 = vperm.xlu0 %8881, %v13553_v6   ;;  %v2737_v52 = vmul.f32 %v10039_v41, %v2198_v28  ;;  %v2736_v28 = vmul.f32 %v10039_v41, %v13531_v0  ;;  %v4142_v37 = vsel %vm3269_vm4, %v4141_v53, %v4140_v18  ;;  %v4280_v18 = vsel %vm4168_vm7, %v4125_v12, %v4118_v17  ;;  %v4496_v12 = vpop.f32.mrf.mxu1 }
 0x5c1   : > { %v4150_v62 = vperm.slane %v2738_v27, %v10077_v3  ;;  %v4144_v59 = vsel %vm3273_vm5, %v4143_v33, %v4142_v37 }
 0x5c2   : > { %v4148_v0 = vperm.slane %v2737_v52, %v10050_v45 }
 0x5c3   : > { %4609 = vperm.xlu2 %8890, %v13515_v36  }
 0x5c4   : > { %8893 = vset.pattern.permute.xlu1 %v13394_v43 }
 0x5c6   : > { %v2213_v15 = vpop.xlane.xlu2 %2212  ;;  %v2210_v30 = vpop.xlane.xlu1 %2209 }
 0x5c7   : > { %v2207_v14 = vpop.xlane.xlu0 %2206  ;;  %v2741_v55 = vmul.f32 %v10039_v41, %v2210_v30  ;;  %v2735_v30 = vmul.f32 %v10039_v41, %v13533_v5  ;;  %v2742_v20 = vmul.f32 %v10039_v41, %v2213_v15  ;;  %v4132_v15 = vsel %vm3277_vm6, %v4131_v9, %v4130_v2 }
 0x5c8   : > { %5747 = vperm.xlu0 %8881, %v13572_v48   ;;  %v2740_v21 = vmul.f32 %v10039_v41, %v2207_v14  ;;  %v4147_v14 = vperm.slane %v2736_v28, %v10042_v42 }
 0x5c9   : > { %v4155_v52 = vperm.slane %v2741_v55, %v10050_v45  ;;  %v4145_v27 = vperm.slane %v2735_v30, %v10085_v46  ;;  %v4152_v55 = vperm.slane %v2739_v56, %v10085_v46 }
 0x5ca   : > { %v4154_v4 = vperm.slane %v2740_v21, %v10042_v42  ;;  %v4149_v39 = vsel %vm3269_vm4, %v4148_v0, %v4147_v14  ;;  %v4157_v21 = vperm.slane %v2742_v20, %v10077_v3  ;;  %v9297_v0 = vld [vmem:[%s9854_s18] sm:$0xff]  ;;  %v4281_v14 = vsel %vm4170_vm8, %v4132_v15, %v4280_v18  ;;  %v9298_v15 = vld [vmem:[%s9854_s18 + $0x18] sm:$0x3] }
 0x5cb   : > { %8892 = vset.pattern.permute.xlu2 %v13301_v63  ;;  %v4151_v54 = vsel %vm3273_vm5, %v4150_v62, %v4149_v39  ;;  %v13694_v62 = vperm.slane %v13337_v34, 4 }
 0x5cc   : > { %4634 = vperm.xlu1 %8893, %v13372_v32   ;;  %v4156_v47 = vsel %vm3269_vm4, %v4155_v52, %v4154_v4 }
 0x5ce   : > { %v2222_v23 = vpop.xlane.xlu2 %2221  ;;  %v2219_v44 = vpop.xlane.xlu1 %2218 }
 0x5cf   : > { %v2216_v24 = vpop.xlane.xlu0 %2215  ;;  %v2745_v25 = vmul.f32 %v10039_v41, %v2222_v23  ;;  %v2744_v28 = vmul.f32 %v10039_v41, %v2219_v44 }
 0x5d0   : > { %5872 = vperm.xlu0 %8881, %v13593_v35   ;;  %v2743_v5 = vmul.f32 %v10039_v41, %v2216_v24 }
 0x5d1   : > { %v4162_v2 = vperm.slane %v2745_v25, %v10050_v45  ;;  %v4161_v40 = vperm.slane %v2744_v28, %v10042_v42  ;;  %v4153_v42 = vsel %vm3277_vm6, %v4152_v55, %v4151_v54  ;;  %v4158_v45 = vsel %vm3273_vm5, %v4157_v21, %v4156_v47  ;;  %v9299_v54 = vld [vmem:[%s9854_s18 + $0x8] sm:$0xff] }
 0x5d2   : > { %v4159_v9 = vperm.slane %v2743_v5, %v10085_v46  ;;  %v13707_v28 = vperm.slane %v13567_v60, 7 }
 0x5d3   : > { %4628 = vperm.xlu2 %8892, %v13372_v32   ;;  %v4139_v32 = vsel %vm3277_vm6, %v4138_v26, %v4137_v57  ;;  %v4146_v26 = vsel %vm3277_vm6, %v4145_v27, %v4144_v59  ;;  %v4163_v52 = vsel %vm3269_vm4, %v4162_v2, %v4161_v40  ;;  %v13714_v27 = vmax.f32 %v4496_v12, 0.0  ;;  %v4499_v59 = vpop.f32.mrf.mxu3 }
 0x5d4   : > { %8895 = vset.pattern.permute.xlu1 %v13292_v50  ;;  %v4282_v56 = vsel %vm4172_vm9, %v4139_v32, %v4281_v14  ;;  %v13722_v55 = vmax.f32 %v4499_v59, 0.0  ;;  %v13725_v32 = vperm.slane %v13337_v34, 5  ;;  %v4686_v59 = vperm.slane %v13337_v34, 6 }
 0x5d5   : > { %v13719_v57 = vperm.slane %v13714_v27, 4 }
 0x5d6   : > { %v2228_v23 = vpop.xlane.xlu1 %2227  ;;  %v4542_v44 = vpop.permute.xlu2 %4541  ;;  %v13734_v40 = vperm.slane %v13722_v55, 1 }
 0x5d7   : > { %v2747_v7 = vmul.f32 %v10039_v41, %v2228_v23  ;;  %v7736_v24 = vmul.f32 %v9297_v0, %v4542_v44  ;;  %v2225_v53 = vpop.xlane.xlu0 %2224  ;;  %v9300_v23 = vld [vmem:[%s9854_s18 + $0x20] sm:$0xff] }
 0x5d8   : > { %v2746_v30 = vmul.f32 %v10039_v41, %v2225_v53  ;;  %5997 = vperm.xlu0 %8881, %v13596_v51   ;;  %v4160_v41 = vsel %vm3277_vm6, %v4159_v9, %v4158_v45  ;;  %v9302_v53 = vld [vmem:[%s9854_s18 + $0x68] sm:$0xff] }
 0x5d9   : > { %v4166_v33 = vperm.slane %v2747_v7, %v10085_v46  ;;  %8248 = vst.msk [vmem:[%s13671_s4] sm:$0xff] %vm691_vm0, %v7736_v24  ;;  %v4283_v46 = vsel %vm4174_vm10, %v4146_v26, %v4282_v56  ;;  %v9301_v7 = vld [vmem:[%s9854_s18 + $0x10] sm:$0xff]  ;;  %v13748_v26 = vperm.slane %v13722_v55, 6 }
 0x5da   : > { %v4164_v20 = vperm.slane %v2746_v30, %v10077_v3  ;;  %v4284_v5 = vsel %vm4176_vm11, %v4153_v42, %v4283_v46  ;;  %v9303_v42 = vld [vmem:[%s9854_s18 + $0x108] sm:$0xff] }
 0x5db   : > { %8894 = vset.pattern.permute.xlu2 %v13281_v16  ;;  %v4285_v17 = vsel %vm4178_vm12, %v4160_v41, %v4284_v5  ;;  %v4502_v30 = vpop.f32.mrf.mxu3  ;;  %v9305_v5 = vld [vmem:[%s9854_s18 + $0x28] sm:$0xff] }
 0x5dc   : > { %4647 = vperm.xlu1 %8895, %v13694_v62   ;;  %v4165_v4 = vsel %vm3273_vm5, %v4164_v20, %v4163_v52  ;;  %v13751_v14 = vmax.f32 %v4502_v30, 0.0  ;;  %v9304_v20 = vld [vmem:[%s9854_s18 + $0x30] sm:$0xff] }
 0x5dd   : > { %v4167_v3 = vsel %vm3277_vm6, %v4166_v33, %v4165_v4 }
 0x5de   : > { %v4560_v39 = vpop.permute.xlu2 %4559  ;;  %v4286_v25 = vsel %vm4180_vm13, %v4167_v3, %v4285_v17  ;;  %v13760_v46 = vperm.slane %v13751_v14, 3 }
 0x5df   : > { %v7739_v37 = vmul.f32 %v9298_v15, %v4560_v39  ;;  %8845 = vmatmul.msk.f32.gmra.mxu2 %vm4287_vm14, %v4286_v25  ;;  %v9306_v25 = vld [vmem:[%s9854_s18 + $0x1a8] sm:$0xff] }
 0x5e0   : > { %6122 = vperm.xlu0 %8881, %v13707_v28   ;;  %16381 = vst [vmem:[#allocation2_spill] sm:$0xff] %v13760_v46 }
 0x5e1   : > { %8251 = vst.msk [vmem:[%s13671_s4 + $0x18] sm:$0x3] %vm701_vm1, %v7739_v37 }
 0x5e3   : > { %4641 = vperm.xlu2 %8894, %v13694_v62   ;;  %v4505_v4 = vpop.f32.mrf.mxu3 }
 0x5e4   : > { %8897 = vset.pattern.permute.xlu1 %v13281_v16  ;;  %v13768_v17 = vmax.f32 %v4505_v4, 0.0 }
 0x5e6   : > { %v13776_v15 = vperm.slane %v13768_v17, 0 }
 0x5e8   : > { %6247 = vperm.xlu0 %8881, %v13719_v57   ;;  %16382 = vst [vmem:[#allocation3_spill] sm:$0xff] %v13776_v15 }
 0x5ea   : > { %v4548_v21 = vpop.permute.xlu0 %4547 }
 0x5eb   : > { %v7737_v47 = vmul.f32 %v9299_v54, %v4548_v21  ;;  %8896 = vset.pattern.permute.xlu2 %v13394_v43  ;;  %v9307_v21 = vld [vmem:[%s9854_s18 + $0x248] sm:$0xff] }
 0x5ec   : > { %4666 = vperm.xlu1 %8897, %v13725_v32  }
 0x5ed   : > { %8249 = vst.msk [vmem:[%s13671_s4 + $0x8] sm:$0xff] %vm691_vm0, %v7737_v47  ;;  %v4567_v9 = vpop.permute.xlu2 %4566 }
 0x5ee   : > { %v7740_v44 = vmul.f32 %v9300_v23, %v4567_v9  ;;  %v4554_v2 = vpop.permute.xlu1 %4553 }
 0x5ef   : > { %v7738_v0 = vmul.f32 %v9301_v7, %v4554_v2 }
 0x5f0   : > { %8252 = vst.msk [vmem:[%s13671_s4 + $0x20] sm:$0xff] %vm691_vm0, %v7740_v44  ;;  %6372 = vperm.xlu0 %8881, %v13734_v40   ;;  %v9308_v44 = vld [vmem:[%s9854_s18 + $0x48] sm:$0xff] }
 0x5f1   : > { %8250 = vst.msk [vmem:[%s13671_s4 + $0x10] sm:$0xff] %vm691_vm0, %v7738_v0  ;;  %v13787_v0 = vperm.slane %v13768_v17, 5 }
 0x5f2   : > { %v4623_v24 = vpop.permute.xlu0 %4622 }
 0x5f3   : > { %v7749_v18 = vmul.f32 %v9302_v53, %v4623_v24  ;;  %4659 = vperm.xlu2 %8896, %v13694_v62   ;;  %16383 = vst [vmem:[#allocation4_spill] sm:$0xff] %v13787_v0  ;;  %v4508_v24 = vpop.f32.mrf.mxu3  ;;  %v9309_v53 = vld [vmem:[%s9854_s18 + $0x38] sm:$0x3] }
 0x5f4   : > { %8899 = vset.pattern.permute.xlu1 %v13301_v63  ;;  %v13795_v30 = vmax.f32 %v4508_v24, 0.0 }
 0x5f5   : > { %8261 = vst.msk [vmem:[%s13671_s4 + $0x68] sm:$0xff] %vm691_vm0, %v7749_v18 }
 0x5f8   : > { %6497 = vperm.xlu0 %8881, %v13748_v26  }
 0x5fa   : > { %v4748_v33 = vpop.permute.xlu0 %4747 }
 0x5fb   : > { %v7769_v45 = vmul.f32 %v9303_v42, %v4748_v33  ;;  %8898 = vset.pattern.permute.xlu2 %v13292_v50  ;;  %v9310_v42 = vld [vmem:[%s9854_s18 + $0x2e8] sm:$0xff] }
 0x5fc   : > { %4678 = vperm.xlu1 %8899, %v13725_v32  }
 0x5fd   : > { %8281 = vst.msk [vmem:[%s13671_s4 + $0x108] sm:$0xff] %vm691_vm0, %v7769_v45  ;;  %v4579_v56 = vpop.permute.xlu2 %4578 }
 0x5fe   : > { %v7742_v41 = vmul.f32 %v9304_v20, %v4579_v56  ;;  %v4573_v52 = vpop.permute.xlu1 %4572  ;;  %v13802_v56 = vperm.slane %v13795_v30, 2 }
 0x5ff   : > { %v7741_v3 = vmul.f32 %v9305_v5, %v4573_v52  ;;  %v9312_v5 = vld [vmem:[%s9854_s18 + $0x58] sm:$0x3] }
 0x600   : > { %8254 = vst.msk [vmem:[%s13671_s4 + $0x30] sm:$0xff] %vm691_vm0, %v7742_v41  ;;  %6622 = vperm.xlu0 %8881, %v13760_v46   ;;  %v9311_v41 = vld [vmem:[%s9854_s18 + $0x388] sm:$0xff] }
 0x601   : > { %8253 = vst.msk [vmem:[%s13671_s4 + $0x28] sm:$0xff] %vm691_vm0, %v7741_v3 }
 0x602   : > { %v4873_v39 = vpop.permute.xlu0 %4872  ;;  %16384 = vst [vmem:[#allocation5_spill] sm:$0xff] %v13802_v56 }
 0x603   : > { %v7789_v12 = vmul.f32 %v9306_v25, %v4873_v39  ;;  %4672 = vperm.xlu2 %8898, %v13725_v32   ;;  %v13811_v25 = vperm.slane %v13795_v30, 7 }
 0x604   : > { %8901 = vset.pattern.permute.xlu1 %v13292_v50 }
 0x605   : > { %8301 = vst.msk [vmem:[%s13671_s4 + $0x1a8] sm:$0xff] %vm691_vm0, %v7789_v12  ;;  %v9313_v12 = vld [vmem:[%s9854_s18 + $0x50] sm:$0xff] }
 0x606   : > { %16385 = vst [vmem:[#allocation6_spill] sm:$0xff] %v13811_v25 }
 0x608   : > { %6747 = vperm.xlu0 %8881, %v13776_v15  }
 0x60a   : > { %v4998_v37 = vpop.permute.xlu0 %4997 }
 0x60b   : > { %v7809_v54 = vmul.f32 %v9307_v21, %v4998_v37  ;;  %v4383_v47 = vpop.f32.mrf.mxu2  ;;  %8900 = vset.pattern.permute.xlu2 %v13281_v16 }
 0x60c   : > { %v4403_v9 = vmax.f32 %v4383_v47, 0.0  ;;  %4697 = vperm.xlu1 %8901, %v4686_v59  }
 0x60d   : > { %8321 = vst.msk [vmem:[%s13671_s4 + $0x248] sm:$0xff] %vm691_vm0, %v7809_v54  ;;  %v4598_v23 = vpop.permute.xlu2 %4597  ;;  %v9314_v54 = vld [vmem:[%s9854_s18 + $0x428] sm:$0xff] }
 0x60e   : > { %v7745_v2 = vmul.f32 %v9308_v44, %v4598_v23  ;;  %8860 = vmatmul.msk.f32.gmra.mxu3 %vm4406_vm15, %v4403_v9  ;;  %v4585_v7 = vpop.permute.xlu1 %4584  ;;  %v13824_v23 = vperm.slane %v13337_v34, 7  ;;  %v9315_v44 = vld [vmem:[%s9854_s18 + $0x4c8] sm:$0xff] }
 0x60f   : > { %v7743_v18 = vmul.f32 %v9309_v53, %v4585_v7  ;;  %v9316_v7 = vld [vmem:[%s9854_s18 + $0x70] sm:$0xff] }
 0x610   : > { %8257 = vst.msk [vmem:[%s13671_s4 + $0x48] sm:$0xff] %vm691_vm0, %v7745_v2  ;;  %6872 = vperm.xlu0 %8881, %v13787_v0   ;;  %v9383_v0 = vld [vmem:[%s9854_s18 + $0x310] sm:$0xff] }
 0x611   : > { %8255 = vst.msk [vmem:[%s13671_s4 + $0x38] sm:$0x3] %vm701_vm1, %v7743_v18  ;;  %v9317_v18 = vld [vmem:[%s9854_s18 + $0x60] sm:$0xff] }
 0x612   : > { %v5123_v33 = vpop.permute.xlu0 %5122 }
 0x613   : > { %v7829_v45 = vmul.f32 %v9310_v42, %v5123_v33  ;;  %4691 = vperm.xlu2 %8900, %v4686_v59   ;;  %v9318_v42 = vld [vmem:[%s9854_s18 + $0x568] sm:$0xff] }
 0x614   : > { %8903 = vset.pattern.permute.xlu1 %v13394_v43 }
 0x615   : > { %8341 = vst.msk [vmem:[%s13671_s4 + $0x2e8] sm:$0xff] %vm691_vm0, %v7829_v45 }
 0x618   : > { %6997 = vperm.xlu0 %8881, %v13802_v56   ;;  %v14201_v56 = vperm.slane %v13768_v17, 1 }
 0x61a   : > { %v5248_v20 = vpop.permute.xlu0 %5247  ;;  %16392 = vst [vmem:[#allocation13_spill] sm:$0xff] %v14201_v56 }
 0x61b   : > { %v7849_v52 = vmul.f32 %v9311_v41, %v5248_v20  ;;  %8902 = vset.pattern.permute.xlu2 %v13301_v63  ;;  %v9319_v41 = vld [vmem:[%s9854_s18 + $0x608] sm:$0xff] }
 0x61c   : > { %4709 = vperm.xlu1 %8903, %v4686_v59  }
 0x61d   : > { %8361 = vst.msk [vmem:[%s13671_s4 + $0x388] sm:$0xff] %vm691_vm0, %v7849_v52  ;;  %v4610_v4 = vpop.permute.xlu2 %4609 }
 0x61e   : > { %v7747_v3 = vmul.f32 %v9312_v5, %v4610_v4  ;;  %v4604_v39 = vpop.permute.xlu1 %4603  ;;  %v9320_v5 = vld [vmem:[%s9854_s18 + $0x80] sm:$0xff] }
 0x61f   : > { %v7746_v37 = vmul.f32 %v9313_v12, %v4604_v39  ;;  %v9321_v12 = vld [vmem:[%s9854_s18 + $0x78] sm:$0x3] }
 0x620   : > { %8259 = vst.msk [vmem:[%s13671_s4 + $0x58] sm:$0x3] %vm701_vm1, %v7747_v3  ;;  %7122 = vperm.xlu0 %8881, %v13811_v25   ;;  %v14177_v25 = vperm.slane %v13722_v55, 7 }
 0x621   : > { %8258 = vst.msk [vmem:[%s13671_s4 + $0x50] sm:$0xff] %vm691_vm0, %v7746_v37 }
 0x622   : > { %v5373_v21 = vpop.permute.xlu0 %5372  ;;  %16390 = vst [vmem:[#allocation11_spill] sm:$0xff] %v14177_v25 }
 0x623   : > { %v7869_v47 = vmul.f32 %v9314_v54, %v5373_v21  ;;  %4703 = vperm.xlu2 %8902, %v4686_v59  }
 0x624   : > { %8905 = vset.pattern.permute.xlu1 %v13301_v63 }
 0x625   : > { %8381 = vst.msk [vmem:[%s13671_s4 + $0x428] sm:$0xff] %vm691_vm0, %v7869_v47 }
 0x62a   : > { %v5498_v9 = vpop.permute.xlu0 %5497 }
 0x62b   : > { %v7889_v2 = vmul.f32 %v9315_v44, %v5498_v9  ;;  %8904 = vset.pattern.permute.xlu2 %v13292_v50  ;;  %v9322_v44 = vld [vmem:[%s9854_s18 + $0x6a8] sm:$0xff] }
 0x62c   : > { %4728 = vperm.xlu1 %8905, %v13824_v23  }
 0x62d   : > { %8401 = vst.msk [vmem:[%s13671_s4 + $0x4c8] sm:$0xff] %vm691_vm0, %v7889_v2  ;;  %v4629_v59 = vpop.permute.xlu2 %4628 }
 0x62e   : > { %v7750_v24 = vmul.f32 %v9316_v7, %v4629_v59  ;;  %v4617_v53 = vpop.permute.xlu1 %4616  ;;  %v9323_v7 = vld [vmem:[%s9854_s18 + $0x748] sm:$0xff] }
 0x62f   : > { %v7748_v33 = vmul.f32 %v9317_v18, %v4617_v53  ;;  %v9324_v18 = vld [vmem:[%s9854_s18 + $0x98] sm:$0x3] }
 0x630   : > { %8262 = vst.msk [vmem:[%s13671_s4 + $0x70] sm:$0xff] %vm691_vm0, %v7750_v24 }
 0x631   : > { %8260 = vst.msk [vmem:[%s13671_s4 + $0x60] sm:$0xff] %vm691_vm0, %v7748_v33 }
 0x632   : > { %v5623_v34 = vpop.permute.xlu0 %5622 }
 0x633   : > { %v7909_v45 = vmul.f32 %v9318_v42, %v5623_v34  ;;  %4722 = vperm.xlu2 %8904, %v13824_v23   ;;  %v9325_v42 = vld [vmem:[%s9854_s18 + $0x88] sm:$0xff] }
 0x634   : > { %8907 = vset.pattern.permute.xlu1 %v13281_v16 }
 0x635   : > { %8421 = vst.msk [vmem:[%s13671_s4 + $0x568] sm:$0xff] %vm691_vm0, %v7909_v45 }
 0x63a   : > { %v5748_v20 = vpop.permute.xlu0 %5747 }
 0x63b   : > { %v7929_v52 = vmul.f32 %v9319_v41, %v5748_v20  ;;  %8906 = vset.pattern.permute.xlu2 %v13394_v43  ;;  %v9326_v41 = vld [vmem:[%s9854_s18 + $0x7e8] sm:$0xff] }
 0x63c   : > { %4741 = vperm.xlu1 %8907, %v13460_v49  }
 0x63d   : > { %8441 = vst.msk [vmem:[%s13671_s4 + $0x608] sm:$0xff] %vm691_vm0, %v7929_v52  ;;  %v4642_v4 = vpop.permute.xlu2 %4641 }
 0x63e   : > { %v7752_v3 = vmul.f32 %v9320_v5, %v4642_v4  ;;  %v4635_v39 = vpop.permute.xlu1 %4634  ;;  %v13881_v5 = vperm.slane %v13367_v10, 1 }
 0x63f   : > { %v7751_v37 = vmul.f32 %v9321_v12, %v4635_v39  ;;  %v4511_v21 = vpop.f32.mrf.mxu3  ;;  %v9328_v12 = vld [vmem:[%s9854_s18 + $0xa8] sm:$0xff] }
 0x640   : > { %8264 = vst.msk [vmem:[%s13671_s4 + $0x80] sm:$0xff] %vm691_vm0, %v7752_v3  ;;  %v13851_v54 = vmax.f32 %v4511_v21, 0.0  ;;  %v9327_v3 = vld [vmem:[%s9854_s18 + $0x888] sm:$0xff] }
 0x641   : > { %8263 = vst.msk [vmem:[%s13671_s4 + $0x78] sm:$0x3] %vm701_vm1, %v7751_v37 }
 0x642   : > { %v5873_v47 = vpop.permute.xlu0 %5872  ;;  %v13856_v9 = vperm.slane %v13851_v54, 4 }
 0x643   : > { %v7949_v2 = vmul.f32 %v9322_v44, %v5873_v47  ;;  %4734 = vperm.xlu2 %8906, %v13824_v23   ;;  %v9329_v47 = vld [vmem:[%s9854_s18 + $0xa0] sm:$0xff] }
 0x644   : > { %16386 = vst [vmem:[#allocation7_spill] sm:$0xff] %v13856_v9  ;;  %7247 = vperm.xlu0 %8881, %v13856_v9   ;;  %8909 = vset.pattern.permute.xlu1 %v13394_v43 }
 0x645   : > { %8461 = vst.msk [vmem:[%s13671_s4 + $0x6a8] sm:$0xff] %vm691_vm0, %v7949_v2 }
 0x64a   : > { %v5998_v59 = vpop.permute.xlu0 %5997 }
 0x64b   : > { %v7969_v24 = vmul.f32 %v9323_v7, %v5998_v59  ;;  %8908 = vset.pattern.permute.xlu2 %v13301_v63 }
 0x64c   : > { %4759 = vperm.xlu1 %8909, %v13460_v49  }
 0x64d   : > { %8481 = vst.msk [vmem:[%s13671_s4 + $0x748] sm:$0xff] %vm691_vm0, %v7969_v24  ;;  %v4660_v53 = vpop.permute.xlu2 %4659  ;;  %v9330_v24 = vld [vmem:[%s9854_s18 + $0x928] sm:$0xff] }
 0x64e   : > { %v7755_v33 = vmul.f32 %v9324_v18, %v4660_v53  ;;  %v4648_v34 = vpop.permute.xlu1 %4647 }
 0x64f   : > { %v7753_v45 = vmul.f32 %v9325_v42, %v4648_v34  ;;  %v9331_v34 = vld [vmem:[%s9854_s18 + $0x9c8] sm:$0xff] }
 0x650   : > { %8267 = vst.msk [vmem:[%s13671_s4 + $0x98] sm:$0x3] %vm701_vm1, %v7755_v33  ;;  %v13901_v33 = vperm.slane %v13367_v10, 2 }
 0x651   : > { %8265 = vst.msk [vmem:[%s13671_s4 + $0x88] sm:$0xff] %vm691_vm0, %v7753_v45 }
 0x652   : > { %v6123_v20 = vpop.permute.xlu0 %6122 }
 0x653   : > { %v7989_v52 = vmul.f32 %v9326_v41, %v6123_v20  ;;  %4753 = vperm.xlu2 %8908, %v13460_v49   ;;  %v9332_v20 = vld [vmem:[%s9854_s18 + $0xc0] sm:$0xff] }
 0x654   : > { %8911 = vset.pattern.permute.xlu1 %v13292_v50 }
 0x655   : > { %8501 = vst.msk [vmem:[%s13671_s4 + $0x7e8] sm:$0xff] %vm691_vm0, %v7989_v52 }
 0x65a   : > { %v6248_v4 = vpop.permute.xlu0 %6247 }
 0x65b   : > { %v8009_v39 = vmul.f32 %v9327_v3, %v6248_v4  ;;  %8910 = vset.pattern.permute.xlu2 %v13281_v16  ;;  %v9333_v4 = vld [vmem:[%s9854_s18 + $0xb0] sm:$0xff] }
 0x65c   : > { %4772 = vperm.xlu1 %8911, %v13881_v5  }
 0x65d   : > { %8521 = vst.msk [vmem:[%s13671_s4 + $0x888] sm:$0xff] %vm691_vm0, %v8009_v39  ;;  %v4673_v49 = vpop.permute.xlu2 %4672 }
 0x65e   : > { %v7757_v37 = vmul.f32 %v9328_v12, %v4673_v49  ;;  %v4667_v21 = vpop.permute.xlu1 %4666  ;;  %v9334_v49 = vld [vmem:[%s9854_s18 + $0xa68] sm:$0xff] }
 0x65f   : > { %v7756_v44 = vmul.f32 %v9329_v47, %v4667_v21  ;;  %v9335_v21 = vld [vmem:[%s9854_s18 + $0xb08] sm:$0xff] }
 0x660   : > { %8269 = vst.msk [vmem:[%s13671_s4 + $0xa8] sm:$0xff] %vm691_vm0, %v7757_v37 }
 0x661   : > { %8268 = vst.msk [vmem:[%s13671_s4 + $0xa0] sm:$0xff] %vm691_vm0, %v7756_v44 }
 0x662   : > { %v4386_v2 = vpop.f32.mrf.mxu2  ;;  %v6373_v59 = vpop.permute.xlu0 %6372 }
 0x663   : > { %v4404_v7 = vmax.f32 %v4386_v2, 0.0  ;;  %v8029_v53 = vmul.f32 %v9330_v24, %v6373_v59  ;;  %4766 = vperm.xlu2 %8910, %v13881_v5   ;;  %v9336_v2 = vld [vmem:[%s9854_s18 + $0xd0] sm:$0xff]  ;;  %v9337_v24 = vld [vmem:[%s9854_s18 + $0xc8] sm:$0xff] }
 0x664   : > { %8913 = vset.pattern.permute.xlu1 %v13281_v16 }
 0x665   : > { %8541 = vst.msk [vmem:[%s13671_s4 + $0x928] sm:$0xff] %vm691_vm0, %v8029_v53  ;;  %8861 = vmatmul.msk.f32.gmra.mxu3 %vm4406_vm15, %v4404_v7 }
 0x66a   : > { %v6498_v18 = vpop.permute.xlu0 %6497 }
 0x66b   : > { %v8049_v42 = vmul.f32 %v9331_v34, %v6498_v18  ;;  %8912 = vset.pattern.permute.xlu2 %v13394_v43  ;;  %v9338_v34 = vld [vmem:[%s9854_s18 + $0xba8] sm:$0xff] }
 0x66c   : > { %4791 = vperm.xlu1 %8913, %v13901_v33  }
 0x66d   : > { %8561 = vst.msk [vmem:[%s13671_s4 + $0x9c8] sm:$0xff] %vm691_vm0, %v8049_v42  ;;  %v4692_v45 = vpop.permute.xlu2 %4691 }
 0x66e   : > { %v7760_v41 = vmul.f32 %v9332_v20, %v4692_v45  ;;  %v4679_v52 = vpop.permute.xlu1 %4678  ;;  %v4811_v20 = vperm.slane %v13367_v10, 3 }
 0x66f   : > { %v7758_v3 = vmul.f32 %v9333_v4, %v4679_v52 }
 0x670   : > { %8272 = vst.msk [vmem:[%s13671_s4 + $0xc0] sm:$0xff] %vm691_vm0, %v7760_v41  ;;  %v9339_v41 = vld [vmem:[%s9854_s18 + $0xc48] sm:$0xff] }
 0x671   : > { %8270 = vst.msk [vmem:[%s13671_s4 + $0xb0] sm:$0xff] %vm691_vm0, %v7758_v3  ;;  %v9340_v3 = vld [vmem:[%s9854_s18 + $0xe8] sm:$0xff] }
 0x672   : > { %v6623_v39 = vpop.permute.xlu0 %6622 }
 0x673   : > { %v8069_v12 = vmul.f32 %v9334_v49, %v6623_v39  ;;  %4784 = vperm.xlu2 %8912, %v13881_v5  }
 0x674   : > { %8915 = vset.pattern.permute.xlu1 %v13301_v63 }
 0x675   : > { %8581 = vst.msk [vmem:[%s13671_s4 + $0xa68] sm:$0xff] %vm691_vm0, %v8069_v12  ;;  %v9341_v12 = vld [vmem:[%s9854_s18 + $0xd8] sm:$0x3] }
 0x67a   : > { %v6748_v37 = vpop.permute.xlu0 %6747 }
 0x67b   : > { %v8089_v47 = vmul.f32 %v9335_v21, %v6748_v37  ;;  %8914 = vset.pattern.permute.xlu2 %v13292_v50 }
 0x67c   : > { %4803 = vperm.xlu1 %8915, %v13901_v33  }
 0x67d   : > { %8601 = vst.msk [vmem:[%s13671_s4 + $0xb08] sm:$0xff] %vm691_vm0, %v8089_v47  ;;  %v4704_v44 = vpop.permute.xlu2 %4703 }
 0x67e   : > { %v7762_v59 = vmul.f32 %v9336_v2, %v4704_v44  ;;  %v4698_v7 = vpop.permute.xlu1 %4697  ;;  %v9342_v2 = vld [vmem:[%s9854_s18 + $0xce8] sm:$0xff] }
 0x67f   : > { %v7761_v53 = vmul.f32 %v9337_v24, %v4698_v7 }
 0x680   : > { %8274 = vst.msk [vmem:[%s13671_s4 + $0xd0] sm:$0xff] %vm691_vm0, %v7762_v59 }
 0x681   : > { %8273 = vst.msk [vmem:[%s13671_s4 + $0xc8] sm:$0xff] %vm691_vm0, %v7761_v53 }
 0x682   : > { %v6873_v18 = vpop.permute.xlu0 %6872 }
 0x683   : > { %v8109_v42 = vmul.f32 %v9338_v34, %v6873_v18  ;;  %4797 = vperm.xlu2 %8914, %v13901_v33   ;;  %v9343_v18 = vld [vmem:[%s9854_s18 + $0xf8] sm:$0x3] }
 0x684   : > { %8917 = vset.pattern.permute.xlu1 %v13292_v50 }
 0x685   : > { %8621 = vst.msk [vmem:[%s13671_s4 + $0xba8] sm:$0xff] %vm691_vm0, %v8109_v42 }
 0x68a   : > { %v6998_v45 = vpop.permute.xlu0 %6997 }
 0x68b   : > { %v8129_v52 = vmul.f32 %v9339_v41, %v6998_v45  ;;  %8916 = vset.pattern.permute.xlu2 %v13281_v16  ;;  %v9344_v45 = vld [vmem:[%s9854_s18 + $0xf0] sm:$0xff] }
 0x68c   : > { %4822 = vperm.xlu1 %8917, %v4811_v20  }
 0x68d   : > { %8641 = vst.msk [vmem:[%s13671_s4 + $0xc48] sm:$0xff] %vm691_vm0, %v8129_v52  ;;  %v4723_v4 = vpop.permute.xlu2 %4722  ;;  %v13969_v52 = vperm.slane %v13367_v10, 4 }
 0x68e   : > { %v7765_v39 = vmul.f32 %v9340_v3, %v4723_v4  ;;  %v4710_v49 = vpop.permute.xlu1 %4709  ;;  %v9345_v3 = vld [vmem:[%s9854_s18 + $0x110] sm:$0xff] }
 0x68f   : > { %v7763_v37 = vmul.f32 %v9341_v12, %v4710_v49  ;;  %v9346_v12 = vld [vmem:[%s9854_s18 + $0x100] sm:$0xff] }
 0x690   : > { %8277 = vst.msk [vmem:[%s13671_s4 + $0xe8] sm:$0xff] %vm691_vm0, %v7765_v39 }
 0x691   : > { %8275 = vst.msk [vmem:[%s13671_s4 + $0xd8] sm:$0x3] %vm701_vm1, %v7763_v37  ;;  %v4514_v21 = vpop.f32.mrf.mxu3 }
 0x692   : > { %v13946_v47 = vmax.f32 %v4514_v21, 0.0  ;;  %v7123_v44 = vpop.permute.xlu0 %7122  ;;  %v9347_v21 = vld [vmem:[%s9854_s18 + $0xd88] sm:$0xff] }
 0x693   : > { %v8149_v59 = vmul.f32 %v9342_v2, %v7123_v44  ;;  %4816 = vperm.xlu2 %8916, %v4811_v20  }
 0x694   : > { %8919 = vset.pattern.permute.xlu1 %v13394_v43  ;;  %v13951_v7 = vperm.slane %v13946_v47, 1  ;;  %v13958_v24 = vperm.slane %v13946_v47, 6 }
 0x695   : > { %8661 = vst.msk [vmem:[%s13671_s4 + $0xce8] sm:$0xff] %vm691_vm0, %v8149_v59  ;;  %v9348_v59 = vld [vmem:[%s9854_s18 + $0x120] sm:$0xff] }
 0x696   : > { %16387 = vst [vmem:[#allocation8_spill] sm:$0xff] %v13951_v7  ;;  %7372 = vperm.xlu0 %8881, %v13951_v7   ;;  %v9375_v7 = vld [vmem:[%s9854_s18 + $0x90] sm:$0xff] }
 0x697   : > { %16388 = vst [vmem:[#allocation9_spill] sm:$0xff] %v13958_v24 }
 0x69b   : > { %8918 = vset.pattern.permute.xlu2 %v13301_v63 }
 0x69c   : > { %4834 = vperm.xlu1 %8919, %v4811_v20  }
 0x69d   : > { %v4735_v53 = vpop.permute.xlu2 %4734 }
 0x69e   : > { %v7767_v34 = vmul.f32 %v9343_v18, %v4735_v53  ;;  %7497 = vperm.xlu0 %8881, %v13958_v24   ;;  %v4729_v42 = vpop.permute.xlu1 %4728  ;;  %v14153_v24 = vperm.slane %v13714_v27, 5 }
 0x69f   : > { %v7766_v41 = vmul.f32 %v9344_v45, %v4729_v42 }
 0x6a0   : > { %8279 = vst.msk [vmem:[%s13671_s4 + $0xf8] sm:$0x3] %vm701_vm1, %v7767_v34  ;;  %v9349_v34 = vld [vmem:[%s9854_s18 + $0x118] sm:$0x3] }
 0x6a1   : > { %8278 = vst.msk [vmem:[%s13671_s4 + $0xf0] sm:$0xff] %vm691_vm0, %v7766_v41  ;;  %v9350_v41 = vld [vmem:[%s9854_s18 + $0x138] sm:$0x3] }
 0x6a3   : > { %4828 = vperm.xlu2 %8918, %v4811_v20  }
 0x6a4   : > { %8921 = vset.pattern.permute.xlu1 %v13301_v63 }
 0x6ab   : > { %8920 = vset.pattern.permute.xlu2 %v13292_v50 }
 0x6ac   : > { %4853 = vperm.xlu1 %8921, %v13969_v52  }
 0x6ad   : > { %v4754_v4 = vpop.permute.xlu2 %4753 }
 0x6ae   : > { %v7770_v39 = vmul.f32 %v9345_v3, %v4754_v4  ;;  %v4742_v49 = vpop.permute.xlu1 %4741 }
 0x6af   : > { %v7768_v37 = vmul.f32 %v9346_v12, %v4742_v49  ;;  %v4886_v12 = vperm.slane %v13367_v10, 6 }
 0x6b0   : > { %8282 = vst.msk [vmem:[%s13671_s4 + $0x110] sm:$0xff] %vm691_vm0, %v7770_v39  ;;  %v9351_v39 = vld [vmem:[%s9854_s18 + $0x128] sm:$0xff] }
 0x6b1   : > { %8280 = vst.msk [vmem:[%s13671_s4 + $0x100] sm:$0xff] %vm691_vm0, %v7768_v37 }
 0x6b3   : > { %4847 = vperm.xlu2 %8920, %v13969_v52  }
 0x6b4   : > { %8923 = vset.pattern.permute.xlu1 %v13281_v16 }
 0x6b6   : > { %v7248_v20 = vpop.permute.xlu0 %7247 }
 0x6b7   : > { %v8169_v44 = vmul.f32 %v9347_v21, %v7248_v20  ;;  %v9352_v20 = vld [vmem:[%s9854_s18 + $0x148] sm:$0xff] }
 0x6b9   : > { %8681 = vst.msk [vmem:[%s13671_s4 + $0xd88] sm:$0xff] %vm691_vm0, %v8169_v44 }
 0x6bb   : > { %8922 = vset.pattern.permute.xlu2 %v13394_v43 }
 0x6bc   : > { %4866 = vperm.xlu1 %8923, %v13476_v38  }
 0x6bd   : > { %v4767_v2 = vpop.permute.xlu2 %4766 }
 0x6be   : > { %v7772_v53 = vmul.f32 %v9348_v59, %v4767_v2  ;;  %v4760_v18 = vpop.permute.xlu1 %4759  ;;  %v9353_v2 = vld [vmem:[%s9854_s18 + $0x140] sm:$0xff] }
 0x6bf   : > { %v7771_v42 = vmul.f32 %v9349_v34, %v4760_v18  ;;  %v14016_v18 = vperm.slane %v13367_v10, 7 }
 0x6c0   : > { %8284 = vst.msk [vmem:[%s13671_s4 + $0x120] sm:$0xff] %vm691_vm0, %v7772_v53 }
 0x6c1   : > { %8283 = vst.msk [vmem:[%s13671_s4 + $0x118] sm:$0x3] %vm701_vm1, %v7771_v42 }
 0x6c3   : > { %4859 = vperm.xlu2 %8922, %v13969_v52  }
 0x6c4   : > { %8925 = vset.pattern.permute.xlu1 %v13394_v43 }
 0x6cb   : > { %8924 = vset.pattern.permute.xlu2 %v13301_v63 }
 0x6cc   : > { %4884 = vperm.xlu1 %8925, %v13476_v38  }
 0x6cd   : > { %v4785_v45 = vpop.permute.xlu2 %4784 }
 0x6ce   : > { %v7775_v4 = vmul.f32 %v9350_v41, %v4785_v45  ;;  %v4773_v3 = vpop.permute.xlu1 %4772  ;;  %v9354_v45 = vld [vmem:[%s9854_s18 + $0x160] sm:$0xff] }
 0x6cf   : > { %v7773_v49 = vmul.f32 %v9351_v39, %v4773_v3  ;;  %v9355_v3 = vld [vmem:[%s9854_s18 + $0x150] sm:$0xff] }
 0x6d0   : > { %8287 = vst.msk [vmem:[%s13671_s4 + $0x138] sm:$0x3] %vm701_vm1, %v7775_v4 }
 0x6d1   : > { %8285 = vst.msk [vmem:[%s13671_s4 + $0x128] sm:$0xff] %vm691_vm0, %v7773_v49  ;;  %v9356_v49 = vld [vmem:[%s9854_s18 + $0x170] sm:$0xff] }
 0x6d3   : > { %4878 = vperm.xlu2 %8924, %v13476_v38  }
 0x6d4   : > { %8927 = vset.pattern.permute.xlu1 %v13292_v50 }
 0x6db   : > { %8926 = vset.pattern.permute.xlu2 %v13281_v16 }
 0x6dc   : > { %4897 = vperm.xlu1 %8927, %v4886_v12  }
 0x6dd   : > { %v4798_v37 = vpop.permute.xlu2 %4797 }
 0x6de   : > { %v7777_v21 = vmul.f32 %v9352_v20, %v4798_v37  ;;  %v4792_v44 = vpop.permute.xlu1 %4791 }
 0x6df   : > { %v7776_v59 = vmul.f32 %v9353_v2, %v4792_v44  ;;  %v9358_v2 = vld [vmem:[%s9854_s18 + $0xe28] sm:$0xff] }
 0x6e0   : > { %8289 = vst.msk [vmem:[%s13671_s4 + $0x148] sm:$0xff] %vm691_vm0, %v7777_v21  ;;  %v9357_v21 = vld [vmem:[%s9854_s18 + $0x168] sm:$0xff] }
 0x6e1   : > { %8288 = vst.msk [vmem:[%s13671_s4 + $0x140] sm:$0xff] %vm691_vm0, %v7776_v59 }
 0x6e3   : > { %4891 = vperm.xlu2 %8926, %v4886_v12  }
 0x6e4   : > { %8929 = vset.pattern.permute.xlu1 %v13281_v16 }
 0x6e8   : > { %v4517_v38 = vpop.f32.mrf.mxu3 }
 0x6e9   : > { %v14013_v53 = vmax.f32 %v4517_v38, 0.0  ;;  %v4936_v38 = vperm.slane %v13481_v29, 0 }
 0x6eb   : > { %8928 = vset.pattern.permute.xlu2 %v13394_v43  ;;  %v14020_v34 = vperm.slane %v14013_v53, 3 }
 0x6ec   : > { %4916 = vperm.xlu1 %8929, %v14016_v18  }
 0x6ed   : > { %16389 = vst [vmem:[#allocation10_spill] sm:$0xff] %v14020_v34  ;;  %7622 = vperm.xlu0 %8881, %v14020_v34   ;;  %v4817_v42 = vpop.permute.xlu2 %4816 }
 0x6ee   : > { %v7780_v41 = vmul.f32 %v9354_v45, %v4817_v42  ;;  %v4804_v4 = vpop.permute.xlu1 %4803  ;;  %v9359_v45 = vld [vmem:[%s9854_s18 + $0x188] sm:$0xff] }
 0x6ef   : > { %v7778_v39 = vmul.f32 %v9355_v3, %v4804_v4  ;;  %v9360_v3 = vld [vmem:[%s9854_s18 + $0x178] sm:$0x3] }
 0x6f0   : > { %8292 = vst.msk [vmem:[%s13671_s4 + $0x160] sm:$0xff] %vm691_vm0, %v7780_v41 }
 0x6f1   : > { %8290 = vst.msk [vmem:[%s13671_s4 + $0x150] sm:$0xff] %vm691_vm0, %v7778_v39 }
 0x6f3   : > { %4909 = vperm.xlu2 %8928, %v4886_v12  }
 0x6f4   : > { %8931 = vset.pattern.permute.xlu1 %v13301_v63 }
 0x6f5   : > { %9276 = vset.pattern.permute.xlu0 %v13301_v63 }
 0x6fb   : > { %8930 = vset.pattern.permute.xlu2 %v13292_v50 }
 0x6fc   : > { %4928 = vperm.xlu1 %8931, %v14016_v18  }
 0x6fd   : > { %4653 = vperm.xlu0 %9276, %v13694_v62   ;;  %v4829_v10 = vpop.permute.xlu2 %4828 }
 0x6fe   : > { %v7782_v37 = vmul.f32 %v9356_v49, %v4829_v10  ;;  %v4823_v20 = vpop.permute.xlu1 %4822  ;;  %v9361_v10 = vld [vmem:[%s9854_s18 + $0xec8] sm:$0xff] }
 0x6ff   : > { %v7781_v44 = vmul.f32 %v9357_v21, %v4823_v20  ;;  %v9362_v21 = vld [vmem:[%s9854_s18 + $0x198] sm:$0x3] }
 0x700   : > { %8294 = vst.msk [vmem:[%s13671_s4 + $0x170] sm:$0xff] %vm691_vm0, %v7782_v37  ;;  %v14065_v37 = vperm.slane %v13503_v13, 0 }
 0x701   : > { %8293 = vst.msk [vmem:[%s13671_s4 + $0x168] sm:$0xff] %vm691_vm0, %v7781_v44 }
 0x703   : > { %4922 = vperm.xlu2 %8930, %v14016_v18  }
 0x704   : > { %8933 = vset.pattern.permute.xlu1 %v13292_v50 }
 0x705   : > { %4778 = vperm.xlu0 %9276, %v13881_v5  }
 0x708   : > { %v7373_v62 = vpop.permute.xlu0 %7372 }
 0x709   : > { %v8189_v59 = vmul.f32 %v9358_v2, %v7373_v62  ;;  %v9363_v2 = vld [vmem:[%s9854_s18 + $0x190] sm:$0xff] }
 0x70b   : > { %8701 = vst.msk [vmem:[%s13671_s4 + $0xe28] sm:$0xff] %vm691_vm0, %v8189_v59  ;;  %8932 = vset.pattern.permute.xlu2 %v13281_v16 }
 0x70c   : > { %4947 = vperm.xlu1 %8933, %v4936_v38  }
 0x70d   : > { %4903 = vperm.xlu0 %9276, %v4886_v12   ;;  %v4848_v42 = vpop.permute.xlu2 %4847  ;;  %v14059_v12 = vperm.slane %v13481_v29, 3 }
 0x70e   : > { %v7785_v41 = vmul.f32 %v9359_v45, %v4848_v42  ;;  %v4835_v4 = vpop.permute.xlu1 %4834  ;;  %v14075_v42 = vperm.slane %v13503_v13, 5  ;;  %v14080_v45 = vperm.slane %v13481_v29, 1 }
 0x70f   : > { %v7783_v5 = vmul.f32 %v9360_v3, %v4835_v4  ;;  %v9364_v4 = vld [vmem:[%s9854_s18 + $0x1b0] sm:$0xff] }
 0x710   : > { %8297 = vst.msk [vmem:[%s13671_s4 + $0x188] sm:$0xff] %vm691_vm0, %v7785_v41  ;;  %v7498_v39 = vpop.permute.xlu0 %7497  ;;  %v14084_v41 = vperm.slane %v13512_v19, 2 }
 0x711   : > { %8295 = vst.msk [vmem:[%s13671_s4 + $0x178] sm:$0x3] %vm701_vm1, %v7783_v5  ;;  %v8209_v49 = vmul.f32 %v9361_v10, %v7498_v39  ;;  %v9365_v39 = vld [vmem:[%s9854_s18 + $0x1a0] sm:$0xff] }
 0x713   : > { %8721 = vst.msk [vmem:[%s13671_s4 + $0xec8] sm:$0xff] %vm691_vm0, %v8209_v49  ;;  %4941 = vperm.xlu2 %8932, %v4936_v38   ;;  %v14096_v49 = vperm.slane %v13512_v19, 7 }
 0x714   : > { %8935 = vset.pattern.permute.xlu1 %v13394_v43 }
 0x715   : > { %5028 = vperm.xlu0 %9276, %v14059_v12  }
 0x71b   : > { %8934 = vset.pattern.permute.xlu2 %v13301_v63 }
 0x71c   : > { %4959 = vperm.xlu1 %8935, %v4936_v38  }
 0x71d   : > { %5153 = vperm.xlu0 %9276, %v14065_v37   ;;  %v4860_v20 = vpop.permute.xlu2 %4859 }
 0x71e   : > { %v7787_v44 = vmul.f32 %v9362_v21, %v4860_v20  ;;  %v4854_v62 = vpop.permute.xlu1 %4853  ;;  %v14102_v20 = vperm.slane %v13541_v61, 4 }
 0x71f   : > { %v7786_v59 = vmul.f32 %v9363_v2, %v4854_v62 }
 0x720   : > { %8299 = vst.msk [vmem:[%s13671_s4 + $0x198] sm:$0x3] %vm701_vm1, %v7787_v44  ;;  %v9366_v44 = vld [vmem:[%s9854_s18 + $0x1c0] sm:$0xff] }
 0x721   : > { %8298 = vst.msk [vmem:[%s13671_s4 + $0x190] sm:$0xff] %vm691_vm0, %v7786_v59  ;;  %v9367_v59 = vld [vmem:[%s9854_s18 + $0x1b8] sm:$0x3] }
 0x723   : > { %4953 = vperm.xlu2 %8934, %v4936_v38  }
 0x724   : > { %8937 = vset.pattern.permute.xlu1 %v13301_v63 }
 0x725   : > { %5278 = vperm.xlu0 %9276, %v14075_v42  }
 0x72b   : > { %8936 = vset.pattern.permute.xlu2 %v13292_v50 }
 0x72c   : > { %4978 = vperm.xlu1 %8937, %v14080_v45  }
 0x72d   : > { %5403 = vperm.xlu0 %9276, %v14084_v41   ;;  %v4879_v38 = vpop.permute.xlu2 %4878 }
 0x72e   : > { %v7790_v3 = vmul.f32 %v9364_v4, %v4879_v38  ;;  %v4867_v5 = vpop.permute.xlu1 %4866  ;;  %v14114_v4 = vperm.slane %v13555_v8, 1 }
 0x72f   : > { %v7788_v10 = vmul.f32 %v9365_v39, %v4867_v5  ;;  %v9368_v39 = vld [vmem:[%s9854_s18 + $0x1d8] sm:$0x3] }
 0x730   : > { %8302 = vst.msk [vmem:[%s13671_s4 + $0x1b0] sm:$0xff] %vm691_vm0, %v7790_v3  ;;  %v14120_v3 = vperm.slane %v13555_v8, 6 }
 0x731   : > { %8300 = vst.msk [vmem:[%s13671_s4 + $0x1a0] sm:$0xff] %vm691_vm0, %v7788_v10 }
 0x733   : > { %4972 = vperm.xlu2 %8936, %v14080_v45  }
 0x734   : > { %8939 = vset.pattern.permute.xlu1 %v13281_v16 }
 0x735   : > { %5528 = vperm.xlu0 %9276, %v14096_v49  }
 0x73b   : > { %8938 = vset.pattern.permute.xlu2 %v13394_v43 }
 0x73c   : > { %4991 = vperm.xlu1 %8939, %v13489_v22  }
 0x73d   : > { %5653 = vperm.xlu0 %9276, %v14102_v20   ;;  %v4892_v21 = vpop.permute.xlu2 %4891 }
 0x73e   : > { %v7792_v62 = vmul.f32 %v9366_v44, %v4892_v21  ;;  %v4885_v2 = vpop.permute.xlu1 %4884  ;;  %v9369_v44 = vld [vmem:[%s9854_s18 + $0x1c8] sm:$0xff] }
 0x73f   : > { %v7791_v38 = vmul.f32 %v9367_v59, %v4885_v2  ;;  %v14132_v2 = vperm.slane %v13567_v60, 3  ;;  %v14138_v59 = vperm.slane %v13714_v27, 0 }
 0x740   : > { %8304 = vst.msk [vmem:[%s13671_s4 + $0x1c0] sm:$0xff] %vm691_vm0, %v7792_v62 }
 0x741   : > { %8303 = vst.msk [vmem:[%s13671_s4 + $0x1b8] sm:$0x3] %vm701_vm1, %v7791_v38  ;;  %v9370_v38 = vld [vmem:[%s9854_s18 + $0x1e8] sm:$0xff] }
 0x743   : > { %4984 = vperm.xlu2 %8938, %v14080_v45  }
 0x744   : > { %8941 = vset.pattern.permute.xlu1 %v13394_v43 }
 0x745   : > { %5778 = vperm.xlu0 %9276, %v14114_v4  }
 0x74b   : > { %8940 = vset.pattern.permute.xlu2 %v13301_v63 }
 0x74c   : > { %5009 = vperm.xlu1 %8941, %v13489_v22  }
 0x74d   : > { %5903 = vperm.xlu0 %9276, %v14120_v3   ;;  %v4910_v5 = vpop.permute.xlu2 %4909 }
 0x74e   : > { %v7795_v10 = vmul.f32 %v9368_v39, %v4910_v5  ;;  %v4898_v21 = vpop.permute.xlu1 %4897 }
 0x74f   : > { %v7793_v62 = vmul.f32 %v9369_v44, %v4898_v21 }
 0x750   : > { %8307 = vst.msk [vmem:[%s13671_s4 + $0x1d8] sm:$0x3] %vm701_vm1, %v7795_v10  ;;  %v9371_v10 = vld [vmem:[%s9854_s18 + $0x1e0] sm:$0xff] }
 0x751   : > { %8305 = vst.msk [vmem:[%s13671_s4 + $0x1c8] sm:$0xff] %vm691_vm0, %v7793_v62  ;;  %v9372_v62 = vld [vmem:[%s9854_s18 + $0xf68] sm:$0xff] }
 0x753   : > { %5003 = vperm.xlu2 %8940, %v13489_v22  }
 0x754   : > { %8943 = vset.pattern.permute.xlu1 %v13292_v50 }
 0x755   : > { %6028 = vperm.xlu0 %9276, %v14132_v2  }
 0x75b   : > { %8942 = vset.pattern.permute.xlu2 %v13281_v16 }
 0x75c   : > { %5022 = vperm.xlu1 %8943, %v14059_v12  }
 0x75d   : > { %6153 = vperm.xlu0 %9276, %v14138_v59   ;;  %v4923_v22 = vpop.permute.xlu2 %4922 }
 0x75e   : > { %v7797_v5 = vmul.f32 %v9370_v38, %v4923_v22  ;;  %v4917_v39 = vpop.permute.xlu1 %4916  ;;  %v14158_v22 = vperm.slane %v13481_v29, 4 }
 0x75f   : > { %v7796_v21 = vmul.f32 %v9371_v10, %v4917_v39  ;;  %v7623_v44 = vpop.permute.xlu0 %7622 }
 0x760   : > { %8309 = vst.msk [vmem:[%s13671_s4 + $0x1e8] sm:$0xff] %vm691_vm0, %v7797_v5  ;;  %v8229_v34 = vmul.f32 %v9372_v62, %v7623_v44  ;;  %v9373_v5 = vld [vmem:[%s9854_s18 + $0x200] sm:$0xff] }
 0x761   : > { %8308 = vst.msk [vmem:[%s13671_s4 + $0x1e0] sm:$0xff] %vm691_vm0, %v7796_v21  ;;  %v9374_v21 = vld [vmem:[%s9854_s18 + $0x1f0] sm:$0xff] }
 0x762   : > { %8741 = vst.msk [vmem:[%s13671_s4 + $0xf68] sm:$0xff] %vm691_vm0, %v8229_v34  ;;  %v14162_v34 = vperm.slane %v13722_v55, 2 }
 0x763   : > { %5016 = vperm.xlu2 %8942, %v14059_v12  }
 0x764   : > { %8945 = vset.pattern.permute.xlu1 %v13281_v16 }
 0x765   : > { %6278 = vperm.xlu0 %9276, %v14153_v24  }
 0x76b   : > { %8944 = vset.pattern.permute.xlu2 %v13394_v43 }
 0x76c   : > { %5041 = vperm.xlu1 %8945, %v14158_v22  }
 0x76d   : > { %6403 = vperm.xlu0 %9276, %v14162_v34   ;;  %v4942_v38 = vpop.permute.xlu2 %4941 }
 0x76e   : > { %v7800_v39 = vmul.f32 %v9373_v5, %v4942_v38  ;;  %v4929_v10 = vpop.permute.xlu1 %4928  ;;  %v9376_v5 = vld [vmem:[%s9854_s18 + $0x130] sm:$0xff] }
 0x76f   : > { %v7798_v44 = vmul.f32 %v9374_v21, %v4929_v10  ;;  %v4654_v62 = vpop.permute.xlu0 %4653 }
 0x770   : > { %8312 = vst.msk [vmem:[%s13671_s4 + $0x200] sm:$0xff] %vm691_vm0, %v7800_v39  ;;  %v7754_v9 = vmul.f32 %v9375_v7, %v4654_v62  ;;  %v9377_v39 = vld [vmem:[%s9854_s18 + $0x210] sm:$0xff] }
 0x771   : > { %8310 = vst.msk [vmem:[%s13671_s4 + $0x1f0] sm:$0xff] %vm691_vm0, %v7798_v44  ;;  %v9378_v44 = vld [vmem:[%s9854_s18 + $0x208] sm:$0xff] }
 0x772   : > { %8266 = vst.msk [vmem:[%s13671_s4 + $0x90] sm:$0xff] %vm691_vm0, %v7754_v9  ;;  %v14186_v9 = vperm.slane %v13751_v14, 4 }
 0x773   : > { %5034 = vperm.xlu2 %8944, %v14059_v12  }
 0x774   : > { %8947 = vset.pattern.permute.xlu1 %v13301_v63  ;;  %16391 = vst [vmem:[#allocation12_spill] sm:$0xff] %v14186_v9 }
 0x775   : > { %6528 = vperm.xlu0 %9276, %v14177_v25   ;;  %v14465_v25 = vperm.slane %v13751_v14, 0 }
 0x777   : > { %v4779_v38 = vpop.permute.xlu0 %4778  ;;  %16400 = vst [vmem:[#allocation21_spill] sm:$0xff] %v14465_v25 }
 0x778   : > { %v7774_v7 = vmul.f32 %v9376_v5, %v4779_v38  ;;  %v9379_v5 = vld [vmem:[%s9854_s18 + $0x1d0] sm:$0xff] }
 0x77a   : > { %8286 = vst.msk [vmem:[%s13671_s4 + $0x130] sm:$0xff] %vm691_vm0, %v7774_v7 }
 0x77b   : > { %8946 = vset.pattern.permute.xlu2 %v13292_v50 }
 0x77c   : > { %5053 = vperm.xlu1 %8947, %v14158_v22  }
 0x77d   : > { %6653 = vperm.xlu0 %9276, %v14186_v9   ;;  %v4954_v12 = vpop.permute.xlu2 %4953  ;;  %v9426_v9 = vld [vmem:[%s9854_s18 + $0xb8] sm:$0x3] }
 0x77e   : > { %v7802_v10 = vmul.f32 %v9377_v39, %v4954_v12  ;;  %v4948_v21 = vpop.permute.xlu1 %4947  ;;  %v9380_v39 = vld [vmem:[%s9854_s18 + $0x270] sm:$0xff] }
 0x77f   : > { %v7801_v62 = vmul.f32 %v9378_v44, %v4948_v21  ;;  %v4904_v38 = vpop.permute.xlu0 %4903  ;;  %v5061_v21 = vperm.slane %v13481_v29, 5  ;;  %v14211_v44 = vperm.slane %v13768_v17, 6 }
 0x780   : > { %8314 = vst.msk [vmem:[%s13671_s4 + $0x210] sm:$0xff] %vm691_vm0, %v7802_v10  ;;  %v7794_v7 = vmul.f32 %v9379_v5, %v4904_v38  ;;  %v9381_v38 = vld [vmem:[%s9854_s18 + $0x228] sm:$0xff] }
 0x781   : > { %8313 = vst.msk [vmem:[%s13671_s4 + $0x208] sm:$0xff] %vm691_vm0, %v7801_v62 }
 0x782   : > { %8306 = vst.msk [vmem:[%s13671_s4 + $0x1d0] sm:$0xff] %vm691_vm0, %v7794_v7 }
 0x783   : > { %5047 = vperm.xlu2 %8946, %v14158_v22   ;;  %16393 = vst [vmem:[#allocation14_spill] sm:$0xff] %v14211_v44 }
 0x784   : > { %8949 = vset.pattern.permute.xlu1 %v13292_v50 }
 0x785   : > { %6778 = vperm.xlu0 %9276, %v14201_v56  }
 0x787   : > { %v5029_v12 = vpop.permute.xlu0 %5028 }
 0x788   : > { %v7814_v10 = vmul.f32 %v9380_v39, %v5029_v12  ;;  %v9382_v12 = vld [vmem:[%s9854_s18 + $0x218] sm:$0x3] }
 0x78a   : > { %8326 = vst.msk [vmem:[%s13671_s4 + $0x270] sm:$0xff] %vm691_vm0, %v7814_v10 }
 0x78b   : > { %8948 = vset.pattern.permute.xlu2 %v13281_v16 }
 0x78c   : > { %5072 = vperm.xlu1 %8949, %v5061_v21  }
 0x78d   : > { %6903 = vperm.xlu0 %9276, %v14211_v44   ;;  %v4973_v62 = vpop.permute.xlu2 %4972  ;;  %v14224_v44 = vperm.slane %v13795_v30, 3 }
 0x78e   : > { %v7805_v5 = vmul.f32 %v9381_v38, %v4973_v62  ;;  %v4960_v7 = vpop.permute.xlu1 %4959  ;;  %v9384_v38 = vld [vmem:[%s9854_s18 + $0x3b0] sm:$0xff] }
 0x78f   : > { %v7803_v39 = vmul.f32 %v9382_v12, %v4960_v7  ;;  %v5154_v10 = vpop.permute.xlu0 %5153  ;;  %16394 = vst [vmem:[#allocation15_spill] sm:$0xff] %v14224_v44  ;;  %v9385_v7 = vld [vmem:[%s9854_s18 + $0x238] sm:$0x3] }
 0x790   : > { %8317 = vst.msk [vmem:[%s13671_s4 + $0x228] sm:$0xff] %vm691_vm0, %v7805_v5  ;;  %v7834_v56 = vmul.f32 %v9383_v0, %v5154_v10  ;;  %v14233_v0 = vperm.slane %v13851_v54, 0  ;;  %v9386_v10 = vld [vmem:[%s9854_s18 + $0x230] sm:$0xff] }
 0x791   : > { %8315 = vst.msk [vmem:[%s13671_s4 + $0x218] sm:$0x3] %vm701_vm1, %v7803_v39 }
 0x792   : > { %8346 = vst.msk [vmem:[%s13671_s4 + $0x310] sm:$0xff] %vm691_vm0, %v7834_v56 }
 0x793   : > { %5066 = vperm.xlu2 %8948, %v5061_v21   ;;  %16395 = vst [vmem:[#allocation16_spill] sm:$0xff] %v14233_v0 }
 0x794   : > { %8951 = vset.pattern.permute.xlu1 %v13394_v43 }
 0x795   : > { %7028 = vperm.xlu0 %9276, %v14224_v44  }
 0x797   : > { %v5279_v62 = vpop.permute.xlu0 %5278 }
 0x798   : > { %v7854_v5 = vmul.f32 %v9384_v38, %v5279_v62 }
 0x79a   : > { %8366 = vst.msk [vmem:[%s13671_s4 + $0x3b0] sm:$0xff] %vm691_vm0, %v7854_v5  ;;  %v9387_v5 = vld [vmem:[%s9854_s18 + $0x450] sm:$0xff] }
 0x79b   : > { %8950 = vset.pattern.permute.xlu2 %v13301_v63 }
 0x79c   : > { %5084 = vperm.xlu1 %8951, %v5061_v21  }
 0x79d   : > { %7153 = vperm.xlu0 %9276, %v14233_v0   ;;  %v4985_v56 = vpop.permute.xlu2 %4984  ;;  %v14246_v0 = vperm.slane %v13851_v54, 5 }
 0x79e   : > { %v7807_v12 = vmul.f32 %v9385_v7, %v4985_v56  ;;  %v4979_v39 = vpop.permute.xlu1 %4978  ;;  %v9388_v7 = vld [vmem:[%s9854_s18 + $0x4f0] sm:$0xff] }
 0x79f   : > { %v7806_v62 = vmul.f32 %v9386_v10, %v4979_v39  ;;  %v5404_v38 = vpop.permute.xlu0 %5403  ;;  %16396 = vst [vmem:[#allocation17_spill] sm:$0xff] %v14246_v0  ;;  %v14254_v39 = vperm.slane %v13481_v29, 6  ;;  %v9389_v10 = vld [vmem:[%s9854_s18 + $0x250] sm:$0xff] }
 0x7a0   : > { %8319 = vst.msk [vmem:[%s13671_s4 + $0x238] sm:$0x3] %vm701_vm1, %v7807_v12  ;;  %v7874_v44 = vmul.f32 %v9387_v5, %v5404_v38  ;;  %v9390_v5 = vld [vmem:[%s9854_s18 + $0x240] sm:$0xff] }
 0x7a1   : > { %8318 = vst.msk [vmem:[%s13671_s4 + $0x230] sm:$0xff] %vm691_vm0, %v7806_v62 }
 0x7a2   : > { %8386 = vst.msk [vmem:[%s13671_s4 + $0x450] sm:$0xff] %vm691_vm0, %v7874_v44 }
 0x7a3   : > { %5078 = vperm.xlu2 %8950, %v5061_v21   ;;  %v14258_v21 = vperm.slane %v13946_v47, 2 }
 0x7a4   : > { %8953 = vset.pattern.permute.xlu1 %v13301_v63 }
 0x7a5   : > { %7278 = vperm.xlu0 %9276, %v14246_v0   ;;  %16397 = vst [vmem:[#allocation18_spill] sm:$0xff] %v14258_v21  ;;  %v14417_v0 = vperm.slane %v13567_v60, 4 }
 0x7a7   : > { %v5529_v56 = vpop.permute.xlu0 %5528 }
 0x7a8   : > { %v7894_v12 = vmul.f32 %v9388_v7, %v5529_v56  ;;  %v9391_v7 = vld [vmem:[%s9854_s18 + $0x590] sm:$0xff] }
 0x7aa   : > { %8406 = vst.msk [vmem:[%s13671_s4 + $0x4f0] sm:$0xff] %vm691_vm0, %v7894_v12 }
 0x7ab   : > { %8952 = vset.pattern.permute.xlu2 %v13292_v50 }
 0x7ac   : > { %5103 = vperm.xlu1 %8953, %v14254_v39  }
 0x7ad   : > { %7403 = vperm.xlu0 %9276, %v14258_v21   ;;  %v5004_v44 = vpop.permute.xlu2 %5003  ;;  %v14273_v21 = vperm.slane %v13946_v47, 7 }
 0x7ae   : > { %v7810_v62 = vmul.f32 %v9389_v10, %v5004_v44  ;;  %v4992_v38 = vpop.permute.xlu1 %4991  ;;  %v9392_v10 = vld [vmem:[%s9854_s18 + $0x630] sm:$0xff] }
 0x7af   : > { %v7808_v56 = vmul.f32 %v9390_v5, %v4992_v38  ;;  %v5654_v29 = vpop.permute.xlu0 %5653  ;;  %16398 = vst [vmem:[#allocation19_spill] sm:$0xff] %v14273_v21  ;;  %v14282_v38 = vperm.slane %v14013_v53, 4 }
 0x7b0   : > { %8322 = vst.msk [vmem:[%s13671_s4 + $0x250] sm:$0xff] %vm691_vm0, %v7810_v62  ;;  %v7914_v12 = vmul.f32 %v9391_v7, %v5654_v29 }
 0x7b1   : > { %8320 = vst.msk [vmem:[%s13671_s4 + $0x240] sm:$0xff] %vm691_vm0, %v7808_v56  ;;  %v9393_v56 = vld [vmem:[%s9854_s18 + $0x260] sm:$0xff] }
 0x7b2   : > { %8426 = vst.msk [vmem:[%s13671_s4 + $0x590] sm:$0xff] %vm691_vm0, %v7914_v12  ;;  %v9394_v12 = vld [vmem:[%s9854_s18 + $0x258] sm:$0x3] }
 0x7b3   : > { %5097 = vperm.xlu2 %8952, %v14254_v39   ;;  %16399 = vst [vmem:[#allocation20_spill] sm:$0xff] %v14282_v38 }
 0x7b4   : > { %8955 = vset.pattern.permute.xlu1 %v13281_v16 }
 0x7b5   : > { %7528 = vperm.xlu0 %9276, %v14273_v21  }
 0x7b7   : > { %v5779_v44 = vpop.permute.xlu0 %5778 }
 0x7b8   : > { %v7934_v62 = vmul.f32 %v9392_v10, %v5779_v44 }
 0x7ba   : > { %8446 = vst.msk [vmem:[%s13671_s4 + $0x630] sm:$0xff] %vm691_vm0, %v7934_v62  ;;  %v9395_v62 = vld [vmem:[%s9854_s18 + $0x6d0] sm:$0xff] }
 0x7bb   : > { %8954 = vset.pattern.permute.xlu2 %v13394_v43 }
 0x7bc   : > { %5116 = vperm.xlu1 %8955, %v13500_v1  }
 0x7bd   : > { %7653 = vperm.xlu0 %9276, %v14282_v38   ;;  %v5017_v5 = vpop.permute.xlu2 %5016 }
 0x7be   : > { %v7812_v29 = vmul.f32 %v9393_v56, %v5017_v5  ;;  %v5010_v7 = vpop.permute.xlu1 %5009  ;;  %v9396_v56 = vld [vmem:[%s9854_s18 + $0x770] sm:$0xff] }
 0x7bf   : > { %v7811_v44 = vmul.f32 %v9394_v12, %v5010_v7  ;;  %v5904_v10 = vpop.permute.xlu0 %5903  ;;  %v9397_v7 = vld [vmem:[%s9854_s18 + $0x278] sm:$0x3] }
 0x7c0   : > { %8324 = vst.msk [vmem:[%s13671_s4 + $0x260] sm:$0xff] %vm691_vm0, %v7812_v29  ;;  %v7954_v21 = vmul.f32 %v9395_v62, %v5904_v10  ;;  %v9398_v10 = vld [vmem:[%s9854_s18 + $0x268] sm:$0xff] }
 0x7c1   : > { %8323 = vst.msk [vmem:[%s13671_s4 + $0x258] sm:$0x3] %vm701_vm1, %v7811_v44 }
 0x7c2   : > { %8466 = vst.msk [vmem:[%s13671_s4 + $0x6d0] sm:$0xff] %vm691_vm0, %v7954_v21 }
 0x7c3   : > { %5109 = vperm.xlu2 %8954, %v14254_v39  }
 0x7c4   : > { %8957 = vset.pattern.permute.xlu1 %v13394_v43 }
 0x7c5   : > { %9281 = vset.pattern.permute.xlu0 %v13394_v43 }
 0x7c7   : > { %v6029_v5 = vpop.permute.xlu0 %6028 }
 0x7c8   : > { %v7974_v29 = vmul.f32 %v9396_v56, %v6029_v5  ;;  %v9399_v5 = vld [vmem:[%s9854_s18 + $0x810] sm:$0xff] }
 0x7ca   : > { %8486 = vst.msk [vmem:[%s13671_s4 + $0x770] sm:$0xff] %vm691_vm0, %v7974_v29  ;;  %v9400_v29 = vld [vmem:[%s9854_s18 + $0x8b0] sm:$0xff] }
 0x7cb   : > { %8956 = vset.pattern.permute.xlu2 %v13301_v63 }
 0x7cc   : > { %5134 = vperm.xlu1 %8957, %v13500_v1  }
 0x7cd   : > { %4684 = vperm.xlu0 %9281, %v13725_v32   ;;  %v5035_v21 = vpop.permute.xlu2 %5034 }
 0x7ce   : > { %v7815_v12 = vmul.f32 %v9397_v7, %v5035_v21  ;;  %v5023_v44 = vpop.permute.xlu1 %5022 }
 0x7cf   : > { %v7813_v62 = vmul.f32 %v9398_v10, %v5023_v44  ;;  %v6154_v38 = vpop.permute.xlu0 %6153 }
 0x7d0   : > { %8327 = vst.msk [vmem:[%s13671_s4 + $0x278] sm:$0x3] %vm701_vm1, %v7815_v12  ;;  %v7994_v56 = vmul.f32 %v9399_v5, %v6154_v38  ;;  %v9401_v38 = vld [vmem:[%s9854_s18 + $0x288] sm:$0xff]  ;;  %v9402_v12 = vld [vmem:[%s9854_s18 + $0x280] sm:$0xff] }
 0x7d1   : > { %8325 = vst.msk [vmem:[%s13671_s4 + $0x268] sm:$0xff] %vm691_vm0, %v7813_v62  ;;  %v9403_v62 = vld [vmem:[%s9854_s18 + $0x950] sm:$0xff] }
 0x7d2   : > { %8506 = vst.msk [vmem:[%s13671_s4 + $0x810] sm:$0xff] %vm691_vm0, %v7994_v56  ;;  %v9404_v56 = vld [vmem:[%s9854_s18 + $0x9f0] sm:$0xff] }
 0x7d3   : > { %5128 = vperm.xlu2 %8956, %v13500_v1  }
 0x7d4   : > { %8959 = vset.pattern.permute.xlu1 %v13292_v50 }
 0x7d5   : > { %4809 = vperm.xlu0 %9281, %v13901_v33  }
 0x7d7   : > { %v6279_v32 = vpop.permute.xlu0 %6278 }
 0x7d8   : > { %v8014_v21 = vmul.f32 %v9400_v29, %v6279_v32  ;;  %v5161_v29 = vperm.slane %v13503_v13, 1 }
 0x7da   : > { %8526 = vst.msk [vmem:[%s13671_s4 + $0x8b0] sm:$0xff] %vm691_vm0, %v8014_v21 }
 0x7db   : > { %8958 = vset.pattern.permute.xlu2 %v13281_v16 }
 0x7dc   : > { %5147 = vperm.xlu1 %8959, %v14065_v37  }
 0x7dd   : > { %4934 = vperm.xlu0 %9281, %v14016_v18   ;;  %v5048_v1 = vpop.permute.xlu2 %5047 }
 0x7de   : > { %v7817_v7 = vmul.f32 %v9401_v38, %v5048_v1  ;;  %v5042_v33 = vpop.permute.xlu1 %5041  ;;  %v9405_v1 = vld [vmem:[%s9854_s18 + $0x2a0] sm:$0xff] }
 0x7df   : > { %v7816_v44 = vmul.f32 %v9402_v12, %v5042_v33  ;;  %v6404_v10 = vpop.permute.xlu0 %6403 }
 0x7e0   : > { %8329 = vst.msk [vmem:[%s13671_s4 + $0x288] sm:$0xff] %vm691_vm0, %v7817_v7  ;;  %v8034_v5 = vmul.f32 %v9403_v62, %v6404_v10  ;;  %v9406_v7 = vld [vmem:[%s9854_s18 + $0x290] sm:$0xff]  ;;  %v14350_v62 = vperm.slane %v13503_v13, 6 }
 0x7e1   : > { %8328 = vst.msk [vmem:[%s13671_s4 + $0x280] sm:$0xff] %vm691_vm0, %v7816_v44  ;;  %v9407_v44 = vld [vmem:[%s9854_s18 + $0xa90] sm:$0xff] }
 0x7e2   : > { %8546 = vst.msk [vmem:[%s13671_s4 + $0x950] sm:$0xff] %vm691_vm0, %v8034_v5 }
 0x7e3   : > { %5141 = vperm.xlu2 %8958, %v14065_v37  }
 0x7e4   : > { %8961 = vset.pattern.permute.xlu1 %v13281_v16 }
 0x7e5   : > { %5059 = vperm.xlu0 %9281, %v14158_v22  }
 0x7e7   : > { %v6529_v18 = vpop.permute.xlu0 %6528 }
 0x7e8   : > { %v8054_v32 = vmul.f32 %v9404_v56, %v6529_v18  ;;  %v9408_v18 = vld [vmem:[%s9854_s18 + $0xb30] sm:$0xff] }
 0x7ea   : > { %8566 = vst.msk [vmem:[%s13671_s4 + $0x9f0] sm:$0xff] %vm691_vm0, %v8054_v32 }
 0x7eb   : > { %8960 = vset.pattern.permute.xlu2 %v13394_v43 }
 0x7ec   : > { %5166 = vperm.xlu1 %8961, %v5161_v29  }
 0x7ed   : > { %5184 = vperm.xlu0 %9281, %v5161_v29   ;;  %v5067_v21 = vpop.permute.xlu2 %5066 }
 0x7ee   : > { %v7820_v38 = vmul.f32 %v9405_v1, %v5067_v21  ;;  %v5054_v22 = vpop.permute.xlu1 %5053  ;;  %v9409_v21 = vld [vmem:[%s9854_s18 + $0x2b0] sm:$0xff] }
 0x7ef   : > { %v7818_v33 = vmul.f32 %v9406_v7, %v5054_v22  ;;  %v6654_v12 = vpop.permute.xlu0 %6653  ;;  %v9410_v22 = vld [vmem:[%s9854_s18 + $0x2a8] sm:$0xff] }
 0x7f0   : > { %8332 = vst.msk [vmem:[%s13671_s4 + $0x2a0] sm:$0xff] %vm691_vm0, %v7820_v38  ;;  %v8074_v10 = vmul.f32 %v9407_v44, %v6654_v12  ;;  %v9411_v12 = vld [vmem:[%s9854_s18 + $0xbd0] sm:$0xff] }
 0x7f1   : > { %8330 = vst.msk [vmem:[%s13671_s4 + $0x290] sm:$0xff] %vm691_vm0, %v7818_v33 }
 0x7f2   : > { %8586 = vst.msk [vmem:[%s13671_s4 + $0xa90] sm:$0xff] %vm691_vm0, %v8074_v10  ;;  %v14372_v10 = vperm.slane %v13541_v61, 0 }
 0x7f3   : > { %5159 = vperm.xlu2 %8960, %v14065_v37   ;;  %v14359_v37 = vperm.slane %v13512_v19, 3 }
 0x7f4   : > { %8963 = vset.pattern.permute.xlu1 %v13301_v63 }
 0x7f5   : > { %5309 = vperm.xlu0 %9281, %v14350_v62  }
 0x7f7   : > { %v6779_v5 = vpop.permute.xlu0 %6778 }
 0x7f8   : > { %v8094_v56 = vmul.f32 %v9408_v18, %v6779_v5  ;;  %v9412_v18 = vld [vmem:[%s9854_s18 + $0xc70] sm:$0xff] }
 0x7fa   : > { %8606 = vst.msk [vmem:[%s13671_s4 + $0xb30] sm:$0xff] %vm691_vm0, %v8094_v56 }
 0x7fb   : > { %8962 = vset.pattern.permute.xlu2 %v13292_v50 }
 0x7fc   : > { %5178 = vperm.xlu1 %8963, %v5161_v29  }
 0x7fd   : > { %5434 = vperm.xlu0 %9281, %v14359_v37   ;;  %v5079_v32 = vpop.permute.xlu2 %5078 }
 0x7fe   : > { %v7822_v1 = vmul.f32 %v9409_v21, %v5079_v32  ;;  %v5073_v38 = vpop.permute.xlu1 %5072  ;;  %v5186_v32 = vperm.slane %v13503_v13, 2 }
 0x7ff   : > { %v7821_v7 = vmul.f32 %v9410_v22, %v5073_v38  ;;  %v6904_v33 = vpop.permute.xlu0 %6903 }
 0x800   : > { %8334 = vst.msk [vmem:[%s13671_s4 + $0x2b0] sm:$0xff] %vm691_vm0, %v7822_v1  ;;  %v8114_v44 = vmul.f32 %v9411_v12, %v6904_v33  ;;  %v9413_v1 = vld [vmem:[%s9854_s18 + $0x2c8] sm:$0xff] }
 0x801   : > { %8333 = vst.msk [vmem:[%s13671_s4 + $0x2a8] sm:$0xff] %vm691_vm0, %v7821_v7  ;;  %v9414_v7 = vld [vmem:[%s9854_s18 + $0x2b8] sm:$0x3] }
 0x802   : > { %8626 = vst.msk [vmem:[%s13671_s4 + $0xbd0] sm:$0xff] %vm691_vm0, %v8114_v44  ;;  %v9415_v44 = vld [vmem:[%s9854_s18 + $0xd10] sm:$0xff] }
 0x803   : > { %5172 = vperm.xlu2 %8962, %v5161_v29   ;;  %v14382_v29 = vperm.slane %v13541_v61, 5 }
 0x804   : > { %8965 = vset.pattern.permute.xlu1 %v13292_v50 }
 0x805   : > { %5559 = vperm.xlu0 %9281, %v14372_v10  }
 0x807   : > { %v7029_v5 = vpop.permute.xlu0 %7028 }
 0x808   : > { %v8134_v56 = vmul.f32 %v9412_v18, %v7029_v5  ;;  %v14395_v18 = vperm.slane %v13555_v8, 2 }
 0x80a   : > { %8646 = vst.msk [vmem:[%s13671_s4 + $0xc70] sm:$0xff] %vm691_vm0, %v8134_v56 }
 0x80b   : > { %8964 = vset.pattern.permute.xlu2 %v13281_v16 }
 0x80c   : > { %5197 = vperm.xlu1 %8965, %v5186_v32  }
 0x80d   : > { %5684 = vperm.xlu0 %9281, %v14382_v29   ;;  %v5098_v21 = vpop.permute.xlu2 %5097 }
 0x80e   : > { %v7825_v38 = vmul.f32 %v9413_v1, %v5098_v21  ;;  %v5085_v22 = vpop.permute.xlu1 %5084  ;;  %v9416_v21 = vld [vmem:[%s9854_s18 + $0xdb0] sm:$0xff] }
 0x80f   : > { %v7823_v33 = vmul.f32 %v9414_v7, %v5085_v22  ;;  %v7154_v12 = vpop.permute.xlu0 %7153  ;;  %v9417_v7 = vld [vmem:[%s9854_s18 + $0x2d8] sm:$0x3] }
 0x810   : > { %8337 = vst.msk [vmem:[%s13671_s4 + $0x2c8] sm:$0xff] %vm691_vm0, %v7825_v38  ;;  %v8154_v5 = vmul.f32 %v9415_v44, %v7154_v12  ;;  %v14404_v38 = vperm.slane %v13555_v8, 7  ;;  %v9418_v44 = vld [vmem:[%s9854_s18 + $0x2d0] sm:$0xff] }
 0x811   : > { %8335 = vst.msk [vmem:[%s13671_s4 + $0x2b8] sm:$0x3] %vm701_vm1, %v7823_v33 }
 0x812   : > { %8666 = vst.msk [vmem:[%s13671_s4 + $0xd10] sm:$0xff] %vm691_vm0, %v8154_v5 }
 0x813   : > { %5191 = vperm.xlu2 %8964, %v5186_v32  }
 0x814   : > { %8967 = vset.pattern.permute.xlu1 %v13394_v43 }
 0x815   : > { %5809 = vperm.xlu0 %9281, %v14395_v18  }
 0x817   : > { %v7279_v56 = vpop.permute.xlu0 %7278 }
 0x818   : > { %v8174_v1 = vmul.f32 %v9416_v21, %v7279_v56  ;;  %v9419_v21 = vld [vmem:[%s9854_s18 + $0xe50] sm:$0xff] }
 0x81a   : > { %8686 = vst.msk [vmem:[%s13671_s4 + $0xdb0] sm:$0xff] %vm691_vm0, %v8174_v1 }
 0x81b   : > { %8966 = vset.pattern.permute.xlu2 %v13301_v63 }
 0x81c   : > { %5209 = vperm.xlu1 %8967, %v5186_v32  }
 0x81d   : > { %5934 = vperm.xlu0 %9281, %v14404_v38   ;;  %v5110_v22 = vpop.permute.xlu2 %5109 }
 0x81e   : > { %v7827_v33 = vmul.f32 %v9417_v7, %v5110_v22  ;;  %v5104_v12 = vpop.permute.xlu1 %5103  ;;  %v9420_v7 = vld [vmem:[%s9854_s18 + $0xef0] sm:$0xff] }
 0x81f   : > { %v7826_v5 = vmul.f32 %v9418_v44, %v5104_v12  ;;  %v7404_v56 = vpop.permute.xlu0 %7403  ;;  %v14425_v12 = vperm.slane %v13503_v13, 3 }
 0x820   : > { %8339 = vst.msk [vmem:[%s13671_s4 + $0x2d8] sm:$0x3] %vm701_vm1, %v7827_v33  ;;  %v8194_v1 = vmul.f32 %v9419_v21, %v7404_v56 }
 0x821   : > { %8338 = vst.msk [vmem:[%s13671_s4 + $0x2d0] sm:$0xff] %vm691_vm0, %v7826_v5  ;;  %v9421_v5 = vld [vmem:[%s9854_s18 + $0x2f0] sm:$0xff] }
 0x822   : > { %8706 = vst.msk [vmem:[%s13671_s4 + $0xe50] sm:$0xff] %vm691_vm0, %v8194_v1  ;;  %v9422_v1 = vld [vmem:[%s9854_s18 + $0x2e0] sm:$0xff] }
 0x823   : > { %5203 = vperm.xlu2 %8966, %v5186_v32   ;;  %v14429_v32 = vperm.slane %v13714_v27, 1 }
 0x824   : > { %8969 = vset.pattern.permute.xlu1 %v13301_v63 }
 0x825   : > { %6059 = vperm.xlu0 %9281, %v14417_v0  }
 0x827   : > { %v7529_v22 = vpop.permute.xlu0 %7528 }
 0x828   : > { %v8214_v33 = vmul.f32 %v9420_v7, %v7529_v22 }
 0x82a   : > { %8726 = vst.msk [vmem:[%s13671_s4 + $0xef0] sm:$0xff] %vm691_vm0, %v8214_v33  ;;  %v9423_v33 = vld [vmem:[%s9854_s18 + $0xf90] sm:$0xff] }
 0x82b   : > { %8968 = vset.pattern.permute.xlu2 %v13292_v50 }
 0x82c   : > { %5228 = vperm.xlu1 %8969, %v14425_v12  }
 0x82d   : > { %6184 = vperm.xlu0 %9281, %v14429_v32   ;;  %v5129_v44 = vpop.permute.xlu2 %5128 }
 0x82e   : > { %v7830_v56 = vmul.f32 %v9421_v5, %v5129_v44  ;;  %v5117_v21 = vpop.permute.xlu1 %5116  ;;  %v14444_v44 = vperm.slane %v13714_v27, 6  ;;  %v14450_v5 = vperm.slane %v13722_v55, 3 }
 0x82f   : > { %v7828_v22 = vmul.f32 %v9422_v1, %v5117_v21  ;;  %v7654_v7 = vpop.permute.xlu0 %7653 }
 0x830   : > { %8342 = vst.msk [vmem:[%s13671_s4 + $0x2f0] sm:$0xff] %vm691_vm0, %v7830_v56  ;;  %v8234_v15 = vmul.f32 %v9423_v33, %v7654_v7  ;;  %v9424_v56 = vld [vmem:[%s9854_s18 + $0x300] sm:$0xff] }
 0x831   : > { %8340 = vst.msk [vmem:[%s13671_s4 + $0x2e0] sm:$0xff] %vm691_vm0, %v7828_v22  ;;  %v9425_v22 = vld [vmem:[%s9854_s18 + $0x2f8] sm:$0x3] }
 0x832   : > { %8746 = vst.msk [vmem:[%s13671_s4 + $0xf90] sm:$0xff] %vm691_vm0, %v8234_v15 }
 0x833   : > { %5222 = vperm.xlu2 %8968, %v14425_v12  }
 0x834   : > { %8971 = vset.pattern.permute.xlu1 %v13281_v16 }
 0x835   : > { %6309 = vperm.xlu0 %9281, %v14444_v44  }
 0x83b   : > { %8970 = vset.pattern.permute.xlu2 %v13394_v43 }
 0x83c   : > { %5241 = vperm.xlu1 %8971, %v13509_v11  }
 0x83d   : > { %6434 = vperm.xlu0 %9281, %v14450_v5   ;;  %v5142_v15 = vpop.permute.xlu2 %5141 }
 0x83e   : > { %v7832_v21 = vmul.f32 %v9424_v56, %v5142_v15  ;;  %v5135_v1 = vpop.permute.xlu1 %5134  ;;  %v9427_v56 = vld [vmem:[%s9854_s18 + $0x158] sm:$0x3] }
 0x83f   : > { %v7831_v7 = vmul.f32 %v9425_v22, %v5135_v1  ;;  %v4685_v33 = vpop.permute.xlu0 %4684  ;;  %v9428_v1 = vld [vmem:[%s9854_s18 + $0x318] sm:$0x3] }
 0x840   : > { %8344 = vst.msk [vmem:[%s13671_s4 + $0x300] sm:$0xff] %vm691_vm0, %v7832_v21  ;;  %v7759_v46 = vmul.f32 %v9426_v9, %v4685_v33  ;;  %v9429_v33 = vld [vmem:[%s9854_s18 + $0x308] sm:$0xff] }
 0x841   : > { %8343 = vst.msk [vmem:[%s13671_s4 + $0x2f8] sm:$0x3] %vm701_vm1, %v7831_v7 }
 0x842   : > { %8271 = vst.msk [vmem:[%s13671_s4 + $0xb8] sm:$0x3] %vm701_vm1, %v7759_v46  ;;  %v14474_v46 = vperm.slane %v13751_v14, 5 }
 0x843   : > { %5234 = vperm.xlu2 %8970, %v14425_v12  }
 0x844   : > { %8973 = vset.pattern.permute.xlu1 %v13394_v43  ;;  %16401 = vst [vmem:[#allocation22_spill] sm:$0xff] %v14474_v46 }
 0x845   : > { %6559 = vperm.xlu0 %9281, %v14465_v25  }
 0x847   : > { %v4810_v15 = vpop.permute.xlu0 %4809 }
 0x848   : > { %v7779_v9 = vmul.f32 %v9427_v56, %v4810_v15 }
 0x84a   : > { %8291 = vst.msk [vmem:[%s13671_s4 + $0x158] sm:$0x3] %vm701_vm1, %v7779_v9  ;;  %v9430_v9 = vld [vmem:[%s9854_s18 + $0x1f8] sm:$0x3] }
 0x84b   : > { %8972 = vset.pattern.permute.xlu2 %v13301_v63 }
 0x84c   : > { %5259 = vperm.xlu1 %8973, %v13509_v11  }
 0x84d   : > { %6684 = vperm.xlu0 %9281, %v14474_v46   ;;  %v5160_v21 = vpop.permute.xlu2 %5159  ;;  %v14489_v46 = vperm.slane %v13768_v17, 2 }
 0x84e   : > { %v7835_v22 = vmul.f32 %v9428_v1, %v5160_v21  ;;  %v5148_v7 = vpop.permute.xlu1 %5147  ;;  %v9431_v1 = vld [vmem:[%s9854_s18 + $0x298] sm:$0x3] }
 0x84f   : > { %v7833_v15 = vmul.f32 %v9429_v33, %v5148_v7  ;;  %v4935_v56 = vpop.permute.xlu0 %4934  ;;  %v9432_v7 = vld [vmem:[%s9854_s18 + $0x328] sm:$0xff] }
 0x850   : > { %8347 = vst.msk [vmem:[%s13671_s4 + $0x318] sm:$0x3] %vm701_vm1, %v7835_v22  ;;  %v7799_v25 = vmul.f32 %v9430_v9, %v4935_v56  ;;  %v9433_v56 = vld [vmem:[%s9854_s18 + $0x320] sm:$0xff] }
 0x851   : > { %8345 = vst.msk [vmem:[%s13671_s4 + $0x308] sm:$0xff] %vm691_vm0, %v7833_v15 }
 0x852   : > { %8311 = vst.msk [vmem:[%s13671_s4 + $0x1f8] sm:$0x3] %vm701_vm1, %v7799_v25 }
 0x853   : > { %5253 = vperm.xlu2 %8972, %v13509_v11   ;;  %v14498_v11 = vperm.slane %v13768_v17, 7 }
 0x854   : > { %8975 = vset.pattern.permute.xlu1 %v13292_v50 }
 0x855   : > { %6809 = vperm.xlu0 %9281, %v14489_v46   ;;  %16402 = vst [vmem:[#allocation23_spill] sm:$0xff] %v14498_v11 }
 0x857   : > { %v5060_v21 = vpop.permute.xlu0 %5059 }
 0x858   : > { %v7819_v22 = vmul.f32 %v9431_v1, %v5060_v21  ;;  %v9434_v1 = vld [vmem:[%s9854_s18 + $0x338] sm:$0x3] }
 0x85a   : > { %8331 = vst.msk [vmem:[%s13671_s4 + $0x298] sm:$0x3] %vm701_vm1, %v7819_v22 }
 0x85b   : > { %8974 = vset.pattern.permute.xlu2 %v13281_v16 }
 0x85c   : > { %5272 = vperm.xlu1 %8975, %v14075_v42  }
 0x85d   : > { %6934 = vperm.xlu0 %9281, %v14498_v11   ;;  %v5173_v25 = vpop.permute.xlu2 %5172  ;;  %v14513_v11 = vperm.slane %v13795_v30, 4 }
 0x85e   : > { %v7837_v33 = vmul.f32 %v9432_v7, %v5173_v25  ;;  %v5167_v15 = vpop.permute.xlu1 %5166  ;;  %v9435_v7 = vld [vmem:[%s9854_s18 + $0x3d8] sm:$0x3] }
 0x85f   : > { %v7836_v9 = vmul.f32 %v9433_v56, %v5167_v15  ;;  %v5185_v21 = vpop.permute.xlu0 %5184  ;;  %16403 = vst [vmem:[#allocation24_spill] sm:$0xff] %v14513_v11  ;;  %v14522_v15 = vperm.slane %v13851_v54, 1 }
 0x860   : > { %8349 = vst.msk [vmem:[%s13671_s4 + $0x328] sm:$0xff] %vm691_vm0, %v7837_v33  ;;  %v7839_v22 = vmul.f32 %v9434_v1, %v5185_v21 }
 0x861   : > { %8348 = vst.msk [vmem:[%s13671_s4 + $0x320] sm:$0xff] %vm691_vm0, %v7836_v9  ;;  %v9436_v9 = vld [vmem:[%s9854_s18 + $0x340] sm:$0xff] }
 0x862   : > { %8351 = vst.msk [vmem:[%s13671_s4 + $0x338] sm:$0x3] %vm701_vm1, %v7839_v22  ;;  %v9437_v22 = vld [vmem:[%s9854_s18 + $0x330] sm:$0xff] }
 0x863   : > { %5266 = vperm.xlu2 %8974, %v14075_v42   ;;  %16404 = vst [vmem:[#allocation25_spill] sm:$0xff] %v14522_v15 }
 0x864   : > { %8977 = vset.pattern.permute.xlu1 %v13281_v16 }
 0x865   : > { %7059 = vperm.xlu0 %9281, %v14513_v11  }
 0x867   : > { %v5310_v25 = vpop.permute.xlu0 %5309 }
 0x868   : > { %v7859_v33 = vmul.f32 %v9435_v7, %v5310_v25 }
 0x86a   : > { %8371 = vst.msk [vmem:[%s13671_s4 + $0x3d8] sm:$0x3] %vm701_vm1, %v7859_v33  ;;  %v9438_v33 = vld [vmem:[%s9854_s18 + $0x478] sm:$0x3] }
 0x86b   : > { %8976 = vset.pattern.permute.xlu2 %v13394_v43 }
 0x86c   : > { %5291 = vperm.xlu1 %8977, %v14350_v62  }
 0x86d   : > { %7184 = vperm.xlu0 %9281, %v14522_v15   ;;  %v5192_v56 = vpop.permute.xlu2 %5191  ;;  %v14537_v15 = vperm.slane %v13851_v54, 6 }
 0x86e   : > { %v7840_v21 = vmul.f32 %v9436_v9, %v5192_v56  ;;  %v5179_v1 = vpop.permute.xlu1 %5178  ;;  %v9439_v9 = vld [vmem:[%s9854_s18 + $0x518] sm:$0x3] }
 0x86f   : > { %v7838_v25 = vmul.f32 %v9437_v22, %v5179_v1  ;;  %v5435_v7 = vpop.permute.xlu0 %5434  ;;  %16405 = vst [vmem:[#allocation26_spill] sm:$0xff] %v14537_v15  ;;  %v9440_v1 = vld [vmem:[%s9854_s18 + $0x350] sm:$0xff] }
 0x870   : > { %8352 = vst.msk [vmem:[%s13671_s4 + $0x340] sm:$0xff] %vm691_vm0, %v7840_v21  ;;  %v7879_v11 = vmul.f32 %v9438_v33, %v5435_v7  ;;  %v9441_v7 = vld [vmem:[%s9854_s18 + $0x348] sm:$0xff] }
 0x871   : > { %8350 = vst.msk [vmem:[%s13671_s4 + $0x330] sm:$0xff] %vm691_vm0, %v7838_v25 }
 0x872   : > { %8391 = vst.msk [vmem:[%s13671_s4 + $0x478] sm:$0x3] %vm701_vm1, %v7879_v11 }
 0x873   : > { %5284 = vperm.xlu2 %8976, %v14075_v42   ;;  %v14546_v42 = vperm.slane %v13946_v47, 3 }
 0x874   : > { %8979 = vset.pattern.permute.xlu1 %v13301_v63 }
 0x875   : > { %7309 = vperm.xlu0 %9281, %v14537_v15   ;;  %16406 = vst [vmem:[#allocation27_spill] sm:$0xff] %v14546_v42 }
 0x877   : > { %v5560_v56 = vpop.permute.xlu0 %5559 }
 0x878   : > { %v7899_v21 = vmul.f32 %v9439_v9, %v5560_v56  ;;  %v9442_v9 = vld [vmem:[%s9854_s18 + $0x5b8] sm:$0x3] }
 0x87a   : > { %8411 = vst.msk [vmem:[%s13671_s4 + $0x518] sm:$0x3] %vm701_vm1, %v7899_v21 }
 0x87b   : > { %8978 = vset.pattern.permute.xlu2 %v13292_v50 }
 0x87c   : > { %5303 = vperm.xlu1 %8979, %v14350_v62  }
 0x87d   : > { %7434 = vperm.xlu0 %9281, %v14546_v42   ;;  %v5204_v11 = vpop.permute.xlu2 %5203  ;;  %v14561_v42 = vperm.slane %v14013_v53, 0 }
 0x87e   : > { %v7842_v22 = vmul.f32 %v9440_v1, %v5204_v11  ;;  %v5198_v25 = vpop.permute.xlu1 %5197  ;;  %v9443_v1 = vld [vmem:[%s9854_s18 + $0x658] sm:$0x3] }
 0x87f   : > { %v7841_v33 = vmul.f32 %v9441_v7, %v5198_v25  ;;  %v5685_v56 = vpop.permute.xlu0 %5684  ;;  %16407 = vst [vmem:[#allocation28_spill] sm:$0xff] %v14561_v42  ;;  %v5311_v25 = vperm.slane %v13503_v13, 7  ;;  %v9446_v13 = vld [vmem:[%s9854_s18 + $0x6f8] sm:$0x3] }
 0x880   : > { %8354 = vst.msk [vmem:[%s13671_s4 + $0x350] sm:$0xff] %vm691_vm0, %v7842_v22  ;;  %v7919_v21 = vmul.f32 %v9442_v9, %v5685_v56 }
 0x881   : > { %8353 = vst.msk [vmem:[%s13671_s4 + $0x348] sm:$0xff] %vm691_vm0, %v7841_v33  ;;  %v9444_v33 = vld [vmem:[%s9854_s18 + $0x368] sm:$0xff] }
 0x882   : > { %8431 = vst.msk [vmem:[%s13671_s4 + $0x5b8] sm:$0x3] %vm701_vm1, %v7919_v21  ;;  %v9445_v21 = vld [vmem:[%s9854_s18 + $0x358] sm:$0x3] }
 0x883   : > { %5297 = vperm.xlu2 %8978, %v14350_v62   ;;  %v14571_v62 = vperm.slane %v14013_v53, 5 }
 0x884   : > { %8981 = vset.pattern.permute.xlu1 %v13292_v50 }
 0x885   : > { %7559 = vperm.xlu0 %9281, %v14561_v42   ;;  %16408 = vst [vmem:[#allocation29_spill] sm:$0xff] %v14571_v62  ;;  %v14789_v42 = vperm.slane %v13795_v30, 1 }
 0x887   : > { %v5810_v11 = vpop.permute.xlu0 %5809 }
 0x888   : > { %v7939_v22 = vmul.f32 %v9443_v1, %v5810_v11 }
 0x88a   : > { %8451 = vst.msk [vmem:[%s13671_s4 + $0x658] sm:$0x3] %vm701_vm1, %v7939_v22 }
 0x88b   : > { %8980 = vset.pattern.permute.xlu2 %v13281_v16 }
 0x88c   : > { %5322 = vperm.xlu1 %8981, %v5311_v25  }
 0x88d   : > { %7684 = vperm.xlu0 %9281, %v14571_v62   ;;  %v5223_v7 = vpop.permute.xlu2 %5222 }
 0x88e   : > { %v7845_v56 = vmul.f32 %v9444_v33, %v5223_v7  ;;  %v5210_v9 = vpop.permute.xlu1 %5209  ;;  %v9447_v33 = vld [vmem:[%s9854_s18 + $0x798] sm:$0x3] }
 0x88f   : > { %v7843_v11 = vmul.f32 %v9445_v21, %v5210_v9  ;;  %v5935_v1 = vpop.permute.xlu0 %5934  ;;  %v9448_v21 = vld [vmem:[%s9854_s18 + $0x378] sm:$0x3] }
 0x890   : > { %8357 = vst.msk [vmem:[%s13671_s4 + $0x368] sm:$0xff] %vm691_vm0, %v7845_v56  ;;  %v7959_v22 = vmul.f32 %v9446_v13, %v5935_v1  ;;  %v9449_v13 = vld [vmem:[%s9854_s18 + $0x370] sm:$0xff] }
 0x891   : > { %8355 = vst.msk [vmem:[%s13671_s4 + $0x358] sm:$0x3] %vm701_vm1, %v7843_v11 }
 0x892   : > { %8471 = vst.msk [vmem:[%s13671_s4 + $0x6f8] sm:$0x3] %vm701_vm1, %v7959_v22 }
 0x893   : > { %5316 = vperm.xlu2 %8980, %v5311_v25  }
 0x894   : > { %8983 = vset.pattern.permute.xlu1 %v13394_v43 }
 0x895   : > { %9286 = vset.pattern.permute.xlu0 %v13281_v16 }
 0x897   : > { %v6060_v7 = vpop.permute.xlu0 %6059 }
 0x898   : > { %v7979_v9 = vmul.f32 %v9447_v33, %v6060_v7  ;;  %v9450_v7 = vld [vmem:[%s9854_s18 + $0x838] sm:$0x3] }
 0x89a   : > { %8491 = vst.msk [vmem:[%s13671_s4 + $0x798] sm:$0x3] %vm701_vm1, %v7979_v9  ;;  %v9451_v9 = vld [vmem:[%s9854_s18 + $0x8d8] sm:$0x3] }
 0x89b   : > { %8982 = vset.pattern.permute.xlu2 %v13301_v63 }
 0x89c   : > { %5334 = vperm.xlu1 %8983, %v5311_v25  }
 0x89d   : > { %4591 = vperm.xlu0 %9286, %v13515_v36   ;;  %v5235_v56 = vpop.permute.xlu2 %5234 }
 0x89e   : > { %v7847_v11 = vmul.f32 %v9448_v21, %v5235_v56  ;;  %v5229_v1 = vpop.permute.xlu1 %5228  ;;  %v9452_v21 = vld [vmem:[%s9854_s18 + $0x390] sm:$0xff] }
 0x89f   : > { %v7846_v22 = vmul.f32 %v9449_v13, %v5229_v1  ;;  %v6185_v62 = vpop.permute.xlu0 %6184  ;;  %v9453_v1 = vld [vmem:[%s9854_s18 + $0x380] sm:$0xff] }
 0x8a0   : > { %8359 = vst.msk [vmem:[%s13671_s4 + $0x378] sm:$0x3] %vm701_vm1, %v7847_v11  ;;  %v7999_v33 = vmul.f32 %v9450_v7, %v6185_v62  ;;  %v5336_v62 = vperm.slane %v13512_v19, 0  ;;  %v9454_v7 = vld [vmem:[%s9854_s18 + $0x978] sm:$0x3] }
 0x8a1   : > { %8358 = vst.msk [vmem:[%s13671_s4 + $0x370] sm:$0xff] %vm691_vm0, %v7846_v22 }
 0x8a2   : > { %8511 = vst.msk [vmem:[%s13671_s4 + $0x838] sm:$0x3] %vm701_vm1, %v7999_v33 }
 0x8a3   : > { %5328 = vperm.xlu2 %8982, %v5311_v25  }
 0x8a4   : > { %8985 = vset.pattern.permute.xlu1 %v13301_v63 }
 0x8a5   : > { %4716 = vperm.xlu0 %9286, %v13824_v23  }
 0x8a7   : > { %v6310_v36 = vpop.permute.xlu0 %6309 }
 0x8a8   : > { %v8019_v56 = vmul.f32 %v9451_v9, %v6310_v36  ;;  %v9455_v36 = vld [vmem:[%s9854_s18 + $0xa18] sm:$0x3] }
 0x8aa   : > { %8531 = vst.msk [vmem:[%s13671_s4 + $0x8d8] sm:$0x3] %vm701_vm1, %v8019_v56 }
 0x8ab   : > { %8984 = vset.pattern.permute.xlu2 %v13292_v50 }
 0x8ac   : > { %5353 = vperm.xlu1 %8985, %v5336_v62  }
 0x8ad   : > { %4841 = vperm.xlu0 %9286, %v13969_v52   ;;  %v5254_v25 = vpop.permute.xlu2 %5253 }
 0x8ae   : > { %v7850_v23 = vmul.f32 %v9452_v21, %v5254_v25  ;;  %v5242_v11 = vpop.permute.xlu1 %5241  ;;  %v9456_v25 = vld [vmem:[%s9854_s18 + $0x3a0] sm:$0xff] }
 0x8af   : > { %v7848_v13 = vmul.f32 %v9453_v1, %v5242_v11  ;;  %v6435_v22 = vpop.permute.xlu0 %6434 }
 0x8b0   : > { %8362 = vst.msk [vmem:[%s13671_s4 + $0x390] sm:$0xff] %vm691_vm0, %v7850_v23  ;;  %v8039_v33 = vmul.f32 %v9454_v7, %v6435_v22  ;;  %v9457_v23 = vld [vmem:[%s9854_s18 + $0x398] sm:$0x3] }
 0x8b1   : > { %8360 = vst.msk [vmem:[%s13671_s4 + $0x380] sm:$0xff] %vm691_vm0, %v7848_v13  ;;  %v9458_v13 = vld [vmem:[%s9854_s18 + $0xab8] sm:$0x3] }
 0x8b2   : > { %8551 = vst.msk [vmem:[%s13671_s4 + $0x978] sm:$0x3] %vm701_vm1, %v8039_v33  ;;  %v9459_v7 = vld [vmem:[%s9854_s18 + $0xb58] sm:$0x3] }
 0x8b3   : > { %5347 = vperm.xlu2 %8984, %v5336_v62  }
 0x8b4   : > { %8987 = vset.pattern.permute.xlu1 %v13281_v16 }
 0x8b5   : > { %4966 = vperm.xlu0 %9286, %v14080_v45  }
 0x8b7   : > { %v6560_v52 = vpop.permute.xlu0 %6559 }
 0x8b8   : > { %v8059_v9 = vmul.f32 %v9455_v36, %v6560_v52  ;;  %v9460_v36 = vld [vmem:[%s9854_s18 + $0x3b8] sm:$0x3] }
 0x8ba   : > { %8571 = vst.msk [vmem:[%s13671_s4 + $0xa18] sm:$0x3] %vm701_vm1, %v8059_v9 }
 0x8bb   : > { %8986 = vset.pattern.permute.xlu2 %v13394_v43 }
 0x8bc   : > { %5366 = vperm.xlu1 %8987, %v13524_v58  }
 0x8bd   : > { %5091 = vperm.xlu0 %9286, %v14254_v39   ;;  %v5267_v56 = vpop.permute.xlu2 %5266 }
 0x8be   : > { %v7852_v21 = vmul.f32 %v9456_v25, %v5267_v56  ;;  %v5260_v45 = vpop.permute.xlu1 %5259 }
 0x8bf   : > { %v7851_v11 = vmul.f32 %v9457_v23, %v5260_v45  ;;  %v6685_v1 = vpop.permute.xlu0 %6684  ;;  %v9462_v45 = vld [vmem:[%s9854_s18 + $0xbf8] sm:$0x3] }
 0x8c0   : > { %8364 = vst.msk [vmem:[%s13671_s4 + $0x3a0] sm:$0xff] %vm691_vm0, %v7852_v21  ;;  %v8079_v22 = vmul.f32 %v9458_v13, %v6685_v1  ;;  %v9463_v1 = vld [vmem:[%s9854_s18 + $0xc98] sm:$0x3] }
 0x8c1   : > { %8363 = vst.msk [vmem:[%s13671_s4 + $0x398] sm:$0x3] %vm701_vm1, %v7851_v11 }
 0x8c2   : > { %8591 = vst.msk [vmem:[%s13671_s4 + $0xab8] sm:$0x3] %vm701_vm1, %v8079_v22 }
 0x8c3   : > { %5359 = vperm.xlu2 %8986, %v5336_v62  }
 0x8c4   : > { %8989 = vset.pattern.permute.xlu1 %v13394_v43 }
 0x8c5   : > { %5216 = vperm.xlu0 %9286, %v14425_v12   ;;  %v9461_v12 = vld [vmem:[%s9854_s18 + $0x3a8] sm:$0xff] }
 0x8c7   : > { %v6810_v39 = vpop.permute.xlu0 %6809 }
 0x8c8   : > { %v8099_v33 = vmul.f32 %v9459_v7, %v6810_v39  ;;  %v9464_v39 = vld [vmem:[%s9854_s18 + $0x3c8] sm:$0xff] }
 0x8ca   : > { %8611 = vst.msk [vmem:[%s13671_s4 + $0xb58] sm:$0x3] %vm701_vm1, %v8099_v33 }
 0x8cb   : > { %8988 = vset.pattern.permute.xlu2 %v13301_v63 }
 0x8cc   : > { %5384 = vperm.xlu1 %8989, %v13524_v58  }
 0x8cd   : > { %5341 = vperm.xlu0 %9286, %v5336_v62   ;;  %v5285_v52 = vpop.permute.xlu2 %5284  ;;  %v14651_v62 = vperm.slane %v13512_v19, 5 }
 0x8ce   : > { %v7855_v9 = vmul.f32 %v9460_v36, %v5285_v52  ;;  %v5273_v56 = vpop.permute.xlu1 %5272  ;;  %v9465_v52 = vld [vmem:[%s9854_s18 + $0x3c0] sm:$0xff] }
 0x8cf   : > { %v7853_v25 = vmul.f32 %v9461_v12, %v5273_v56  ;;  %v6935_v21 = vpop.permute.xlu0 %6934  ;;  %v9466_v56 = vld [vmem:[%s9854_s18 + $0xd38] sm:$0x3] }
 0x8d0   : > { %8367 = vst.msk [vmem:[%s13671_s4 + $0x3b8] sm:$0x3] %vm701_vm1, %v7855_v9  ;;  %v8119_v23 = vmul.f32 %v9462_v45, %v6935_v21  ;;  %v9467_v45 = vld [vmem:[%s9854_s18 + $0xdd8] sm:$0x3] }
 0x8d1   : > { %8365 = vst.msk [vmem:[%s13671_s4 + $0x3a8] sm:$0xff] %vm691_vm0, %v7853_v25  ;;  %v14675_v25 = vperm.slane %v13541_v61, 7 }
 0x8d2   : > { %8631 = vst.msk [vmem:[%s13671_s4 + $0xbf8] sm:$0x3] %vm701_vm1, %v8119_v23 }
 0x8d3   : > { %5378 = vperm.xlu2 %8988, %v13524_v58   ;;  %v14660_v58 = vperm.slane %v13541_v61, 2 }
 0x8d4   : > { %8991 = vset.pattern.permute.xlu1 %v13292_v50 }
 0x8d5   : > { %5466 = vperm.xlu0 %9286, %v14651_v62  }
 0x8d7   : > { %v7060_v11 = vpop.permute.xlu0 %7059 }
 0x8d8   : > { %v8139_v13 = vmul.f32 %v9463_v1, %v7060_v11  ;;  %v14684_v11 = vperm.slane %v13555_v8, 4 }
 0x8da   : > { %8651 = vst.msk [vmem:[%s13671_s4 + $0xc98] sm:$0x3] %vm701_vm1, %v8139_v13  ;;  %v9468_v13 = vld [vmem:[%s9854_s18 + $0x3e0] sm:$0xff] }
 0x8db   : > { %8990 = vset.pattern.permute.xlu2 %v13281_v16 }
 0x8dc   : > { %5397 = vperm.xlu1 %8991, %v14084_v41  }
 0x8dd   : > { %5591 = vperm.xlu0 %9286, %v14660_v58   ;;  %v5298_v22 = vpop.permute.xlu2 %5297 }
 0x8de   : > { %v7857_v7 = vmul.f32 %v9464_v39, %v5298_v22  ;;  %v5292_v33 = vpop.permute.xlu1 %5291 }
 0x8df   : > { %v7856_v36 = vmul.f32 %v9465_v52, %v5292_v33  ;;  %v7185_v9 = vpop.permute.xlu0 %7184 }
 0x8e0   : > { %8369 = vst.msk [vmem:[%s13671_s4 + $0x3c8] sm:$0xff] %vm691_vm0, %v7857_v7  ;;  %v8159_v12 = vmul.f32 %v9466_v56, %v7185_v9  ;;  %v9469_v7 = vld [vmem:[%s9854_s18 + $0x3d0] sm:$0xff]  ;;  %v14699_v56 = vperm.slane %v13567_v60, 1 }
 0x8e1   : > { %8368 = vst.msk [vmem:[%s13671_s4 + $0x3c0] sm:$0xff] %vm691_vm0, %v7856_v36  ;;  %v9470_v36 = vld [vmem:[%s9854_s18 + $0xe78] sm:$0x3] }
 0x8e2   : > { %8671 = vst.msk [vmem:[%s13671_s4 + $0xd38] sm:$0x3] %vm701_vm1, %v8159_v12 }
 0x8e3   : > { %5391 = vperm.xlu2 %8990, %v14084_v41  }
 0x8e4   : > { %8993 = vset.pattern.permute.xlu1 %v13281_v16 }
 0x8e5   : > { %5716 = vperm.xlu0 %9286, %v14675_v25  }
 0x8e7   : > { %v7310_v21 = vpop.permute.xlu0 %7309 }
 0x8e8   : > { %v8179_v23 = vmul.f32 %v9467_v45, %v7310_v21  ;;  %v9471_v21 = vld [vmem:[%s9854_s18 + $0xf18] sm:$0x3] }
 0x8ea   : > { %8691 = vst.msk [vmem:[%s13671_s4 + $0xdd8] sm:$0x3] %vm701_vm1, %v8179_v23 }
 0x8eb   : > { %8992 = vset.pattern.permute.xlu2 %v13394_v43 }
 0x8ec   : > { %5416 = vperm.xlu1 %8993, %v14359_v37  }
 0x8ed   : > { %5841 = vperm.xlu0 %9286, %v14684_v11   ;;  %v5317_v1 = vpop.permute.xlu2 %5316 }
 0x8ee   : > { %v7860_v22 = vmul.f32 %v9468_v13, %v5317_v1  ;;  %v5304_v39 = vpop.permute.xlu1 %5303  ;;  %v9472_v1 = vld [vmem:[%s9854_s18 + $0x3f0] sm:$0xff] }
 0x8ef   : > { %v7858_v33 = vmul.f32 %v9469_v7, %v5304_v39  ;;  %v7435_v52 = vpop.permute.xlu0 %7434  ;;  %v9473_v39 = vld [vmem:[%s9854_s18 + $0x3e8] sm:$0xff] }
 0x8f0   : > { %8372 = vst.msk [vmem:[%s13671_s4 + $0x3e0] sm:$0xff] %vm691_vm0, %v7860_v22  ;;  %v8199_v9 = vmul.f32 %v9470_v36, %v7435_v52  ;;  %v9474_v52 = vld [vmem:[%s9854_s18 + $0xfb8] sm:$0x3] }
 0x8f1   : > { %8370 = vst.msk [vmem:[%s13671_s4 + $0x3d0] sm:$0xff] %vm691_vm0, %v7858_v33 }
 0x8f2   : > { %8711 = vst.msk [vmem:[%s13671_s4 + $0xe78] sm:$0x3] %vm701_vm1, %v8199_v9  ;;  %v14723_v9 = vperm.slane %v13714_v27, 3 }
 0x8f3   : > { %5409 = vperm.xlu2 %8992, %v14084_v41   ;;  %v14708_v41 = vperm.slane %v13567_v60, 6 }
 0x8f4   : > { %8995 = vset.pattern.permute.xlu1 %v13301_v63 }
 0x8f5   : > { %5966 = vperm.xlu0 %9286, %v14699_v56  }
 0x8f7   : > { %v7560_v12 = vpop.permute.xlu0 %7559 }
 0x8f8   : > { %v8219_v45 = vmul.f32 %v9471_v21, %v7560_v12  ;;  %v5436_v12 = vperm.slane %v13512_v19, 4  ;;  %v14730_v21 = vperm.slane %v13722_v55, 0  ;;  %v9477_v19 = vld [vmem:[%s9854_s18 + $0x40] sm:$0xff] }
 0x8fa   : > { %8731 = vst.msk [vmem:[%s13671_s4 + $0xf18] sm:$0x3] %vm701_vm1, %v8219_v45  ;;  %v9475_v45 = vld [vmem:[%s9854_s18 + $0x408] sm:$0xff] }
 0x8fb   : > { %8994 = vset.pattern.permute.xlu2 %v13292_v50 }
 0x8fc   : > { %5428 = vperm.xlu1 %8995, %v14359_v37  }
 0x8fd   : > { %6091 = vperm.xlu0 %9286, %v14708_v41   ;;  %v5329_v23 = vpop.permute.xlu2 %5328 }
 0x8fe   : > { %v7862_v13 = vmul.f32 %v9472_v1, %v5329_v23  ;;  %v5323_v22 = vpop.permute.xlu1 %5322 }
 0x8ff   : > { %v7861_v7 = vmul.f32 %v9473_v39, %v5323_v22  ;;  %v7685_v33 = vpop.permute.xlu0 %7684 }
 0x900   : > { %8374 = vst.msk [vmem:[%s13671_s4 + $0x3f0] sm:$0xff] %vm691_vm0, %v7862_v13  ;;  %v8239_v36 = vmul.f32 %v9474_v52, %v7685_v33  ;;  %v9476_v13 = vld [vmem:[%s9854_s18 + $0x3f8] sm:$0x3]  ;;  %v14743_v33 = vperm.slane %v13722_v55, 5 }
 0x901   : > { %8373 = vst.msk [vmem:[%s13671_s4 + $0x3e8] sm:$0xff] %vm691_vm0, %v7861_v7 }
 0x902   : > { %8751 = vst.msk [vmem:[%s13671_s4 + $0xfb8] sm:$0x3] %vm701_vm1, %v8239_v36  ;;  %v9478_v36 = vld [vmem:[%s9854_s18 + $0xe0] sm:$0xff] }
 0x903   : > { %5422 = vperm.xlu2 %8994, %v14359_v37  }
 0x904   : > { %8997 = vset.pattern.permute.xlu1 %v13292_v50 }
 0x905   : > { %6216 = vperm.xlu0 %9286, %v14723_v9  }
 0x90b   : > { %8996 = vset.pattern.permute.xlu2 %v13281_v16 }
 0x90c   : > { %5447 = vperm.xlu1 %8997, %v5436_v12  }
 0x90d   : > { %6341 = vperm.xlu0 %9286, %v14730_v21   ;;  %v5348_v37 = vpop.permute.xlu2 %5347 }
 0x90e   : > { %v7865_v23 = vmul.f32 %v9475_v45, %v5348_v37  ;;  %v5335_v1 = vpop.permute.xlu1 %5334  ;;  %v14752_v45 = vperm.slane %v13751_v14, 2 }
 0x90f   : > { %v7863_v22 = vmul.f32 %v9476_v13, %v5335_v1  ;;  %v4592_v39 = vpop.permute.xlu0 %4591  ;;  %v9479_v1 = vld [vmem:[%s9854_s18 + $0x418] sm:$0x3] }
 0x910   : > { %8377 = vst.msk [vmem:[%s13671_s4 + $0x408] sm:$0xff] %vm691_vm0, %v7865_v23  ;;  %v7744_v7 = vmul.f32 %v9477_v19, %v4592_v39  ;;  %v9480_v39 = vld [vmem:[%s9854_s18 + $0x410] sm:$0xff] }
 0x911   : > { %8375 = vst.msk [vmem:[%s13671_s4 + $0x3f8] sm:$0x3] %vm701_vm1, %v7863_v22 }
 0x912   : > { %8256 = vst.msk [vmem:[%s13671_s4 + $0x40] sm:$0xff] %vm691_vm0, %v7744_v7 }
 0x913   : > { %5441 = vperm.xlu2 %8996, %v5436_v12  }
 0x914   : > { %8999 = vset.pattern.permute.xlu1 %v13394_v43 }
 0x915   : > { %6466 = vperm.xlu0 %9286, %v14743_v33  }
 0x917   : > { %v4717_v52 = vpop.permute.xlu0 %4716 }
 0x918   : > { %v7764_v37 = vmul.f32 %v9478_v36, %v4717_v52  ;;  %v9481_v52 = vld [vmem:[%s9854_s18 + $0x180] sm:$0xff] }
 0x91a   : > { %8276 = vst.msk [vmem:[%s13671_s4 + $0xe0] sm:$0xff] %vm691_vm0, %v7764_v37  ;;  %v14765_v37 = vperm.slane %v13751_v14, 7 }
 0x91b   : > { %8998 = vset.pattern.permute.xlu2 %v13301_v63 }
 0x91c   : > { %5459 = vperm.xlu1 %8999, %v5436_v12  }
 0x91d   : > { %6591 = vperm.xlu0 %9286, %v14752_v45   ;;  %v5360_v23 = vpop.permute.xlu2 %5359 }
 0x91e   : > { %v7867_v13 = vmul.f32 %v9479_v1, %v5360_v23  ;;  %v5354_v22 = vpop.permute.xlu1 %5353  ;;  %v9482_v1 = vld [vmem:[%s9854_s18 + $0x220] sm:$0xff] }
 0x91f   : > { %v7866_v19 = vmul.f32 %v9480_v39, %v5354_v22  ;;  %v4842_v7 = vpop.permute.xlu0 %4841  ;;  %v9483_v39 = vld [vmem:[%s9854_s18 + $0x430] sm:$0xff] }
 0x920   : > { %8379 = vst.msk [vmem:[%s13671_s4 + $0x418] sm:$0x3] %vm701_vm1, %v7867_v13  ;;  %v7784_v36 = vmul.f32 %v9481_v52, %v4842_v7  ;;  %v9484_v52 = vld [vmem:[%s9854_s18 + $0x420] sm:$0xff] }
 0x921   : > { %8378 = vst.msk [vmem:[%s13671_s4 + $0x410] sm:$0xff] %vm691_vm0, %v7866_v19 }
 0x922   : > { %8296 = vst.msk [vmem:[%s13671_s4 + $0x180] sm:$0xff] %vm691_vm0, %v7784_v36 }
 0x923   : > { %5453 = vperm.xlu2 %8998, %v5436_v12   ;;  %v14774_v12 = vperm.slane %v13768_v17, 4 }
 0x924   : > { %9001 = vset.pattern.permute.xlu1 %v13301_v63 }
 0x925   : > { %6716 = vperm.xlu0 %9286, %v14765_v37  }
 0x927   : > { %v4967_v23 = vpop.permute.xlu0 %4966 }
 0x928   : > { %v7804_v13 = vmul.f32 %v9482_v1, %v4967_v23  ;;  %v9485_v1 = vld [vmem:[%s9854_s18 + $0x2c0] sm:$0xff] }
 0x92a   : > { %8316 = vst.msk [vmem:[%s13671_s4 + $0x220] sm:$0xff] %vm691_vm0, %v7804_v13 }
 0x92b   : > { %9000 = vset.pattern.permute.xlu2 %v13292_v50 }
 0x92c   : > { %5478 = vperm.xlu1 %9001, %v14651_v62  }
 0x92d   : > { %6841 = vperm.xlu0 %9286, %v14774_v12   ;;  %v5379_v22 = vpop.permute.xlu2 %5378 }
 0x92e   : > { %v7870_v19 = vmul.f32 %v9483_v39, %v5379_v22  ;;  %v5367_v7 = vpop.permute.xlu1 %5366  ;;  %v9486_v39 = vld [vmem:[%s9854_s18 + $0x360] sm:$0xff] }
 0x92f   : > { %v7868_v36 = vmul.f32 %v9484_v52, %v5367_v7  ;;  %v5092_v23 = vpop.permute.xlu0 %5091  ;;  %v14798_v7 = vperm.slane %v13795_v30, 6 }
 0x930   : > { %8382 = vst.msk [vmem:[%s13671_s4 + $0x430] sm:$0xff] %vm691_vm0, %v7870_v19  ;;  %v7824_v13 = vmul.f32 %v9485_v1, %v5092_v23 }
 0x931   : > { %8380 = vst.msk [vmem:[%s13671_s4 + $0x420] sm:$0xff] %vm691_vm0, %v7868_v36  ;;  %v9487_v36 = vld [vmem:[%s9854_s18 + $0x440] sm:$0xff] }
 0x932   : > { %8336 = vst.msk [vmem:[%s13671_s4 + $0x2c0] sm:$0xff] %vm691_vm0, %v7824_v13  ;;  %v9488_v13 = vld [vmem:[%s9854_s18 + $0x438] sm:$0x3] }
 0x933   : > { %5472 = vperm.xlu2 %9000, %v14651_v62   ;;  %16409 = vst [vmem:[#allocation30_spill] sm:$0xff] %v14798_v7 }
 0x934   : > { %9003 = vset.pattern.permute.xlu1 %v13281_v16 }
 0x935   : > { %6966 = vperm.xlu0 %9286, %v14789_v42  }
 0x937   : > { %v5217_v22 = vpop.permute.xlu0 %5216 }
 0x938   : > { %v7844_v19 = vmul.f32 %v9486_v39, %v5217_v22 }
 0x93a   : > { %8356 = vst.msk [vmem:[%s13671_s4 + $0x360] sm:$0xff] %vm691_vm0, %v7844_v19  ;;  %v9489_v19 = vld [vmem:[%s9854_s18 + $0x400] sm:$0xff] }
 0x93b   : > { %9002 = vset.pattern.permute.xlu2 %v13394_v43 }
 0x93c   : > { %5491 = vperm.xlu1 %9003, %v13536_v31  }
 0x93d   : > { %7091 = vperm.xlu0 %9286, %v14798_v7   ;;  %v5392_v52 = vpop.permute.xlu2 %5391  ;;  %v14813_v7 = vperm.slane %v13851_v54, 3 }
 0x93e   : > { %v7872_v23 = vmul.f32 %v9487_v36, %v5392_v52  ;;  %v5385_v1 = vpop.permute.xlu1 %5384  ;;  %v9490_v36 = vld [vmem:[%s9854_s18 + $0x4a0] sm:$0xff] }
 0x93f   : > { %v7871_v22 = vmul.f32 %v9488_v13, %v5385_v1  ;;  %v5342_v39 = vpop.permute.xlu0 %5341  ;;  %v9491_v1 = vld [vmem:[%s9854_s18 + $0x458] sm:$0x3] }
 0x940   : > { %8384 = vst.msk [vmem:[%s13671_s4 + $0x440] sm:$0xff] %vm691_vm0, %v7872_v23  ;;  %v7864_v15 = vmul.f32 %v9489_v19, %v5342_v39  ;;  %v9492_v39 = vld [vmem:[%s9854_s18 + $0x448] sm:$0xff] }
 0x941   : > { %8383 = vst.msk [vmem:[%s13671_s4 + $0x438] sm:$0x3] %vm701_vm1, %v7871_v22 }
 0x942   : > { %8376 = vst.msk [vmem:[%s13671_s4 + $0x400] sm:$0xff] %vm691_vm0, %v7864_v15  ;;  %v14822_v15 = vperm.slane %v13946_v47, 0 }
 0x943   : > { %5484 = vperm.xlu2 %9002, %v14651_v62  }
 0x944   : > { %9005 = vset.pattern.permute.xlu1 %v13394_v43  ;;  %16410 = vst [vmem:[#allocation31_spill] sm:$0xff] %v14822_v15 }
 0x945   : > { %7216 = vperm.xlu0 %9286, %v14813_v7  }
 0x947   : > { %v5467_v52 = vpop.permute.xlu0 %5466 }
 0x948   : > { %v7884_v23 = vmul.f32 %v9490_v36, %v5467_v52  ;;  %v9493_v36 = vld [vmem:[%s9854_s18 + $0x540] sm:$0xff] }
 0x94a   : > { %8396 = vst.msk [vmem:[%s13671_s4 + $0x4a0] sm:$0xff] %vm691_vm0, %v7884_v23 }
 0x94b   : > { %9004 = vset.pattern.permute.xlu2 %v13301_v63 }
 0x94c   : > { %5509 = vperm.xlu1 %9005, %v13536_v31  }
 0x94d   : > { %7341 = vperm.xlu0 %9286, %v14822_v15   ;;  %v5410_v62 = vpop.permute.xlu2 %5409  ;;  %v14837_v15 = vperm.slane %v13946_v47, 5 }
 0x94e   : > { %v7875_v13 = vmul.f32 %v9491_v1, %v5410_v62  ;;  %v5398_v22 = vpop.permute.xlu1 %5397  ;;  %v9494_v1 = vld [vmem:[%s9854_s18 + $0x5e0] sm:$0xff] }
 0x94f   : > { %v7873_v19 = vmul.f32 %v9492_v39, %v5398_v22  ;;  %v5592_v52 = vpop.permute.xlu0 %5591  ;;  %v9495_v39 = vld [vmem:[%s9854_s18 + $0x468] sm:$0xff] }
 0x950   : > { %8387 = vst.msk [vmem:[%s13671_s4 + $0x458] sm:$0x3] %vm701_vm1, %v7875_v13  ;;  %v7904_v23 = vmul.f32 %v9493_v36, %v5592_v52  ;;  %v9496_v36 = vld [vmem:[%s9854_s18 + $0x460] sm:$0xff] }
 0x951   : > { %8385 = vst.msk [vmem:[%s13671_s4 + $0x448] sm:$0xff] %vm691_vm0, %v7873_v19 }
 0x952   : > { %8416 = vst.msk [vmem:[%s13671_s4 + $0x540] sm:$0xff] %vm691_vm0, %v7904_v23 }
 0x953   : > { %5503 = vperm.xlu2 %9004, %v13536_v31   ;;  %v14846_v31 = vperm.slane %v14013_v53, 2 }
 0x954   : > { %9007 = vset.pattern.permute.xlu1 %v13292_v50 }
 0x955   : > { %7466 = vperm.xlu0 %9286, %v14837_v15   ;;  %16411 = vst [vmem:[#allocation32_spill] sm:$0xff] %v14846_v31 }
 0x957   : > { %v5717_v62 = vpop.permute.xlu0 %5716 }
 0x958   : > { %v7924_v13 = vmul.f32 %v9494_v1, %v5717_v62  ;;  %v9497_v1 = vld [vmem:[%s9854_s18 + $0x680] sm:$0xff] }
 0x95a   : > { %8436 = vst.msk [vmem:[%s13671_s4 + $0x5e0] sm:$0xff] %vm691_vm0, %v7924_v13 }
 0x95b   : > { %9006 = vset.pattern.permute.xlu2 %v13281_v16 }
 0x95c   : > { %5522 = vperm.xlu1 %9007, %v14096_v49  }
 0x95d   : > { %7591 = vperm.xlu0 %9286, %v14846_v31   ;;  %v5423_v22 = vpop.permute.xlu2 %5422  ;;  %v14861_v31 = vperm.slane %v14013_v53, 7 }
 0x95e   : > { %v7877_v19 = vmul.f32 %v9495_v39, %v5423_v22  ;;  %v5417_v52 = vpop.permute.xlu1 %5416  ;;  %v9498_v39 = vld [vmem:[%s9854_s18 + $0x720] sm:$0xff] }
 0x95f   : > { %v7876_v23 = vmul.f32 %v9496_v36, %v5417_v52  ;;  %v5842_v62 = vpop.permute.xlu0 %5841  ;;  %16412 = vst [vmem:[#allocation33_spill] sm:$0xff] %v14861_v31  ;;  %v9499_v36 = vld [vmem:[%s9854_s18 + $0x480] sm:$0xff] }
 0x960   : > { %8389 = vst.msk [vmem:[%s13671_s4 + $0x468] sm:$0xff] %vm691_vm0, %v7877_v19  ;;  %v7944_v13 = vmul.f32 %v9497_v1, %v5842_v62  ;;  %v9500_v1 = vld [vmem:[%s9854_s18 + $0x470] sm:$0xff] }
 0x961   : > { %8388 = vst.msk [vmem:[%s13671_s4 + $0x460] sm:$0xff] %vm691_vm0, %v7876_v23 }
 0x962   : > { %8456 = vst.msk [vmem:[%s13671_s4 + $0x680] sm:$0xff] %vm691_vm0, %v7944_v13 }
 0x963   : > { %5516 = vperm.xlu2 %9006, %v14096_v49  }
 0x964   : > { %9009 = vset.pattern.permute.xlu1 %v13281_v16 }
 0x965   : > { %7716 = vperm.xlu0 %9286, %v14861_v31  }
 0x967   : > { %v5967_v22 = vpop.permute.xlu0 %5966 }
 0x968   : > { %v7964_v19 = vmul.f32 %v9498_v39, %v5967_v22  ;;  %v9501_v22 = vld [vmem:[%s9854_s18 + $0x7c0] sm:$0xff] }
 0x96a   : > { %8476 = vst.msk [vmem:[%s13671_s4 + $0x720] sm:$0xff] %vm691_vm0, %v7964_v19 }
 0x96b   : > { %9008 = vset.pattern.permute.xlu2 %v13394_v43 }
 0x96c   : > { %5541 = vperm.xlu1 %9009, %v14372_v10  }
 0x96d   : > { %v5442_v52 = vpop.permute.xlu2 %5441  ;;  %9294 = vset.pattern.permute.xlu0 %v13394_v43 }
 0x96e   : > { %v7880_v23 = vmul.f32 %v9499_v36, %v5442_v52  ;;  %v5429_v62 = vpop.permute.xlu1 %5428  ;;  %v9502_v52 = vld [vmem:[%s9854_s18 + $0x860] sm:$0xff] }
 0x96f   : > { %v7878_v13 = vmul.f32 %v9500_v1, %v5429_v62  ;;  %v6092_v31 = vpop.permute.xlu0 %6091  ;;  %v9504_v1 = vld [vmem:[%s9854_s18 + $0x488] sm:$0xff] }
 0x970   : > { %8392 = vst.msk [vmem:[%s13671_s4 + $0x480] sm:$0xff] %vm691_vm0, %v7880_v23  ;;  %v7984_v39 = vmul.f32 %v9501_v22, %v6092_v31  ;;  %v9503_v23 = vld [vmem:[%s9854_s18 + $0x490] sm:$0xff] }
 0x971   : > { %8390 = vst.msk [vmem:[%s13671_s4 + $0x470] sm:$0xff] %vm691_vm0, %v7878_v13 }
 0x972   : > { %8496 = vst.msk [vmem:[%s13671_s4 + $0x7c0] sm:$0xff] %vm691_vm0, %v7984_v39  ;;  %v9505_v39 = vld [vmem:[%s9854_s18 + $0x900] sm:$0xff] }
 0x973   : > { %5534 = vperm.xlu2 %9008, %v14096_v49  }
 0x974   : > { %9011 = vset.pattern.permute.xlu1 %v13301_v63 }
 0x977   : > { %v6217_v19 = vpop.permute.xlu0 %6216 }
 0x978   : > { %v8004_v36 = vmul.f32 %v9502_v52, %v6217_v19 }
 0x97a   : > { %8516 = vst.msk [vmem:[%s13671_s4 + $0x860] sm:$0xff] %vm691_vm0, %v8004_v36  ;;  %v9506_v36 = vld [vmem:[%s9854_s18 + $0x9a0] sm:$0xff] }
 0x97b   : > { %9010 = vset.pattern.permute.xlu2 %v13292_v50 }
 0x97c   : > { %5553 = vperm.xlu1 %9011, %v14372_v10  }
 0x97d   : > { %v5454_v31 = vpop.permute.xlu2 %5453 }
 0x97e   : > { %v7882_v62 = vmul.f32 %v9503_v23, %v5454_v31  ;;  %v5448_v49 = vpop.permute.xlu1 %5447  ;;  %v5561_v23 = vperm.slane %v13541_v61, 1 }
 0x97f   : > { %v7881_v13 = vmul.f32 %v9504_v1, %v5448_v49  ;;  %v6342_v22 = vpop.permute.xlu0 %6341  ;;  %v9507_v49 = vld [vmem:[%s9854_s18 + $0x4a8] sm:$0xff] }
 0x980   : > { %8394 = vst.msk [vmem:[%s13671_s4 + $0x490] sm:$0xff] %vm691_vm0, %v7882_v62  ;;  %v8024_v19 = vmul.f32 %v9505_v39, %v6342_v22 }
 0x981   : > { %8393 = vst.msk [vmem:[%s13671_s4 + $0x488] sm:$0xff] %vm691_vm0, %v7881_v13  ;;  %v9508_v13 = vld [vmem:[%s9854_s18 + $0x498] sm:$0x3] }
 0x982   : > { %8536 = vst.msk [vmem:[%s13671_s4 + $0x900] sm:$0xff] %vm691_vm0, %v8024_v19  ;;  %v9509_v19 = vld [vmem:[%s9854_s18 + $0xa40] sm:$0xff] }
 0x983   : > { %5547 = vperm.xlu2 %9010, %v14372_v10  }
 0x984   : > { %9013 = vset.pattern.permute.xlu1 %v13292_v50 }
 0x987   : > { %v6467_v52 = vpop.permute.xlu0 %6466 }
 0x988   : > { %v8044_v31 = vmul.f32 %v9506_v36, %v6467_v52 }
 0x98a   : > { %8556 = vst.msk [vmem:[%s13671_s4 + $0x9a0] sm:$0xff] %vm691_vm0, %v8044_v31  ;;  %v9510_v31 = vld [vmem:[%s9854_s18 + $0xae0] sm:$0xff] }
 0x98b   : > { %9012 = vset.pattern.permute.xlu2 %v13281_v16 }
 0x98c   : > { %5572 = vperm.xlu1 %9013, %v5561_v23  }
 0x98d   : > { %v5473_v62 = vpop.permute.xlu2 %5472 }
 0x98e   : > { %v7885_v10 = vmul.f32 %v9507_v49, %v5473_v62  ;;  %v5460_v1 = vpop.permute.xlu1 %5459 }
 0x98f   : > { %v7883_v22 = vmul.f32 %v9508_v13, %v5460_v1  ;;  %v6592_v39 = vpop.permute.xlu0 %6591 }
 0x990   : > { %8397 = vst.msk [vmem:[%s13671_s4 + $0x4a8] sm:$0xff] %vm691_vm0, %v7885_v10  ;;  %v8064_v52 = vmul.f32 %v9509_v19, %v6592_v39  ;;  %v9511_v10 = vld [vmem:[%s9854_s18 + $0x4b8] sm:$0x3] }
 0x991   : > { %8395 = vst.msk [vmem:[%s13671_s4 + $0x498] sm:$0x3] %vm701_vm1, %v7883_v22  ;;  %v9512_v22 = vld [vmem:[%s9854_s18 + $0x4b0] sm:$0xff] }
 0x992   : > { %8576 = vst.msk [vmem:[%s13671_s4 + $0xa40] sm:$0xff] %vm691_vm0, %v8064_v52  ;;  %v9513_v52 = vld [vmem:[%s9854_s18 + $0xb80] sm:$0xff] }
 0x993   : > { %5566 = vperm.xlu2 %9012, %v5561_v23  }
 0x994   : > { %9015 = vset.pattern.permute.xlu1 %v13394_v43 }
 0x997   : > { %v6717_v36 = vpop.permute.xlu0 %6716 }
 0x998   : > { %v8084_v62 = vmul.f32 %v9510_v31, %v6717_v36 }
 0x99a   : > { %8596 = vst.msk [vmem:[%s13671_s4 + $0xae0] sm:$0xff] %vm691_vm0, %v8084_v62  ;;  %v9514_v62 = vld [vmem:[%s9854_s18 + $0xc20] sm:$0xff] }
 0x99b   : > { %9014 = vset.pattern.permute.xlu2 %v13301_v63 }
 0x99c   : > { %5584 = vperm.xlu1 %9015, %v5561_v23  }
 0x99d   : > { %v5485_v49 = vpop.permute.xlu2 %5484 }
 0x99e   : > { %v7887_v1 = vmul.f32 %v9511_v10, %v5485_v49  ;;  %v5479_v13 = vpop.permute.xlu1 %5478 }
 0x99f   : > { %v7886_v39 = vmul.f32 %v9512_v22, %v5479_v13  ;;  %v6842_v19 = vpop.permute.xlu0 %6841  ;;  %v9516_v22 = vld [vmem:[%s9854_s18 + $0x4c0] sm:$0xff] }
 0x9a0   : > { %8399 = vst.msk [vmem:[%s13671_s4 + $0x4b8] sm:$0x3] %vm701_vm1, %v7887_v1  ;;  %v8104_v36 = vmul.f32 %v9513_v52, %v6842_v19  ;;  %v9515_v1 = vld [vmem:[%s9854_s18 + $0x4d0] sm:$0xff]  ;;  %v9517_v52 = vld [vmem:[%s9854_s18 + $0xcc0] sm:$0xff] }
 0x9a1   : > { %8398 = vst.msk [vmem:[%s13671_s4 + $0x4b0] sm:$0xff] %vm691_vm0, %v7886_v39 }
 0x9a2   : > { %8616 = vst.msk [vmem:[%s13671_s4 + $0xb80] sm:$0xff] %vm691_vm0, %v8104_v36 }
 0x9a3   : > { %5578 = vperm.xlu2 %9014, %v5561_v23  }
 0x9a4   : > { %9017 = vset.pattern.permute.xlu1 %v13301_v63 }
 0x9a7   : > { %v6967_v31 = vpop.permute.xlu0 %6966 }
 0x9a8   : > { %v8124_v49 = vmul.f32 %v9514_v62, %v6967_v31  ;;  %v9518_v62 = vld [vmem:[%s9854_s18 + $0xd60] sm:$0xff] }
 0x9aa   : > { %8636 = vst.msk [vmem:[%s13671_s4 + $0xc20] sm:$0xff] %vm691_vm0, %v8124_v49 }
 0x9ab   : > { %9016 = vset.pattern.permute.xlu2 %v13292_v50 }
 0x9ac   : > { %5603 = vperm.xlu1 %9017, %v14660_v58  }
 0x9ad   : > { %v5504_v10 = vpop.permute.xlu2 %5503 }
 0x9ae   : > { %v7890_v13 = vmul.f32 %v9515_v1, %v5504_v10  ;;  %v5492_v23 = vpop.permute.xlu1 %5491  ;;  %v9519_v1 = vld [vmem:[%s9854_s18 + $0x4e0] sm:$0xff] }
 0x9af   : > { %v7888_v39 = vmul.f32 %v9516_v22, %v5492_v23  ;;  %v7092_v19 = vpop.permute.xlu0 %7091  ;;  %v9520_v22 = vld [vmem:[%s9854_s18 + $0x4d8] sm:$0x3] }
 0x9b0   : > { %8402 = vst.msk [vmem:[%s13671_s4 + $0x4d0] sm:$0xff] %vm691_vm0, %v7890_v13  ;;  %v8144_v36 = vmul.f32 %v9517_v52, %v7092_v19  ;;  %v9521_v52 = vld [vmem:[%s9854_s18 + $0xe00] sm:$0xff] }
 0x9b1   : > { %8400 = vst.msk [vmem:[%s13671_s4 + $0x4c0] sm:$0xff] %vm691_vm0, %v7888_v39 }
 0x9b2   : > { %8656 = vst.msk [vmem:[%s13671_s4 + $0xcc0] sm:$0xff] %vm691_vm0, %v8144_v36 }
 0x9b3   : > { %5597 = vperm.xlu2 %9016, %v14660_v58  }
 0x9b4   : > { %9019 = vset.pattern.permute.xlu1 %v13281_v16 }
 0x9b7   : > { %v7217_v31 = vpop.permute.xlu0 %7216 }
 0x9b8   : > { %v8164_v49 = vmul.f32 %v9518_v62, %v7217_v31  ;;  %v9522_v62 = vld [vmem:[%s9854_s18 + $0xea0] sm:$0xff] }
 0x9ba   : > { %8676 = vst.msk [vmem:[%s13671_s4 + $0xd60] sm:$0xff] %vm691_vm0, %v8164_v49 }
 0x9bb   : > { %9018 = vset.pattern.permute.xlu2 %v13394_v43 }
 0x9bc   : > { %5616 = vperm.xlu1 %9019, %v13553_v6  }
 0x9bd   : > { %v5517_v10 = vpop.permute.xlu2 %5516 }
 0x9be   : > { %v7892_v13 = vmul.f32 %v9519_v1, %v5517_v10  ;;  %v5510_v23 = vpop.permute.xlu1 %5509  ;;  %v9523_v1 = vld [vmem:[%s9854_s18 + $0x4f8] sm:$0x3] }
 0x9bf   : > { %v7891_v39 = vmul.f32 %v9520_v22, %v5510_v23  ;;  %v7342_v19 = vpop.permute.xlu0 %7341  ;;  %v9524_v23 = vld [vmem:[%s9854_s18 + $0x4e8] sm:$0xff] }
 0x9c0   : > { %8404 = vst.msk [vmem:[%s13671_s4 + $0x4e0] sm:$0xff] %vm691_vm0, %v7892_v13  ;;  %v8184_v36 = vmul.f32 %v9521_v52, %v7342_v19  ;;  %v9525_v19 = vld [vmem:[%s9854_s18 + $0xf40] sm:$0xff] }
 0x9c1   : > { %8403 = vst.msk [vmem:[%s13671_s4 + $0x4d8] sm:$0x3] %vm701_vm1, %v7891_v39 }
 0x9c2   : > { %8696 = vst.msk [vmem:[%s13671_s4 + $0xe00] sm:$0xff] %vm691_vm0, %v8184_v36 }
 0x9c3   : > { %5609 = vperm.xlu2 %9018, %v14660_v58  }
 0x9c4   : > { %9021 = vset.pattern.permute.xlu1 %v13394_v43 }
 0x9c7   : > { %v7467_v31 = vpop.permute.xlu0 %7466 }
 0x9c8   : > { %v8204_v49 = vmul.f32 %v9522_v62, %v7467_v31  ;;  %v9526_v31 = vld [vmem:[%s9854_s18 + $0xfe0] sm:$0xff] }
 0x9ca   : > { %8716 = vst.msk [vmem:[%s13671_s4 + $0xea0] sm:$0xff] %vm691_vm0, %v8204_v49 }
 0x9cb   : > { %9020 = vset.pattern.permute.xlu2 %v13301_v63 }
 0x9cc   : > { %5634 = vperm.xlu1 %9021, %v13553_v6  }
 0x9cd   : > { %v5535_v10 = vpop.permute.xlu2 %5534 }
 0x9ce   : > { %v7895_v13 = vmul.f32 %v9523_v1, %v5535_v10  ;;  %v5523_v58 = vpop.permute.xlu1 %5522  ;;  %v9527_v10 = vld [vmem:[%s9854_s18 + $0x508] sm:$0xff] }
 0x9cf   : > { %v7893_v22 = vmul.f32 %v9524_v23, %v5523_v58  ;;  %v7592_v39 = vpop.permute.xlu0 %7591 }
 0x9d0   : > { %8407 = vst.msk [vmem:[%s13671_s4 + $0x4f8] sm:$0x3] %vm701_vm1, %v7895_v13  ;;  %v8224_v52 = vmul.f32 %v9525_v19, %v7592_v39 }
 0x9d1   : > { %8405 = vst.msk [vmem:[%s13671_s4 + $0x4e8] sm:$0xff] %vm691_vm0, %v7893_v22  ;;  %v9529_v22 = vld [vmem:[%s9854_s18 + $0x520] sm:$0xff] }
 0x9d2   : > { %8736 = vst.msk [vmem:[%s13671_s4 + $0xf40] sm:$0xff] %vm691_vm0, %v8224_v52  ;;  %v9530_v52 = vld [vmem:[%s9854_s18 + $0x510] sm:$0xff] }
 0x9d3   : > { %5628 = vperm.xlu2 %9020, %v13553_v6   ;;  %v9528_v6 = vld [vmem:[%s9854_s18 + $0x500] sm:$0xff] }
 0x9d4   : > { %9023 = vset.pattern.permute.xlu1 %v13292_v50 }
 0x9d7   : > { %v7717_v36 = vpop.permute.xlu0 %7716 }
 0x9d8   : > { %v8244_v62 = vmul.f32 %v9526_v31, %v7717_v36 }
 0x9da   : > { %8756 = vst.msk [vmem:[%s13671_s4 + $0xfe0] sm:$0xff] %vm691_vm0, %v8244_v62  ;;  %v9531_v62 = vld [vmem:[%s9854_s18 + $0x530] sm:$0xff] }
 0x9db   : > { %9022 = vset.pattern.permute.xlu2 %v13281_v16 }
 0x9dc   : > { %5647 = vperm.xlu1 %9023, %v14102_v20  }
 0x9dd   : > { %v5548_v49 = vpop.permute.xlu2 %5547 }
 0x9de   : > { %v7897_v1 = vmul.f32 %v9527_v10, %v5548_v49  ;;  %v5542_v13 = vpop.permute.xlu1 %5541 }
 0x9df   : > { %v7896_v58 = vmul.f32 %v9528_v6, %v5542_v13 }
 0x9e0   : > { %8409 = vst.msk [vmem:[%s13671_s4 + $0x508] sm:$0xff] %vm691_vm0, %v7897_v1  ;;  %v9532_v1 = vld [vmem:[%s9854_s18 + $0x528] sm:$0xff] }
 0x9e1   : > { %8408 = vst.msk [vmem:[%s13671_s4 + $0x500] sm:$0xff] %vm691_vm0, %v7896_v58  ;;  %v9533_v58 = vld [vmem:[%s9854_s18 + $0x548] sm:$0xff] }
 0x9e3   : > { %5641 = vperm.xlu2 %9022, %v14102_v20  }
 0x9e4   : > { %9025 = vset.pattern.permute.xlu1 %v13281_v16 }
 0x9eb   : > { %9024 = vset.pattern.permute.xlu2 %v13394_v43 }
 0x9ec   : > { %5666 = vperm.xlu1 %9025, %v14382_v29  }
 0x9ed   : > { %v5567_v23 = vpop.permute.xlu2 %5566 }
 0x9ee   : > { %v7900_v39 = vmul.f32 %v9529_v22, %v5567_v23  ;;  %v5554_v19 = vpop.permute.xlu1 %5553 }
 0x9ef   : > { %v7898_v36 = vmul.f32 %v9530_v52, %v5554_v19 }
 0x9f0   : > { %8412 = vst.msk [vmem:[%s13671_s4 + $0x520] sm:$0xff] %vm691_vm0, %v7900_v39  ;;  %v9534_v39 = vld [vmem:[%s9854_s18 + $0x538] sm:$0x3] }
 0x9f1   : > { %8410 = vst.msk [vmem:[%s13671_s4 + $0x510] sm:$0xff] %vm691_vm0, %v7898_v36 }
 0x9f3   : > { %5659 = vperm.xlu2 %9024, %v14102_v20   ;;  %v5686_v20 = vperm.slane %v13541_v61, 6 }
 0x9f4   : > { %9027 = vset.pattern.permute.xlu1 %v13301_v63 }
 0x9fb   : > { %9026 = vset.pattern.permute.xlu2 %v13292_v50 }
 0x9fc   : > { %5678 = vperm.xlu1 %9027, %v14382_v29  }
 0x9fd   : > { %v5579_v31 = vpop.permute.xlu2 %5578 }
 0x9fe   : > { %v7902_v49 = vmul.f32 %v9531_v62, %v5579_v31  ;;  %v5573_v10 = vpop.permute.xlu1 %5572  ;;  %v9536_v31 = vld [vmem:[%s9854_s18 + $0x550] sm:$0xff] }
 0x9ff   : > { %v7901_v13 = vmul.f32 %v9532_v1, %v5573_v10  ;;  %v9537_v10 = vld [vmem:[%s9854_s18 + $0x570] sm:$0xff] }
 0xa00   : > { %8414 = vst.msk [vmem:[%s13671_s4 + $0x530] sm:$0xff] %vm691_vm0, %v7902_v49 }
 0xa01   : > { %8413 = vst.msk [vmem:[%s13671_s4 + $0x528] sm:$0xff] %vm691_vm0, %v7901_v13 }
 0xa03   : > { %5672 = vperm.xlu2 %9026, %v14382_v29   ;;  %v9535_v29 = vld [vmem:[%s9854_s18 + $0x558] sm:$0x3] }
 0xa04   : > { %9029 = vset.pattern.permute.xlu1 %v13292_v50 }
 0xa0b   : > { %9028 = vset.pattern.permute.xlu2 %v13281_v16 }
 0xa0c   : > { %5697 = vperm.xlu1 %9029, %v5686_v20  }
 0xa0d   : > { %v5598_v6 = vpop.permute.xlu2 %5597 }
 0xa0e   : > { %v7905_v23 = vmul.f32 %v9533_v58, %v5598_v6  ;;  %v5585_v22 = vpop.permute.xlu1 %5584  ;;  %v9538_v6 = vld [vmem:[%s9854_s18 + $0x560] sm:$0xff] }
 0xa0f   : > { %v7903_v19 = vmul.f32 %v9534_v39, %v5585_v22 }
 0xa10   : > { %8417 = vst.msk [vmem:[%s13671_s4 + $0x548] sm:$0xff] %vm691_vm0, %v7905_v23  ;;  %v9539_v23 = vld [vmem:[%s9854_s18 + $0x580] sm:$0xff] }
 0xa11   : > { %8415 = vst.msk [vmem:[%s13671_s4 + $0x538] sm:$0x3] %vm701_vm1, %v7903_v19  ;;  %v9540_v19 = vld [vmem:[%s9854_s18 + $0x578] sm:$0x3] }
 0xa13   : > { %5691 = vperm.xlu2 %9028, %v5686_v20  }
 0xa14   : > { %9031 = vset.pattern.permute.xlu1 %v13394_v43 }
 0xa1b   : > { %9030 = vset.pattern.permute.xlu2 %v13301_v63 }
 0xa1c   : > { %5709 = vperm.xlu1 %9031, %v5686_v20  }
 0xa1d   : > { %v5610_v61 = vpop.permute.xlu2 %5609 }
 0xa1e   : > { %v7907_v52 = vmul.f32 %v9535_v29, %v5610_v61  ;;  %v5604_v36 = vpop.permute.xlu1 %5603 }
 0xa1f   : > { %v7906_v62 = vmul.f32 %v9536_v31, %v5604_v36 }
 0xa20   : > { %8419 = vst.msk [vmem:[%s13671_s4 + $0x558] sm:$0x3] %vm701_vm1, %v7907_v52  ;;  %v9541_v52 = vld [vmem:[%s9854_s18 + $0x598] sm:$0x3] }
 0xa21   : > { %8418 = vst.msk [vmem:[%s13671_s4 + $0x550] sm:$0xff] %vm691_vm0, %v7906_v62  ;;  %v9542_v62 = vld [vmem:[%s9854_s18 + $0x588] sm:$0xff] }
 0xa23   : > { %5703 = vperm.xlu2 %9030, %v5686_v20  }
 0xa24   : > { %9033 = vset.pattern.permute.xlu1 %v13301_v63 }
 0xa2b   : > { %9032 = vset.pattern.permute.xlu2 %v13292_v50 }
 0xa2c   : > { %5728 = vperm.xlu1 %9033, %v14675_v25  }
 0xa2d   : > { %v5629_v49 = vpop.permute.xlu2 %5628 }
 0xa2e   : > { %v7910_v1 = vmul.f32 %v9537_v10, %v5629_v49  ;;  %v5617_v13 = vpop.permute.xlu1 %5616  ;;  %v9543_v10 = vld [vmem:[%s9854_s18 + $0x5a8] sm:$0xff] }
 0xa2f   : > { %v7908_v58 = vmul.f32 %v9538_v6, %v5617_v13  ;;  %v9544_v6 = vld [vmem:[%s9854_s18 + $0x5a0] sm:$0xff] }
 0xa30   : > { %8422 = vst.msk [vmem:[%s13671_s4 + $0x570] sm:$0xff] %vm691_vm0, %v7910_v1 }
 0xa31   : > { %8420 = vst.msk [vmem:[%s13671_s4 + $0x560] sm:$0xff] %vm691_vm0, %v7908_v58 }
 0xa33   : > { %5722 = vperm.xlu2 %9032, %v14675_v25  }
 0xa34   : > { %9035 = vset.pattern.permute.xlu1 %v13281_v16 }
 0xa3b   : > { %9034 = vset.pattern.permute.xlu2 %v13394_v43 }
 0xa3c   : > { %5741 = vperm.xlu1 %9035, %v13572_v48  }
 0xa3d   : > { %v5642_v20 = vpop.permute.xlu2 %5641 }
 0xa3e   : > { %v7912_v22 = vmul.f32 %v9539_v23, %v5642_v20  ;;  %v5635_v39 = vpop.permute.xlu1 %5634  ;;  %v9545_v20 = vld [vmem:[%s9854_s18 + $0x5c0] sm:$0xff] }
 0xa3f   : > { %v7911_v61 = vmul.f32 %v9540_v19, %v5635_v39  ;;  %v9546_v39 = vld [vmem:[%s9854_s18 + $0x5b0] sm:$0xff] }
 0xa40   : > { %8424 = vst.msk [vmem:[%s13671_s4 + $0x580] sm:$0xff] %vm691_vm0, %v7912_v22 }
 0xa41   : > { %8423 = vst.msk [vmem:[%s13671_s4 + $0x578] sm:$0x3] %vm701_vm1, %v7911_v61 }
 0xa43   : > { %5734 = vperm.xlu2 %9034, %v14675_v25  }
 0xa44   : > { %9037 = vset.pattern.permute.xlu1 %v13394_v43 }
 0xa4b   : > { %9036 = vset.pattern.permute.xlu2 %v13301_v63 }
 0xa4c   : > { %5759 = vperm.xlu1 %9037, %v13572_v48  }
 0xa4d   : > { %v5660_v29 = vpop.permute.xlu2 %5659 }
 0xa4e   : > { %v7915_v36 = vmul.f32 %v9541_v52, %v5660_v29  ;;  %v5648_v31 = vpop.permute.xlu1 %5647  ;;  %v9547_v29 = vld [vmem:[%s9854_s18 + $0x5d0] sm:$0xff] }
 0xa4f   : > { %v7913_v49 = vmul.f32 %v9542_v62, %v5648_v31  ;;  %v9548_v31 = vld [vmem:[%s9854_s18 + $0x5c8] sm:$0xff] }
 0xa50   : > { %8427 = vst.msk [vmem:[%s13671_s4 + $0x598] sm:$0x3] %vm701_vm1, %v7915_v36 }
 0xa51   : > { %8425 = vst.msk [vmem:[%s13671_s4 + $0x588] sm:$0xff] %vm691_vm0, %v7913_v49 }
 0xa53   : > { %5753 = vperm.xlu2 %9036, %v13572_v48  }
 0xa54   : > { %9039 = vset.pattern.permute.xlu1 %v13292_v50 }
 0xa5b   : > { %9038 = vset.pattern.permute.xlu2 %v13281_v16 }
 0xa5c   : > { %5772 = vperm.xlu1 %9039, %v14114_v4  }
 0xa5d   : > { %v5673_v25 = vpop.permute.xlu2 %5672 }
 0xa5e   : > { %v7917_v1 = vmul.f32 %v9543_v10, %v5673_v25  ;;  %v5667_v13 = vpop.permute.xlu1 %5666  ;;  %v9549_v25 = vld [vmem:[%s9854_s18 + $0x5e8] sm:$0xff] }
 0xa5f   : > { %v7916_v58 = vmul.f32 %v9544_v6, %v5667_v13  ;;  %v9550_v13 = vld [vmem:[%s9854_s18 + $0x5d8] sm:$0x3] }
 0xa60   : > { %8429 = vst.msk [vmem:[%s13671_s4 + $0x5a8] sm:$0xff] %vm691_vm0, %v7917_v1 }
 0xa61   : > { %8428 = vst.msk [vmem:[%s13671_s4 + $0x5a0] sm:$0xff] %vm691_vm0, %v7916_v58 }
 0xa63   : > { %5766 = vperm.xlu2 %9038, %v14114_v4  }
 0xa64   : > { %9041 = vset.pattern.permute.xlu1 %v13281_v16 }
 0xa6b   : > { %9040 = vset.pattern.permute.xlu2 %v13394_v43 }
 0xa6c   : > { %5791 = vperm.xlu1 %9041, %v14395_v18  }
 0xa6d   : > { %v5692_v48 = vpop.permute.xlu2 %5691 }
 0xa6e   : > { %v7920_v23 = vmul.f32 %v9545_v20, %v5692_v48  ;;  %v5679_v22 = vpop.permute.xlu1 %5678  ;;  %v9552_v20 = vld [vmem:[%s9854_s18 + $0x5f0] sm:$0xff] }
 0xa6f   : > { %v7918_v19 = vmul.f32 %v9546_v39, %v5679_v22  ;;  %v9553_v39 = vld [vmem:[%s9854_s18 + $0x610] sm:$0xff] }
 0xa70   : > { %8432 = vst.msk [vmem:[%s13671_s4 + $0x5c0] sm:$0xff] %vm691_vm0, %v7920_v23 }
 0xa71   : > { %8430 = vst.msk [vmem:[%s13671_s4 + $0x5b0] sm:$0xff] %vm691_vm0, %v7918_v19 }
 0xa73   : > { %5784 = vperm.xlu2 %9040, %v14114_v4   ;;  %v5811_v4 = vperm.slane %v13555_v8, 3 }
 0xa74   : > { %9043 = vset.pattern.permute.xlu1 %v13301_v63 }
 0xa7b   : > { %9042 = vset.pattern.permute.xlu2 %v13292_v50 }
 0xa7c   : > { %5803 = vperm.xlu1 %9043, %v14395_v18  }
 0xa7d   : > { %v5704_v61 = vpop.permute.xlu2 %5703 }
 0xa7e   : > { %v7922_v52 = vmul.f32 %v9547_v29, %v5704_v61  ;;  %v5698_v36 = vpop.permute.xlu1 %5697  ;;  %v9554_v29 = vld [vmem:[%s9854_s18 + $0x600] sm:$0xff] }
 0xa7f   : > { %v7921_v62 = vmul.f32 %v9548_v31, %v5698_v36  ;;  %v9555_v31 = vld [vmem:[%s9854_s18 + $0x620] sm:$0xff] }
 0xa80   : > { %8434 = vst.msk [vmem:[%s13671_s4 + $0x5d0] sm:$0xff] %vm691_vm0, %v7922_v52 }
 0xa81   : > { %8433 = vst.msk [vmem:[%s13671_s4 + $0x5c8] sm:$0xff] %vm691_vm0, %v7921_v62 }
 0xa83   : > { %5797 = vperm.xlu2 %9042, %v14395_v18   ;;  %v9551_v18 = vld [vmem:[%s9854_s18 + $0x5f8] sm:$0x3] }
 0xa84   : > { %9045 = vset.pattern.permute.xlu1 %v13292_v50 }
 0xa8b   : > { %9044 = vset.pattern.permute.xlu2 %v13281_v16 }
 0xa8c   : > { %5822 = vperm.xlu1 %9045, %v5811_v4  }
 0xa8d   : > { %v5723_v49 = vpop.permute.xlu2 %5722 }
 0xa8e   : > { %v7925_v10 = vmul.f32 %v9549_v25, %v5723_v49  ;;  %v5710_v1 = vpop.permute.xlu1 %5709  ;;  %v9556_v49 = vld [vmem:[%s9854_s18 + $0x618] sm:$0x3] }
 0xa8f   : > { %v7923_v6 = vmul.f32 %v9550_v13, %v5710_v1  ;;  %v9557_v1 = vld [vmem:[%s9854_s18 + $0x638] sm:$0x3] }
 0xa90   : > { %8437 = vst.msk [vmem:[%s13671_s4 + $0x5e8] sm:$0xff] %vm691_vm0, %v7925_v10 }
 0xa91   : > { %8435 = vst.msk [vmem:[%s13671_s4 + $0x5d8] sm:$0x3] %vm701_vm1, %v7923_v6 }
 0xa93   : > { %5816 = vperm.xlu2 %9044, %v5811_v4  }
 0xa94   : > { %9047 = vset.pattern.permute.xlu1 %v13394_v43 }
 0xa9b   : > { %9046 = vset.pattern.permute.xlu2 %v13301_v63 }
 0xa9c   : > { %5834 = vperm.xlu1 %9047, %v5811_v4  }
 0xa9d   : > { %v5735_v8 = vpop.permute.xlu2 %5734 }
 0xa9e   : > { %v7927_v58 = vmul.f32 %v9551_v18, %v5735_v8  ;;  %v5729_v48 = vpop.permute.xlu1 %5728  ;;  %v9558_v8 = vld [vmem:[%s9854_s18 + $0x628] sm:$0xff] }
 0xa9f   : > { %v7926_v23 = vmul.f32 %v9552_v20, %v5729_v48 }
 0xaa0   : > { %8439 = vst.msk [vmem:[%s13671_s4 + $0x5f8] sm:$0x3] %vm701_vm1, %v7927_v58  ;;  %v9559_v58 = vld [vmem:[%s9854_s18 + $0x648] sm:$0xff] }
 0xaa1   : > { %8438 = vst.msk [vmem:[%s13671_s4 + $0x5f0] sm:$0xff] %vm691_vm0, %v7926_v23  ;;  %v9560_v23 = vld [vmem:[%s9854_s18 + $0x640] sm:$0xff] }
 0xaa3   : > { %5828 = vperm.xlu2 %9046, %v5811_v4  }
 0xaa4   : > { %9049 = vset.pattern.permute.xlu1 %v13301_v63 }
 0xaab   : > { %9048 = vset.pattern.permute.xlu2 %v13292_v50 }
 0xaac   : > { %5853 = vperm.xlu1 %9049, %v14684_v11  }
 0xaad   : > { %v5754_v22 = vpop.permute.xlu2 %5753 }
 0xaae   : > { %v7930_v19 = vmul.f32 %v9553_v39, %v5754_v22  ;;  %v5742_v61 = vpop.permute.xlu1 %5741  ;;  %v9561_v39 = vld [vmem:[%s9854_s18 + $0x660] sm:$0xff] }
 0xaaf   : > { %v7928_v52 = vmul.f32 %v9554_v29, %v5742_v61  ;;  %v9562_v29 = vld [vmem:[%s9854_s18 + $0x650] sm:$0xff] }
 0xab0   : > { %8442 = vst.msk [vmem:[%s13671_s4 + $0x610] sm:$0xff] %vm691_vm0, %v7930_v19 }
 0xab1   : > { %8440 = vst.msk [vmem:[%s13671_s4 + $0x600] sm:$0xff] %vm691_vm0, %v7928_v52 }
 0xab3   : > { %5847 = vperm.xlu2 %9048, %v14684_v11  }
 0xab4   : > { %9051 = vset.pattern.permute.xlu1 %v13281_v16 }
 0xabb   : > { %9050 = vset.pattern.permute.xlu2 %v13394_v43 }
 0xabc   : > { %5866 = vperm.xlu1 %9051, %v13593_v35  }
 0xabd   : > { %v5767_v36 = vpop.permute.xlu2 %5766 }
 0xabe   : > { %v7932_v62 = vmul.f32 %v9555_v31, %v5767_v36  ;;  %v5760_v4 = vpop.permute.xlu1 %5759  ;;  %v9563_v31 = vld [vmem:[%s9854_s18 + $0x670] sm:$0xff] }
 0xabf   : > { %v7931_v25 = vmul.f32 %v9556_v49, %v5760_v4  ;;  %v9564_v49 = vld [vmem:[%s9854_s18 + $0x668] sm:$0xff] }
 0xac0   : > { %8444 = vst.msk [vmem:[%s13671_s4 + $0x620] sm:$0xff] %vm691_vm0, %v7932_v62 }
 0xac1   : > { %8443 = vst.msk [vmem:[%s13671_s4 + $0x618] sm:$0x3] %vm701_vm1, %v7931_v25 }
 0xac3   : > { %5859 = vperm.xlu2 %9050, %v14684_v11  }
 0xac4   : > { %9053 = vset.pattern.permute.xlu1 %v13394_v43 }
 0xacb   : > { %9052 = vset.pattern.permute.xlu2 %v13301_v63 }
 0xacc   : > { %5884 = vperm.xlu1 %9053, %v13593_v35  }
 0xacd   : > { %v5785_v10 = vpop.permute.xlu2 %5784 }
 0xace   : > { %v7935_v13 = vmul.f32 %v9557_v1, %v5785_v10  ;;  %v5773_v6 = vpop.permute.xlu1 %5772  ;;  %v9565_v1 = vld [vmem:[%s9854_s18 + $0x688] sm:$0xff] }
 0xacf   : > { %v7933_v18 = vmul.f32 %v9558_v8, %v5773_v6  ;;  %v9566_v8 = vld [vmem:[%s9854_s18 + $0x678] sm:$0x3] }
 0xad0   : > { %8447 = vst.msk [vmem:[%s13671_s4 + $0x638] sm:$0x3] %vm701_vm1, %v7935_v13 }
 0xad1   : > { %8445 = vst.msk [vmem:[%s13671_s4 + $0x628] sm:$0xff] %vm691_vm0, %v7933_v18 }
 0xad3   : > { %5878 = vperm.xlu2 %9052, %v13593_v35  }
 0xad4   : > { %9055 = vset.pattern.permute.xlu1 %v13292_v50 }
 0xadb   : > { %9054 = vset.pattern.permute.xlu2 %v13281_v16 }
 0xadc   : > { %5897 = vperm.xlu1 %9055, %v14120_v3  }
 0xadd   : > { %v5798_v11 = vpop.permute.xlu2 %5797 }
 0xade   : > { %v7937_v48 = vmul.f32 %v9559_v58, %v5798_v11  ;;  %v5792_v20 = vpop.permute.xlu1 %5791  ;;  %v9567_v11 = vld [vmem:[%s9854_s18 + $0x698] sm:$0x3] }
 0xadf   : > { %v7936_v22 = vmul.f32 %v9560_v23, %v5792_v20  ;;  %v9568_v20 = vld [vmem:[%s9854_s18 + $0x690] sm:$0xff] }
 0xae0   : > { %8449 = vst.msk [vmem:[%s13671_s4 + $0x648] sm:$0xff] %vm691_vm0, %v7937_v48 }
 0xae1   : > { %8448 = vst.msk [vmem:[%s13671_s4 + $0x640] sm:$0xff] %vm691_vm0, %v7936_v22 }
 0xae3   : > { %5891 = vperm.xlu2 %9054, %v14120_v3  }
 0xae4   : > { %9057 = vset.pattern.permute.xlu1 %v13281_v16 }
 0xaeb   : > { %9056 = vset.pattern.permute.xlu2 %v13394_v43 }
 0xaec   : > { %5916 = vperm.xlu1 %9057, %v14404_v38  }
 0xaed   : > { %v5817_v35 = vpop.permute.xlu2 %5816 }
 0xaee   : > { %v7940_v19 = vmul.f32 %v9561_v39, %v5817_v35  ;;  %v5804_v61 = vpop.permute.xlu1 %5803  ;;  %v9569_v35 = vld [vmem:[%s9854_s18 + $0x6b0] sm:$0xff] }
 0xaef   : > { %v7938_v52 = vmul.f32 %v9562_v29, %v5804_v61  ;;  %v9570_v61 = vld [vmem:[%s9854_s18 + $0x6a0] sm:$0xff] }
 0xaf0   : > { %8452 = vst.msk [vmem:[%s13671_s4 + $0x660] sm:$0xff] %vm691_vm0, %v7940_v19 }
 0xaf1   : > { %8450 = vst.msk [vmem:[%s13671_s4 + $0x650] sm:$0xff] %vm691_vm0, %v7938_v52 }
 0xaf3   : > { %5909 = vperm.xlu2 %9056, %v14120_v3   ;;  %v5936_v3 = vperm.slane %v13567_v60, 0 }
 0xaf4   : > { %9059 = vset.pattern.permute.xlu1 %v13301_v63 }
 0xafb   : > { %9058 = vset.pattern.permute.xlu2 %v13292_v50 }
 0xafc   : > { %5928 = vperm.xlu1 %9059, %v14404_v38  }
 0xafd   : > { %v5829_v36 = vpop.permute.xlu2 %5828 }
 0xafe   : > { %v7942_v62 = vmul.f32 %v9563_v31, %v5829_v36  ;;  %v5823_v4 = vpop.permute.xlu1 %5822  ;;  %v9571_v36 = vld [vmem:[%s9854_s18 + $0x6c0] sm:$0xff] }
 0xaff   : > { %v7941_v25 = vmul.f32 %v9564_v49, %v5823_v4  ;;  %v9572_v4 = vld [vmem:[%s9854_s18 + $0x6b8] sm:$0x3] }
 0xb00   : > { %8454 = vst.msk [vmem:[%s13671_s4 + $0x670] sm:$0xff] %vm691_vm0, %v7942_v62 }
 0xb01   : > { %8453 = vst.msk [vmem:[%s13671_s4 + $0x668] sm:$0xff] %vm691_vm0, %v7941_v25 }
 0xb03   : > { %5922 = vperm.xlu2 %9058, %v14404_v38  }
 0xb04   : > { %9061 = vset.pattern.permute.xlu1 %v13292_v50 }
 0xb0b   : > { %9060 = vset.pattern.permute.xlu2 %v13281_v16 }
 0xb0c   : > { %5947 = vperm.xlu1 %9061, %v5936_v3  }
 0xb0d   : > { %v5848_v10 = vpop.permute.xlu2 %5847 }
 0xb0e   : > { %v7945_v13 = vmul.f32 %v9565_v1, %v5848_v10  ;;  %v5835_v6 = vpop.permute.xlu1 %5834 }
 0xb0f   : > { %v7943_v18 = vmul.f32 %v9566_v8, %v5835_v6  ;;  %v9575_v8 = vld [vmem:[%s9854_s18 + $0x6e8] sm:$0xff] }
 0xb10   : > { %8457 = vst.msk [vmem:[%s13671_s4 + $0x688] sm:$0xff] %vm691_vm0, %v7945_v13  ;;  %v9574_v13 = vld [vmem:[%s9854_s18 + $0x6c8] sm:$0xff] }
 0xb11   : > { %8455 = vst.msk [vmem:[%s13671_s4 + $0x678] sm:$0x3] %vm701_vm1, %v7943_v18 }
 0xb13   : > { %5941 = vperm.xlu2 %9060, %v5936_v3  }
 0xb14   : > { %9063 = vset.pattern.permute.xlu1 %v13394_v43 }
 0xb1b   : > { %9062 = vset.pattern.permute.xlu2 %v13301_v63 }
 0xb1c   : > { %5959 = vperm.xlu1 %9063, %v5936_v3  }
 0xb1d   : > { %v5860_v38 = vpop.permute.xlu2 %5859 }
 0xb1e   : > { %v7947_v58 = vmul.f32 %v9567_v11, %v5860_v38  ;;  %v5854_v48 = vpop.permute.xlu1 %5853  ;;  %v9576_v11 = vld [vmem:[%s9854_s18 + $0x6e0] sm:$0xff] }
 0xb1f   : > { %v7946_v23 = vmul.f32 %v9568_v20, %v5854_v48  ;;  %v9577_v48 = vld [vmem:[%s9854_s18 + $0x700] sm:$0xff] }
 0xb20   : > { %8459 = vst.msk [vmem:[%s13671_s4 + $0x698] sm:$0x3] %vm701_vm1, %v7947_v58 }
 0xb21   : > { %8458 = vst.msk [vmem:[%s13671_s4 + $0x690] sm:$0xff] %vm691_vm0, %v7946_v23 }
 0xb23   : > { %5953 = vperm.xlu2 %9062, %v5936_v3   ;;  %v9573_v3 = vld [vmem:[%s9854_s18 + $0x6d8] sm:$0x3] }
 0xb24   : > { %9065 = vset.pattern.permute.xlu1 %v13301_v63 }
 0xb2b   : > { %9064 = vset.pattern.permute.xlu2 %v13292_v50 }
 0xb2c   : > { %5978 = vperm.xlu1 %9065, %v14699_v56  }
 0xb2d   : > { %v5879_v22 = vpop.permute.xlu2 %5878 }
 0xb2e   : > { %v7950_v39 = vmul.f32 %v9569_v35, %v5879_v22  ;;  %v5867_v19 = vpop.permute.xlu1 %5866  ;;  %v9578_v22 = vld [vmem:[%s9854_s18 + $0x6f0] sm:$0xff] }
 0xb2f   : > { %v7948_v29 = vmul.f32 %v9570_v61, %v5867_v19  ;;  %v9579_v19 = vld [vmem:[%s9854_s18 + $0x710] sm:$0xff] }
 0xb30   : > { %8462 = vst.msk [vmem:[%s13671_s4 + $0x6b0] sm:$0xff] %vm691_vm0, %v7950_v39 }
 0xb31   : > { %8460 = vst.msk [vmem:[%s13671_s4 + $0x6a0] sm:$0xff] %vm691_vm0, %v7948_v29 }
 0xb33   : > { %5972 = vperm.xlu2 %9064, %v14699_v56  }
 0xb34   : > { %9067 = vset.pattern.permute.xlu1 %v13281_v16 }
 0xb3b   : > { %9066 = vset.pattern.permute.xlu2 %v13394_v43 }
 0xb3c   : > { %5991 = vperm.xlu1 %9067, %v13596_v51  }
 0xb3d   : > { %v5892_v52 = vpop.permute.xlu2 %5891 }
 0xb3e   : > { %v7952_v31 = vmul.f32 %v9571_v36, %v5892_v52  ;;  %v5885_v62 = vpop.permute.xlu1 %5884  ;;  %v9580_v52 = vld [vmem:[%s9854_s18 + $0x708] sm:$0xff] }
 0xb3f   : > { %v7951_v49 = vmul.f32 %v9572_v4, %v5885_v62  ;;  %v9581_v62 = vld [vmem:[%s9854_s18 + $0x728] sm:$0xff] }
 0xb40   : > { %8464 = vst.msk [vmem:[%s13671_s4 + $0x6c0] sm:$0xff] %vm691_vm0, %v7952_v31 }
 0xb41   : > { %8463 = vst.msk [vmem:[%s13671_s4 + $0x6b8] sm:$0x3] %vm701_vm1, %v7951_v49 }
 0xb43   : > { %5984 = vperm.xlu2 %9066, %v14699_v56  }
 0xb44   : > { %9069 = vset.pattern.permute.xlu1 %v13394_v43 }
 0xb4b   : > { %9068 = vset.pattern.permute.xlu2 %v13301_v63 }
 0xb4c   : > { %6009 = vperm.xlu1 %9069, %v13596_v51  }
 0xb4d   : > { %v5910_v25 = vpop.permute.xlu2 %5909 }
 0xb4e   : > { %v7955_v10 = vmul.f32 %v9573_v3, %v5910_v25  ;;  %v5898_v1 = vpop.permute.xlu1 %5897  ;;  %v9582_v25 = vld [vmem:[%s9854_s18 + $0x718] sm:$0x3] }
 0xb4f   : > { %v7953_v6 = vmul.f32 %v9574_v13, %v5898_v1  ;;  %v9584_v13 = vld [vmem:[%s9854_s18 + $0x730] sm:$0xff] }
 0xb50   : > { %8467 = vst.msk [vmem:[%s13671_s4 + $0x6d8] sm:$0x3] %vm701_vm1, %v7955_v10 }
 0xb51   : > { %8465 = vst.msk [vmem:[%s13671_s4 + $0x6c8] sm:$0xff] %vm691_vm0, %v7953_v6 }
 0xb53   : > { %6003 = vperm.xlu2 %9068, %v13596_v51  }
 0xb54   : > { %9071 = vset.pattern.permute.xlu1 %v13292_v50 }
 0xb5b   : > { %9070 = vset.pattern.permute.xlu2 %v13281_v16 }
 0xb5c   : > { %6022 = vperm.xlu1 %9071, %v14132_v2  }
 0xb5d   : > { %v5923_v56 = vpop.permute.xlu2 %5922 }
 0xb5e   : > { %v7957_v18 = vmul.f32 %v9575_v8, %v5923_v56  ;;  %v5917_v38 = vpop.permute.xlu1 %5916  ;;  %v9585_v8 = vld [vmem:[%s9854_s18 + $0x750] sm:$0xff] }
 0xb5f   : > { %v7956_v58 = vmul.f32 %v9576_v11, %v5917_v38  ;;  %v9586_v11 = vld [vmem:[%s9854_s18 + $0x740] sm:$0xff] }
 0xb60   : > { %8469 = vst.msk [vmem:[%s13671_s4 + $0x6e8] sm:$0xff] %vm691_vm0, %v7957_v18 }
 0xb61   : > { %8468 = vst.msk [vmem:[%s13671_s4 + $0x6e0] sm:$0xff] %vm691_vm0, %v7956_v58 }
 0xb63   : > { %6016 = vperm.xlu2 %9070, %v14132_v2  }
 0xb64   : > { %9073 = vset.pattern.permute.xlu1 %v13281_v16 }
 0xb6b   : > { %9072 = vset.pattern.permute.xlu2 %v13394_v43 }
 0xb6c   : > { %6041 = vperm.xlu1 %9073, %v14417_v0  }
 0xb6d   : > { %v5942_v51 = vpop.permute.xlu2 %5941 }
 0xb6e   : > { %v7960_v20 = vmul.f32 %v9577_v48, %v5942_v51  ;;  %v5929_v23 = vpop.permute.xlu1 %5928  ;;  %v9587_v48 = vld [vmem:[%s9854_s18 + $0x760] sm:$0xff] }
 0xb6f   : > { %v7958_v35 = vmul.f32 %v9578_v22, %v5929_v23  ;;  %v9588_v22 = vld [vmem:[%s9854_s18 + $0x758] sm:$0x3] }
 0xb70   : > { %8472 = vst.msk [vmem:[%s13671_s4 + $0x700] sm:$0xff] %vm691_vm0, %v7960_v20 }
 0xb71   : > { %8470 = vst.msk [vmem:[%s13671_s4 + $0x6f0] sm:$0xff] %vm691_vm0, %v7958_v35 }
 0xb73   : > { %6034 = vperm.xlu2 %9072, %v14132_v2   ;;  %v6061_v2 = vperm.slane %v13567_v60, 5 }
 0xb74   : > { %9075 = vset.pattern.permute.xlu1 %v13301_v63 }
 0xb7b   : > { %9074 = vset.pattern.permute.xlu2 %v13292_v50 }
 0xb7c   : > { %6053 = vperm.xlu1 %9075, %v14417_v0  }
 0xb7d   : > { %v5954_v39 = vpop.permute.xlu2 %5953 }
 0xb7e   : > { %v7962_v61 = vmul.f32 %v9579_v19, %v5954_v39  ;;  %v5948_v29 = vpop.permute.xlu1 %5947  ;;  %v9589_v19 = vld [vmem:[%s9854_s18 + $0x778] sm:$0x3] }
 0xb7f   : > { %v7961_v36 = vmul.f32 %v9580_v52, %v5948_v29  ;;  %v9590_v52 = vld [vmem:[%s9854_s18 + $0x768] sm:$0xff] }
 0xb80   : > { %8474 = vst.msk [vmem:[%s13671_s4 + $0x710] sm:$0xff] %vm691_vm0, %v7962_v61 }
 0xb81   : > { %8473 = vst.msk [vmem:[%s13671_s4 + $0x708] sm:$0xff] %vm691_vm0, %v7961_v36 }
 0xb83   : > { %6047 = vperm.xlu2 %9074, %v14417_v0   ;;  %v9583_v0 = vld [vmem:[%s9854_s18 + $0x738] sm:$0x3] }
 0xb84   : > { %9077 = vset.pattern.permute.xlu1 %v13292_v50 }
 0xb8b   : > { %9076 = vset.pattern.permute.xlu2 %v13281_v16 }
 0xb8c   : > { %6072 = vperm.xlu1 %9077, %v6061_v2  }
 0xb8d   : > { %v5973_v31 = vpop.permute.xlu2 %5972 }
 0xb8e   : > { %v7965_v4 = vmul.f32 %v9581_v62, %v5973_v31  ;;  %v5960_v49 = vpop.permute.xlu1 %5959 }
 0xb8f   : > { %v7963_v3 = vmul.f32 %v9582_v25, %v5960_v49  ;;  %v9593_v25 = vld [vmem:[%s9854_s18 + $0x7a0] sm:$0xff] }
 0xb90   : > { %8477 = vst.msk [vmem:[%s13671_s4 + $0x728] sm:$0xff] %vm691_vm0, %v7965_v4  ;;  %v9592_v4 = vld [vmem:[%s9854_s18 + $0x780] sm:$0xff] }
 0xb91   : > { %8475 = vst.msk [vmem:[%s13671_s4 + $0x718] sm:$0x3] %vm701_vm1, %v7963_v3 }
 0xb93   : > { %6066 = vperm.xlu2 %9076, %v6061_v2  }
 0xb94   : > { %9079 = vset.pattern.permute.xlu1 %v13394_v43 }
 0xb9b   : > { %9078 = vset.pattern.permute.xlu2 %v13301_v63 }
 0xb9c   : > { %6084 = vperm.xlu1 %9079, %v6061_v2  }
 0xb9d   : > { %v5985_v60 = vpop.permute.xlu2 %5984 }
 0xb9e   : > { %v7967_v10 = vmul.f32 %v9583_v0, %v5985_v60  ;;  %v5979_v1 = vpop.permute.xlu1 %5978  ;;  %v9594_v0 = vld [vmem:[%s9854_s18 + $0x790] sm:$0xff] }
 0xb9f   : > { %v7966_v6 = vmul.f32 %v9584_v13, %v5979_v1  ;;  %v9595_v13 = vld [vmem:[%s9854_s18 + $0x7b0] sm:$0xff] }
 0xba0   : > { %8479 = vst.msk [vmem:[%s13671_s4 + $0x738] sm:$0x3] %vm701_vm1, %v7967_v10 }
 0xba1   : > { %8478 = vst.msk [vmem:[%s13671_s4 + $0x730] sm:$0xff] %vm691_vm0, %v7966_v6 }
 0xba3   : > { %6078 = vperm.xlu2 %9078, %v6061_v2   ;;  %v9591_v2 = vld [vmem:[%s9854_s18 + $0x788] sm:$0xff] }
 0xba4   : > { %9081 = vset.pattern.permute.xlu1 %v13301_v63 }
 0xbab   : > { %9080 = vset.pattern.permute.xlu2 %v13292_v50 }
 0xbac   : > { %6103 = vperm.xlu1 %9081, %v14708_v41  }
 0xbad   : > { %v6004_v56 = vpop.permute.xlu2 %6003 }
 0xbae   : > { %v7970_v18 = vmul.f32 %v9585_v8, %v6004_v56  ;;  %v5992_v38 = vpop.permute.xlu1 %5991  ;;  %v9596_v8 = vld [vmem:[%s9854_s18 + $0x7a8] sm:$0xff] }
 0xbaf   : > { %v7968_v58 = vmul.f32 %v9586_v11, %v5992_v38  ;;  %v9597_v11 = vld [vmem:[%s9854_s18 + $0x7c8] sm:$0xff] }
 0xbb0   : > { %8482 = vst.msk [vmem:[%s13671_s4 + $0x750] sm:$0xff] %vm691_vm0, %v7970_v18 }
 0xbb1   : > { %8480 = vst.msk [vmem:[%s13671_s4 + $0x740] sm:$0xff] %vm691_vm0, %v7968_v58 }
 0xbb3   : > { %6097 = vperm.xlu2 %9080, %v14708_v41  }
 0xbb4   : > { %9083 = vset.pattern.permute.xlu1 %v13281_v16 }
 0xbbb   : > { %9082 = vset.pattern.permute.xlu2 %v13394_v43 }
 0xbbc   : > { %6116 = vperm.xlu1 %9083, %v13707_v28  }
 0xbbd   : > { %v6017_v51 = vpop.permute.xlu2 %6016 }
 0xbbe   : > { %v7972_v20 = vmul.f32 %v9587_v48, %v6017_v51  ;;  %v6010_v23 = vpop.permute.xlu1 %6009  ;;  %v9598_v48 = vld [vmem:[%s9854_s18 + $0x7b8] sm:$0x3] }
 0xbbf   : > { %v7971_v35 = vmul.f32 %v9588_v22, %v6010_v23  ;;  %v9599_v23 = vld [vmem:[%s9854_s18 + $0x7d8] sm:$0x3] }
 0xbc0   : > { %8484 = vst.msk [vmem:[%s13671_s4 + $0x760] sm:$0xff] %vm691_vm0, %v7972_v20 }
 0xbc1   : > { %8483 = vst.msk [vmem:[%s13671_s4 + $0x758] sm:$0x3] %vm701_vm1, %v7971_v35 }
 0xbc3   : > { %6109 = vperm.xlu2 %9082, %v14708_v41  }
 0xbc4   : > { %9085 = vset.pattern.permute.xlu1 %v13394_v43 }
 0xbcb   : > { %9084 = vset.pattern.permute.xlu2 %v13301_v63 }
 0xbcc   : > { %6134 = vperm.xlu1 %9085, %v13707_v28  }
 0xbcd   : > { %v6035_v39 = vpop.permute.xlu2 %6034 }
 0xbce   : > { %v7975_v61 = vmul.f32 %v9589_v19, %v6035_v39  ;;  %v6023_v29 = vpop.permute.xlu1 %6022  ;;  %v9600_v39 = vld [vmem:[%s9854_s18 + $0x7d0] sm:$0xff] }
 0xbcf   : > { %v7973_v36 = vmul.f32 %v9590_v52, %v6023_v29  ;;  %v9601_v29 = vld [vmem:[%s9854_s18 + $0x7f0] sm:$0xff] }
 0xbd0   : > { %8487 = vst.msk [vmem:[%s13671_s4 + $0x778] sm:$0x3] %vm701_vm1, %v7975_v61 }
 0xbd1   : > { %8485 = vst.msk [vmem:[%s13671_s4 + $0x768] sm:$0xff] %vm691_vm0, %v7973_v36 }
 0xbd3   : > { %6128 = vperm.xlu2 %9084, %v13707_v28  }
 0xbd4   : > { %9087 = vset.pattern.permute.xlu1 %v13292_v50 }
 0xbdb   : > { %9086 = vset.pattern.permute.xlu2 %v13281_v16 }
 0xbdc   : > { %6147 = vperm.xlu1 %9087, %v14138_v59  }
 0xbdd   : > { %v6048_v41 = vpop.permute.xlu2 %6047 }
 0xbde   : > { %v7977_v31 = vmul.f32 %v9591_v2, %v6048_v41  ;;  %v6042_v62 = vpop.permute.xlu1 %6041  ;;  %v9602_v41 = vld [vmem:[%s9854_s18 + $0x7e0] sm:$0xff] }
 0xbdf   : > { %v7976_v49 = vmul.f32 %v9592_v4, %v6042_v62  ;;  %v9603_v62 = vld [vmem:[%s9854_s18 + $0x800] sm:$0xff] }
 0xbe0   : > { %8489 = vst.msk [vmem:[%s13671_s4 + $0x788] sm:$0xff] %vm691_vm0, %v7977_v31 }
 0xbe1   : > { %8488 = vst.msk [vmem:[%s13671_s4 + $0x780] sm:$0xff] %vm691_vm0, %v7976_v49 }
 0xbe3   : > { %6141 = vperm.xlu2 %9086, %v14138_v59  }
 0xbe4   : > { %9089 = vset.pattern.permute.xlu1 %v13281_v16 }
 0xbeb   : > { %9088 = vset.pattern.permute.xlu2 %v13394_v43 }
 0xbec   : > { %6166 = vperm.xlu1 %9089, %v14429_v32  }
 0xbed   : > { %v6067_v28 = vpop.permute.xlu2 %6066 }
 0xbee   : > { %v7980_v3 = vmul.f32 %v9593_v25, %v6067_v28  ;;  %v6054_v60 = vpop.permute.xlu1 %6053  ;;  %v9604_v28 = vld [vmem:[%s9854_s18 + $0x7f8] sm:$0x3] }
 0xbef   : > { %v7978_v10 = vmul.f32 %v9594_v0, %v6054_v60  ;;  %v9605_v60 = vld [vmem:[%s9854_s18 + $0x818] sm:$0x3] }
 0xbf0   : > { %8492 = vst.msk [vmem:[%s13671_s4 + $0x7a0] sm:$0xff] %vm691_vm0, %v7980_v3 }
 0xbf1   : > { %8490 = vst.msk [vmem:[%s13671_s4 + $0x790] sm:$0xff] %vm691_vm0, %v7978_v10 }
 0xbf3   : > { %6159 = vperm.xlu2 %9088, %v14138_v59   ;;  %v6186_v59 = vperm.slane %v13714_v27, 2 }
 0xbf4   : > { %9091 = vset.pattern.permute.xlu1 %v13301_v63 }
 0xbfb   : > { %9090 = vset.pattern.permute.xlu2 %v13292_v50 }
 0xbfc   : > { %6178 = vperm.xlu1 %9091, %v14429_v32  }
 0xbfd   : > { %v6079_v1 = vpop.permute.xlu2 %6078 }
 0xbfe   : > { %v7982_v6 = vmul.f32 %v9595_v13, %v6079_v1  ;;  %v6073_v56 = vpop.permute.xlu1 %6072  ;;  %v9606_v1 = vld [vmem:[%s9854_s18 + $0x808] sm:$0xff] }
 0xbff   : > { %v7981_v18 = vmul.f32 %v9596_v8, %v6073_v56 }
 0xc00   : > { %8494 = vst.msk [vmem:[%s13671_s4 + $0x7b0] sm:$0xff] %vm691_vm0, %v7982_v6  ;;  %v9607_v6 = vld [vmem:[%s9854_s18 + $0x828] sm:$0xff] }
 0xc01   : > { %8493 = vst.msk [vmem:[%s13671_s4 + $0x7a8] sm:$0xff] %vm691_vm0, %v7981_v18  ;;  %v9608_v18 = vld [vmem:[%s9854_s18 + $0x820] sm:$0xff] }
 0xc03   : > { %6172 = vperm.xlu2 %9090, %v14429_v32  }
 0xc04   : > { %9093 = vset.pattern.permute.xlu1 %v13292_v50 }
 0xc0b   : > { %9092 = vset.pattern.permute.xlu2 %v13281_v16 }
 0xc0c   : > { %6197 = vperm.xlu1 %9093, %v6186_v59  }
 0xc0d   : > { %v6098_v38 = vpop.permute.xlu2 %6097 }
 0xc0e   : > { %v7985_v58 = vmul.f32 %v9597_v11, %v6098_v38  ;;  %v6085_v51 = vpop.permute.xlu1 %6084  ;;  %v9609_v38 = vld [vmem:[%s9854_s18 + $0x840] sm:$0xff] }
 0xc0f   : > { %v7983_v20 = vmul.f32 %v9598_v48, %v6085_v51  ;;  %v9610_v51 = vld [vmem:[%s9854_s18 + $0x830] sm:$0xff] }
 0xc10   : > { %8497 = vst.msk [vmem:[%s13671_s4 + $0x7c8] sm:$0xff] %vm691_vm0, %v7985_v58 }
 0xc11   : > { %8495 = vst.msk [vmem:[%s13671_s4 + $0x7b8] sm:$0x3] %vm701_vm1, %v7983_v20 }
 0xc13   : > { %6191 = vperm.xlu2 %9092, %v6186_v59  }
 0xc14   : > { %9095 = vset.pattern.permute.xlu1 %v13394_v43 }
 0xc1b   : > { %9094 = vset.pattern.permute.xlu2 %v13301_v63 }
 0xc1c   : > { %6209 = vperm.xlu1 %9095, %v6186_v59  }
 0xc1d   : > { %v6110_v32 = vpop.permute.xlu2 %6109 }
 0xc1e   : > { %v7987_v22 = vmul.f32 %v9599_v23, %v6110_v32  ;;  %v6104_v35 = vpop.permute.xlu1 %6103  ;;  %v9611_v32 = vld [vmem:[%s9854_s18 + $0x850] sm:$0xff] }
 0xc1f   : > { %v7986_v19 = vmul.f32 %v9600_v39, %v6104_v35  ;;  %v9612_v35 = vld [vmem:[%s9854_s18 + $0x848] sm:$0xff] }
 0xc20   : > { %8499 = vst.msk [vmem:[%s13671_s4 + $0x7d8] sm:$0x3] %vm701_vm1, %v7987_v22 }
 0xc21   : > { %8498 = vst.msk [vmem:[%s13671_s4 + $0x7d0] sm:$0xff] %vm691_vm0, %v7986_v19 }
 0xc23   : > { %6203 = vperm.xlu2 %9094, %v6186_v59  }
 0xc24   : > { %9097 = vset.pattern.permute.xlu1 %v13301_v63 }
 0xc2b   : > { %9096 = vset.pattern.permute.xlu2 %v13292_v50 }
 0xc2c   : > { %6228 = vperm.xlu1 %9097, %v14723_v9  }
 0xc2d   : > { %v6129_v61 = vpop.permute.xlu2 %6128 }
 0xc2e   : > { %v7990_v52 = vmul.f32 %v9601_v29, %v6129_v61  ;;  %v6117_v36 = vpop.permute.xlu1 %6116  ;;  %v9613_v61 = vld [vmem:[%s9854_s18 + $0x868] sm:$0xff] }
 0xc2f   : > { %v7988_v2 = vmul.f32 %v9602_v41, %v6117_v36  ;;  %v9614_v36 = vld [vmem:[%s9854_s18 + $0x858] sm:$0x3] }
 0xc30   : > { %8502 = vst.msk [vmem:[%s13671_s4 + $0x7f0] sm:$0xff] %vm691_vm0, %v7990_v52 }
 0xc31   : > { %8500 = vst.msk [vmem:[%s13671_s4 + $0x7e0] sm:$0xff] %vm691_vm0, %v7988_v2 }
 0xc33   : > { %6222 = vperm.xlu2 %9096, %v14723_v9  }
 0xc34   : > { %9099 = vset.pattern.permute.xlu1 %v13281_v16 }
 0xc3b   : > { %9098 = vset.pattern.permute.xlu2 %v13394_v43 }
 0xc3c   : > { %6241 = vperm.xlu1 %9099, %v13719_v57  }
 0xc3d   : > { %v6142_v31 = vpop.permute.xlu2 %6141 }
 0xc3e   : > { %v7992_v4 = vmul.f32 %v9603_v62, %v6142_v31  ;;  %v6135_v49 = vpop.permute.xlu1 %6134  ;;  %v9616_v62 = vld [vmem:[%s9854_s18 + $0x870] sm:$0xff] }
 0xc3f   : > { %v7991_v25 = vmul.f32 %v9604_v28, %v6135_v49  ;;  %v9617_v28 = vld [vmem:[%s9854_s18 + $0x890] sm:$0xff] }
 0xc40   : > { %8504 = vst.msk [vmem:[%s13671_s4 + $0x800] sm:$0xff] %vm691_vm0, %v7992_v4 }
 0xc41   : > { %8503 = vst.msk [vmem:[%s13671_s4 + $0x7f8] sm:$0x3] %vm701_vm1, %v7991_v25 }
 0xc43   : > { %6234 = vperm.xlu2 %9098, %v14723_v9  }
 0xc44   : > { %9101 = vset.pattern.permute.xlu1 %v13394_v43 }
 0xc4b   : > { %9100 = vset.pattern.permute.xlu2 %v13301_v63 }
 0xc4c   : > { %6259 = vperm.xlu1 %9101, %v13719_v57  }
 0xc4d   : > { %v6160_v3 = vpop.permute.xlu2 %6159 }
 0xc4e   : > { %v7995_v0 = vmul.f32 %v9605_v60, %v6160_v3  ;;  %v6148_v10 = vpop.permute.xlu1 %6147  ;;  %v9618_v60 = vld [vmem:[%s9854_s18 + $0x880] sm:$0xff] }
 0xc4f   : > { %v7993_v13 = vmul.f32 %v9606_v1, %v6148_v10  ;;  %v9619_v1 = vld [vmem:[%s9854_s18 + $0x8a0] sm:$0xff] }
 0xc50   : > { %8507 = vst.msk [vmem:[%s13671_s4 + $0x818] sm:$0x3] %vm701_vm1, %v7995_v0 }
 0xc51   : > { %8505 = vst.msk [vmem:[%s13671_s4 + $0x808] sm:$0xff] %vm691_vm0, %v7993_v13 }
 0xc53   : > { %6253 = vperm.xlu2 %9100, %v13719_v57  }
 0xc54   : > { %9103 = vset.pattern.permute.xlu1 %v13292_v50 }
 0xc5b   : > { %9102 = vset.pattern.permute.xlu2 %v13281_v16 }
 0xc5c   : > { %6272 = vperm.xlu1 %9103, %v14153_v24  }
 0xc5d   : > { %v6173_v9 = vpop.permute.xlu2 %6172 }
 0xc5e   : > { %v7997_v56 = vmul.f32 %v9607_v6, %v6173_v9  ;;  %v6167_v8 = vpop.permute.xlu1 %6166  ;;  %v9620_v6 = vld [vmem:[%s9854_s18 + $0x898] sm:$0x3] }
 0xc5f   : > { %v7996_v59 = vmul.f32 %v9608_v18, %v6167_v8  ;;  %v9621_v18 = vld [vmem:[%s9854_s18 + $0x8b8] sm:$0x3] }
 0xc60   : > { %8509 = vst.msk [vmem:[%s13671_s4 + $0x828] sm:$0xff] %vm691_vm0, %v7997_v56 }
 0xc61   : > { %8508 = vst.msk [vmem:[%s13671_s4 + $0x820] sm:$0xff] %vm691_vm0, %v7996_v59 }
 0xc63   : > { %6266 = vperm.xlu2 %9102, %v14153_v24  }
 0xc64   : > { %9105 = vset.pattern.permute.xlu1 %v13281_v16 }
 0xc6b   : > { %9104 = vset.pattern.permute.xlu2 %v13394_v43 }
 0xc6c   : > { %6291 = vperm.xlu1 %9105, %v14444_v44  }
 0xc6d   : > { %v6192_v57 = vpop.permute.xlu2 %6191 }
 0xc6e   : > { %v8000_v11 = vmul.f32 %v9609_v38, %v6192_v57  ;;  %v6179_v58 = vpop.permute.xlu1 %6178  ;;  %v9622_v38 = vld [vmem:[%s9854_s18 + $0x8a8] sm:$0xff] }
 0xc6f   : > { %v7998_v48 = vmul.f32 %v9610_v51, %v6179_v58  ;;  %v9623_v58 = vld [vmem:[%s9854_s18 + $0x8c8] sm:$0xff] }
 0xc70   : > { %8512 = vst.msk [vmem:[%s13671_s4 + $0x840] sm:$0xff] %vm691_vm0, %v8000_v11 }
 0xc71   : > { %8510 = vst.msk [vmem:[%s13671_s4 + $0x830] sm:$0xff] %vm691_vm0, %v7998_v48 }
 0xc73   : > { %6284 = vperm.xlu2 %9104, %v14153_v24   ;;  %v6311_v24 = vperm.slane %v13714_v27, 7 }
 0xc74   : > { %9107 = vset.pattern.permute.xlu1 %v13301_v63 }
 0xc7b   : > { %9106 = vset.pattern.permute.xlu2 %v13292_v50 }
 0xc7c   : > { %6303 = vperm.xlu1 %9107, %v14444_v44  }
 0xc7d   : > { %v6204_v20 = vpop.permute.xlu2 %6203 }
 0xc7e   : > { %v8002_v23 = vmul.f32 %v9611_v32, %v6204_v20  ;;  %v6198_v22 = vpop.permute.xlu1 %6197  ;;  %v9624_v20 = vld [vmem:[%s9854_s18 + $0x8c0] sm:$0xff] }
 0xc7f   : > { %v8001_v39 = vmul.f32 %v9612_v35, %v6198_v22 }
 0xc80   : > { %8514 = vst.msk [vmem:[%s13671_s4 + $0x850] sm:$0xff] %vm691_vm0, %v8002_v23  ;;  %v9625_v23 = vld [vmem:[%s9854_s18 + $0x8e0] sm:$0xff] }
 0xc81   : > { %8513 = vst.msk [vmem:[%s13671_s4 + $0x848] sm:$0xff] %vm691_vm0, %v8001_v39  ;;  %v9626_v39 = vld [vmem:[%s9854_s18 + $0x8d0] sm:$0xff] }
 0xc83   : > { %6297 = vperm.xlu2 %9106, %v14444_v44   ;;  %v9615_v44 = vld [vmem:[%s9854_s18 + $0x878] sm:$0x3] }
 0xc84   : > { %9109 = vset.pattern.permute.xlu1 %v13292_v50 }
 0xc8b   : > { %9108 = vset.pattern.permute.xlu2 %v13281_v16 }
 0xc8c   : > { %6322 = vperm.xlu1 %9109, %v6311_v24  }
 0xc8d   : > { %v6223_v19 = vpop.permute.xlu2 %6222 }
 0xc8e   : > { %v8005_v29 = vmul.f32 %v9613_v61, %v6223_v19  ;;  %v6210_v52 = vpop.permute.xlu1 %6209  ;;  %v9627_v61 = vld [vmem:[%s9854_s18 + $0x8f0] sm:$0xff] }
 0xc8f   : > { %v8003_v41 = vmul.f32 %v9614_v36, %v6210_v52  ;;  %v9628_v36 = vld [vmem:[%s9854_s18 + $0x8e8] sm:$0xff] }
 0xc90   : > { %8517 = vst.msk [vmem:[%s13671_s4 + $0x868] sm:$0xff] %vm691_vm0, %v8005_v29 }
 0xc91   : > { %8515 = vst.msk [vmem:[%s13671_s4 + $0x858] sm:$0x3] %vm701_vm1, %v8003_v41 }
 0xc93   : > { %6316 = vperm.xlu2 %9108, %v6311_v24  }
 0xc94   : > { %9111 = vset.pattern.permute.xlu1 %v13394_v43 }
 0xc9b   : > { %9110 = vset.pattern.permute.xlu2 %v13301_v63 }
 0xc9c   : > { %6334 = vperm.xlu1 %9111, %v6311_v24  }
 0xc9d   : > { %v6235_v27 = vpop.permute.xlu2 %6234 }
 0xc9e   : > { %v8007_v2 = vmul.f32 %v9615_v44, %v6235_v27  ;;  %v6229_v31 = vpop.permute.xlu1 %6228  ;;  %v9629_v44 = vld [vmem:[%s9854_s18 + $0x908] sm:$0xff] }
 0xc9f   : > { %v8006_v4 = vmul.f32 %v9616_v62, %v6229_v31  ;;  %v9630_v62 = vld [vmem:[%s9854_s18 + $0x8f8] sm:$0x3] }
 0xca0   : > { %8519 = vst.msk [vmem:[%s13671_s4 + $0x878] sm:$0x3] %vm701_vm1, %v8007_v2 }
 0xca1   : > { %8518 = vst.msk [vmem:[%s13671_s4 + $0x870] sm:$0xff] %vm691_vm0, %v8006_v4 }
 0xca3   : > { %6328 = vperm.xlu2 %9110, %v6311_v24  }
 0xca4   : > { %9113 = vset.pattern.permute.xlu1 %v13301_v63 }
 0xcab   : > { %9112 = vset.pattern.permute.xlu2 %v13292_v50 }
 0xcac   : > { %6353 = vperm.xlu1 %9113, %v14730_v21  }
 0xcad   : > { %v6254_v49 = vpop.permute.xlu2 %6253 }
 0xcae   : > { %v8010_v25 = vmul.f32 %v9617_v28, %v6254_v49  ;;  %v6242_v3 = vpop.permute.xlu1 %6241 }
 0xcaf   : > { %v8008_v0 = vmul.f32 %v9618_v60, %v6242_v3 }
 0xcb0   : > { %8522 = vst.msk [vmem:[%s13671_s4 + $0x890] sm:$0xff] %vm691_vm0, %v8010_v25  ;;  %v9632_v25 = vld [vmem:[%s9854_s18 + $0x910] sm:$0xff] }
 0xcb1   : > { %8520 = vst.msk [vmem:[%s13671_s4 + $0x880] sm:$0xff] %vm691_vm0, %v8008_v0  ;;  %v9633_v0 = vld [vmem:[%s9854_s18 + $0x930] sm:$0xff] }
 0xcb3   : > { %6347 = vperm.xlu2 %9112, %v14730_v21  }
 0xcb4   : > { %9115 = vset.pattern.permute.xlu1 %v13281_v16 }
 0xcbb   : > { %9114 = vset.pattern.permute.xlu2 %v13394_v43 }
 0xcbc   : > { %6366 = vperm.xlu1 %9115, %v13734_v40  }
 0xcbd   : > { %v6267_v10 = vpop.permute.xlu2 %6266 }
 0xcbe   : > { %v8012_v13 = vmul.f32 %v9619_v1, %v6267_v10  ;;  %v6260_v9 = vpop.permute.xlu1 %6259 }
 0xcbf   : > { %v8011_v56 = vmul.f32 %v9620_v6, %v6260_v9 }
 0xcc0   : > { %8524 = vst.msk [vmem:[%s13671_s4 + $0x8a0] sm:$0xff] %vm691_vm0, %v8012_v13  ;;  %v9634_v13 = vld [vmem:[%s9854_s18 + $0x920] sm:$0xff] }
 0xcc1   : > { %8523 = vst.msk [vmem:[%s13671_s4 + $0x898] sm:$0x3] %vm701_vm1, %v8011_v56  ;;  %v9635_v56 = vld [vmem:[%s9854_s18 + $0x940] sm:$0xff] }
 0xcc3   : > { %6359 = vperm.xlu2 %9114, %v14730_v21  }
 0xcc4   : > { %9117 = vset.pattern.permute.xlu1 %v13394_v43 }
 0xccb   : > { %9116 = vset.pattern.permute.xlu2 %v13301_v63 }
 0xccc   : > { %6384 = vperm.xlu1 %9117, %v13734_v40  }
 0xccd   : > { %v6285_v8 = vpop.permute.xlu2 %6284 }
 0xcce   : > { %v8015_v59 = vmul.f32 %v9621_v18, %v6285_v8  ;;  %v6273_v57 = vpop.permute.xlu1 %6272 }
 0xccf   : > { %v8013_v11 = vmul.f32 %v9622_v38, %v6273_v57 }
 0xcd0   : > { %8527 = vst.msk [vmem:[%s13671_s4 + $0x8b8] sm:$0x3] %vm701_vm1, %v8015_v59  ;;  %v9636_v59 = vld [vmem:[%s9854_s18 + $0x938] sm:$0x3] }
 0xcd1   : > { %8525 = vst.msk [vmem:[%s13671_s4 + $0x8a8] sm:$0xff] %vm691_vm0, %v8013_v11  ;;  %v9637_v11 = vld [vmem:[%s9854_s18 + $0x958] sm:$0x3] }
 0xcd3   : > { %6378 = vperm.xlu2 %9116, %v13734_v40  }
 0xcd4   : > { %9119 = vset.pattern.permute.xlu1 %v13292_v50 }
 0xcdb   : > { %9118 = vset.pattern.permute.xlu2 %v13281_v16 }
 0xcdc   : > { %6397 = vperm.xlu1 %9119, %v14162_v34  }
 0xcdd   : > { %v6298_v21 = vpop.permute.xlu2 %6297 }
 0xcde   : > { %v8017_v51 = vmul.f32 %v9623_v58, %v6298_v21  ;;  %v6292_v48 = vpop.permute.xlu1 %6291 }
 0xcdf   : > { %v8016_v32 = vmul.f32 %v9624_v20, %v6292_v48 }
 0xce0   : > { %8529 = vst.msk [vmem:[%s13671_s4 + $0x8c8] sm:$0xff] %vm691_vm0, %v8017_v51  ;;  %v9638_v51 = vld [vmem:[%s9854_s18 + $0x948] sm:$0xff] }
 0xce1   : > { %8528 = vst.msk [vmem:[%s13671_s4 + $0x8c0] sm:$0xff] %vm691_vm0, %v8016_v32  ;;  %v9639_v32 = vld [vmem:[%s9854_s18 + $0x968] sm:$0xff] }
 0xce3   : > { %6391 = vperm.xlu2 %9118, %v14162_v34  }
 0xce4   : > { %9121 = vset.pattern.permute.xlu1 %v13281_v16 }
 0xceb   : > { %9120 = vset.pattern.permute.xlu2 %v13394_v43 }
 0xcec   : > { %6416 = vperm.xlu1 %9121, %v14450_v5  }
 0xced   : > { %v6317_v40 = vpop.permute.xlu2 %6316 }
 0xcee   : > { %v8020_v22 = vmul.f32 %v9625_v23, %v6317_v40  ;;  %v6304_v35 = vpop.permute.xlu1 %6303 }
 0xcef   : > { %v8018_v24 = vmul.f32 %v9626_v39, %v6304_v35 }
 0xcf0   : > { %8532 = vst.msk [vmem:[%s13671_s4 + $0x8e0] sm:$0xff] %vm691_vm0, %v8020_v22  ;;  %v9640_v22 = vld [vmem:[%s9854_s18 + $0x960] sm:$0xff] }
 0xcf1   : > { %8530 = vst.msk [vmem:[%s13671_s4 + $0x8d0] sm:$0xff] %vm691_vm0, %v8018_v24  ;;  %v9641_v24 = vld [vmem:[%s9854_s18 + $0x980] sm:$0xff] }
 0xcf3   : > { %6409 = vperm.xlu2 %9120, %v14162_v34   ;;  %v6436_v34 = vperm.slane %v13722_v55, 4 }
 0xcf4   : > { %9123 = vset.pattern.permute.xlu1 %v13301_v63 }
 0xcfb   : > { %9122 = vset.pattern.permute.xlu2 %v13292_v50 }
 0xcfc   : > { %6428 = vperm.xlu1 %9123, %v14450_v5  }
 0xcfd   : > { %v6329_v19 = vpop.permute.xlu2 %6328 }
 0xcfe   : > { %v8022_v29 = vmul.f32 %v9627_v61, %v6329_v19  ;;  %v6323_v52 = vpop.permute.xlu1 %6322 }
 0xcff   : > { %v8021_v41 = vmul.f32 %v9628_v36, %v6323_v52 }
 0xd00   : > { %8534 = vst.msk [vmem:[%s13671_s4 + $0x8f0] sm:$0xff] %vm691_vm0, %v8022_v29  ;;  %v9642_v29 = vld [vmem:[%s9854_s18 + $0x970] sm:$0xff] }
 0xd01   : > { %8533 = vst.msk [vmem:[%s13671_s4 + $0x8e8] sm:$0xff] %vm691_vm0, %v8021_v41  ;;  %v9643_v41 = vld [vmem:[%s9854_s18 + $0x990] sm:$0xff] }
 0xd03   : > { %6422 = vperm.xlu2 %9122, %v14450_v5   ;;  %v9631_v5 = vld [vmem:[%s9854_s18 + $0x918] sm:$0x3] }
 0xd04   : > { %9125 = vset.pattern.permute.xlu1 %v13292_v50 }
 0xd0b   : > { %9124 = vset.pattern.permute.xlu2 %v13281_v16 }
 0xd0c   : > { %6447 = vperm.xlu1 %9125, %v6436_v34  }
 0xd0d   : > { %v6348_v27 = vpop.permute.xlu2 %6347 }
 0xd0e   : > { %v8025_v2 = vmul.f32 %v9629_v44, %v6348_v27  ;;  %v6335_v31 = vpop.permute.xlu1 %6334  ;;  %v9644_v44 = vld [vmem:[%s9854_s18 + $0x988] sm:$0xff] }
 0xd0f   : > { %v8023_v4 = vmul.f32 %v9630_v62, %v6335_v31  ;;  %v6561_v31 = vperm.slane %v13751_v14, 1 }
 0xd10   : > { %8537 = vst.msk [vmem:[%s13671_s4 + $0x908] sm:$0xff] %vm691_vm0, %v8025_v2 }
 0xd11   : > { %8535 = vst.msk [vmem:[%s13671_s4 + $0x8f8] sm:$0x3] %vm701_vm1, %v8023_v4  ;;  %v9645_v4 = vld [vmem:[%s9854_s18 + $0x9a8] sm:$0xff] }
 0xd13   : > { %6441 = vperm.xlu2 %9124, %v6436_v34  }
 0xd14   : > { %9127 = vset.pattern.permute.xlu1 %v13394_v43 }
 0xd1b   : > { %9126 = vset.pattern.permute.xlu2 %v13301_v63 }
 0xd1c   : > { %6459 = vperm.xlu1 %9127, %v6436_v34  }
 0xd1d   : > { %v6360_v55 = vpop.permute.xlu2 %6359 }
 0xd1e   : > { %v8027_v49 = vmul.f32 %v9631_v5, %v6360_v55  ;;  %v6354_v28 = vpop.permute.xlu1 %6353 }
 0xd1f   : > { %v8026_v3 = vmul.f32 %v9632_v25, %v6354_v28 }
 0xd20   : > { %8539 = vst.msk [vmem:[%s13671_s4 + $0x918] sm:$0x3] %vm701_vm1, %v8027_v49  ;;  %v9646_v49 = vld [vmem:[%s9854_s18 + $0x998] sm:$0x3] }
 0xd21   : > { %8538 = vst.msk [vmem:[%s13671_s4 + $0x910] sm:$0xff] %vm691_vm0, %v8026_v3  ;;  %v9647_v3 = vld [vmem:[%s9854_s18 + $0x9b8] sm:$0x3] }
 0xd23   : > { %6453 = vperm.xlu2 %9126, %v6436_v34  }
 0xd24   : > { %9129 = vset.pattern.permute.xlu1 %v13301_v63 }
 0xd2b   : > { %9128 = vset.pattern.permute.xlu2 %v13292_v50 }
 0xd2c   : > { %6478 = vperm.xlu1 %9129, %v14743_v33  }
 0xd2d   : > { %v6379_v60 = vpop.permute.xlu2 %6378 }
 0xd2e   : > { %v8030_v10 = vmul.f32 %v9633_v0, %v6379_v60  ;;  %v6367_v1 = vpop.permute.xlu1 %6366 }
 0xd2f   : > { %v8028_v9 = vmul.f32 %v9634_v13, %v6367_v1 }
 0xd30   : > { %8542 = vst.msk [vmem:[%s13671_s4 + $0x930] sm:$0xff] %vm691_vm0, %v8030_v10  ;;  %v9648_v10 = vld [vmem:[%s9854_s18 + $0x9b0] sm:$0xff] }
 0xd31   : > { %8540 = vst.msk [vmem:[%s13671_s4 + $0x920] sm:$0xff] %vm691_vm0, %v8028_v9  ;;  %v9649_v9 = vld [vmem:[%s9854_s18 + $0x9d0] sm:$0xff] }
 0xd33   : > { %6472 = vperm.xlu2 %9128, %v14743_v33  }
 0xd34   : > { %9131 = vset.pattern.permute.xlu1 %v13281_v16 }
 0xd3b   : > { %9130 = vset.pattern.permute.xlu2 %v13394_v43 }
 0xd3c   : > { %6491 = vperm.xlu1 %9131, %v13748_v26  }
 0xd3d   : > { %v6392_v6 = vpop.permute.xlu2 %6391 }
 0xd3e   : > { %v8032_v8 = vmul.f32 %v9635_v56, %v6392_v6  ;;  %v6385_v18 = vpop.permute.xlu1 %6384 }
 0xd3f   : > { %v8031_v57 = vmul.f32 %v9636_v59, %v6385_v18  ;;  %v16415_v59 = vld [vmem:[#allocation2_spill] sm:$0xff] }
 0xd40   : > { %8544 = vst.msk [vmem:[%s13671_s4 + $0x940] sm:$0xff] %vm691_vm0, %v8032_v8  ;;  %v9650_v8 = vld [vmem:[%s9854_s18 + $0x9c0] sm:$0xff] }
 0xd41   : > { %8543 = vst.msk [vmem:[%s13671_s4 + $0x938] sm:$0x3] %vm701_vm1, %v8031_v57 }
 0xd43   : > { %6484 = vperm.xlu2 %9130, %v14743_v33   ;;  %v16413_v33 = vld [vmem:[#allocation11_spill] sm:$0xff] }
 0xd44   : > { %9133 = vset.pattern.permute.xlu1 %v13394_v43 }
 0xd4b   : > { %9132 = vset.pattern.permute.xlu2 %v13301_v63 }
 0xd4c   : > { %6509 = vperm.xlu1 %9133, %v13748_v26  }
 0xd4d   : > { %v6410_v38 = vpop.permute.xlu2 %6409 }
 0xd4e   : > { %v8035_v21 = vmul.f32 %v9637_v11, %v6410_v38  ;;  %v6398_v58 = vpop.permute.xlu1 %6397  ;;  %v9651_v38 = vld [vmem:[%s9854_s18 + $0x9e0] sm:$0xff] }
 0xd4f   : > { %v8033_v48 = vmul.f32 %v9638_v51, %v6398_v58  ;;  %v9652_v58 = vld [vmem:[%s9854_s18 + $0x9d8] sm:$0x3] }
 0xd50   : > { %8547 = vst.msk [vmem:[%s13671_s4 + $0x958] sm:$0x3] %vm701_vm1, %v8035_v21 }
 0xd51   : > { %8545 = vst.msk [vmem:[%s13671_s4 + $0x948] sm:$0xff] %vm691_vm0, %v8033_v48 }
 0xd53   : > { %6503 = vperm.xlu2 %9132, %v13748_v26   ;;  %v16414_v26 = vld [vmem:[#allocation21_spill] sm:$0xff] }
 0xd54   : > { %9135 = vset.pattern.permute.xlu1 %v13292_v50 }
 0xd5b   : > { %9134 = vset.pattern.permute.xlu2 %v13281_v16 }
 0xd5c   : > { %6522 = vperm.xlu1 %9135, %v16413_v33  }
 0xd5d   : > { %v6423_v20 = vpop.permute.xlu2 %6422 }
 0xd5e   : > { %v8037_v40 = vmul.f32 %v9639_v32, %v6423_v20  ;;  %v6417_v23 = vpop.permute.xlu1 %6416 }
 0xd5f   : > { %v8036_v35 = vmul.f32 %v9640_v22, %v6417_v23 }
 0xd60   : > { %8549 = vst.msk [vmem:[%s13671_s4 + $0x968] sm:$0xff] %vm691_vm0, %v8037_v40  ;;  %v9654_v40 = vld [vmem:[%s9854_s18 + $0x9e8] sm:$0xff] }
 0xd61   : > { %8548 = vst.msk [vmem:[%s13671_s4 + $0x960] sm:$0xff] %vm691_vm0, %v8036_v35  ;;  %v9655_v35 = vld [vmem:[%s9854_s18 + $0xa08] sm:$0xff] }
 0xd63   : > { %6516 = vperm.xlu2 %9134, %v16413_v33  }
 0xd64   : > { %9137 = vset.pattern.permute.xlu1 %v13281_v16 }
 0xd6b   : > { %9136 = vset.pattern.permute.xlu2 %v13394_v43 }
 0xd6c   : > { %6541 = vperm.xlu1 %9137, %v16414_v26  }
 0xd6d   : > { %v6442_v39 = vpop.permute.xlu2 %6441 }
 0xd6e   : > { %v8040_v19 = vmul.f32 %v9641_v24, %v6442_v39  ;;  %v6429_v61 = vpop.permute.xlu1 %6428  ;;  %v9656_v24 = vld [vmem:[%s9854_s18 + $0xa00] sm:$0xff] }
 0xd6f   : > { %v8038_v52 = vmul.f32 %v9642_v29, %v6429_v61  ;;  %v16417_v61 = vld [vmem:[#allocation22_spill] sm:$0xff] }
 0xd70   : > { %8552 = vst.msk [vmem:[%s13671_s4 + $0x980] sm:$0xff] %vm691_vm0, %v8040_v19 }
 0xd71   : > { %8550 = vst.msk [vmem:[%s13671_s4 + $0x970] sm:$0xff] %vm691_vm0, %v8038_v52  ;;  %v9657_v52 = vld [vmem:[%s9854_s18 + $0xa20] sm:$0xff] }
 0xd73   : > { %6534 = vperm.xlu2 %9136, %v16413_v33   ;;  %v9653_v33 = vld [vmem:[%s9854_s18 + $0x9f8] sm:$0x3] }
 0xd74   : > { %9139 = vset.pattern.permute.xlu1 %v13301_v63 }
 0xd7b   : > { %9138 = vset.pattern.permute.xlu2 %v13292_v50 }
 0xd7c   : > { %6553 = vperm.xlu1 %9139, %v16414_v26  }
 0xd7d   : > { %v6454_v36 = vpop.permute.xlu2 %6453 }
 0xd7e   : > { %v8042_v34 = vmul.f32 %v9643_v41, %v6454_v36  ;;  %v6448_v27 = vpop.permute.xlu1 %6447 }
 0xd7f   : > { %v8041_v2 = vmul.f32 %v9644_v44, %v6448_v27 }
 0xd80   : > { %8554 = vst.msk [vmem:[%s13671_s4 + $0x990] sm:$0xff] %vm691_vm0, %v8042_v34  ;;  %v9658_v34 = vld [vmem:[%s9854_s18 + $0xa10] sm:$0xff] }
 0xd81   : > { %8553 = vst.msk [vmem:[%s13671_s4 + $0x988] sm:$0xff] %vm691_vm0, %v8041_v2  ;;  %v9659_v2 = vld [vmem:[%s9854_s18 + $0xa30] sm:$0xff] }
 0xd83   : > { %6547 = vperm.xlu2 %9138, %v16414_v26  }
 0xd84   : > { %9141 = vset.pattern.permute.xlu1 %v13292_v50 }
 0xd8b   : > { %9140 = vset.pattern.permute.xlu2 %v13281_v16 }
 0xd8c   : > { %6572 = vperm.xlu1 %9141, %v6561_v31  }
 0xd8d   : > { %v6473_v62 = vpop.permute.xlu2 %6472 }
 0xd8e   : > { %v8045_v55 = vmul.f32 %v9645_v4, %v6473_v62  ;;  %v6460_v5 = vpop.permute.xlu1 %6459  ;;  %v9660_v4 = vld [vmem:[%s9854_s18 + $0xa28] sm:$0xff] }
 0xd8f   : > { %v8043_v28 = vmul.f32 %v9646_v49, %v6460_v5  ;;  %v6686_v5 = vperm.slane %v13751_v14, 6 }
 0xd90   : > { %8557 = vst.msk [vmem:[%s13671_s4 + $0x9a8] sm:$0xff] %vm691_vm0, %v8045_v55 }
 0xd91   : > { %8555 = vst.msk [vmem:[%s13671_s4 + $0x998] sm:$0x3] %vm701_vm1, %v8043_v28  ;;  %v9661_v28 = vld [vmem:[%s9854_s18 + $0xa48] sm:$0xff] }
 0xd93   : > { %6566 = vperm.xlu2 %9140, %v6561_v31  }
 0xd94   : > { %9143 = vset.pattern.permute.xlu1 %v13394_v43 }
 0xd9b   : > { %9142 = vset.pattern.permute.xlu2 %v13301_v63 }
 0xd9c   : > { %6584 = vperm.xlu1 %9143, %v6561_v31  }
 0xd9d   : > { %v6485_v25 = vpop.permute.xlu2 %6484 }
 0xd9e   : > { %v8047_v60 = vmul.f32 %v9647_v3, %v6485_v25  ;;  %v6479_v0 = vpop.permute.xlu1 %6478 }
 0xd9f   : > { %v8046_v1 = vmul.f32 %v9648_v10, %v6479_v0  ;;  %v9663_v10 = vld [vmem:[%s9854_s18 + $0xa58] sm:$0x3] }
 0xda0   : > { %8559 = vst.msk [vmem:[%s13671_s4 + $0x9b8] sm:$0x3] %vm701_vm1, %v8047_v60  ;;  %v9662_v60 = vld [vmem:[%s9854_s18 + $0xa38] sm:$0x3] }
 0xda1   : > { %8558 = vst.msk [vmem:[%s13671_s4 + $0x9b0] sm:$0xff] %vm691_vm0, %v8046_v1 }
 0xda3   : > { %6578 = vperm.xlu2 %9142, %v6561_v31  }
 0xda4   : > { %9145 = vset.pattern.permute.xlu1 %v13301_v63 }
 0xdab   : > { %9144 = vset.pattern.permute.xlu2 %v13292_v50 }
 0xdac   : > { %6603 = vperm.xlu1 %9145, %v14752_v45  }
 0xdad   : > { %v6504_v13 = vpop.permute.xlu2 %6503 }
 0xdae   : > { %v8050_v6 = vmul.f32 %v9649_v9, %v6504_v13  ;;  %v6492_v56 = vpop.permute.xlu1 %6491  ;;  %v9664_v9 = vld [vmem:[%s9854_s18 + $0xa50] sm:$0xff] }
 0xdaf   : > { %v8048_v18 = vmul.f32 %v9650_v8, %v6492_v56  ;;  %v9665_v8 = vld [vmem:[%s9854_s18 + $0xa70] sm:$0xff] }
 0xdb0   : > { %8562 = vst.msk [vmem:[%s13671_s4 + $0x9d0] sm:$0xff] %vm691_vm0, %v8050_v6 }
 0xdb1   : > { %8560 = vst.msk [vmem:[%s13671_s4 + $0x9c0] sm:$0xff] %vm691_vm0, %v8048_v18 }
 0xdb3   : > { %6597 = vperm.xlu2 %9144, %v14752_v45  }
 0xdb4   : > { %9147 = vset.pattern.permute.xlu1 %v13281_v16 }
 0xdbb   : > { %9146 = vset.pattern.permute.xlu2 %v13394_v43 }
 0xdbc   : > { %6616 = vperm.xlu1 %9147, %v16415_v59  }
 0xdbd   : > { %v6517_v57 = vpop.permute.xlu2 %6516 }
 0xdbe   : > { %v8052_v11 = vmul.f32 %v9651_v38, %v6517_v57  ;;  %v6510_v21 = vpop.permute.xlu1 %6509  ;;  %v9666_v57 = vld [vmem:[%s9854_s18 + $0xa60] sm:$0xff] }
 0xdbf   : > { %v8051_v51 = vmul.f32 %v9652_v58, %v6510_v21  ;;  %v9667_v58 = vld [vmem:[%s9854_s18 + $0xa80] sm:$0xff] }
 0xdc0   : > { %8564 = vst.msk [vmem:[%s13671_s4 + $0x9e0] sm:$0xff] %vm691_vm0, %v8052_v11  ;;  %v16418_v11 = vld [vmem:[#allocation3_spill] sm:$0xff] }
 0xdc1   : > { %8563 = vst.msk [vmem:[%s13671_s4 + $0x9d8] sm:$0x3] %vm701_vm1, %v8051_v51 }
 0xdc3   : > { %6609 = vperm.xlu2 %9146, %v14752_v45   ;;  %v16416_v45 = vld [vmem:[#allocation12_spill] sm:$0xff] }
 0xdc4   : > { %9149 = vset.pattern.permute.xlu1 %v13394_v43 }
 0xdcb   : > { %9148 = vset.pattern.permute.xlu2 %v13301_v63 }
 0xdcc   : > { %6634 = vperm.xlu1 %9149, %v16415_v59  }
 0xdcd   : > { %v6535_v48 = vpop.permute.xlu2 %6534 }
 0xdce   : > { %v8055_v20 = vmul.f32 %v9653_v33, %v6535_v48  ;;  %v6523_v32 = vpop.permute.xlu1 %6522  ;;  %v9668_v33 = vld [vmem:[%s9854_s18 + $0xa78] sm:$0x3] }
 0xdcf   : > { %v8053_v23 = vmul.f32 %v9654_v40, %v6523_v32  ;;  %v9669_v40 = vld [vmem:[%s9854_s18 + $0xa98] sm:$0x3] }
 0xdd0   : > { %8567 = vst.msk [vmem:[%s13671_s4 + $0x9f8] sm:$0x3] %vm701_vm1, %v8055_v20 }
 0xdd1   : > { %8565 = vst.msk [vmem:[%s13671_s4 + $0x9e8] sm:$0xff] %vm691_vm0, %v8053_v23 }
 0xdd3   : > { %6628 = vperm.xlu2 %9148, %v16415_v59  }
 0xdd4   : > { %9151 = vset.pattern.permute.xlu1 %v13292_v50 }
 0xddb   : > { %9150 = vset.pattern.permute.xlu2 %v13281_v16 }
 0xddc   : > { %6647 = vperm.xlu1 %9151, %v16416_v45  }
 0xddd   : > { %v6548_v22 = vpop.permute.xlu2 %6547 }
 0xdde   : > { %v8057_v26 = vmul.f32 %v9655_v35, %v6548_v22  ;;  %v6542_v39 = vpop.permute.xlu1 %6541  ;;  %v9670_v22 = vld [vmem:[%s9854_s18 + $0xa88] sm:$0xff] }
 0xddf   : > { %v8056_v19 = vmul.f32 %v9656_v24, %v6542_v39  ;;  %v9671_v39 = vld [vmem:[%s9854_s18 + $0xaa8] sm:$0xff] }
 0xde0   : > { %8569 = vst.msk [vmem:[%s13671_s4 + $0xa08] sm:$0xff] %vm691_vm0, %v8057_v26 }
 0xde1   : > { %8568 = vst.msk [vmem:[%s13671_s4 + $0xa00] sm:$0xff] %vm691_vm0, %v8056_v19 }
 0xde3   : > { %6641 = vperm.xlu2 %9150, %v16416_v45  }
 0xde4   : > { %9153 = vset.pattern.permute.xlu1 %v13281_v16 }
 0xdeb   : > { %9152 = vset.pattern.permute.xlu2 %v13394_v43 }
 0xdec   : > { %6666 = vperm.xlu1 %9153, %v16417_v61  }
 0xded   : > { %v6567_v29 = vpop.permute.xlu2 %6566 }
 0xdee   : > { %v8060_v36 = vmul.f32 %v9657_v52, %v6567_v29  ;;  %v6554_v41 = vpop.permute.xlu1 %6553 }
 0xdef   : > { %v8058_v27 = vmul.f32 %v9658_v34, %v6554_v41 }
 0xdf0   : > { %8572 = vst.msk [vmem:[%s13671_s4 + $0xa20] sm:$0xff] %vm691_vm0, %v8060_v36  ;;  %v9673_v36 = vld [vmem:[%s9854_s18 + $0xac0] sm:$0xff] }
 0xdf1   : > { %8570 = vst.msk [vmem:[%s13671_s4 + $0xa10] sm:$0xff] %vm691_vm0, %v8058_v27  ;;  %v9674_v27 = vld [vmem:[%s9854_s18 + $0xab0] sm:$0xff] }
 0xdf3   : > { %6659 = vperm.xlu2 %9152, %v16416_v45  }
 0xdf4   : > { %9155 = vset.pattern.permute.xlu1 %v13301_v63 }
 0xdfb   : > { %9154 = vset.pattern.permute.xlu2 %v13292_v50 }
 0xdfc   : > { %6678 = vperm.xlu1 %9155, %v16417_v61  }
 0xdfd   : > { %v6579_v44 = vpop.permute.xlu2 %6578 }
 0xdfe   : > { %v8062_v31 = vmul.f32 %v9659_v2, %v6579_v44  ;;  %v6573_v62 = vpop.permute.xlu1 %6572 }
 0xdff   : > { %v8061_v55 = vmul.f32 %v9660_v4, %v6573_v62 }
 0xe00   : > { %8574 = vst.msk [vmem:[%s13671_s4 + $0xa30] sm:$0xff] %vm691_vm0, %v8062_v31  ;;  %v9675_v31 = vld [vmem:[%s9854_s18 + $0xad0] sm:$0xff] }
 0xe01   : > { %8573 = vst.msk [vmem:[%s13671_s4 + $0xa28] sm:$0xff] %vm691_vm0, %v8061_v55  ;;  %v9676_v55 = vld [vmem:[%s9854_s18 + $0xac8] sm:$0xff] }
 0xe03   : > { %6672 = vperm.xlu2 %9154, %v16417_v61   ;;  %v9672_v61 = vld [vmem:[%s9854_s18 + $0xaa0] sm:$0xff] }
 0xe04   : > { %9157 = vset.pattern.permute.xlu1 %v13292_v50 }
 0xe0b   : > { %9156 = vset.pattern.permute.xlu2 %v13281_v16 }
 0xe0c   : > { %6697 = vperm.xlu1 %9157, %v6686_v5  }
 0xe0d   : > { %v6598_v49 = vpop.permute.xlu2 %6597 }
 0xe0e   : > { %v8065_v25 = vmul.f32 %v9661_v28, %v6598_v49  ;;  %v6585_v3 = vpop.permute.xlu1 %6584  ;;  %v6811_v49 = vperm.slane %v13768_v17, 3 }
 0xe0f   : > { %v8063_v0 = vmul.f32 %v9662_v60, %v6585_v3 }
 0xe10   : > { %8577 = vst.msk [vmem:[%s13671_s4 + $0xa48] sm:$0xff] %vm691_vm0, %v8065_v25  ;;  %v9677_v25 = vld [vmem:[%s9854_s18 + $0xae8] sm:$0xff] }
 0xe11   : > { %8575 = vst.msk [vmem:[%s13671_s4 + $0xa38] sm:$0x3] %vm701_vm1, %v8063_v0  ;;  %v9678_v0 = vld [vmem:[%s9854_s18 + $0xad8] sm:$0x3] }
 0xe13   : > { %6691 = vperm.xlu2 %9156, %v6686_v5  }
 0xe14   : > { %9159 = vset.pattern.permute.xlu1 %v13394_v43 }
 0xe1b   : > { %9158 = vset.pattern.permute.xlu2 %v13301_v63 }
 0xe1c   : > { %6709 = vperm.xlu1 %9159, %v6686_v5  }
 0xe1d   : > { %v6610_v14 = vpop.permute.xlu2 %6609 }
 0xe1e   : > { %v8067_v1 = vmul.f32 %v9663_v10, %v6610_v14  ;;  %v6604_v13 = vpop.permute.xlu1 %6603 }
 0xe1f   : > { %v8066_v6 = vmul.f32 %v9664_v9, %v6604_v13  ;;  %v9680_v13 = vld [vmem:[%s9854_s18 + $0xaf0] sm:$0xff] }
 0xe20   : > { %8579 = vst.msk [vmem:[%s13671_s4 + $0xa58] sm:$0x3] %vm701_vm1, %v8067_v1 }
 0xe21   : > { %8578 = vst.msk [vmem:[%s13671_s4 + $0xa50] sm:$0xff] %vm691_vm0, %v8066_v6 }
 0xe23   : > { %6703 = vperm.xlu2 %9158, %v6686_v5  }
 0xe24   : > { %9161 = vset.pattern.permute.xlu1 %v13301_v63 }
 0xe2b   : > { %9160 = vset.pattern.permute.xlu2 %v13292_v50 }
 0xe2c   : > { %6728 = vperm.xlu1 %9161, %v14765_v37  }
 0xe2d   : > { %v6629_v56 = vpop.permute.xlu2 %6628 }
 0xe2e   : > { %v8070_v18 = vmul.f32 %v9665_v8, %v6629_v56  ;;  %v6617_v59 = vpop.permute.xlu1 %6616  ;;  %v9681_v56 = vld [vmem:[%s9854_s18 + $0xb10] sm:$0xff] }
 0xe2f   : > { %v8068_v38 = vmul.f32 %v9666_v57, %v6617_v59  ;;  %v9682_v59 = vld [vmem:[%s9854_s18 + $0xb00] sm:$0xff] }
 0xe30   : > { %8582 = vst.msk [vmem:[%s13671_s4 + $0xa70] sm:$0xff] %vm691_vm0, %v8070_v18 }
 0xe31   : > { %8580 = vst.msk [vmem:[%s13671_s4 + $0xa60] sm:$0xff] %vm691_vm0, %v8068_v38  ;;  %v16420_v38 = vld [vmem:[#allocation4_spill] sm:$0xff] }
 0xe33   : > { %6722 = vperm.xlu2 %9160, %v14765_v37  }
 0xe34   : > { %9163 = vset.pattern.permute.xlu1 %v13281_v16 }
 0xe3b   : > { %9162 = vset.pattern.permute.xlu2 %v13394_v43 }
 0xe3c   : > { %6741 = vperm.xlu1 %9163, %v16418_v11  }
 0xe3d   : > { %v6642_v21 = vpop.permute.xlu2 %6641 }
 0xe3e   : > { %v8072_v51 = vmul.f32 %v9667_v58, %v6642_v21  ;;  %v6635_v48 = vpop.permute.xlu1 %6634  ;;  %v9683_v21 = vld [vmem:[%s9854_s18 + $0xb20] sm:$0xff] }
 0xe3f   : > { %v8071_v20 = vmul.f32 %v9668_v33, %v6635_v48  ;;  %v9684_v48 = vld [vmem:[%s9854_s18 + $0xb18] sm:$0x3] }
 0xe40   : > { %8584 = vst.msk [vmem:[%s13671_s4 + $0xa80] sm:$0xff] %vm691_vm0, %v8072_v51 }
 0xe41   : > { %8583 = vst.msk [vmem:[%s13671_s4 + $0xa78] sm:$0x3] %vm701_vm1, %v8071_v20 }
 0xe43   : > { %6734 = vperm.xlu2 %9162, %v14765_v37   ;;  %v16419_v37 = vld [vmem:[#allocation13_spill] sm:$0xff] }
 0xe44   : > { %9165 = vset.pattern.permute.xlu1 %v13394_v43 }
 0xe4b   : > { %9164 = vset.pattern.permute.xlu2 %v13301_v63 }
 0xe4c   : > { %6759 = vperm.xlu1 %9165, %v16418_v11  }
 0xe4d   : > { %v6660_v32 = vpop.permute.xlu2 %6659 }
 0xe4e   : > { %v8075_v23 = vmul.f32 %v9669_v40, %v6660_v32  ;;  %v6648_v45 = vpop.permute.xlu1 %6647  ;;  %v9685_v32 = vld [vmem:[%s9854_s18 + $0xb38] sm:$0x3] }
 0xe4f   : > { %v8073_v35 = vmul.f32 %v9670_v22, %v6648_v45  ;;  %v9686_v45 = vld [vmem:[%s9854_s18 + $0xb28] sm:$0xff] }
 0xe50   : > { %8587 = vst.msk [vmem:[%s13671_s4 + $0xa98] sm:$0x3] %vm701_vm1, %v8075_v23 }
 0xe51   : > { %8585 = vst.msk [vmem:[%s13671_s4 + $0xa88] sm:$0xff] %vm691_vm0, %v8073_v35 }
 0xe53   : > { %6753 = vperm.xlu2 %9164, %v16418_v11  }
 0xe54   : > { %9167 = vset.pattern.permute.xlu1 %v13292_v50 }
 0xe5b   : > { %9166 = vset.pattern.permute.xlu2 %v13281_v16 }
 0xe5c   : > { %6772 = vperm.xlu1 %9167, %v16419_v37  }
 0xe5d   : > { %v6673_v26 = vpop.permute.xlu2 %6672 }
 0xe5e   : > { %v8077_v24 = vmul.f32 %v9671_v39, %v6673_v26  ;;  %v6667_v19 = vpop.permute.xlu1 %6666 }
 0xe5f   : > { %v8076_v29 = vmul.f32 %v9672_v61, %v6667_v19  ;;  %v16422_v61 = vld [vmem:[#allocation23_spill] sm:$0xff] }
 0xe60   : > { %8589 = vst.msk [vmem:[%s13671_s4 + $0xaa8] sm:$0xff] %vm691_vm0, %v8077_v24  ;;  %v9688_v24 = vld [vmem:[%s9854_s18 + $0xb40] sm:$0xff] }
 0xe61   : > { %8588 = vst.msk [vmem:[%s13671_s4 + $0xaa0] sm:$0xff] %vm691_vm0, %v8076_v29 }
 0xe63   : > { %6766 = vperm.xlu2 %9166, %v16419_v37  }
 0xe64   : > { %9169 = vset.pattern.permute.xlu1 %v13281_v16 }
 0xe6b   : > { %9168 = vset.pattern.permute.xlu2 %v13394_v43 }
 0xe6c   : > { %6791 = vperm.xlu1 %9169, %v14489_v46  }
 0xe6d   : > { %v6692_v52 = vpop.permute.xlu2 %6691 }
 0xe6e   : > { %v8080_v41 = vmul.f32 %v9673_v36, %v6692_v52  ;;  %v6679_v34 = vpop.permute.xlu1 %6678  ;;  %v9689_v52 = vld [vmem:[%s9854_s18 + $0xb60] sm:$0xff] }
 0xe6f   : > { %v8078_v44 = vmul.f32 %v9674_v27, %v6679_v34  ;;  %v9690_v34 = vld [vmem:[%s9854_s18 + $0xb50] sm:$0xff] }
 0xe70   : > { %8592 = vst.msk [vmem:[%s13671_s4 + $0xac0] sm:$0xff] %vm691_vm0, %v8080_v41 }
 0xe71   : > { %8590 = vst.msk [vmem:[%s13671_s4 + $0xab0] sm:$0xff] %vm691_vm0, %v8078_v44 }
 0xe73   : > { %6784 = vperm.xlu2 %9168, %v16419_v37   ;;  %v9687_v37 = vld [vmem:[%s9854_s18 + $0xb48] sm:$0xff] }
 0xe74   : > { %9171 = vset.pattern.permute.xlu1 %v13301_v63 }
 0xe7b   : > { %9170 = vset.pattern.permute.xlu2 %v13292_v50 }
 0xe7c   : > { %6803 = vperm.xlu1 %9171, %v14489_v46  }
 0xe7d   : > { %v6704_v2 = vpop.permute.xlu2 %6703 }
 0xe7e   : > { %v8082_v62 = vmul.f32 %v9675_v31, %v6704_v2  ;;  %v6698_v4 = vpop.permute.xlu1 %6697  ;;  %v9691_v2 = vld [vmem:[%s9854_s18 + $0xb70] sm:$0xff] }
 0xe7f   : > { %v8081_v5 = vmul.f32 %v9676_v55, %v6698_v4  ;;  %v9692_v4 = vld [vmem:[%s9854_s18 + $0xb68] sm:$0xff] }
 0xe80   : > { %8594 = vst.msk [vmem:[%s13671_s4 + $0xad0] sm:$0xff] %vm691_vm0, %v8082_v62 }
 0xe81   : > { %8593 = vst.msk [vmem:[%s13671_s4 + $0xac8] sm:$0xff] %vm691_vm0, %v8081_v5  ;;  %v6936_v5 = vperm.slane %v13795_v30, 0 }
 0xe83   : > { %6797 = vperm.xlu2 %9170, %v14489_v46   ;;  %v9679_v46 = vld [vmem:[%s9854_s18 + $0xaf8] sm:$0x3] }
 0xe84   : > { %9173 = vset.pattern.permute.xlu1 %v13292_v50 }
 0xe8b   : > { %9172 = vset.pattern.permute.xlu2 %v13281_v16 }
 0xe8c   : > { %6822 = vperm.xlu1 %9173, %v6811_v49  }
 0xe8d   : > { %v6723_v28 = vpop.permute.xlu2 %6722 }
 0xe8e   : > { %v8085_v3 = vmul.f32 %v9677_v25, %v6723_v28  ;;  %v6710_v60 = vpop.permute.xlu1 %6709  ;;  %v9693_v28 = vld [vmem:[%s9854_s18 + $0xb88] sm:$0xff] }
 0xe8f   : > { %v8083_v14 = vmul.f32 %v9678_v0, %v6710_v60  ;;  %v9694_v60 = vld [vmem:[%s9854_s18 + $0xb78] sm:$0x3] }
 0xe90   : > { %8597 = vst.msk [vmem:[%s13671_s4 + $0xae8] sm:$0xff] %vm691_vm0, %v8085_v3 }
 0xe91   : > { %8595 = vst.msk [vmem:[%s13671_s4 + $0xad8] sm:$0x3] %vm701_vm1, %v8083_v14 }
 0xe93   : > { %6816 = vperm.xlu2 %9172, %v6811_v49  }
 0xe94   : > { %9175 = vset.pattern.permute.xlu1 %v13394_v43 }
 0xe9b   : > { %9174 = vset.pattern.permute.xlu2 %v13301_v63 }
 0xe9c   : > { %6834 = vperm.xlu1 %9175, %v6811_v49  }
 0xe9d   : > { %v6735_v17 = vpop.permute.xlu2 %6734 }
 0xe9e   : > { %v8087_v10 = vmul.f32 %v9679_v46, %v6735_v17  ;;  %v6729_v1 = vpop.permute.xlu1 %6728  ;;  %v9695_v17 = vld [vmem:[%s9854_s18 + $0xb98] sm:$0x3] }
 0xe9f   : > { %v8086_v9 = vmul.f32 %v9680_v13, %v6729_v1  ;;  %v9696_v1 = vld [vmem:[%s9854_s18 + $0xb90] sm:$0xff] }
 0xea0   : > { %8599 = vst.msk [vmem:[%s13671_s4 + $0xaf8] sm:$0x3] %vm701_vm1, %v8087_v10 }
 0xea1   : > { %8598 = vst.msk [vmem:[%s13671_s4 + $0xaf0] sm:$0xff] %vm691_vm0, %v8086_v9 }
 0xea3   : > { %6828 = vperm.xlu2 %9174, %v6811_v49  }
 0xea4   : > { %9177 = vset.pattern.permute.xlu1 %v13301_v63 }
 0xeab   : > { %9176 = vset.pattern.permute.xlu2 %v13292_v50 }
 0xeac   : > { %6853 = vperm.xlu1 %9177, %v14774_v12  }
 0xead   : > { %v6754_v6 = vpop.permute.xlu2 %6753 }
 0xeae   : > { %v8090_v8 = vmul.f32 %v9681_v56, %v6754_v6  ;;  %v6742_v18 = vpop.permute.xlu1 %6741  ;;  %v9697_v6 = vld [vmem:[%s9854_s18 + $0xbb0] sm:$0xff] }
 0xeaf   : > { %v8088_v57 = vmul.f32 %v9682_v59, %v6742_v18  ;;  %v9698_v18 = vld [vmem:[%s9854_s18 + $0xba0] sm:$0xff] }
 0xeb0   : > { %8602 = vst.msk [vmem:[%s13671_s4 + $0xb10] sm:$0xff] %vm691_vm0, %v8090_v8 }
 0xeb1   : > { %8600 = vst.msk [vmem:[%s13671_s4 + $0xb00] sm:$0xff] %vm691_vm0, %v8088_v57  ;;  %v16423_v57 = vld [vmem:[#allocation5_spill] sm:$0xff] }
 0xeb3   : > { %6847 = vperm.xlu2 %9176, %v14774_v12  }
 0xeb4   : > { %9179 = vset.pattern.permute.xlu1 %v13281_v16 }
 0xebb   : > { %9178 = vset.pattern.permute.xlu2 %v13394_v43 }
 0xebc   : > { %6866 = vperm.xlu1 %9179, %v16420_v38  }
 0xebd   : > { %v6767_v11 = vpop.permute.xlu2 %6766 }
 0xebe   : > { %v8092_v58 = vmul.f32 %v9683_v21, %v6767_v11  ;;  %v6760_v51 = vpop.permute.xlu1 %6759  ;;  %v9699_v11 = vld [vmem:[%s9854_s18 + $0xbc0] sm:$0xff] }
 0xebf   : > { %v8091_v33 = vmul.f32 %v9684_v48, %v6760_v51  ;;  %v9700_v51 = vld [vmem:[%s9854_s18 + $0xbb8] sm:$0x3] }
 0xec0   : > { %8604 = vst.msk [vmem:[%s13671_s4 + $0xb20] sm:$0xff] %vm691_vm0, %v8092_v58 }
 0xec1   : > { %8603 = vst.msk [vmem:[%s13671_s4 + $0xb18] sm:$0x3] %vm701_vm1, %v8091_v33 }
 0xec3   : > { %6859 = vperm.xlu2 %9178, %v14774_v12   ;;  %v16421_v12 = vld [vmem:[#allocation14_spill] sm:$0xff] }
 0xec4   : > { %9181 = vset.pattern.permute.xlu1 %v13394_v43 }
 0xecb   : > { %9180 = vset.pattern.permute.xlu2 %v13301_v63 }
 0xecc   : > { %6884 = vperm.xlu1 %9181, %v16420_v38  }
 0xecd   : > { %v6785_v20 = vpop.permute.xlu2 %6784 }
 0xece   : > { %v8095_v40 = vmul.f32 %v9685_v32, %v6785_v20  ;;  %v6773_v23 = vpop.permute.xlu1 %6772  ;;  %v9701_v20 = vld [vmem:[%s9854_s18 + $0xbd8] sm:$0x3] }
 0xecf   : > { %v8093_v22 = vmul.f32 %v9686_v45, %v6773_v23  ;;  %v9702_v23 = vld [vmem:[%s9854_s18 + $0xbc8] sm:$0xff] }
 0xed0   : > { %8607 = vst.msk [vmem:[%s13671_s4 + $0xb38] sm:$0x3] %vm701_vm1, %v8095_v40 }
 0xed1   : > { %8605 = vst.msk [vmem:[%s13671_s4 + $0xb28] sm:$0xff] %vm691_vm0, %v8093_v22 }
 0xed3   : > { %6878 = vperm.xlu2 %9180, %v16420_v38  }
 0xed4   : > { %9183 = vset.pattern.permute.xlu1 %v13292_v50 }
 0xedb   : > { %9182 = vset.pattern.permute.xlu2 %v13281_v16 }
 0xedc   : > { %6897 = vperm.xlu1 %9183, %v16421_v12  }
 0xedd   : > { %v6798_v35 = vpop.permute.xlu2 %6797 }
 0xede   : > { %v8097_v26 = vmul.f32 %v9687_v37, %v6798_v35  ;;  %v6792_v39 = vpop.permute.xlu1 %6791 }
 0xedf   : > { %v8096_v19 = vmul.f32 %v9688_v24, %v6792_v39  ;;  %v16425_v24 = vld [vmem:[#allocation24_spill] sm:$0xff] }
 0xee0   : > { %8609 = vst.msk [vmem:[%s13671_s4 + $0xb48] sm:$0xff] %vm691_vm0, %v8097_v26  ;;  %v9704_v26 = vld [vmem:[%s9854_s18 + $0xbe0] sm:$0xff] }
 0xee1   : > { %8608 = vst.msk [vmem:[%s13671_s4 + $0xb40] sm:$0xff] %vm691_vm0, %v8096_v19 }
 0xee3   : > { %6891 = vperm.xlu2 %9182, %v16421_v12  }
 0xee4   : > { %9185 = vset.pattern.permute.xlu1 %v13281_v16 }
 0xeeb   : > { %9184 = vset.pattern.permute.xlu2 %v13394_v43 }
 0xeec   : > { %6916 = vperm.xlu1 %9185, %v16422_v61  }
 0xeed   : > { %v6817_v29 = vpop.permute.xlu2 %6816 }
 0xeee   : > { %v8100_v36 = vmul.f32 %v9689_v52, %v6817_v29  ;;  %v6804_v41 = vpop.permute.xlu1 %6803 }
 0xeef   : > { %v8098_v27 = vmul.f32 %v9690_v34, %v6804_v41 }
 0xef0   : > { %8612 = vst.msk [vmem:[%s13671_s4 + $0xb60] sm:$0xff] %vm691_vm0, %v8100_v36  ;;  %v9706_v36 = vld [vmem:[%s9854_s18 + $0xbf0] sm:$0xff] }
 0xef1   : > { %8610 = vst.msk [vmem:[%s13671_s4 + $0xb50] sm:$0xff] %vm691_vm0, %v8098_v27  ;;  %v9707_v27 = vld [vmem:[%s9854_s18 + $0xc10] sm:$0xff] }
 0xef3   : > { %6909 = vperm.xlu2 %9184, %v16421_v12   ;;  %v9703_v12 = vld [vmem:[%s9854_s18 + $0xbe8] sm:$0xff] }
 0xef4   : > { %9187 = vset.pattern.permute.xlu1 %v13301_v63 }
 0xefb   : > { %9186 = vset.pattern.permute.xlu2 %v13292_v50 }
 0xefc   : > { %6928 = vperm.xlu1 %9187, %v16422_v61  }
 0xefd   : > { %v6829_v44 = vpop.permute.xlu2 %6828 }
 0xefe   : > { %v8102_v31 = vmul.f32 %v9691_v2, %v6829_v44  ;;  %v6823_v62 = vpop.permute.xlu1 %6822 }
 0xeff   : > { %v8101_v55 = vmul.f32 %v9692_v4, %v6823_v62  ;;  %v7061_v4 = vperm.slane %v13795_v30, 5 }
 0xf00   : > { %8614 = vst.msk [vmem:[%s13671_s4 + $0xb70] sm:$0xff] %vm691_vm0, %v8102_v31  ;;  %v9708_v31 = vld [vmem:[%s9854_s18 + $0xc08] sm:$0xff] }
 0xf01   : > { %8613 = vst.msk [vmem:[%s13671_s4 + $0xb68] sm:$0xff] %vm691_vm0, %v8101_v55 }
 0xf03   : > { %6922 = vperm.xlu2 %9186, %v16422_v61   ;;  %v9705_v61 = vld [vmem:[%s9854_s18 + $0xc00] sm:$0xff] }
 0xf04   : > { %9189 = vset.pattern.permute.xlu1 %v13292_v50 }
 0xf0b   : > { %9188 = vset.pattern.permute.xlu2 %v13281_v16 }
 0xf0c   : > { %6947 = vperm.xlu1 %9189, %v6936_v5  }
 0xf0d   : > { %v6848_v49 = vpop.permute.xlu2 %6847 }
 0xf0e   : > { %v8105_v25 = vmul.f32 %v9693_v28, %v6848_v49  ;;  %v6835_v3 = vpop.permute.xlu1 %6834 }
 0xf0f   : > { %v8103_v0 = vmul.f32 %v9694_v60, %v6835_v3  ;;  %v9711_v60 = vld [vmem:[%s9854_s18 + $0xc38] sm:$0x3] }
 0xf10   : > { %8617 = vst.msk [vmem:[%s13671_s4 + $0xb88] sm:$0xff] %vm691_vm0, %v8105_v25  ;;  %v9710_v25 = vld [vmem:[%s9854_s18 + $0xc18] sm:$0x3] }
 0xf11   : > { %8615 = vst.msk [vmem:[%s13671_s4 + $0xb78] sm:$0x3] %vm701_vm1, %v8103_v0 }
 0xf13   : > { %6941 = vperm.xlu2 %9188, %v6936_v5  }
 0xf14   : > { %9191 = vset.pattern.permute.xlu1 %v13394_v43 }
 0xf1b   : > { %9190 = vset.pattern.permute.xlu2 %v13301_v63 }
 0xf1c   : > { %6959 = vperm.xlu1 %9191, %v6936_v5  }
 0xf1d   : > { %v6860_v14 = vpop.permute.xlu2 %6859 }
 0xf1e   : > { %v8107_v46 = vmul.f32 %v9695_v17, %v6860_v14  ;;  %v6854_v10 = vpop.permute.xlu1 %6853  ;;  %v9712_v17 = vld [vmem:[%s9854_s18 + $0xc30] sm:$0xff] }
 0xf1f   : > { %v8106_v13 = vmul.f32 %v9696_v1, %v6854_v10  ;;  %v16426_v10 = vld [vmem:[#allocation30_spill] sm:$0xff] }
 0xf20   : > { %8619 = vst.msk [vmem:[%s13671_s4 + $0xb98] sm:$0x3] %vm701_vm1, %v8107_v46 }
 0xf21   : > { %8618 = vst.msk [vmem:[%s13671_s4 + $0xb90] sm:$0xff] %vm691_vm0, %v8106_v13  ;;  %v9713_v13 = vld [vmem:[%s9854_s18 + $0xc50] sm:$0xff] }
 0xf23   : > { %6953 = vperm.xlu2 %9190, %v6936_v5   ;;  %v9709_v5 = vld [vmem:[%s9854_s18 + $0xc28] sm:$0xff] }
 0xf24   : > { %9193 = vset.pattern.permute.xlu1 %v13301_v63 }
 0xf2b   : > { %9192 = vset.pattern.permute.xlu2 %v13292_v50 }
 0xf2c   : > { %6978 = vperm.xlu1 %9193, %v14789_v42  }
 0xf2d   : > { %v6879_v9 = vpop.permute.xlu2 %6878 }
 0xf2e   : > { %v8110_v56 = vmul.f32 %v9697_v6, %v6879_v9  ;;  %v6867_v8 = vpop.permute.xlu1 %6866 }
 0xf2f   : > { %v8108_v59 = vmul.f32 %v9698_v18, %v6867_v8  ;;  %v16427_v18 = vld [vmem:[#allocation6_spill] sm:$0xff] }
 0xf30   : > { %8622 = vst.msk [vmem:[%s13671_s4 + $0xbb0] sm:$0xff] %vm691_vm0, %v8110_v56  ;;  %v9714_v56 = vld [vmem:[%s9854_s18 + $0xc40] sm:$0xff] }
 0xf31   : > { %8620 = vst.msk [vmem:[%s13671_s4 + $0xba0] sm:$0xff] %vm691_vm0, %v8108_v59 }
 0xf33   : > { %6972 = vperm.xlu2 %9192, %v14789_v42  }
 0xf34   : > { %9195 = vset.pattern.permute.xlu1 %v13281_v16 }
 0xf3b   : > { %9194 = vset.pattern.permute.xlu2 %v13394_v43 }
 0xf3c   : > { %6991 = vperm.xlu1 %9195, %v16423_v57  }
 0xf3d   : > { %v6892_v38 = vpop.permute.xlu2 %6891 }
 0xf3e   : > { %v8112_v21 = vmul.f32 %v9699_v11, %v6892_v38  ;;  %v6885_v58 = vpop.permute.xlu1 %6884 }
 0xf3f   : > { %v8111_v48 = vmul.f32 %v9700_v51, %v6885_v58 }
 0xf40   : > { %8624 = vst.msk [vmem:[%s13671_s4 + $0xbc0] sm:$0xff] %vm691_vm0, %v8112_v21  ;;  %v9716_v21 = vld [vmem:[%s9854_s18 + $0xc58] sm:$0x3] }
 0xf41   : > { %8623 = vst.msk [vmem:[%s13671_s4 + $0xbb8] sm:$0x3] %vm701_vm1, %v8111_v48  ;;  %v9717_v48 = vld [vmem:[%s9854_s18 + $0xc78] sm:$0x3] }
 0xf43   : > { %6984 = vperm.xlu2 %9194, %v14789_v42   ;;  %v16424_v42 = vld [vmem:[#allocation15_spill] sm:$0xff] }
 0xf44   : > { %9197 = vset.pattern.permute.xlu1 %v13394_v43 }
 0xf4b   : > { %9196 = vset.pattern.permute.xlu2 %v13301_v63 }
 0xf4c   : > { %7009 = vperm.xlu1 %9197, %v16423_v57  }
 0xf4d   : > { %v6910_v33 = vpop.permute.xlu2 %6909 }
 0xf4e   : > { %v8115_v32 = vmul.f32 %v9701_v20, %v6910_v33  ;;  %v6898_v40 = vpop.permute.xlu1 %6897 }
 0xf4f   : > { %v8113_v45 = vmul.f32 %v9702_v23, %v6898_v40  ;;  %v16428_v23 = vld [vmem:[#allocation16_spill] sm:$0xff] }
 0xf50   : > { %8627 = vst.msk [vmem:[%s13671_s4 + $0xbd8] sm:$0x3] %vm701_vm1, %v8115_v32  ;;  %v9718_v32 = vld [vmem:[%s9854_s18 + $0xc68] sm:$0xff] }
 0xf51   : > { %8625 = vst.msk [vmem:[%s13671_s4 + $0xbc8] sm:$0xff] %vm691_vm0, %v8113_v45 }
 0xf53   : > { %7003 = vperm.xlu2 %9196, %v16423_v57   ;;  %v9715_v57 = vld [vmem:[%s9854_s18 + $0xc60] sm:$0xff] }
 0xf54   : > { %9199 = vset.pattern.permute.xlu1 %v13292_v50 }
 0xf5b   : > { %9198 = vset.pattern.permute.xlu2 %v13281_v16 }
 0xf5c   : > { %7022 = vperm.xlu1 %9199, %v16424_v42  }
 0xf5d   : > { %v6923_v22 = vpop.permute.xlu2 %6922 }
 0xf5e   : > { %v8117_v35 = vmul.f32 %v9703_v12, %v6923_v22  ;;  %v6917_v37 = vpop.permute.xlu1 %6916 }
 0xf5f   : > { %v8116_v39 = vmul.f32 %v9704_v26, %v6917_v37  ;;  %v16429_v26 = vld [vmem:[#allocation25_spill] sm:$0xff] }
 0xf60   : > { %8629 = vst.msk [vmem:[%s13671_s4 + $0xbe8] sm:$0xff] %vm691_vm0, %v8117_v35  ;;  %v9720_v35 = vld [vmem:[%s9854_s18 + $0xc80] sm:$0xff] }
 0xf61   : > { %8628 = vst.msk [vmem:[%s13671_s4 + $0xbe0] sm:$0xff] %vm691_vm0, %v8116_v39 }
 0xf63   : > { %7016 = vperm.xlu2 %9198, %v16424_v42  }
 0xf64   : > { %9201 = vset.pattern.permute.xlu1 %v13281_v16 }
 0xf6b   : > { %9200 = vset.pattern.permute.xlu2 %v13394_v43 }
 0xf6c   : > { %7041 = vperm.xlu1 %9201, %v16425_v24  }
 0xf6d   : > { %v6942_v19 = vpop.permute.xlu2 %6941 }
 0xf6e   : > { %v8120_v29 = vmul.f32 %v9705_v61, %v6942_v19  ;;  %v6929_v52 = vpop.permute.xlu1 %6928 }
 0xf6f   : > { %v8118_v41 = vmul.f32 %v9706_v36, %v6929_v52 }
 0xf70   : > { %8632 = vst.msk [vmem:[%s13671_s4 + $0xc00] sm:$0xff] %vm691_vm0, %v8120_v29  ;;  %v9722_v29 = vld [vmem:[%s9854_s18 + $0xc90] sm:$0xff] }
 0xf71   : > { %8630 = vst.msk [vmem:[%s13671_s4 + $0xbf0] sm:$0xff] %vm691_vm0, %v8118_v41  ;;  %v9723_v41 = vld [vmem:[%s9854_s18 + $0xcb0] sm:$0xff] }
 0xf73   : > { %7034 = vperm.xlu2 %9200, %v16424_v42   ;;  %v9719_v42 = vld [vmem:[%s9854_s18 + $0xc88] sm:$0xff] }
 0xf74   : > { %9203 = vset.pattern.permute.xlu1 %v13301_v63 }
 0xf7b   : > { %9202 = vset.pattern.permute.xlu2 %v13292_v50 }
 0xf7c   : > { %7053 = vperm.xlu1 %9203, %v16425_v24  }
 0xf7d   : > { %v6954_v34 = vpop.permute.xlu2 %6953 }
 0xf7e   : > { %v8122_v44 = vmul.f32 %v9707_v27, %v6954_v34  ;;  %v6948_v2 = vpop.permute.xlu1 %6947 }
 0xf7f   : > { %v8121_v62 = vmul.f32 %v9708_v31, %v6948_v2  ;;  %v7186_v31 = vperm.slane %v13851_v54, 2 }
 0xf80   : > { %8634 = vst.msk [vmem:[%s13671_s4 + $0xc10] sm:$0xff] %vm691_vm0, %v8122_v44  ;;  %v9724_v44 = vld [vmem:[%s9854_s18 + $0xca8] sm:$0xff] }
 0xf81   : > { %8633 = vst.msk [vmem:[%s13671_s4 + $0xc08] sm:$0xff] %vm691_vm0, %v8121_v62 }
 0xf83   : > { %7047 = vperm.xlu2 %9202, %v16425_v24   ;;  %v9721_v24 = vld [vmem:[%s9854_s18 + $0xca0] sm:$0xff] }
 0xf84   : > { %9205 = vset.pattern.permute.xlu1 %v13292_v50 }
 0xf8b   : > { %9204 = vset.pattern.permute.xlu2 %v13281_v16 }
 0xf8c   : > { %7072 = vperm.xlu1 %9205, %v7061_v4  }
 0xf8d   : > { %v6973_v55 = vpop.permute.xlu2 %6972 }
 0xf8e   : > { %v8125_v49 = vmul.f32 %v9709_v5, %v6973_v55  ;;  %v6960_v28 = vpop.permute.xlu1 %6959 }
 0xf8f   : > { %v8123_v3 = vmul.f32 %v9710_v25, %v6960_v28 }
 0xf90   : > { %8637 = vst.msk [vmem:[%s13671_s4 + $0xc28] sm:$0xff] %vm691_vm0, %v8125_v49  ;;  %v9726_v49 = vld [vmem:[%s9854_s18 + $0xcb8] sm:$0x3] }
 0xf91   : > { %8635 = vst.msk [vmem:[%s13671_s4 + $0xc18] sm:$0x3] %vm701_vm1, %v8123_v3  ;;  %v9727_v3 = vld [vmem:[%s9854_s18 + $0xcd8] sm:$0x3] }
 0xf93   : > { %7066 = vperm.xlu2 %9204, %v7061_v4  }
 0xf94   : > { %9207 = vset.pattern.permute.xlu1 %v13394_v43 }
 0xf9b   : > { %9206 = vset.pattern.permute.xlu2 %v13301_v63 }
 0xf9c   : > { %7084 = vperm.xlu1 %9207, %v7061_v4  }
 0xf9d   : > { %v6985_v30 = vpop.permute.xlu2 %6984 }
 0xf9e   : > { %v8127_v0 = vmul.f32 %v9711_v60, %v6985_v30  ;;  %v6979_v14 = vpop.permute.xlu1 %6978 }
 0xf9f   : > { %v8126_v46 = vmul.f32 %v9712_v17, %v6979_v14 }
 0xfa0   : > { %8639 = vst.msk [vmem:[%s13671_s4 + $0xc38] sm:$0x3] %vm701_vm1, %v8127_v0  ;;  %v9728_v0 = vld [vmem:[%s9854_s18 + $0xcd0] sm:$0xff] }
 0xfa1   : > { %8638 = vst.msk [vmem:[%s13671_s4 + $0xc30] sm:$0xff] %vm691_vm0, %v8126_v46  ;;  %v9729_v46 = vld [vmem:[%s9854_s18 + $0xcf0] sm:$0xff] }
 0xfa3   : > { %7078 = vperm.xlu2 %9206, %v7061_v4   ;;  %v9725_v4 = vld [vmem:[%s9854_s18 + $0xcc8] sm:$0xff] }
 0xfa4   : > { %9209 = vset.pattern.permute.xlu1 %v13301_v63 }
 0xfab   : > { %9208 = vset.pattern.permute.xlu2 %v13292_v50 }
 0xfac   : > { %7103 = vperm.xlu1 %9209, %v16426_v10  }
 0xfad   : > { %v7004_v1 = vpop.permute.xlu2 %7003 }
 0xfae   : > { %v8130_v9 = vmul.f32 %v9713_v13, %v7004_v1  ;;  %v6992_v6 = vpop.permute.xlu1 %6991  ;;  %v9730_v13 = vld [vmem:[%s9854_s18 + $0xce0] sm:$0xff] }
 0xfaf   : > { %v8128_v8 = vmul.f32 %v9714_v56, %v6992_v6  ;;  %v16430_v6 = vld [vmem:[#allocation7_spill] sm:$0xff] }
 0xfb0   : > { %8642 = vst.msk [vmem:[%s13671_s4 + $0xc50] sm:$0xff] %vm691_vm0, %v8130_v9 }
 0xfb1   : > { %8640 = vst.msk [vmem:[%s13671_s4 + $0xc40] sm:$0xff] %vm691_vm0, %v8128_v8  ;;  %v9731_v8 = vld [vmem:[%s9854_s18 + $0xd00] sm:$0xff] }
 0xfb3   : > { %7097 = vperm.xlu2 %9208, %v16426_v10  }
 0xfb4   : > { %9211 = vset.pattern.permute.xlu1 %v13281_v16 }
 0xfbb   : > { %9210 = vset.pattern.permute.xlu2 %v13394_v43 }
 0xfbc   : > { %7116 = vperm.xlu1 %9211, %v16427_v18  }
 0xfbd   : > { %v7017_v59 = vpop.permute.xlu2 %7016 }
 0xfbe   : > { %v8132_v38 = vmul.f32 %v9715_v57, %v7017_v59  ;;  %v7010_v11 = vpop.permute.xlu1 %7009  ;;  %v9732_v57 = vld [vmem:[%s9854_s18 + $0xcf8] sm:$0x3] }
 0xfbf   : > { %v8131_v58 = vmul.f32 %v9716_v21, %v7010_v11  ;;  %v9733_v21 = vld [vmem:[%s9854_s18 + $0xd18] sm:$0x3] }
 0xfc0   : > { %8644 = vst.msk [vmem:[%s13671_s4 + $0xc60] sm:$0xff] %vm691_vm0, %v8132_v38 }
 0xfc1   : > { %8643 = vst.msk [vmem:[%s13671_s4 + $0xc58] sm:$0x3] %vm701_vm1, %v8131_v58 }
 0xfc3   : > { %7109 = vperm.xlu2 %9210, %v16426_v10  }
 0xfc4   : > { %9213 = vset.pattern.permute.xlu1 %v13394_v43 }
 0xfcb   : > { %9212 = vset.pattern.permute.xlu2 %v13301_v63 }
 0xfcc   : > { %7134 = vperm.xlu1 %9213, %v16427_v18  }
 0xfcd   : > { %v7035_v51 = vpop.permute.xlu2 %7034 }
 0xfce   : > { %v8135_v33 = vmul.f32 %v9717_v48, %v7035_v51  ;;  %v7023_v20 = vpop.permute.xlu1 %7022  ;;  %v9734_v48 = vld [vmem:[%s9854_s18 + $0xd08] sm:$0xff] }
 0xfcf   : > { %v8133_v40 = vmul.f32 %v9718_v32, %v7023_v20  ;;  %v9735_v32 = vld [vmem:[%s9854_s18 + $0xd28] sm:$0xff] }
 0xfd0   : > { %8647 = vst.msk [vmem:[%s13671_s4 + $0xc78] sm:$0x3] %vm701_vm1, %v8135_v33 }
 0xfd1   : > { %8645 = vst.msk [vmem:[%s13671_s4 + $0xc68] sm:$0xff] %vm691_vm0, %v8133_v40 }
 0xfd3   : > { %7128 = vperm.xlu2 %9212, %v16427_v18  }
 0xfd4   : > { %9215 = vset.pattern.permute.xlu1 %v13292_v50 }
 0xfdb   : > { %9214 = vset.pattern.permute.xlu2 %v13281_v16 }
 0xfdc   : > { %7147 = vperm.xlu1 %9215, %v16428_v23  }
 0xfdd   : > { %v7048_v45 = vpop.permute.xlu2 %7047 }
 0xfde   : > { %v8137_v22 = vmul.f32 %v9719_v42, %v7048_v45  ;;  %v7042_v12 = vpop.permute.xlu1 %7041  ;;  %v9736_v45 = vld [vmem:[%s9854_s18 + $0xd20] sm:$0xff] }
 0xfdf   : > { %v8136_v37 = vmul.f32 %v9720_v35, %v7042_v12  ;;  %v9737_v35 = vld [vmem:[%s9854_s18 + $0xd40] sm:$0xff] }
 0xfe0   : > { %8649 = vst.msk [vmem:[%s13671_s4 + $0xc88] sm:$0xff] %vm691_vm0, %v8137_v22  ;;  %v16432_v22 = vld [vmem:[#allocation26_spill] sm:$0xff] }
 0xfe1   : > { %8648 = vst.msk [vmem:[%s13671_s4 + $0xc80] sm:$0xff] %vm691_vm0, %v8136_v37 }
 0xfe3   : > { %7141 = vperm.xlu2 %9214, %v16428_v23  }
 0xfe4   : > { %9217 = vset.pattern.permute.xlu1 %v13281_v16 }
 0xfeb   : > { %9216 = vset.pattern.permute.xlu2 %v13394_v43 }
 0xfec   : > { %7166 = vperm.xlu1 %9217, %v16429_v26  }
 0xfed   : > { %v7067_v39 = vpop.permute.xlu2 %7066 }
 0xfee   : > { %v8140_v19 = vmul.f32 %v9721_v24, %v7067_v39  ;;  %v7054_v61 = vpop.permute.xlu1 %7053  ;;  %v9738_v39 = vld [vmem:[%s9854_s18 + $0xd30] sm:$0xff] }
 0xfef   : > { %v8138_v52 = vmul.f32 %v9722_v29, %v7054_v61  ;;  %v9739_v61 = vld [vmem:[%s9854_s18 + $0xd50] sm:$0xff] }
 0xff0   : > { %8652 = vst.msk [vmem:[%s13671_s4 + $0xca0] sm:$0xff] %vm691_vm0, %v8140_v19 }
 0xff1   : > { %8650 = vst.msk [vmem:[%s13671_s4 + $0xc90] sm:$0xff] %vm691_vm0, %v8138_v52 }
 0xff3   : > { %7159 = vperm.xlu2 %9216, %v16428_v23  }
 0xff4   : > { %9219 = vset.pattern.permute.xlu1 %v13301_v63 }
 0xffb   : > { %9218 = vset.pattern.permute.xlu2 %v13292_v50 }
 0xffc   : > { %7178 = vperm.xlu1 %9219, %v16429_v26  }
 0xffd   : > { %v7079_v36 = vpop.permute.xlu2 %7078 }
 0xffe   : > { %v8142_v34 = vmul.f32 %v9723_v41, %v7079_v36  ;;  %v7073_v27 = vpop.permute.xlu1 %7072  ;;  %v9740_v36 = vld [vmem:[%s9854_s18 + $0xd48] sm:$0xff] }
 0xfff   : > { %v8141_v2 = vmul.f32 %v9724_v44, %v7073_v27  ;;  %v9741_v44 = vld [vmem:[%s9854_s18 + $0xd68] sm:$0xff] }
0x1000   : > { %8654 = vst.msk [vmem:[%s13671_s4 + $0xcb0] sm:$0xff] %vm691_vm0, %v8142_v34  ;;  %v7311_v34 = vperm.slane %v13851_v54, 7 }
0x1001   : > { %8653 = vst.msk [vmem:[%s13671_s4 + $0xca8] sm:$0xff] %vm691_vm0, %v8141_v2 }
0x1003   : > { %7172 = vperm.xlu2 %9218, %v16429_v26  }
0x1004   : > { %9221 = vset.pattern.permute.xlu1 %v13292_v50 }
0x100b   : > { %9220 = vset.pattern.permute.xlu2 %v13281_v16 }
0x100c   : > { %7197 = vperm.xlu1 %9221, %v7186_v31  }
0x100d   : > { %v7098_v62 = vpop.permute.xlu2 %7097 }
0x100e   : > { %v8145_v55 = vmul.f32 %v9725_v4, %v7098_v62  ;;  %v7085_v5 = vpop.permute.xlu1 %7084  ;;  %v9742_v62 = vld [vmem:[%s9854_s18 + $0xd58] sm:$0x3] }
0x100f   : > { %v8143_v28 = vmul.f32 %v9726_v49, %v7085_v5 }
0x1010   : > { %8657 = vst.msk [vmem:[%s13671_s4 + $0xcc8] sm:$0xff] %vm691_vm0, %v8145_v55  ;;  %v9743_v55 = vld [vmem:[%s9854_s18 + $0xd78] sm:$0x3] }
0x1011   : > { %8655 = vst.msk [vmem:[%s13671_s4 + $0xcb8] sm:$0x3] %vm701_vm1, %v8143_v28  ;;  %v9744_v28 = vld [vmem:[%s9854_s18 + $0xd70] sm:$0xff] }
0x1013   : > { %7191 = vperm.xlu2 %9220, %v7186_v31  }
0x1014   : > { %9223 = vset.pattern.permute.xlu1 %v13394_v43 }
0x101b   : > { %9222 = vset.pattern.permute.xlu2 %v13301_v63 }
0x101c   : > { %7209 = vperm.xlu1 %9223, %v7186_v31  }
0x101d   : > { %v7110_v25 = vpop.permute.xlu2 %7109 }
0x101e   : > { %v8147_v30 = vmul.f32 %v9727_v3, %v7110_v25  ;;  %v7104_v60 = vpop.permute.xlu1 %7103  ;;  %v16433_v3 = vld [vmem:[#allocation31_spill] sm:$0xff] }
0x101f   : > { %v8146_v14 = vmul.f32 %v9728_v0, %v7104_v60  ;;  %v9745_v60 = vld [vmem:[%s9854_s18 + $0xd90] sm:$0xff] }
0x1020   : > { %8659 = vst.msk [vmem:[%s13671_s4 + $0xcd8] sm:$0x3] %vm701_vm1, %v8147_v30 }
0x1021   : > { %8658 = vst.msk [vmem:[%s13671_s4 + $0xcd0] sm:$0xff] %vm691_vm0, %v8146_v14 }
0x1023   : > { %7203 = vperm.xlu2 %9222, %v7186_v31  }
0x1024   : > { %9225 = vset.pattern.permute.xlu1 %v13301_v63 }
0x102b   : > { %9224 = vset.pattern.permute.xlu2 %v13292_v50 }
0x102c   : > { %7228 = vperm.xlu1 %9225, %v14813_v7  }
0x102d   : > { %v7129_v17 = vpop.permute.xlu2 %7128 }
0x102e   : > { %v8150_v10 = vmul.f32 %v9729_v46, %v7129_v17  ;;  %v7117_v1 = vpop.permute.xlu1 %7116  ;;  %v9746_v17 = vld [vmem:[%s9854_s18 + $0xd80] sm:$0xff] }
0x102f   : > { %v8148_v9 = vmul.f32 %v9730_v13, %v7117_v1  ;;  %v9747_v13 = vld [vmem:[%s9854_s18 + $0xda0] sm:$0xff] }
0x1030   : > { %8662 = vst.msk [vmem:[%s13671_s4 + $0xcf0] sm:$0xff] %vm691_vm0, %v8150_v10  ;;  %v16434_v10 = vld [vmem:[#allocation8_spill] sm:$0xff] }
0x1031   : > { %8660 = vst.msk [vmem:[%s13671_s4 + $0xce0] sm:$0xff] %vm691_vm0, %v8148_v9 }
0x1033   : > { %7222 = vperm.xlu2 %9224, %v14813_v7  }
0x1034   : > { %9227 = vset.pattern.permute.xlu1 %v13281_v16 }
0x103b   : > { %9226 = vset.pattern.permute.xlu2 %v13394_v43 }
0x103c   : > { %7241 = vperm.xlu1 %9227, %v16430_v6  }
0x103d   : > { %v7142_v56 = vpop.permute.xlu2 %7141 }
0x103e   : > { %v8152_v18 = vmul.f32 %v9731_v8, %v7142_v56  ;;  %v7135_v59 = vpop.permute.xlu1 %7134  ;;  %v9748_v56 = vld [vmem:[%s9854_s18 + $0xd98] sm:$0x3] }
0x103f   : > { %v8151_v38 = vmul.f32 %v9732_v57, %v7135_v59  ;;  %v9749_v59 = vld [vmem:[%s9854_s18 + $0xdb8] sm:$0x3] }
0x1040   : > { %8664 = vst.msk [vmem:[%s13671_s4 + $0xd00] sm:$0xff] %vm691_vm0, %v8152_v18 }
0x1041   : > { %8663 = vst.msk [vmem:[%s13671_s4 + $0xcf8] sm:$0x3] %vm701_vm1, %v8151_v38 }
0x1043   : > { %7234 = vperm.xlu2 %9226, %v14813_v7   ;;  %v16431_v7 = vld [vmem:[#allocation17_spill] sm:$0xff] }
0x1044   : > { %9229 = vset.pattern.permute.xlu1 %v13394_v43 }
0x104b   : > { %9228 = vset.pattern.permute.xlu2 %v13301_v63 }
0x104c   : > { %7259 = vperm.xlu1 %9229, %v16430_v6  }
0x104d   : > { %v7160_v11 = vpop.permute.xlu2 %7159 }
0x104e   : > { %v8155_v58 = vmul.f32 %v9733_v21, %v7160_v11  ;;  %v7148_v51 = vpop.permute.xlu1 %7147  ;;  %v9750_v11 = vld [vmem:[%s9854_s18 + $0xda8] sm:$0xff] }
0x104f   : > { %v8153_v33 = vmul.f32 %v9734_v48, %v7148_v51  ;;  %v9751_v48 = vld [vmem:[%s9854_s18 + $0xdc8] sm:$0xff] }
0x1050   : > { %8667 = vst.msk [vmem:[%s13671_s4 + $0xd18] sm:$0x3] %vm701_vm1, %v8155_v58  ;;  %v16435_v58 = vld [vmem:[#allocation18_spill] sm:$0xff] }
0x1051   : > { %8665 = vst.msk [vmem:[%s13671_s4 + $0xd08] sm:$0xff] %vm691_vm0, %v8153_v33 }
0x1053   : > { %7253 = vperm.xlu2 %9228, %v16430_v6  }
0x1054   : > { %9231 = vset.pattern.permute.xlu1 %v13292_v50 }
0x105b   : > { %9230 = vset.pattern.permute.xlu2 %v13281_v16 }
0x105c   : > { %7272 = vperm.xlu1 %9231, %v16431_v7  }
0x105d   : > { %v7173_v20 = vpop.permute.xlu2 %7172 }
0x105e   : > { %v8157_v40 = vmul.f32 %v9735_v32, %v7173_v20  ;;  %v7167_v23 = vpop.permute.xlu1 %7166  ;;  %v9752_v20 = vld [vmem:[%s9854_s18 + $0xdc0] sm:$0xff] }
0x105f   : > { %v8156_v42 = vmul.f32 %v9736_v45, %v7167_v23  ;;  %v9753_v45 = vld [vmem:[%s9854_s18 + $0xde0] sm:$0xff] }
0x1060   : > { %8669 = vst.msk [vmem:[%s13671_s4 + $0xd28] sm:$0xff] %vm691_vm0, %v8157_v40  ;;  %v16436_v40 = vld [vmem:[#allocation27_spill] sm:$0xff] }
0x1061   : > { %8668 = vst.msk [vmem:[%s13671_s4 + $0xd20] sm:$0xff] %vm691_vm0, %v8156_v42 }
0x1063   : > { %7266 = vperm.xlu2 %9230, %v16431_v7  }
0x1064   : > { %9233 = vset.pattern.permute.xlu1 %v13281_v16 }
0x106b   : > { %9232 = vset.pattern.permute.xlu2 %v13394_v43 }
0x106c   : > { %7291 = vperm.xlu1 %9233, %v16432_v22  }
0x106d   : > { %v7192_v12 = vpop.permute.xlu2 %7191 }
0x106e   : > { %v8160_v37 = vmul.f32 %v9737_v35, %v7192_v12  ;;  %v7179_v26 = vpop.permute.xlu1 %7178  ;;  %v9754_v12 = vld [vmem:[%s9854_s18 + $0xdd0] sm:$0xff] }
0x106f   : > { %v8158_v24 = vmul.f32 %v9738_v39, %v7179_v26  ;;  %v9755_v26 = vld [vmem:[%s9854_s18 + $0xdf0] sm:$0xff] }
0x1070   : > { %8672 = vst.msk [vmem:[%s13671_s4 + $0xd40] sm:$0xff] %vm691_vm0, %v8160_v37 }
0x1071   : > { %8670 = vst.msk [vmem:[%s13671_s4 + $0xd30] sm:$0xff] %vm691_vm0, %v8158_v24 }
0x1073   : > { %7284 = vperm.xlu2 %9232, %v16431_v7  }
0x1074   : > { %9235 = vset.pattern.permute.xlu1 %v13301_v63 }
0x107b   : > { %9234 = vset.pattern.permute.xlu2 %v13292_v50 }
0x107c   : > { %7303 = vperm.xlu1 %9235, %v16432_v22  }
0x107d   : > { %v7204_v19 = vpop.permute.xlu2 %7203 }
0x107e   : > { %v8162_v29 = vmul.f32 %v9739_v61, %v7204_v19  ;;  %v7198_v52 = vpop.permute.xlu1 %7197  ;;  %v9756_v19 = vld [vmem:[%s9854_s18 + $0xde8] sm:$0xff] }
0x107f   : > { %v8161_v41 = vmul.f32 %v9740_v36, %v7198_v52  ;;  %v9757_v36 = vld [vmem:[%s9854_s18 + $0xe08] sm:$0xff] }
0x1080   : > { %8674 = vst.msk [vmem:[%s13671_s4 + $0xd50] sm:$0xff] %vm691_vm0, %v8162_v29  ;;  %v7436_v29 = vperm.slane %v13946_v47, 4 }
0x1081   : > { %8673 = vst.msk [vmem:[%s13671_s4 + $0xd48] sm:$0xff] %vm691_vm0, %v8161_v41 }
0x1083   : > { %7297 = vperm.xlu2 %9234, %v16432_v22  }
0x1084   : > { %9237 = vset.pattern.permute.xlu1 %v13292_v50 }
0x108b   : > { %9236 = vset.pattern.permute.xlu2 %v13281_v16 }
0x108c   : > { %7322 = vperm.xlu1 %9237, %v7311_v34  }
0x108d   : > { %v7223_v27 = vpop.permute.xlu2 %7222 }
0x108e   : > { %v8165_v2 = vmul.f32 %v9741_v44, %v7223_v27  ;;  %v7210_v31 = vpop.permute.xlu1 %7209  ;;  %v9758_v27 = vld [vmem:[%s9854_s18 + $0xdf8] sm:$0x3] }
0x108f   : > { %v8163_v4 = vmul.f32 %v9742_v62, %v7210_v31 }
0x1090   : > { %8677 = vst.msk [vmem:[%s13671_s4 + $0xd68] sm:$0xff] %vm691_vm0, %v8165_v2  ;;  %v9759_v2 = vld [vmem:[%s9854_s18 + $0xe18] sm:$0x3] }
0x1091   : > { %8675 = vst.msk [vmem:[%s13671_s4 + $0xd58] sm:$0x3] %vm701_vm1, %v8163_v4  ;;  %v9760_v4 = vld [vmem:[%s9854_s18 + $0xe10] sm:$0xff] }
0x1093   : > { %7316 = vperm.xlu2 %9236, %v7311_v34  }
0x1094   : > { %9239 = vset.pattern.permute.xlu1 %v13394_v43 }
0x109b   : > { %9238 = vset.pattern.permute.xlu2 %v13301_v63 }
0x109c   : > { %7334 = vperm.xlu1 %9239, %v7311_v34  }
0x109d   : > { %v7235_v54 = vpop.permute.xlu2 %7234 }
0x109e   : > { %v8167_v5 = vmul.f32 %v9743_v55, %v7235_v54  ;;  %v7229_v49 = vpop.permute.xlu1 %7228 }
0x109f   : > { %v8166_v25 = vmul.f32 %v9744_v28, %v7229_v49 }
0x10a0   : > { %8679 = vst.msk [vmem:[%s13671_s4 + $0xd78] sm:$0x3] %vm701_vm1, %v8167_v5  ;;  %v9761_v5 = vld [vmem:[%s9854_s18 + $0xe30] sm:$0xff] }
0x10a1   : > { %8678 = vst.msk [vmem:[%s13671_s4 + $0xd70] sm:$0xff] %vm691_vm0, %v8166_v25  ;;  %v9762_v25 = vld [vmem:[%s9854_s18 + $0xe20] sm:$0xff] }
0x10a3   : > { %7328 = vperm.xlu2 %9238, %v7311_v34  }
0x10a4   : > { %9241 = vset.pattern.permute.xlu1 %v13301_v63 }
0x10ab   : > { %9240 = vset.pattern.permute.xlu2 %v13292_v50 }
0x10ac   : > { %7353 = vperm.xlu1 %9241, %v16433_v3  }
0x10ad   : > { %v7254_v30 = vpop.permute.xlu2 %7253 }
0x10ae   : > { %v8170_v0 = vmul.f32 %v9745_v60, %v7254_v30  ;;  %v7242_v14 = vpop.permute.xlu1 %7241  ;;  %v16437_v30 = vld [vmem:[#allocation9_spill] sm:$0xff] }
0x10af   : > { %v8168_v46 = vmul.f32 %v9746_v17, %v7242_v14 }
0x10b0   : > { %8682 = vst.msk [vmem:[%s13671_s4 + $0xd90] sm:$0xff] %vm691_vm0, %v8170_v0  ;;  %v9763_v0 = vld [vmem:[%s9854_s18 + $0xe40] sm:$0xff] }
0x10b1   : > { %8680 = vst.msk [vmem:[%s13671_s4 + $0xd80] sm:$0xff] %vm691_vm0, %v8168_v46  ;;  %v9764_v46 = vld [vmem:[%s9854_s18 + $0xe38] sm:$0x3] }
0x10b3   : > { %7347 = vperm.xlu2 %9240, %v16433_v3  }
0x10b4   : > { %9243 = vset.pattern.permute.xlu1 %v13281_v16 }
0x10bb   : > { %9242 = vset.pattern.permute.xlu2 %v13394_v43 }
0x10bc   : > { %7366 = vperm.xlu1 %9243, %v16434_v10  }
0x10bd   : > { %v7267_v1 = vpop.permute.xlu2 %7266 }
0x10be   : > { %v8172_v9 = vmul.f32 %v9747_v13, %v7267_v1  ;;  %v7260_v6 = vpop.permute.xlu1 %7259  ;;  %v9765_v13 = vld [vmem:[%s9854_s18 + $0xe58] sm:$0x3] }
0x10bf   : > { %v8171_v8 = vmul.f32 %v9748_v56, %v7260_v6  ;;  %v9766_v56 = vld [vmem:[%s9854_s18 + $0xe48] sm:$0xff] }
0x10c0   : > { %8684 = vst.msk [vmem:[%s13671_s4 + $0xda0] sm:$0xff] %vm691_vm0, %v8172_v9 }
0x10c1   : > { %8683 = vst.msk [vmem:[%s13671_s4 + $0xd98] sm:$0x3] %vm701_vm1, %v8171_v8 }
0x10c3   : > { %7359 = vperm.xlu2 %9242, %v16433_v3  }
0x10c4   : > { %9245 = vset.pattern.permute.xlu1 %v13394_v43 }
0x10cb   : > { %9244 = vset.pattern.permute.xlu2 %v13301_v63 }
0x10cc   : > { %7384 = vperm.xlu1 %9245, %v16434_v10  }
0x10cd   : > { %v7285_v18 = vpop.permute.xlu2 %7284 }
0x10ce   : > { %v8175_v57 = vmul.f32 %v9749_v59, %v7285_v18  ;;  %v7273_v38 = vpop.permute.xlu1 %7272  ;;  %v9767_v59 = vld [vmem:[%s9854_s18 + $0xe68] sm:$0xff] }
0x10cf   : > { %v8173_v21 = vmul.f32 %v9750_v11, %v7273_v38  ;;  %v9768_v11 = vld [vmem:[%s9854_s18 + $0xe60] sm:$0xff] }
0x10d0   : > { %8687 = vst.msk [vmem:[%s13671_s4 + $0xdb8] sm:$0x3] %vm701_vm1, %v8175_v57 }
0x10d1   : > { %8685 = vst.msk [vmem:[%s13671_s4 + $0xda8] sm:$0xff] %vm691_vm0, %v8173_v21 }
0x10d3   : > { %7378 = vperm.xlu2 %9244, %v16434_v10  }
0x10d4   : > { %9247 = vset.pattern.permute.xlu1 %v13292_v50 }
0x10db   : > { %9246 = vset.pattern.permute.xlu2 %v13281_v16 }
0x10dc   : > { %7397 = vperm.xlu1 %9247, %v16435_v58  }
0x10dd   : > { %v7298_v51 = vpop.permute.xlu2 %7297 }
0x10de   : > { %v8177_v33 = vmul.f32 %v9751_v48, %v7298_v51  ;;  %v7292_v7 = vpop.permute.xlu1 %7291  ;;  %v9769_v48 = vld [vmem:[%s9854_s18 + $0xe80] sm:$0xff] }
0x10df   : > { %v8176_v32 = vmul.f32 %v9752_v20, %v7292_v7  ;;  %v9770_v20 = vld [vmem:[%s9854_s18 + $0xe70] sm:$0xff] }
0x10e0   : > { %8689 = vst.msk [vmem:[%s13671_s4 + $0xdc8] sm:$0xff] %vm691_vm0, %v8177_v33 }
0x10e1   : > { %8688 = vst.msk [vmem:[%s13671_s4 + $0xdc0] sm:$0xff] %vm691_vm0, %v8176_v32 }
0x10e3   : > { %7391 = vperm.xlu2 %9246, %v16435_v58  }
0x10e4   : > { %9249 = vset.pattern.permute.xlu1 %v13281_v16 }
0x10eb   : > { %9248 = vset.pattern.permute.xlu2 %v13394_v43 }
0x10ec   : > { %7416 = vperm.xlu1 %9249, %v16436_v40  }
0x10ed   : > { %v7317_v23 = vpop.permute.xlu2 %7316 }
0x10ee   : > { %v8180_v42 = vmul.f32 %v9753_v45, %v7317_v23  ;;  %v7304_v22 = vpop.permute.xlu1 %7303  ;;  %v9771_v23 = vld [vmem:[%s9854_s18 + $0xe90] sm:$0xff] }
0x10ef   : > { %v8178_v35 = vmul.f32 %v9754_v12, %v7304_v22  ;;  %v9772_v22 = vld [vmem:[%s9854_s18 + $0xe88] sm:$0xff] }
0x10f0   : > { %8692 = vst.msk [vmem:[%s13671_s4 + $0xde0] sm:$0xff] %vm691_vm0, %v8180_v42 }
0x10f1   : > { %8690 = vst.msk [vmem:[%s13671_s4 + $0xdd0] sm:$0xff] %vm691_vm0, %v8178_v35  ;;  %v7561_v35 = vperm.slane %v14013_v53, 1 }
0x10f3   : > { %7409 = vperm.xlu2 %9248, %v16435_v58   ;;  %v16439_v58 = vld [vmem:[#allocation28_spill] sm:$0xff] }
0x10f4   : > { %9251 = vset.pattern.permute.xlu1 %v13301_v63 }
0x10fb   : > { %9250 = vset.pattern.permute.xlu2 %v13292_v50 }
0x10fc   : > { %7428 = vperm.xlu1 %9251, %v16436_v40  }
0x10fd   : > { %v7329_v37 = vpop.permute.xlu2 %7328 }
0x10fe   : > { %v8182_v39 = vmul.f32 %v9755_v26, %v7329_v37  ;;  %v7323_v24 = vpop.permute.xlu1 %7322  ;;  %v9773_v26 = vld [vmem:[%s9854_s18 + $0xea8] sm:$0xff] }
0x10ff   : > { %v8181_v61 = vmul.f32 %v9756_v19, %v7323_v24  ;;  %v9774_v19 = vld [vmem:[%s9854_s18 + $0xe98] sm:$0x3] }
0x1100   : > { %8694 = vst.msk [vmem:[%s13671_s4 + $0xdf0] sm:$0xff] %vm691_vm0, %v8182_v39 }
0x1101   : > { %8693 = vst.msk [vmem:[%s13671_s4 + $0xde8] sm:$0xff] %vm691_vm0, %v8181_v61 }
0x1103   : > { %7422 = vperm.xlu2 %9250, %v16436_v40  }
0x1104   : > { %9253 = vset.pattern.permute.xlu1 %v13292_v50 }
0x110b   : > { %9252 = vset.pattern.permute.xlu2 %v13281_v16 }
0x110c   : > { %7447 = vperm.xlu1 %9253, %v7436_v29  }
0x110d   : > { %v7348_v52 = vpop.permute.xlu2 %7347 }
0x110e   : > { %v8185_v41 = vmul.f32 %v9757_v36, %v7348_v52  ;;  %v7335_v34 = vpop.permute.xlu1 %7334  ;;  %v9775_v52 = vld [vmem:[%s9854_s18 + $0xeb8] sm:$0x3] }
0x110f   : > { %v8183_v44 = vmul.f32 %v9758_v27, %v7335_v34  ;;  %v9776_v34 = vld [vmem:[%s9854_s18 + $0xeb0] sm:$0xff] }
0x1110   : > { %8697 = vst.msk [vmem:[%s13671_s4 + $0xe08] sm:$0xff] %vm691_vm0, %v8185_v41 }
0x1111   : > { %8695 = vst.msk [vmem:[%s13671_s4 + $0xdf8] sm:$0x3] %vm701_vm1, %v8183_v44  ;;  %v16440_v44 = vld [vmem:[#allocation32_spill] sm:$0xff] }
0x1113   : > { %7441 = vperm.xlu2 %9252, %v7436_v29  }
0x1114   : > { %9255 = vset.pattern.permute.xlu1 %v13394_v43 }
0x111b   : > { %9254 = vset.pattern.permute.xlu2 %v13301_v63 }
0x111c   : > { %7459 = vperm.xlu1 %9255, %v7436_v29  }
0x111d   : > { %v7360_v47 = vpop.permute.xlu2 %7359 }
0x111e   : > { %v8187_v31 = vmul.f32 %v9759_v2, %v7360_v47  ;;  %v7354_v62 = vpop.permute.xlu1 %7353  ;;  %v9777_v2 = vld [vmem:[%s9854_s18 + $0xed0] sm:$0xff] }
0x111f   : > { %v8186_v54 = vmul.f32 %v9760_v4, %v7354_v62  ;;  %v9778_v4 = vld [vmem:[%s9854_s18 + $0xec0] sm:$0xff] }
0x1120   : > { %8699 = vst.msk [vmem:[%s13671_s4 + $0xe18] sm:$0x3] %vm701_vm1, %v8187_v31 }
0x1121   : > { %8698 = vst.msk [vmem:[%s13671_s4 + $0xe10] sm:$0xff] %vm691_vm0, %v8186_v54 }
0x1123   : > { %7453 = vperm.xlu2 %9254, %v7436_v29  }
0x1124   : > { %9257 = vset.pattern.permute.xlu1 %v13301_v63 }
0x112b   : > { %9256 = vset.pattern.permute.xlu2 %v13292_v50 }
0x112c   : > { %7478 = vperm.xlu1 %9257, %v14837_v15  }
0x112d   : > { %v7379_v55 = vpop.permute.xlu2 %7378 }
0x112e   : > { %v8190_v49 = vmul.f32 %v9761_v5, %v7379_v55  ;;  %v7367_v28 = vpop.permute.xlu1 %7366  ;;  %v16441_v55 = vld [vmem:[#allocation10_spill] sm:$0xff] }
0x112f   : > { %v8188_v3 = vmul.f32 %v9762_v25, %v7367_v28 }
0x1130   : > { %8702 = vst.msk [vmem:[%s13671_s4 + $0xe30] sm:$0xff] %vm691_vm0, %v8190_v49  ;;  %v9779_v49 = vld [vmem:[%s9854_s18 + $0xee0] sm:$0xff] }
0x1131   : > { %8700 = vst.msk [vmem:[%s13671_s4 + $0xe20] sm:$0xff] %vm691_vm0, %v8188_v3  ;;  %v9780_v3 = vld [vmem:[%s9854_s18 + $0xed8] sm:$0x3] }
0x1133   : > { %7472 = vperm.xlu2 %9256, %v14837_v15  }
0x1134   : > { %9259 = vset.pattern.permute.xlu1 %v13281_v16 }
0x113b   : > { %9258 = vset.pattern.permute.xlu2 %v13394_v43 }
0x113c   : > { %7491 = vperm.xlu1 %9259, %v16437_v30  }
0x113d   : > { %v7392_v60 = vpop.permute.xlu2 %7391 }
0x113e   : > { %v8192_v14 = vmul.f32 %v9763_v0, %v7392_v60  ;;  %v7385_v17 = vpop.permute.xlu1 %7384  ;;  %v9781_v0 = vld [vmem:[%s9854_s18 + $0xef8] sm:$0x3] }
0x113f   : > { %v8191_v10 = vmul.f32 %v9764_v46, %v7385_v17  ;;  %v9782_v46 = vld [vmem:[%s9854_s18 + $0xee8] sm:$0xff] }
0x1140   : > { %8704 = vst.msk [vmem:[%s13671_s4 + $0xe40] sm:$0xff] %vm691_vm0, %v8192_v14 }
0x1141   : > { %8703 = vst.msk [vmem:[%s13671_s4 + $0xe38] sm:$0x3] %vm701_vm1, %v8191_v10 }
0x1143   : > { %7484 = vperm.xlu2 %9258, %v14837_v15   ;;  %v16438_v15 = vld [vmem:[#allocation19_spill] sm:$0xff] }
0x1144   : > { %9261 = vset.pattern.permute.xlu1 %v13394_v43 }
0x114b   : > { %9260 = vset.pattern.permute.xlu2 %v13301_v63 }
0x114c   : > { %7509 = vperm.xlu1 %9261, %v16437_v30  }
0x114d   : > { %v7410_v1 = vpop.permute.xlu2 %7409 }
0x114e   : > { %v8195_v9 = vmul.f32 %v9765_v13, %v7410_v1  ;;  %v7398_v6 = vpop.permute.xlu1 %7397  ;;  %v16442_v1 = vld [vmem:[#allocation20_spill] sm:$0xff] }
0x114f   : > { %v8193_v8 = vmul.f32 %v9766_v56, %v7398_v6 }
0x1150   : > { %8707 = vst.msk [vmem:[%s13671_s4 + $0xe58] sm:$0x3] %vm701_vm1, %v8195_v9  ;;  %v9783_v9 = vld [vmem:[%s9854_s18 + $0xf08] sm:$0xff] }
0x1151   : > { %8705 = vst.msk [vmem:[%s13671_s4 + $0xe48] sm:$0xff] %vm691_vm0, %v8193_v8  ;;  %v9784_v8 = vld [vmem:[%s9854_s18 + $0xf00] sm:$0xff] }
0x1153   : > { %7503 = vperm.xlu2 %9260, %v16437_v30  }
0x1154   : > { %9263 = vset.pattern.permute.xlu1 %v13292_v50 }
0x115b   : > { %9262 = vset.pattern.permute.xlu2 %v13281_v16 }
0x115c   : > { %7522 = vperm.xlu1 %9263, %v16438_v15  }
0x115d   : > { %v7423_v18 = vpop.permute.xlu2 %7422 }
0x115e   : > { %v8197_v57 = vmul.f32 %v9767_v59, %v7423_v18  ;;  %v7417_v38 = vpop.permute.xlu1 %7416  ;;  %v16443_v18 = vld [vmem:[#allocation29_spill] sm:$0xff] }
0x115f   : > { %v8196_v21 = vmul.f32 %v9768_v11, %v7417_v38 }
0x1160   : > { %8709 = vst.msk [vmem:[%s13671_s4 + $0xe68] sm:$0xff] %vm691_vm0, %v8197_v57  ;;  %v9785_v57 = vld [vmem:[%s9854_s18 + $0xf20] sm:$0xff] }
0x1161   : > { %8708 = vst.msk [vmem:[%s13671_s4 + $0xe60] sm:$0xff] %vm691_vm0, %v8196_v21  ;;  %v9786_v21 = vld [vmem:[%s9854_s18 + $0xf10] sm:$0xff] }
0x1163   : > { %7516 = vperm.xlu2 %9262, %v16438_v15  }
0x1164   : > { %9265 = vset.pattern.permute.xlu1 %v13281_v16 }
0x116b   : > { %9264 = vset.pattern.permute.xlu2 %v13394_v43 }
0x116c   : > { %7541 = vperm.xlu1 %9265, %v16439_v58  }
0x116d   : > { %v7442_v51 = vpop.permute.xlu2 %7441 }
0x116e   : > { %v8200_v33 = vmul.f32 %v9769_v48, %v7442_v51  ;;  %v7429_v7 = vpop.permute.xlu1 %7428  ;;  %v9787_v48 = vld [vmem:[%s9854_s18 + $0xf30] sm:$0xff] }
0x116f   : > { %v8198_v32 = vmul.f32 %v9770_v20, %v7429_v7  ;;  %v9788_v20 = vld [vmem:[%s9854_s18 + $0xf28] sm:$0xff] }
0x1170   : > { %8712 = vst.msk [vmem:[%s13671_s4 + $0xe80] sm:$0xff] %vm691_vm0, %v8200_v33 }
0x1171   : > { %8710 = vst.msk [vmem:[%s13671_s4 + $0xe70] sm:$0xff] %vm691_vm0, %v8198_v32 }
0x1173   : > { %7534 = vperm.xlu2 %9264, %v16438_v15  }
0x1174   : > { %9267 = vset.pattern.permute.xlu1 %v13301_v63 }
0x117b   : > { %9266 = vset.pattern.permute.xlu2 %v13292_v50 }
0x117c   : > { %7553 = vperm.xlu1 %9267, %v16439_v58  }
0x117d   : > { %v7454_v40 = vpop.permute.xlu2 %7453 }
0x117e   : > { %v8202_v45 = vmul.f32 %v9771_v23, %v7454_v40  ;;  %v7448_v42 = vpop.permute.xlu1 %7447  ;;  %v7686_v40 = vperm.slane %v14013_v53, 6  ;;  %v9791_v53 = vld [vmem:[%s9854_s18 + $0xf58] sm:$0x3] }
0x117f   : > { %v8201_v12 = vmul.f32 %v9772_v22, %v7448_v42 }
0x1180   : > { %8714 = vst.msk [vmem:[%s13671_s4 + $0xe90] sm:$0xff] %vm691_vm0, %v8202_v45  ;;  %v9789_v45 = vld [vmem:[%s9854_s18 + $0xf48] sm:$0xff] }
0x1181   : > { %8713 = vst.msk [vmem:[%s13671_s4 + $0xe88] sm:$0xff] %vm691_vm0, %v8201_v12  ;;  %v9790_v12 = vld [vmem:[%s9854_s18 + $0xf38] sm:$0x3] }
0x1183   : > { %7547 = vperm.xlu2 %9266, %v16439_v58  }
0x1184   : > { %9269 = vset.pattern.permute.xlu1 %v13292_v50 }
0x118b   : > { %9268 = vset.pattern.permute.xlu2 %v13281_v16 }
0x118c   : > { %7572 = vperm.xlu1 %9269, %v7561_v35  }
0x118d   : > { %v7473_v37 = vpop.permute.xlu2 %7472 }
0x118e   : > { %v8205_v39 = vmul.f32 %v9773_v26, %v7473_v37  ;;  %v7460_v24 = vpop.permute.xlu1 %7459 }
0x118f   : > { %v8203_v61 = vmul.f32 %v9774_v19, %v7460_v24  ;;  %v16444_v19 = vld [vmem:[#allocation33_spill] sm:$0xff] }
0x1190   : > { %8717 = vst.msk [vmem:[%s13671_s4 + $0xea8] sm:$0xff] %vm691_vm0, %v8205_v39  ;;  %v9792_v39 = vld [vmem:[%s9854_s18 + $0xf50] sm:$0xff] }
0x1191   : > { %8715 = vst.msk [vmem:[%s13671_s4 + $0xe98] sm:$0x3] %vm701_vm1, %v8203_v61 }
0x1193   : > { %7566 = vperm.xlu2 %9268, %v7561_v35  }
0x1194   : > { %9271 = vset.pattern.permute.xlu1 %v13394_v43 }
0x119b   : > { %9270 = vset.pattern.permute.xlu2 %v13301_v63 }
0x119c   : > { %7584 = vperm.xlu1 %9271, %v7561_v35  }
0x119d   : > { %v7485_v29 = vpop.permute.xlu2 %7484 }
0x119e   : > { %v8207_v36 = vmul.f32 %v9775_v52, %v7485_v29  ;;  %v7479_v41 = vpop.permute.xlu1 %7478  ;;  %v9793_v29 = vld [vmem:[%s9854_s18 + $0xf70] sm:$0xff] }
0x119f   : > { %v8206_v27 = vmul.f32 %v9776_v34, %v7479_v41  ;;  %v9794_v41 = vld [vmem:[%s9854_s18 + $0xf60] sm:$0xff] }
0x11a0   : > { %8719 = vst.msk [vmem:[%s13671_s4 + $0xeb8] sm:$0x3] %vm701_vm1, %v8207_v36 }
0x11a1   : > { %8718 = vst.msk [vmem:[%s13671_s4 + $0xeb0] sm:$0xff] %vm691_vm0, %v8206_v27 }
0x11a3   : > { %7578 = vperm.xlu2 %9270, %v7561_v35  }
0x11a4   : > { %9273 = vset.pattern.permute.xlu1 %v13301_v63 }
0x11ab   : > { %9272 = vset.pattern.permute.xlu2 %v13292_v50 }
0x11ac   : > { %7603 = vperm.xlu1 %9273, %v16440_v44  }
0x11ad   : > { %v7504_v47 = vpop.permute.xlu2 %7503 }
0x11ae   : > { %v8210_v31 = vmul.f32 %v9777_v2, %v7504_v47  ;;  %v7492_v62 = vpop.permute.xlu1 %7491  ;;  %v9796_v47 = vld [vmem:[%s9854_s18 + $0xf78] sm:$0x3] }
0x11af   : > { %v8208_v54 = vmul.f32 %v9778_v4, %v7492_v62 }
0x11b0   : > { %8722 = vst.msk [vmem:[%s13671_s4 + $0xed0] sm:$0xff] %vm691_vm0, %v8210_v31 }
0x11b1   : > { %8720 = vst.msk [vmem:[%s13671_s4 + $0xec0] sm:$0xff] %vm691_vm0, %v8208_v54  ;;  %v9798_v54 = vld [vmem:[%s9854_s18 + $0xf88] sm:$0xff] }
0x11b3   : > { %7597 = vperm.xlu2 %9272, %v16440_v44  }
0x11b4   : > { %9275 = vset.pattern.permute.xlu1 %v13281_v16 }
0x11bb   : > { %9274 = vset.pattern.permute.xlu2 %v13394_v43 }
0x11bc   : > { %7616 = vperm.xlu1 %9275, %v16441_v55  }
0x11bd   : > { %v7517_v5 = vpop.permute.xlu2 %7516 }
0x11be   : > { %v8212_v28 = vmul.f32 %v9779_v49, %v7517_v5  ;;  %v7510_v25 = vpop.permute.xlu1 %7509  ;;  %v9799_v49 = vld [vmem:[%s9854_s18 + $0xfa8] sm:$0xff] }
0x11bf   : > { %v8211_v30 = vmul.f32 %v9780_v3, %v7510_v25  ;;  %v9800_v3 = vld [vmem:[%s9854_s18 + $0xfa0] sm:$0xff] }
0x11c0   : > { %8724 = vst.msk [vmem:[%s13671_s4 + $0xee0] sm:$0xff] %vm691_vm0, %v8212_v28 }
0x11c1   : > { %8723 = vst.msk [vmem:[%s13671_s4 + $0xed8] sm:$0x3] %vm701_vm1, %v8211_v30 }
0x11c3   : > { %7609 = vperm.xlu2 %9274, %v16440_v44  }
0x11c4   : > { %9278 = vset.pattern.permute.xlu1 %v13394_v43 }
0x11cb   : > { %9277 = vset.pattern.permute.xlu2 %v13301_v63 }
0x11cc   : > { %7634 = vperm.xlu1 %9278, %v16441_v55  }
0x11cd   : > { %v7535_v60 = vpop.permute.xlu2 %7534 }
0x11ce   : > { %v8215_v14 = vmul.f32 %v9781_v0, %v7535_v60  ;;  %v7523_v17 = vpop.permute.xlu1 %7522  ;;  %v9801_v0 = vld [vmem:[%s9854_s18 + $0xfc0] sm:$0xff] }
0x11cf   : > { %v8213_v10 = vmul.f32 %v9782_v46, %v7523_v17  ;;  %v9802_v46 = vld [vmem:[%s9854_s18 + $0xfb0] sm:$0xff] }
0x11d0   : > { %8727 = vst.msk [vmem:[%s13671_s4 + $0xef8] sm:$0x3] %vm701_vm1, %v8215_v14 }
0x11d1   : > { %8725 = vst.msk [vmem:[%s13671_s4 + $0xee8] sm:$0xff] %vm691_vm0, %v8213_v10 }
0x11d3   : > { %7628 = vperm.xlu2 %9277, %v16441_v55  }
0x11d4   : > { %9280 = vset.pattern.permute.xlu1 %v13292_v50 }
0x11db   : > { %9279 = vset.pattern.permute.xlu2 %v13281_v16 }
0x11dc   : > { %7647 = vperm.xlu1 %9280, %v16442_v1  }
0x11dd   : > { %v7548_v13 = vpop.permute.xlu2 %7547 }
0x11de   : > { %v8217_v6 = vmul.f32 %v9783_v9, %v7548_v13  ;;  %v7542_v56 = vpop.permute.xlu1 %7541  ;;  %v9803_v13 = vld [vmem:[%s9854_s18 + $0xfd0] sm:$0xff] }
0x11df   : > { %v8216_v15 = vmul.f32 %v9784_v8, %v7542_v56  ;;  %v9804_v56 = vld [vmem:[%s9854_s18 + $0xfc8] sm:$0xff] }
0x11e0   : > { %8729 = vst.msk [vmem:[%s13671_s4 + $0xf08] sm:$0xff] %vm691_vm0, %v8217_v6 }
0x11e1   : > { %8728 = vst.msk [vmem:[%s13671_s4 + $0xf00] sm:$0xff] %vm691_vm0, %v8216_v15 }
0x11e3   : > { %7641 = vperm.xlu2 %9279, %v16442_v1  }
0x11e4   : > { %9283 = vset.pattern.permute.xlu1 %v13281_v16 }
0x11eb   : > { %9282 = vset.pattern.permute.xlu2 %v13394_v43 }
0x11ec   : > { %7666 = vperm.xlu1 %9283, %v16443_v18  }
0x11ed   : > { %v7567_v59 = vpop.permute.xlu2 %7566 }
0x11ee   : > { %v8220_v38 = vmul.f32 %v9785_v57, %v7567_v59  ;;  %v7554_v11 = vpop.permute.xlu1 %7553 }
0x11ef   : > { %v8218_v58 = vmul.f32 %v9786_v21, %v7554_v11 }
0x11f0   : > { %8732 = vst.msk [vmem:[%s13671_s4 + $0xf20] sm:$0xff] %vm691_vm0, %v8220_v38  ;;  %v9806_v38 = vld [vmem:[%s9854_s18 + $0xfd8] sm:$0x3] }
0x11f1   : > { %8730 = vst.msk [vmem:[%s13671_s4 + $0xf10] sm:$0xff] %vm691_vm0, %v8218_v58  ;;  %v9807_v58 = vld [vmem:[%s9854_s18 + $0xff8] sm:$0x3] }
0x11f3   : > { %7659 = vperm.xlu2 %9282, %v16442_v1  }
0x11f4   : > { %9285 = vset.pattern.permute.xlu1 %v13301_v63 }
0x11fb   : > { %9284 = vset.pattern.permute.xlu2 %v13292_v50 }
0x11fc   : > { %7678 = vperm.xlu1 %9285, %v16443_v18  }
0x11fd   : > { %v7579_v51 = vpop.permute.xlu2 %7578 }
0x11fe   : > { %v8222_v33 = vmul.f32 %v9787_v48, %v7579_v51  ;;  %v7573_v7 = vpop.permute.xlu1 %7572 }
0x11ff   : > { %v8221_v32 = vmul.f32 %v9788_v20, %v7573_v7 }
0x1200   : > { %8734 = vst.msk [vmem:[%s13671_s4 + $0xf30] sm:$0xff] %vm691_vm0, %v8222_v33  ;;  %v9808_v33 = vld [vmem:[%s9854_s18 + $0xff0] sm:$0xff] }
0x1201   : > { %8733 = vst.msk [vmem:[%s13671_s4 + $0xf28] sm:$0xff] %vm691_vm0, %v8221_v32 }
0x1203   : > { %7672 = vperm.xlu2 %9284, %v16443_v18   ;;  %v9805_v18 = vld [vmem:[%s9854_s18 + $0xfe8] sm:$0xff] }
0x1204   : > { %9288 = vset.pattern.permute.xlu1 %v13292_v50 }
0x120b   : > { %9287 = vset.pattern.permute.xlu2 %v13281_v16 }
0x120c   : > { %7697 = vperm.xlu1 %9288, %v7686_v40  }
0x120d   : > { %v7598_v23 = vpop.permute.xlu2 %7597 }
0x120e   : > { %v8225_v42 = vmul.f32 %v9789_v45, %v7598_v23  ;;  %v7585_v22 = vpop.permute.xlu1 %7584 }
0x120f   : > { %v8223_v35 = vmul.f32 %v9790_v12, %v7585_v22 }
0x1210   : > { %8737 = vst.msk [vmem:[%s13671_s4 + $0xf48] sm:$0xff] %vm691_vm0, %v8225_v42 }
0x1211   : > { %8735 = vst.msk [vmem:[%s13671_s4 + $0xf38] sm:$0x3] %vm701_vm1, %v8223_v35 }
0x1213   : > { %7691 = vperm.xlu2 %9287, %v7686_v40  }
0x1214   : > { %9290 = vset.pattern.permute.xlu1 %v13394_v43 }
0x121b   : > { %9289 = vset.pattern.permute.xlu2 %v13301_v63 }
0x121c   : > { %7709 = vperm.xlu1 %9290, %v7686_v40  }
0x121d   : > { %v7610_v16 = vpop.permute.xlu2 %7609 }
0x121e   : > { %v8227_v37 = vmul.f32 %v9791_v53, %v7610_v16  ;;  %v7604_v26 = vpop.permute.xlu1 %7603 }
0x121f   : > { %v8226_v24 = vmul.f32 %v9792_v39, %v7604_v26 }
0x1220   : > { %8739 = vst.msk [vmem:[%s13671_s4 + $0xf58] sm:$0x3] %vm701_vm1, %v8227_v37 }
0x1221   : > { %8738 = vst.msk [vmem:[%s13671_s4 + $0xf50] sm:$0xff] %vm691_vm0, %v8226_v24 }
0x1223   : > { %7703 = vperm.xlu2 %9289, %v7686_v40  }
0x1224   : > { %9292 = vset.pattern.permute.xlu1 %v13301_v63  ;;  %v9795_v63 = vld [vmem:[%s9854_s18 + $0xf80] sm:$0xff] }
0x122b   : > { %9291 = vset.pattern.permute.xlu2 %v13292_v50 }
0x122c   : > { %7728 = vperm.xlu1 %9292, %v16444_v19  }
0x122d   : > { %v7629_v61 = vpop.permute.xlu2 %7628 }
0x122e   : > { %v8230_v52 = vmul.f32 %v9793_v29, %v7629_v61  ;;  %v7617_v36 = vpop.permute.xlu1 %7616 }
0x122f   : > { %v8228_v34 = vmul.f32 %v9794_v41, %v7617_v36 }
0x1230   : > { %8742 = vst.msk [vmem:[%s13671_s4 + $0xf70] sm:$0xff] %vm691_vm0, %v8230_v52 }
0x1231   : > { %8740 = vst.msk [vmem:[%s13671_s4 + $0xf60] sm:$0xff] %vm691_vm0, %v8228_v34 }
0x1233   : > { %7722 = vperm.xlu2 %9291, %v16444_v19  }
0x123b   : > { %9293 = vset.pattern.permute.xlu2 %v13394_v43  ;;  %v9797_v43 = vld [vmem:[%s9854_s18 + $0xf98] sm:$0x3] }
0x123d   : > { %v7642_v50 = vpop.permute.xlu2 %7641 }
0x123e   : > { %v8232_v27 = vmul.f32 %v9795_v63, %v7642_v50  ;;  %v7635_v44 = vpop.permute.xlu1 %7634 }
0x123f   : > { %v8231_v2 = vmul.f32 %v9796_v47, %v7635_v44 }
0x1240   : > { %8744 = vst.msk [vmem:[%s13671_s4 + $0xf80] sm:$0xff] %vm691_vm0, %v8232_v27 }
0x1241   : > { %8743 = vst.msk [vmem:[%s13671_s4 + $0xf78] sm:$0x3] %vm701_vm1, %v8231_v2 }
0x1243   : > { %7734 = vperm.xlu2 %9293, %v16444_v19  }
0x124d   : > { %v7660_v31 = vpop.permute.xlu2 %7659 }
0x124e   : > { %v8235_v62 = vmul.f32 %v9797_v43, %v7660_v31  ;;  %v7648_v4 = vpop.permute.xlu1 %7647 }
0x124f   : > { %v8233_v55 = vmul.f32 %v9798_v54, %v7648_v4 }
0x1250   : > { %8747 = vst.msk [vmem:[%s13671_s4 + $0xf98] sm:$0x3] %vm701_vm1, %v8235_v62 }
0x1251   : > { %8745 = vst.msk [vmem:[%s13671_s4 + $0xf88] sm:$0xff] %vm691_vm0, %v8233_v55 }
0x125d   : > { %v7673_v5 = vpop.permute.xlu2 %7672 }
0x125e   : > { %v8237_v28 = vmul.f32 %v9799_v49, %v7673_v5  ;;  %v7667_v25 = vpop.permute.xlu1 %7666 }
0x125f   : > { %v8236_v30 = vmul.f32 %v9800_v3, %v7667_v25 }
0x1260   : > { %8749 = vst.msk [vmem:[%s13671_s4 + $0xfa8] sm:$0xff] %vm691_vm0, %v8237_v28 }
0x1261   : > { %8748 = vst.msk [vmem:[%s13671_s4 + $0xfa0] sm:$0xff] %vm691_vm0, %v8236_v30 }
0x126d   : > { %v7692_v60 = vpop.permute.xlu2 %7691 }
0x126e   : > { %v8240_v14 = vmul.f32 %v9801_v0, %v7692_v60  ;;  %v7679_v17 = vpop.permute.xlu1 %7678 }
0x126f   : > { %v8238_v10 = vmul.f32 %v9802_v46, %v7679_v17 }
0x1270   : > { %8752 = vst.msk [vmem:[%s13671_s4 + $0xfc0] sm:$0xff] %vm691_vm0, %v8240_v14 }
0x1271   : > { %8750 = vst.msk [vmem:[%s13671_s4 + $0xfb0] sm:$0xff] %vm691_vm0, %v8238_v10 }
0x127d   : > { %v7704_v1 = vpop.permute.xlu2 %7703 }
0x127e   : > { %v8242_v9 = vmul.f32 %v9803_v13, %v7704_v1  ;;  %v7698_v6 = vpop.permute.xlu1 %7697 }
0x127f   : > { %v8241_v8 = vmul.f32 %v9804_v56, %v7698_v6 }
0x1280   : > { %8754 = vst.msk [vmem:[%s13671_s4 + $0xfd0] sm:$0xff] %vm691_vm0, %v8242_v9 }
0x1281   : > { %8753 = vst.msk [vmem:[%s13671_s4 + $0xfc8] sm:$0xff] %vm691_vm0, %v8241_v8 }
0x128d   : > { %v7723_v15 = vpop.permute.xlu2 %7722 }
0x128e   : > { %v8245_v59 = vmul.f32 %v9805_v18, %v7723_v15  ;;  %v7710_v57 = vpop.permute.xlu1 %7709 }
0x128f   : > { %v8243_v11 = vmul.f32 %v9806_v38, %v7710_v57 }
0x1290   : > { %8757 = vst.msk [vmem:[%s13671_s4 + $0xfe8] sm:$0xff] %vm691_vm0, %v8245_v59 }
0x1291   : > { %8755 = vst.msk [vmem:[%s13671_s4 + $0xfd8] sm:$0x3] %vm701_vm1, %v8243_v11 }
0x129d   : > { %v7735_v21 = vpop.permute.xlu2 %7734 }
0x129e   : > { %v8247_v51 = vmul.f32 %v9807_v58, %v7735_v21  ;;  %v7729_v48 = vpop.permute.xlu1 %7728 }
0x129f   : > { %v8246_v7 = vmul.f32 %v9808_v33, %v7729_v48 }
0x12a0   : > { %8759 = vst.msk [vmem:[%s13671_s4 + $0xff8] sm:$0x3] %vm701_vm1, %v8247_v51 }
0x12a1   : > { %8758 = vst.msk [vmem:[%s13671_s4 + $0xff0] sm:$0xff] %vm691_vm0, %v8246_v7 }
0x12a2 PF: > { %s13_s12 = sadd.s32 1, %s9815_s12  }
0x12a3   : > { %p10_p4 = scmp.ge.s32.totalorder %s13_s12, 4  }
0x12a5   :  { %12 = sbr.rel (!%p10_p4) target bundleno = 1 (0x1), region = 62 }

</bundles_post_ra>
